<compile_context>
chip_gen: v7x
topology: tpu7x:2x2x1
jax: 0.10.0
libtpu: 0.0.40
codegen_flags: <defaults>
</compile_context>

<pallas_src>
import jax
import jax.numpy as jnp
from jax import lax
from jax.experimental import pallas as pl
from jax.experimental.pallas import tpu as pltpu


def policy_kernel(xp_ref, w1_ref, b1_ref, w2_ref, b2_ref,
                  wfc1_ref, bfc1_ref, wout_ref, bout_ref,
                  out_ref, h1pad_ref):
    """Fused forward pass for one batch tile (everything resident in VMEM).

    xp_ref    : (bn, H+2, W+2, Cin) zero-padded NHWC input tile (f32)
    w1_ref    : (9*Cin, C1)  bf16 im2col conv1 weight
    w2_ref    : (9*C1,  C2)  bf16 im2col conv2 weight
    wfc1_ref  : (16*C2, hidden) bf16, rows permuted to the kernel's (h, w, c) order
    h1pad_ref : flat f32 scratch (bn*H*W + 2*halo, C1) for conv2's shifted windows
    """
    bn, Hp, Wp, Cin = xp_ref.shape
    H, W = Hp - 2, Wp - 2
    C1 = w1_ref.shape[-1]
    C2 = w2_ref.shape[-1]
    rows = bn * H * W
    halo = (h1pad_ref.shape[0] - rows) // 2

    # ---- conv1 (3x3, pad 1) + ReLU : im2col -> one MXU matmul ------------------
    cols1 = [xp_ref[:, dy:dy + H, dx:dx + W, :].reshape(rows, Cin).astype(jnp.bfloat16)
             for dy in range(3) for dx in range(3)]
    p1 = jnp.concatenate(cols1, axis=-1)                        # (rows, 9*Cin) bf16
    acc1 = jnp.dot(p1, w1_ref[...], preferred_element_type=jnp.float32)
    h1 = jnp.maximum(acc1 + b1_ref[...], 0.0)                   # (rows, C1) f32

    # ---- conv2 (3x3, pad 1) + ReLU : flat-window im2col -> one MXU matmul ------
    # h1 is stored once (dense, sublane-aligned offset) into a flat scratch with a
    # `halo`-row margin on each side; each 3x3 tap is then a *contiguous* rows-row
    # window at offset (dy-1)*W + (dx-1).  Border pixels / cross-sample wraps (and
    # the never-written halo rows) are zeroed with (rows,1) iota masks, so the
    # scratch never needs zero-filling.
    h1pad_ref[halo:halo + rows, :] = h1

    hh = lax.broadcasted_iota(jnp.int32, (bn, H, W, 1), 1).reshape(rows, 1)
    ww = lax.broadcasted_iota(jnp.int32, (bn, H, W, 1), 2).reshape(rows, 1)
    m_top = hh >= 1          # valid for sy = -1
    m_bot = hh < H - 1       # valid for sy = +1
    m_lft = ww >= 1          # valid for sx = -1
    m_rgt = ww < W - 1       # valid for sx = +1

    taps = []
    for dy in range(3):
        for dx in range(3):
            sy, sx = dy - 1, dx - 1
            off = sy * W + sx
            t = h1pad_ref[halo + off:halo + off + rows, :]      # contiguous rows
            conds = []
            if sy < 0:
                conds.append(m_top)
            if sy > 0:
                conds.append(m_bot)
            if sx < 0:
                conds.append(m_lft)
            if sx > 0:
                conds.append(m_rgt)
            if conds:
                valid = conds[0]
                for c in conds[1:]:
                    valid = valid & c
                t = jnp.where(valid, t, 0.0)                    # (rows,1) mask broadcast
            taps.append(t.astype(jnp.bfloat16))
    p2 = jnp.concatenate(taps, axis=-1)                         # (rows, 9*C1) bf16
    acc2 = jnp.dot(p2, w2_ref[...], preferred_element_type=jnp.float32)
    h2 = jnp.maximum(acc2 + b2_ref[...], 0.0)                   # (rows, C2) f32

    # ---- adaptive average pool to (4, 4) ---------------------------------------
    # exact PyTorch semantics since H, W are divisible by 4.
    kh, kw = H // 4, W // 4
    inv = 1.0 / float(kh * kw)
    h2v = h2.reshape(bn, H, W, C2)
    # pool width blocks (sub-lane reduces), lane-concat -> (bn, H, 4*C2), lanes (wb, c)
    wsum = [h2v[:, :, wb * kw:(wb + 1) * kw, :].sum(axis=2) for wb in range(4)]
    rowp = jnp.concatenate(wsum, axis=-1)
    # pool height blocks (sub-lane reduces), lane-concat -> (bn, 16*C2), (hb, wb, c)
    hsum = [rowp[:, hb * kh:(hb + 1) * kh, :].sum(axis=1) for hb in range(4)]
    feat = jnp.concatenate(hsum, axis=-1) * inv

    # ---- fc1 + ReLU, output head ------------------------------------------------
    h3 = jnp.maximum(jnp.dot(feat.astype(jnp.bfloat16), wfc1_ref[...],
                             preferred_element_type=jnp.float32) + bfc1_ref[...], 0.0)
    out_ref[...] = jnp.dot(h3.astype(jnp.bfloat16), wout_ref[...],
                           preferred_element_type=jnp.float32) + bout_ref[...]


def policy_forward(x_nchw, params, *, batch_block=32):
    """x_nchw: (N, Cin, H, W) float32 -> (N, num_actions) float32."""
    N, Cin, H, W = x_nchw.shape
    assert H % 4 == 0 and W % 4 == 0  # adaptive-pool shortcut requires this

    # NCHW -> NHWC, zero pad spatially (conv padding=1).
    x = jnp.transpose(x_nchw, (0, 2, 3, 1))
    xp = jnp.pad(x, ((0, 0), (1, 1), (1, 1), (0, 0)))

    # conv weights OIHW -> (kh*kw*I, O) im2col matrices, cast to bf16 for the MXU.
    w1 = jnp.transpose(params["w1"], (2, 3, 1, 0))              # (3,3,Cin,C1)
    w2 = jnp.transpose(params["w2"], (2, 3, 1, 0))              # (3,3,C1,C2)
    C1, C2 = w1.shape[-1], w2.shape[-1]
    w1m = w1.reshape(9 * Cin, C1).astype(jnp.bfloat16)
    w2m = w2.reshape(9 * C1, C2).astype(jnp.bfloat16)
    b1 = params["b1"].reshape(1, C1)
    b2 = params["b2"].reshape(1, C2)

    # fc1: PyTorch flattens pooled features in (c, h, w) order; the kernel produces
    # (h, w, c).  Permute the (in, out) weight rows accordingly.
    hidden = params["fc1_w"].shape[0]
    wfc1 = (params["fc1_w"].T                                   # (16*C2, hidden), rows (c,h,w)
            .reshape(C2, 4, 4, hidden)
            .transpose(1, 2, 0, 3)                              # -> (h, w, c, hidden)
            .reshape(16 * C2, hidden)).astype(jnp.bfloat16)
    bfc1 = params["fc1_b"].reshape(1, hidden)
    wout = params["out_w"].T.astype(jnp.bfloat16)               # (hidden, num_actions)
    bout = params["out_b"].reshape(1, -1)
    A = wout.shape[-1]

    # Batch tiling: 1-D "parallel" grid (sharded across TCs on v7x).  <=32 samples
    # per step keeps live VMEM ~10 MB -> under the 32 MiB default scoped limit on
    # v5e/v6e (128 MiB phys) and v7x (64 MiB phys).
    bn = min(N, batch_block)
    rows = bn * H * W
    halo = ((W + 1 + 7) // 8) * 8           # flat-window margin, sublane-tile aligned

    flops = (2 * N * H * W * (9 * Cin * C1 + 9 * C1 * C2)
             + 2 * N * (16 * C2 * hidden + hidden * A))
    bytes_accessed = (xp.size * 4 + N * A * 4
                      + 2 * (w1m.size + w2m.size + wfc1.size + wout.size)
                      + 4 * (b1.size + b2.size + bfc1.size + bout.size))

    return pl.pallas_call(
        policy_kernel,
        out_shape=jax.ShapeDtypeStruct((N, A), jnp.float32),
        grid=(pl.cdiv(N, bn),),
        in_specs=[
            pl.BlockSpec((bn, H + 2, W + 2, Cin), lambda i: (i, 0, 0, 0)),
            pl.BlockSpec((9 * Cin, C1), lambda i: (0, 0)),
            pl.BlockSpec((1, C1), lambda i: (0, 0)),
            pl.BlockSpec((9 * C1, C2), lambda i: (0, 0)),
            pl.BlockSpec((1, C2), lambda i: (0, 0)),
            pl.BlockSpec((16 * C2, hidden), lambda i: (0, 0)),
            pl.BlockSpec((1, hidden), lambda i: (0, 0)),
            pl.BlockSpec((hidden, A), lambda i: (0, 0)),
            pl.BlockSpec((1, A), lambda i: (0, 0)),
        ],
        out_specs=pl.BlockSpec((bn, A), lambda i: (i, 0)),
        scratch_shapes=[pltpu.VMEM((rows + 2 * halo, C1), jnp.float32)],
        compiler_params=pltpu.CompilerParams(
            dimension_semantics=("parallel",)),
        cost_estimate=pl.CostEstimate(flops=int(flops), transcendentals=0,
                                      bytes_accessed=int(bytes_accessed)),
    )(xp, w1m, b1, w2m, b2, wfc1, bfc1, wout, bout)


def reference_forward(x, p):
    """Pure-JAX NCHW reference mirroring the PyTorch module (f32)."""
    def conv3x3(x, w, b):
        N, C, H, W = x.shape
        xp = jnp.pad(x, ((0, 0), (0, 0), (1, 1), (1, 1)))
        out = jnp.zeros((N, w.shape[0], H, W), jnp.float32)
        for dy in range(3):
            for dx in range(3):
                out = out + jnp.einsum("nihw,oi->nohw",
                                       xp[:, :, dy:dy + H, dx:dx + W],
                                       w[:, :, dy, dx], precision="highest")
        return out + b[None, :, None, None]

    h = jax.nn.relu(conv3x3(x, p["w1"], p["b1"]))
    h = jax.nn.relu(conv3x3(h, p["w2"], p["b2"]))
    N, C, H, W = h.shape
    h = h.reshape(N, C, 4, H // 4, 4, W // 4).mean(axis=(3, 5))
    h = h.reshape(N, -1)
    h = jax.nn.relu(h @ p["fc1_w"].T + p["fc1_b"])
    return h @ p["out_w"].T + p["out_b"]


if __name__ == "__main__":
    input_channels, num_actions = 4, 5
    N, H, W = 2, 16, 16

    key = jax.random.PRNGKey(0)
    ks = jax.random.split(key, 9)
    s = 0.1
    params = {
        "w1": s * jax.random.normal(ks[0], (16, input_channels, 3, 3), jnp.float32),
        "b1": s * jax.random.normal(ks[1], (16,), jnp.float32),
        "w2": s * jax.random.normal(ks[2], (32, 16, 3, 3), jnp.float32),
        "b2": s * jax.random.normal(ks[3], (32,), jnp.float32),
        "fc1_w": s * jax.random.normal(ks[4], (128, 32 * 4 * 4), jnp.float32),
        "fc1_b": s * jax.random.normal(ks[5], (128,), jnp.float32),
        "out_w": s * jax.random.normal(ks[6], (num_actions, 128), jnp.float32),
        "out_b": s * jax.random.normal(ks[7], (num_actions,), jnp.float32),
    }
    x = jax.random.normal(ks[8], (N, input_channels, H, W), jnp.float32)

    out = jax.jit(policy_forward)(x, params)
    out = jax.block_until_ready(out)

    ref = reference_forward(x, params)
    assert out.shape == (N, num_actions), out.shape
    assert bool(jnp.all(jnp.isfinite(out)))
    assert bool(jnp.allclose(out, ref, atol=5e-2, rtol=5e-2)), (out, ref)

    print("KERNEL_OK")
</pallas_src>

<mosaic_0001>
module attributes {stable_mosaic.version = 11 : i64} {
  func.func @policy_kernel(%arg0: i32, %arg1: memref<2x18x18x4xf32, #tpu.memory_space<vmem>>, %arg2: memref<36x16xbf16, #tpu.memory_space<vmem>>, %arg3: memref<1x16xf32, #tpu.memory_space<vmem>>, %arg4: memref<144x32xbf16, #tpu.memory_space<vmem>>, %arg5: memref<1x32xf32, #tpu.memory_space<vmem>>, %arg6: memref<512x128xbf16, #tpu.memory_space<vmem>>, %arg7: memref<1x128xf32, #tpu.memory_space<vmem>>, %arg8: memref<128x5xbf16, #tpu.memory_space<vmem>>, %arg9: memref<1x5xf32, #tpu.memory_space<vmem>>, %arg10: memref<2x5xf32, #tpu.memory_space<vmem>>, %arg11: memref<560x16xf32, #tpu.memory_space<vmem>>) attributes {dimension_semantics = [#tpu.dimension_semantics<parallel>], iteration_bounds = array<i64: 1>, scalar_prefetch = 0 : i64, scratch_operands = 1 : i64, tpu.core_type = #tpu.core_type<tc>, window_params = [{transform_indices = @transform_0, window_bounds = array<i64: 2, 18, 18, 4>}, {pipeline_mode = #tpu.pipeline_mode<synchronous>, transform_indices = @transform_1, window_bounds = array<i64: 36, 16>}, {pipeline_mode = #tpu.pipeline_mode<synchronous>, transform_indices = @transform_2, window_bounds = array<i64: 1, 16>}, {pipeline_mode = #tpu.pipeline_mode<synchronous>, transform_indices = @transform_3, window_bounds = array<i64: 144, 32>}, {pipeline_mode = #tpu.pipeline_mode<synchronous>, transform_indices = @transform_4, window_bounds = array<i64: 1, 32>}, {pipeline_mode = #tpu.pipeline_mode<synchronous>, transform_indices = @transform_5, window_bounds = array<i64: 512, 128>}, {pipeline_mode = #tpu.pipeline_mode<synchronous>, transform_indices = @transform_6, window_bounds = array<i64: 1, 128>}, {pipeline_mode = #tpu.pipeline_mode<synchronous>, transform_indices = @transform_7, window_bounds = array<i64: 128, 5>}, {pipeline_mode = #tpu.pipeline_mode<synchronous>, transform_indices = @transform_8, window_bounds = array<i64: 1, 5>}, {transform_indices = @transform_9, window_bounds = array<i64: 2, 5>}]} {
    %c0 = arith.constant 0 : index
    %c0_0 = arith.constant 0 : index
    %c0_1 = arith.constant 0 : index
    %c0_2 = arith.constant 0 : index
    %0 = vector.load %arg1[%c0, %c0_0, %c0_1, %c0_2] : memref<2x18x18x4xf32, #tpu.memory_space<vmem>>, vector<2x16x16x4xf32>
    %1 = vector.shape_cast %0 : vector<2x16x16x4xf32> to vector<512x4xf32>
    %2 = arith.truncf %1 : vector<512x4xf32> to vector<512x4xbf16>
    %c0_3 = arith.constant 0 : index
    %c0_4 = arith.constant 0 : index
    %c1 = arith.constant 1 : index
    %c0_5 = arith.constant 0 : index
    %3 = vector.load %arg1[%c0_3, %c0_4, %c1, %c0_5] : memref<2x18x18x4xf32, #tpu.memory_space<vmem>>, vector<2x16x16x4xf32>
    %4 = vector.shape_cast %3 : vector<2x16x16x4xf32> to vector<512x4xf32>
    %5 = arith.truncf %4 : vector<512x4xf32> to vector<512x4xbf16>
    %c0_6 = arith.constant 0 : index
    %c0_7 = arith.constant 0 : index
    %c2 = arith.constant 2 : index
    %c0_8 = arith.constant 0 : index
    %6 = vector.load %arg1[%c0_6, %c0_7, %c2, %c0_8] : memref<2x18x18x4xf32, #tpu.memory_space<vmem>>, vector<2x16x16x4xf32>
    %7 = vector.shape_cast %6 : vector<2x16x16x4xf32> to vector<512x4xf32>
    %8 = arith.truncf %7 : vector<512x4xf32> to vector<512x4xbf16>
    %c0_9 = arith.constant 0 : index
    %c1_10 = arith.constant 1 : index
    %c0_11 = arith.constant 0 : index
    %c0_12 = arith.constant 0 : index
    %9 = vector.load %arg1[%c0_9, %c1_10, %c0_11, %c0_12] : memref<2x18x18x4xf32, #tpu.memory_space<vmem>>, vector<2x16x16x4xf32>
    %10 = vector.shape_cast %9 : vector<2x16x16x4xf32> to vector<512x4xf32>
    %11 = arith.truncf %10 : vector<512x4xf32> to vector<512x4xbf16>
    %c0_13 = arith.constant 0 : index
    %c1_14 = arith.constant 1 : index
    %c1_15 = arith.constant 1 : index
    %c0_16 = arith.constant 0 : index
    %12 = vector.load %arg1[%c0_13, %c1_14, %c1_15, %c0_16] : memref<2x18x18x4xf32, #tpu.memory_space<vmem>>, vector<2x16x16x4xf32>
    %13 = vector.shape_cast %12 : vector<2x16x16x4xf32> to vector<512x4xf32>
    %14 = arith.truncf %13 : vector<512x4xf32> to vector<512x4xbf16>
    %c0_17 = arith.constant 0 : index
    %c1_18 = arith.constant 1 : index
    %c2_19 = arith.constant 2 : index
    %c0_20 = arith.constant 0 : index
    %15 = vector.load %arg1[%c0_17, %c1_18, %c2_19, %c0_20] : memref<2x18x18x4xf32, #tpu.memory_space<vmem>>, vector<2x16x16x4xf32>
    %16 = vector.shape_cast %15 : vector<2x16x16x4xf32> to vector<512x4xf32>
    %17 = arith.truncf %16 : vector<512x4xf32> to vector<512x4xbf16>
    %c0_21 = arith.constant 0 : index
    %c2_22 = arith.constant 2 : index
    %c0_23 = arith.constant 0 : index
    %c0_24 = arith.constant 0 : index
    %18 = vector.load %arg1[%c0_21, %c2_22, %c0_23, %c0_24] : memref<2x18x18x4xf32, #tpu.memory_space<vmem>>, vector<2x16x16x4xf32>
    %19 = vector.shape_cast %18 : vector<2x16x16x4xf32> to vector<512x4xf32>
    %20 = arith.truncf %19 : vector<512x4xf32> to vector<512x4xbf16>
    %c0_25 = arith.constant 0 : index
    %c2_26 = arith.constant 2 : index
    %c1_27 = arith.constant 1 : index
    %c0_28 = arith.constant 0 : index
    %21 = vector.load %arg1[%c0_25, %c2_26, %c1_27, %c0_28] : memref<2x18x18x4xf32, #tpu.memory_space<vmem>>, vector<2x16x16x4xf32>
    %22 = vector.shape_cast %21 : vector<2x16x16x4xf32> to vector<512x4xf32>
    %23 = arith.truncf %22 : vector<512x4xf32> to vector<512x4xbf16>
    %c0_29 = arith.constant 0 : index
    %c2_30 = arith.constant 2 : index
    %c2_31 = arith.constant 2 : index
    %c0_32 = arith.constant 0 : index
    %24 = vector.load %arg1[%c0_29, %c2_30, %c2_31, %c0_32] : memref<2x18x18x4xf32, #tpu.memory_space<vmem>>, vector<2x16x16x4xf32>
    %25 = vector.shape_cast %24 : vector<2x16x16x4xf32> to vector<512x4xf32>
    %26 = arith.truncf %25 : vector<512x4xf32> to vector<512x4xbf16>
    %27 = tpu.concatenate %2, %5, %8, %11, %14, %17, %20, %23, %26 in 1 : vector<512x4xbf16>, vector<512x4xbf16>, vector<512x4xbf16>, vector<512x4xbf16>, vector<512x4xbf16>, vector<512x4xbf16>, vector<512x4xbf16>, vector<512x4xbf16>, vector<512x4xbf16> -> vector<512x36xbf16>
    %c0_33 = arith.constant 0 : index
    %c0_34 = arith.constant 0 : index
    %28 = vector.load %arg2[%c0_33, %c0_34] : memref<36x16xbf16, #tpu.memory_space<vmem>>, vector<36x16xbf16>
    %cst = arith.constant dense<0.000000e+00> : vector<512x16xf32>
    %29 = tpu.matmul %27, %28, %cst {dimension_numbers = #tpu.dot_dimension_numbers<[1], [0], [0], [1], [0, 0, 1, 1], [], []>} : vector<512x36xbf16>, vector<36x16xbf16>, vector<512x16xf32> -> vector<512x16xf32>
    %c0_35 = arith.constant 0 : index
    %c0_36 = arith.constant 0 : index
    %30 = vector.load %arg3[%c0_35, %c0_36] : memref<1x16xf32, #tpu.memory_space<vmem>>, vector<1x16xf32>
    %31 = vector.broadcast %30 : vector<1x16xf32> to vector<512x16xf32>
    %32 = arith.addf %29, %31 : vector<512x16xf32>
    %cst_37 = arith.constant 0.000000e+00 : f32
    %33 = vector.broadcast %cst_37 : f32 to vector<512x16xf32>
    %34 = arith.maximumf %32, %33 : vector<512x16xf32>
    %c24 = arith.constant 24 : index
    %c0_38 = arith.constant 0 : index
    %35 = vector.load %arg11[%c24, %c0_38] : memref<560x16xf32, #tpu.memory_space<vmem>>, vector<512x16xf32>
    tpu.vector_store %arg11[%c24, %c0_38], %34 {strides = array<i32>} : memref<560x16xf32, #tpu.memory_space<vmem>>, vector<512x16xf32>,
    %36 = tpu.iota {dimensions = array<i32: 1>} : vector<2x16x16x1xi32>
    %37 = vector.shape_cast %36 : vector<2x16x16x1xi32> to vector<512x1xi32>
    %38 = tpu.iota {dimensions = array<i32: 2>} : vector<2x16x16x1xi32>
    %39 = vector.shape_cast %38 : vector<2x16x16x1xi32> to vector<512x1xi32>
    %c1_i32 = arith.constant 1 : i32
    %40 = vector.broadcast %c1_i32 : i32 to vector<512x1xi32>
    %41 = arith.cmpi sge, %37, %40 : vector<512x1xi32>
    %c15_i32 = arith.constant 15 : i32
    %42 = vector.broadcast %c15_i32 : i32 to vector<512x1xi32>
    %43 = arith.cmpi slt, %37, %42 : vector<512x1xi32>
    %c1_i32_39 = arith.constant 1 : i32
    %44 = vector.broadcast %c1_i32_39 : i32 to vector<512x1xi32>
    %45 = arith.cmpi sge, %39, %44 : vector<512x1xi32>
    %c15_i32_40 = arith.constant 15 : i32
    %46 = vector.broadcast %c15_i32_40 : i32 to vector<512x1xi32>
    %47 = arith.cmpi slt, %39, %46 : vector<512x1xi32>
    %c7 = arith.constant 7 : index
    %c0_41 = arith.constant 0 : index
    %48 = vector.load %arg11[%c7, %c0_41] : memref<560x16xf32, #tpu.memory_space<vmem>>, vector<512x16xf32>
    %49 = arith.andi %41, %45 : vector<512x1xi1>
    %cst_42 = arith.constant 0.000000e+00 : f32
    %50 = vector.shape_cast %49 : vector<512x1xi1> to vector<512x1xi1>
    %51 = vector.broadcast %50 : vector<512x1xi1> to vector<512x16xi1>
    %52 = vector.broadcast %cst_42 : f32 to vector<512x16xf32>
    %53 = arith.select %51, %48, %52 : vector<512x16xi1>, vector<512x16xf32>
    %54 = arith.truncf %53 : vector<512x16xf32> to vector<512x16xbf16>
    %c8 = arith.constant 8 : index
    %c0_43 = arith.constant 0 : index
    %55 = vector.load %arg11[%c8, %c0_43] : memref<560x16xf32, #tpu.memory_space<vmem>>, vector<512x16xf32>
    %cst_44 = arith.constant 0.000000e+00 : f32
    %56 = vector.shape_cast %41 : vector<512x1xi1> to vector<512x1xi1>
    %57 = vector.broadcast %56 : vector<512x1xi1> to vector<512x16xi1>
    %58 = vector.broadcast %cst_44 : f32 to vector<512x16xf32>
    %59 = arith.select %57, %55, %58 : vector<512x16xi1>, vector<512x16xf32>
    %60 = arith.truncf %59 : vector<512x16xf32> to vector<512x16xbf16>
    %c9 = arith.constant 9 : index
    %c0_45 = arith.constant 0 : index
    %61 = vector.load %arg11[%c9, %c0_45] : memref<560x16xf32, #tpu.memory_space<vmem>>, vector<512x16xf32>
    %62 = arith.andi %41, %47 : vector<512x1xi1>
    %cst_46 = arith.constant 0.000000e+00 : f32
    %63 = vector.shape_cast %62 : vector<512x1xi1> to vector<512x1xi1>
    %64 = vector.broadcast %63 : vector<512x1xi1> to vector<512x16xi1>
    %65 = vector.broadcast %cst_46 : f32 to vector<512x16xf32>
    %66 = arith.select %64, %61, %65 : vector<512x16xi1>, vector<512x16xf32>
    %67 = arith.truncf %66 : vector<512x16xf32> to vector<512x16xbf16>
    %c23 = arith.constant 23 : index
    %c0_47 = arith.constant 0 : index
    %68 = vector.load %arg11[%c23, %c0_47] : memref<560x16xf32, #tpu.memory_space<vmem>>, vector<512x16xf32>
    %cst_48 = arith.constant 0.000000e+00 : f32
    %69 = vector.shape_cast %45 : vector<512x1xi1> to vector<512x1xi1>
    %70 = vector.broadcast %69 : vector<512x1xi1> to vector<512x16xi1>
    %71 = vector.broadcast %cst_48 : f32 to vector<512x16xf32>
    %72 = arith.select %70, %68, %71 : vector<512x16xi1>, vector<512x16xf32>
    %73 = arith.truncf %72 : vector<512x16xf32> to vector<512x16xbf16>
    %c24_49 = arith.constant 24 : index
    %c0_50 = arith.constant 0 : index
    %74 = vector.load %arg11[%c24_49, %c0_50] : memref<560x16xf32, #tpu.memory_space<vmem>>, vector<512x16xf32>
    %75 = arith.truncf %74 : vector<512x16xf32> to vector<512x16xbf16>
    %c25 = arith.constant 25 : index
    %c0_51 = arith.constant 0 : index
    %76 = vector.load %arg11[%c25, %c0_51] : memref<560x16xf32, #tpu.memory_space<vmem>>, vector<512x16xf32>
    %cst_52 = arith.constant 0.000000e+00 : f32
    %77 = vector.shape_cast %47 : vector<512x1xi1> to vector<512x1xi1>
    %78 = vector.broadcast %77 : vector<512x1xi1> to vector<512x16xi1>
    %79 = vector.broadcast %cst_52 : f32 to vector<512x16xf32>
    %80 = arith.select %78, %76, %79 : vector<512x16xi1>, vector<512x16xf32>
    %81 = arith.truncf %80 : vector<512x16xf32> to vector<512x16xbf16>
    %c39 = arith.constant 39 : index
    %c0_53 = arith.constant 0 : index
    %82 = vector.load %arg11[%c39, %c0_53] : memref<560x16xf32, #tpu.memory_space<vmem>>, vector<512x16xf32>
    %83 = arith.andi %43, %45 : vector<512x1xi1>
    %cst_54 = arith.constant 0.000000e+00 : f32
    %84 = vector.shape_cast %83 : vector<512x1xi1> to vector<512x1xi1>
    %85 = vector.broadcast %84 : vector<512x1xi1> to vector<512x16xi1>
    %86 = vector.broadcast %cst_54 : f32 to vector<512x16xf32>
    %87 = arith.select %85, %82, %86 : vector<512x16xi1>, vector<512x16xf32>
    %88 = arith.truncf %87 : vector<512x16xf32> to vector<512x16xbf16>
    %c40 = arith.constant 40 : index
    %c0_55 = arith.constant 0 : index
    %89 = vector.load %arg11[%c40, %c0_55] : memref<560x16xf32, #tpu.memory_space<vmem>>, vector<512x16xf32>
    %cst_56 = arith.constant 0.000000e+00 : f32
    %90 = vector.shape_cast %43 : vector<512x1xi1> to vector<512x1xi1>
    %91 = vector.broadcast %90 : vector<512x1xi1> to vector<512x16xi1>
    %92 = vector.broadcast %cst_56 : f32 to vector<512x16xf32>
    %93 = arith.select %91, %89, %92 : vector<512x16xi1>, vector<512x16xf32>
    %94 = arith.truncf %93 : vector<512x16xf32> to vector<512x16xbf16>
    %c41 = arith.constant 41 : index
    %c0_57 = arith.constant 0 : index
    %95 = vector.load %arg11[%c41, %c0_57] : memref<560x16xf32, #tpu.memory_space<vmem>>, vector<512x16xf32>
    %96 = arith.andi %43, %47 : vector<512x1xi1>
    %cst_58 = arith.constant 0.000000e+00 : f32
    %97 = vector.shape_cast %96 : vector<512x1xi1> to vector<512x1xi1>
    %98 = vector.broadcast %97 : vector<512x1xi1> to vector<512x16xi1>
    %99 = vector.broadcast %cst_58 : f32 to vector<512x16xf32>
    %100 = arith.select %98, %95, %99 : vector<512x16xi1>, vector<512x16xf32>
    %101 = arith.truncf %100 : vector<512x16xf32> to vector<512x16xbf16>
    %102 = tpu.concatenate %54, %60, %67, %73, %75, %81, %88, %94, %101 in 1 : vector<512x16xbf16>, vector<512x16xbf16>, vector<512x16xbf16>, vector<512x16xbf16>, vector<512x16xbf16>, vector<512x16xbf16>, vector<512x16xbf16>, vector<512x16xbf16>, vector<512x16xbf16> -> vector<512x144xbf16>
    %c0_59 = arith.constant 0 : index
    %c0_60 = arith.constant 0 : index
    %103 = vector.load %arg4[%c0_59, %c0_60] : memref<144x32xbf16, #tpu.memory_space<vmem>>, vector<144x32xbf16>
    %cst_61 = arith.constant dense<0.000000e+00> : vector<512x32xf32>
    %104 = tpu.matmul %102, %103, %cst_61 {dimension_numbers = #tpu.dot_dimension_numbers<[1], [0], [0], [1], [0, 0, 1, 1], [], []>} : vector<512x144xbf16>, vector<144x32xbf16>, vector<512x32xf32> -> vector<512x32xf32>
    %c0_62 = arith.constant 0 : index
    %c0_63 = arith.constant 0 : index
    %105 = vector.load %arg5[%c0_62, %c0_63] : memref<1x32xf32, #tpu.memory_space<vmem>>, vector<1x32xf32>
    %106 = vector.broadcast %105 : vector<1x32xf32> to vector<512x32xf32>
    %107 = arith.addf %104, %106 : vector<512x32xf32>
    %cst_64 = arith.constant 0.000000e+00 : f32
    %108 = vector.broadcast %cst_64 : f32 to vector<512x32xf32>
    %109 = arith.maximumf %107, %108 : vector<512x32xf32>
    %110 = vector.shape_cast %109 : vector<512x32xf32> to vector<2x16x16x32xf32>
    %111 = vector.extract_strided_slice %110 {offsets = [0, 0, 0, 0], sizes = [2, 16, 4, 32], strides = [1, 1, 1, 1]} : vector<2x16x16x32xf32> to vector<2x16x4x32xf32>
    %cst_65 = arith.constant dense<0.000000e+00> : vector<2x16x32xf32>
    %112 = vector.multi_reduction <add>, %111, %cst_65 [2] : vector<2x16x4x32xf32> to vector<2x16x32xf32>
    %113 = vector.extract_strided_slice %110 {offsets = [0, 0, 4, 0], sizes = [2, 16, 4, 32], strides = [1, 1, 1, 1]} : vector<2x16x16x32xf32> to vector<2x16x4x32xf32>
    %cst_66 = arith.constant dense<0.000000e+00> : vector<2x16x32xf32>
    %114 = vector.multi_reduction <add>, %113, %cst_66 [2] : vector<2x16x4x32xf32> to vector<2x16x32xf32>
    %115 = vector.extract_strided_slice %110 {offsets = [0, 0, 8, 0], sizes = [2, 16, 4, 32], strides = [1, 1, 1, 1]} : vector<2x16x16x32xf32> to vector<2x16x4x32xf32>
    %cst_67 = arith.constant dense<0.000000e+00> : vector<2x16x32xf32>
    %116 = vector.multi_reduction <add>, %115, %cst_67 [2] : vector<2x16x4x32xf32> to vector<2x16x32xf32>
    %117 = vector.extract_strided_slice %110 {offsets = [0, 0, 12, 0], sizes = [2, 16, 4, 32], strides = [1, 1, 1, 1]} : vector<2x16x16x32xf32> to vector<2x16x4x32xf32>
    %cst_68 = arith.constant dense<0.000000e+00> : vector<2x16x32xf32>
    %118 = vector.multi_reduction <add>, %117, %cst_68 [2] : vector<2x16x4x32xf32> to vector<2x16x32xf32>
    %119 = tpu.concatenate %112, %114, %116, %118 in 2 : vector<2x16x32xf32>, vector<2x16x32xf32>, vector<2x16x32xf32>, vector<2x16x32xf32> -> vector<2x16x128xf32>
    %120 = vector.extract_strided_slice %119 {offsets = [0, 0, 0], sizes = [2, 4, 128], strides = [1, 1, 1]} : vector<2x16x128xf32> to vector<2x4x128xf32>
    %cst_69 = arith.constant dense<0.000000e+00> : vector<2x128xf32>
    %121 = vector.multi_reduction <add>, %120, %cst_69 [1] : vector<2x4x128xf32> to vector<2x128xf32>
    %122 = vector.extract_strided_slice %119 {offsets = [0, 4, 0], sizes = [2, 4, 128], strides = [1, 1, 1]} : vector<2x16x128xf32> to vector<2x4x128xf32>
    %cst_70 = arith.constant dense<0.000000e+00> : vector<2x128xf32>
    %123 = vector.multi_reduction <add>, %122, %cst_70 [1] : vector<2x4x128xf32> to vector<2x128xf32>
    %124 = vector.extract_strided_slice %119 {offsets = [0, 8, 0], sizes = [2, 4, 128], strides = [1, 1, 1]} : vector<2x16x128xf32> to vector<2x4x128xf32>
    %cst_71 = arith.constant dense<0.000000e+00> : vector<2x128xf32>
    %125 = vector.multi_reduction <add>, %124, %cst_71 [1] : vector<2x4x128xf32> to vector<2x128xf32>
    %126 = vector.extract_strided_slice %119 {offsets = [0, 12, 0], sizes = [2, 4, 128], strides = [1, 1, 1]} : vector<2x16x128xf32> to vector<2x4x128xf32>
    %cst_72 = arith.constant dense<0.000000e+00> : vector<2x128xf32>
    %127 = vector.multi_reduction <add>, %126, %cst_72 [1] : vector<2x4x128xf32> to vector<2x128xf32>
    %128 = tpu.concatenate %121, %123, %125, %127 in 1 : vector<2x128xf32>, vector<2x128xf32>, vector<2x128xf32>, vector<2x128xf32> -> vector<2x512xf32>
    %cst_73 = arith.constant 6.250000e-02 : f32
    %129 = vector.broadcast %cst_73 : f32 to vector<2x512xf32>
    %130 = arith.mulf %128, %129 : vector<2x512xf32>
    %131 = arith.truncf %130 : vector<2x512xf32> to vector<2x512xbf16>
    %c0_74 = arith.constant 0 : index
    %c0_75 = arith.constant 0 : index
    %132 = vector.load %arg6[%c0_74, %c0_75] : memref<512x128xbf16, #tpu.memory_space<vmem>>, vector<512x128xbf16>
    %cst_76 = arith.constant dense<0.000000e+00> : vector<2x128xf32>
    %133 = tpu.matmul %131, %132, %cst_76 {dimension_numbers = #tpu.dot_dimension_numbers<[1], [0], [0], [1], [0, 0, 1, 1], [], []>} : vector<2x512xbf16>, vector<512x128xbf16>, vector<2x128xf32> -> vector<2x128xf32>
    %c0_77 = arith.constant 0 : index
    %c0_78 = arith.constant 0 : index
    %134 = vector.load %arg7[%c0_77, %c0_78] : memref<1x128xf32, #tpu.memory_space<vmem>>, vector<1x128xf32>
    %135 = vector.broadcast %134 : vector<1x128xf32> to vector<2x128xf32>
    %136 = arith.addf %133, %135 : vector<2x128xf32>
    %cst_79 = arith.constant 0.000000e+00 : f32
    %137 = vector.broadcast %cst_79 : f32 to vector<2x128xf32>
    %138 = arith.maximumf %136, %137 : vector<2x128xf32>
    %139 = arith.truncf %138 : vector<2x128xf32> to vector<2x128xbf16>
    %c0_80 = arith.constant 0 : index
    %c0_81 = arith.constant 0 : index
    %140 = vector.load %arg8[%c0_80, %c0_81] : memref<128x5xbf16, #tpu.memory_space<vmem>>, vector<128x5xbf16>
    %cst_82 = arith.constant dense<0.000000e+00> : vector<2x5xf32>
    %141 = tpu.matmul %139, %140, %cst_82 {dimension_numbers = #tpu.dot_dimension_numbers<[1], [0], [0], [1], [0, 0, 1, 1], [], []>} : vector<2x128xbf16>, vector<128x5xbf16>, vector<2x5xf32> -> vector<2x5xf32>
    %c0_83 = arith.constant 0 : index
    %c0_84 = arith.constant 0 : index
    %142 = vector.load %arg9[%c0_83, %c0_84] : memref<1x5xf32, #tpu.memory_space<vmem>>, vector<1x5xf32>
    %143 = vector.broadcast %142 : vector<1x5xf32> to vector<2x5xf32>
    %144 = arith.addf %141, %143 : vector<2x5xf32>
    %c0_85 = arith.constant 0 : index
    %c0_86 = arith.constant 0 : index
    %145 = vector.load %arg10[%c0_85, %c0_86] : memref<2x5xf32, #tpu.memory_space<vmem>>, vector<2x5xf32>
    tpu.vector_store %arg10[%c0_85, %c0_86], %144 {strides = array<i32>} : memref<2x5xf32, #tpu.memory_space<vmem>>, vector<2x5xf32>,
    return
  }
  func.func @transform_0(%arg0: i32) -> (i32, i32, i32, i32) {
    %c0_i32 = arith.constant 0 : i32
    %c0_i32_0 = arith.constant 0 : i32
    %c0_i32_1 = arith.constant 0 : i32
    %c0_i32_2 = arith.constant 0 : i32
    return %arg0, %c0_i32, %c0_i32_0, %c0_i32_1 : i32, i32, i32, i32
  }
  func.func @transform_1(%arg0: i32) -> (i32, i32) {
    %c0_i32 = arith.constant 0 : i32
    %c0_i32_0 = arith.constant 0 : i32
    %c0_i32_1 = arith.constant 0 : i32
    return %c0_i32, %c0_i32_0 : i32, i32
  }
  func.func @transform_2(%arg0: i32) -> (i32, i32) {
    %c0_i32 = arith.constant 0 : i32
    %c0_i32_0 = arith.constant 0 : i32
    %c0_i32_1 = arith.constant 0 : i32
    return %c0_i32, %c0_i32_0 : i32, i32
  }
  func.func @transform_3(%arg0: i32) -> (i32, i32) {
    %c0_i32 = arith.constant 0 : i32
    %c0_i32_0 = arith.constant 0 : i32
    %c0_i32_1 = arith.constant 0 : i32
    return %c0_i32, %c0_i32_0 : i32, i32
  }
  func.func @transform_4(%arg0: i32) -> (i32, i32) {
    %c0_i32 = arith.constant 0 : i32
    %c0_i32_0 = arith.constant 0 : i32
    %c0_i32_1 = arith.constant 0 : i32
    return %c0_i32, %c0_i32_0 : i32, i32
  }
  func.func @transform_5(%arg0: i32) -> (i32, i32) {
    %c0_i32 = arith.constant 0 : i32
    %c0_i32_0 = arith.constant 0 : i32
    %c0_i32_1 = arith.constant 0 : i32
    return %c0_i32, %c0_i32_0 : i32, i32
  }
  func.func @transform_6(%arg0: i32) -> (i32, i32) {
    %c0_i32 = arith.constant 0 : i32
    %c0_i32_0 = arith.constant 0 : i32
    %c0_i32_1 = arith.constant 0 : i32
    return %c0_i32, %c0_i32_0 : i32, i32
  }
  func.func @transform_7(%arg0: i32) -> (i32, i32) {
    %c0_i32 = arith.constant 0 : i32
    %c0_i32_0 = arith.constant 0 : i32
    %c0_i32_1 = arith.constant 0 : i32
    return %c0_i32, %c0_i32_0 : i32, i32
  }
  func.func @transform_8(%arg0: i32) -> (i32, i32) {
    %c0_i32 = arith.constant 0 : i32
    %c0_i32_0 = arith.constant 0 : i32
    %c0_i32_1 = arith.constant 0 : i32
    return %c0_i32, %c0_i32_0 : i32, i32
  }
  func.func @transform_9(%arg0: i32) -> (i32, i32) {
    %c0_i32 = arith.constant 0 : i32
    %c0_i32_0 = arith.constant 0 : i32
    return %arg0, %c0_i32 : i32, i32
  }
}

</mosaic_0001>

<bundles_post_ra>
// kernel: policy_forward.1
= control target key start
LH: loop header
LB: loop body
LE: loop exit
PB: predicated region body
PF: predicated region fallthrough
CT: control target
= control target key end

     0   :  { %s7487_s25 = smov 8   ;;  %s7488_s26 = smov 4   ;;  %vm2312_vm0 = vcmask 1041408   ;;  %s11011_s0 = inlined_call_operand.vmem [shape: f32[2,18,18,4], index: 0, kind: input, shape index: {}]   ;;  %s11012_s1 = inlined_call_operand.vmem [shape: bf16[36,16], index: 1, kind: input, shape index: {}]   ;;  %s11013_s2 = inlined_call_operand.vmem [shape: f32[1,16], index: 2, kind: input, shape index: {}]   ;;  %s11014_s3 = inlined_call_operand.vmem [shape: bf16[144,32], index: 3, kind: input, shape index: {}]   ;;  %s11015_s4 = inlined_call_operand.vmem [shape: f32[1,32], index: 4, kind: input, shape index: {}]   ;;  %s11016_s5 = inlined_call_operand.vmem [shape: bf16[512,128], index: 5, kind: input, shape index: {}]   ;;  %s11017_s6 = inlined_call_operand.vmem [shape: f32[1,128], index: 6, kind: input, shape index: {}]   ;;  %s11018_s7 = inlined_call_operand.vmem [shape: bf16[128,5], index: 7, kind: input, shape index: {}]   ;;  %s11019_s8 = inlined_call_operand.vmem [shape: f32[1,5], index: 8, kind: input, shape index: {}]   ;;  %s11020_s9 = inlined_call_operand.hbm [shape: f32[2,5], index: 9, kind: output, shape index: {}]  }
   0x1   :  { %v226_v0 = vld [vmem:[%s11011_s0 + $0x2] sm:$0xff]  ;;  %v227_v1 = vld [vmem:[%s11011_s0 + $0xa] sm:$0xff]  ;;  %v228_v5 = vld [vmem:[%s11011_s0 + $0x1a] sm:$0xff]  ;;  %s7489_s18 = smov 12   ;;  %s7490_s23 = smov 16  }
   0x2   :  { %v130_v2 = vld [vmem:[%s11011_s0 + $0x1] sm:$0xff]  ;;  %v290_v3 = vpack.c.bf16 %v227_v1, %v226_v0  ;;  %v131_v4 = vld [vmem:[%s11011_s0 + $0x9] sm:$0xff]  ;;  %v132_v8 = vld [vmem:[%s11011_s0 + $0x19] sm:$0xff]  ;;  %s7491_s30 = smov 20   ;;  %s7492_s19 = smov 24  }
   0x3   :  { %v229_v6 = vld [vmem:[%s11011_s0 + $0x22] sm:$0xff]  ;;  %v194_v7 = vpack.c.bf16 %v131_v4, %v130_v2  ;;  %v6691_v12 = vld [vmem:[%s11011_s0 + $0x30] sm:$0xff]  ;;  %v6692_v13 = vld [vmem:[%s11011_s0 + $0x38] sm:$0xff]  ;;  %s7493_s22 = smov 28  }
   0x4   :  { %v133_v9 = vld [vmem:[%s11011_s0 + $0x21] sm:$0xff]  ;;  %1028 = vrot.lane.b32.xlu1 %v290_v3, %s7487_s25  ;;  %v291_v10 = vpack.c.bf16 %v229_v6, %v228_v5  ;;  %v6689_v14 = vld [vmem:[%s11011_s0 + $0x18] sm:$0xff]  ;;  %v7594_v16 = vpack.c.bf16 %v6692_v13, %v6691_v12  ;;  %v6884_v25 = vld [vmem:[%s11011_s0 + $0x50] sm:$0xff] }
   0x5   :  { %932 = vrot.lane.b32.xlu0 %v194_v7, %s7488_s26  ;;  %v195_v11 = vpack.c.bf16 %v133_v9, %v132_v8  ;;  %v6690_v15 = vld [vmem:[%s11011_s0 + $0x20] sm:$0xff]  ;;  %v6755_v18 = vld [vmem:[%s11011_s0 + $0x31] sm:$0xff]  ;;  %v6883_v24 = vld [vmem:[%s11011_s0 + $0x48] sm:$0xff] }
   0x6   :  { %v7597_v17 = vpack.c.bf16 %v6690_v15, %v6689_v14  ;;  %v6756_v19 = vld [vmem:[%s11011_s0 + $0x39] sm:$0xff]  ;;  %v7624_v26 = vpack.c.bf16 %v6884_v25, %v6883_v24  ;;  %v6947_v27 = vld [vmem:[%s11011_s0 + $0x49] sm:$0xff]  ;;  %v6948_v28 = vld [vmem:[%s11011_s0 + $0x51] sm:$0xff] }
   0x7   :  { %v484_v20 = vpack.c.bf16 %v6756_v19, %v6755_v18  ;;  %v6819_v21 = vld [vmem:[%s11011_s0 + $0x32] sm:$0xff]  ;;  %v6820_v22 = vld [vmem:[%s11011_s0 + $0x3a] sm:$0xff]  ;;  %v7407_v30 = vld [vmem:[%s11012_s1 + $0x8] sm:$0xff]   ;;  %v773_v31 = vpack.c.bf16 %v6948_v28, %v6947_v27 }
   0x8   :  { %1030 = vrot.lane.b32.xlu1 %v291_v10, %s7487_s25  ;;  %v580_v23 = vpack.c.bf16 %v6820_v22, %v6819_v21  ;;  %v7406_v29 = vld [vmem:[%s11012_s1] sm:$0xff]   ;;  %v7408_v32 = vld [vmem:[%s11012_s1 + $0x10] ss:$0 sps:$4 sm:$0x33]   ;;  %v7012_v35 = vld [vmem:[%s11011_s0 + $0x52] sm:$0xff]  ;;  %s7494_s1 = smov 32  }
   0x9   :  { %934 = vrot.lane.b32.xlu0 %v195_v11, %s7488_s26  ;;  %7279 = vmatprep.subr.bf16.mxu0 %v7406_v29  ;;  %v2314_v33 = vsel %vm2312_vm0, %v7408_v32, 0  ;;  %v7011_v34 = vld [vmem:[%s11011_s0 + $0x4a] sm:$0xff]  ;;  %v6695_v37 = vld [vmem:[%s11011_s0 + $0x60] sm:$0xff]  ;;  %v6887_v45 = vld [vmem:[%s11011_s0 + $0x78] sm:$0xff] }
   0xa   :  { %7280 = vmatpush3.bf16.msra.mxu0 %v7406_v29  ;;  %v869_v36 = vpack.c.bf16 %v7012_v35, %v7011_v34  ;;  %v6696_v38 = vld [vmem:[%s11011_s0 + $0x68] sm:$0xff]  ;;  %v6888_v46 = vld [vmem:[%s11011_s0 + $0x80] sm:$0xff] }
   0xb   :  { %7281 = vmatprep.subr.bf16.mxu0 %v7407_v30  ;;  %v6759_v39 = vld [vmem:[%s11011_s0 + $0x61] sm:$0xff]  ;;  %v6760_v40 = vld [vmem:[%s11011_s0 + $0x69] sm:$0xff]  ;;  %v7671_v41 = vpack.c.bf16 %v6696_v38, %v6695_v37  ;;  %v6951_v48 = vld [vmem:[%s11011_s0 + $0x79] sm:$0xff]  ;;  %v7699_v50 = vpack.c.bf16 %v6888_v46, %v6887_v45 }
   0xc   :  { %1126 = vrot.lane.b32.xlu1 %v7594_v16, %s7489_s18  ;;  %v6823_v42 = vld [vmem:[%s11011_s0 + $0x62] sm:$0xff]  ;;  %v6824_v43 = vld [vmem:[%s11011_s0 + $0x6a] sm:$0xff]  ;;  %v486_v44 = vpack.c.bf16 %v6760_v40, %v6759_v39  ;;  %v7015_v52 = vld [vmem:[%s11011_s0 + $0x7a] sm:$0xff] }
   0xd   :  { %1124 = vrot.lane.b32.xlu0 %v7597_v17, %s7489_s18  ;;  %v582_v47 = vpack.c.bf16 %v6824_v43, %v6823_v42  ;;  %v6952_v49 = vld [vmem:[%s11011_s0 + $0x81] sm:$0xff] }
   0xe   :  { %7282 = vmatpush3.bf16.msra.mxu0 %v7407_v30  ;;  %v775_v51 = vpack.c.bf16 %v6952_v49, %v6951_v48  ;;  %v7016_v53 = vld [vmem:[%s11011_s0 + $0x82] sm:$0xff] }
   0xf   :  { %7387 = vmatprep.subr.msk.bf16.mxu0 %vm2312_vm0, %v7408_v32 }
  0x10   :  { %1222 = vrot.lane.b32.xlu1 %v484_v20, %s7490_s23 }
  0x11   :  { %1220 = vrot.lane.b32.xlu0 %v195_v11, %s7490_s23 }
  0x12   :  { %7284 = vmatpush3.bf16.msra.mxu0 %v2314_v33 }
  0x14   :  { %1318 = vrot.lane.b32.xlu1 %v580_v23, %s7491_s30 }
  0x15   :  { %1316 = vrot.lane.b32.xlu0 %v291_v10, %s7491_s30 }
  0x18   :  { %1414 = vrot.lane.b32.xlu1 %v7624_v26, %s7492_s19 }
  0x19   :  { %1412 = vrot.lane.b32.xlu0 %v7594_v16, %s7492_s19 }
  0x1c   :  { %1510 = vrot.lane.b32.xlu1 %v773_v31, %s7493_s22 }
  0x1d   :  { %1508 = vrot.lane.b32.xlu0 %v484_v20, %s7493_s22 }
  0x20   :  { %936 = vrot.lane.b32.xlu1 %v484_v20, %s7488_s26 }
  0x21   :  { %1604 = vrot.lane.b32.xlu0 %v580_v23, %s7494_s1 }
  0x24   :  { %938 = vrot.lane.b32.xlu1 %v773_v31, %s7488_s26 }
  0x25   :  { %1606 = vrot.lane.b32.xlu0 %v869_v36, %s7494_s1 }
  0x28   :  { %1034 = vrot.lane.b32.xlu1 %v869_v36, %s7487_s25 }
  0x29   :  { %1032 = vrot.lane.b32.xlu0 %v580_v23, %s7487_s25 }
  0x2c   :  { %1130 = vrot.lane.b32.xlu1 %v7671_v41, %s7489_s18 }
  0x2d   :  { %1128 = vrot.lane.b32.xlu0 %v7624_v26, %s7489_s18 }
  0x30   :  { %1226 = vrot.lane.b32.xlu1 %v486_v44, %s7490_s23 }
  0x31   :  { %1224 = vrot.lane.b32.xlu0 %v773_v31, %s7490_s23 }
  0x34   :  { %1322 = vrot.lane.b32.xlu1 %v582_v47, %s7491_s30 }
  0x35   :  { %1320 = vrot.lane.b32.xlu0 %v869_v36, %s7491_s30 }
  0x38   :  { %1418 = vrot.lane.b32.xlu1 %v7699_v50, %s7492_s19 }
  0x39   :  { %1416 = vrot.lane.b32.xlu0 %v7671_v41, %s7492_s19 }
  0x3c   :  { %1514 = vrot.lane.b32.xlu1 %v775_v51, %s7493_s22 }
  0x3d   :  { %1512 = vrot.lane.b32.xlu0 %v486_v44, %s7493_s22 }
  0x40   :  { %940 = vrot.lane.b32.xlu1 %v486_v44, %s7488_s26 }
  0x41   :  { %14 = vsyncpa [#allocation4], 0  ;;  %1608 = vrot.lane.b32.xlu0 %v582_v47, %s7494_s1  ;;  %v871_v54 = vpack.c.bf16 %v7016_v53, %v7015_v52  ;;  %v6699_v55 = vld [vmem:[%s11011_s0 + $0x90] sm:$0xff]  ;;  %v6700_v56 = vld [vmem:[%s11011_s0 + $0x98] sm:$0xff]  ;;  %vm1668_vm1 = vcmask 31744   ;;  %vm1765_vm2 = vcmask 64512  }
  0x42   :  { %v7725_v57 = vpack.c.bf16 %v6700_v56, %v6699_v55  ;;  %v6763_v58 = vld [vmem:[%s11011_s0 + $0x91] sm:$0xff]  ;;  %v6764_v59 = vld [vmem:[%s11011_s0 + $0x99] sm:$0xff]  ;;  %v6891_v0 = vld [vmem:[%s11011_s0 + $0xa8] sm:$0xff]  ;;  %vm1830_vm3 = vcmask 97280   ;;  %vm1895_vm4 = vcmask 130048   ;;  %vm1960_vm5 = vcmask 162816  }
  0x43   :  { %v488_v60 = vpack.c.bf16 %v6764_v59, %v6763_v58  ;;  %v6827_v61 = vld [vmem:[%s11011_s0 + $0x92] sm:$0xff]  ;;  %v6828_v62 = vld [vmem:[%s11011_s0 + $0x9a] sm:$0xff]  ;;  %v6955_v3 = vld [vmem:[%s11011_s0 + $0xa9] sm:$0xff]  ;;  %vm2025_vm6 = vcmask 195584   ;;  %vm2090_vm7 = vcmask 228352   ;;  %vm2155_vm8 = vcmask 261120  }
  0x44   :  { %942 = vrot.lane.b32.xlu1 %v775_v51, %s7488_s26  ;;  %v584_v63 = vpack.c.bf16 %v6828_v62, %v6827_v61  ;;  %v6892_v1 = vld [vmem:[%s11011_s0 + $0xb0] sm:$0xff]  ;;  %v6703_v9 = vld [vmem:[%s11011_s0 + $0xc0] sm:$0xff]  ;;  %v6704_v10 = vld [vmem:[%s11011_s0 + $0xc8] sm:$0xff]  ;;  %vm2247_vm9 = vcmask 293888   ;;  %s7496_s29 = smov 64   ;;  %s7497_s10 = smov 48  }
  0x45   :  { %1610 = vrot.lane.b32.xlu0 %v871_v54, %s7494_s1  ;;  %v7753_v2 = vpack.c.bf16 %v6892_v1, %v6891_v0  ;;  %v6956_v4 = vld [vmem:[%s11011_s0 + $0xb1] sm:$0xff]  ;;  %v7785_v11 = vpack.c.bf16 %v6704_v10, %v6703_v9  ;;  %v6767_v12 = vld [vmem:[%s11011_s0 + $0xc1] sm:$0xff]  ;;  %v6768_v13 = vld [vmem:[%s11011_s0 + $0xc9] sm:$0xff]  ;;  %s7498_s13 = smov 96   ;;  %s7499_s14 = smov 80   ;;  %vm3857_vm12 = vcmask 392192  }
  0x46   :  { %v777_v5 = vpack.c.bf16 %v6956_v4, %v6955_v3  ;;  %v7019_v6 = vld [vmem:[%s11011_s0 + $0xaa] sm:$0xff]  ;;  %v7020_v7 = vld [vmem:[%s11011_s0 + $0xb2] sm:$0xff]  ;;  %v490_v14 = vpack.c.bf16 %v6768_v13, %v6767_v12  ;;  %v6831_v15 = vld [vmem:[%s11011_s0 + $0xc2] sm:$0xff]  ;;  %vm3922_vm13 = vcmask 523264   ;;  %vm3987_vm14 = vcmask 654336   ;;  %s7504_s20 = smov [#allocation3]  }
  0x47   :  { %v873_v8 = vpack.c.bf16 %v7020_v7, %v7019_v6  ;;  %v6832_v18 = vld [vmem:[%s11011_s0 + $0xca] sm:$0xff]  ;;  %v6895_v20 = vld [vmem:[%s11011_s0 + $0xd8] sm:$0xff]  ;;  %v6896_v21 = vld [vmem:[%s11011_s0 + $0xe0] sm:$0xff]  ;;  %vm4052_vm15 = vcmask 785408   ;;  %vm4116_vm0 = vcmask 916480   ;;  %s6681_s21 = sshll.u32 %s7504_s20, 4  ;;  %s6682_s21 = int_to_ptr.vmem [resolvable:$true] %s6681_s21 }
  0x48   :  { %1038 = vrot.lane.b32.xlu1 %v871_v54, %s7487_s25  ;;  %v586_v19 = vpack.c.bf16 %v6832_v18, %v6831_v15  ;;  %v7813_v22 = vpack.c.bf16 %v6896_v21, %v6895_v20  ;;  %v6959_v23 = vld [vmem:[%s11011_s0 + $0xd9] sm:$0xff]  ;;  %v6960_v24 = vld [vmem:[%s11011_s0 + $0xe1] sm:$0xff]  ;;  %v6707_v40 = vld [vmem:[%s11011_s0 + $0xf0] sm:$0xff]  ;;  %p7468_p1 = scmp.lt.s32.totalorder %s6682_s21, %s6682_s21 }
  0x49   :  { %1036 = vrot.lane.b32.xlu0 %v582_v47, %s7487_s25  ;;  %v779_v28 = vpack.c.bf16 %v6960_v24, %v6959_v23  ;;  %v7023_v29 = vld [vmem:[%s11011_s0 + $0xda] sm:$0xff]  ;;  %v7024_v30 = vld [vmem:[%s11011_s0 + $0xe2] sm:$0xff]  ;;  %v6771_v47 = vld [vmem:[%s11011_s0 + $0xf1] sm:$0xff] }
  0x4a   :  { %v7833_v33 = vpack.c.bf16 %v7024_v30, %v7023_v29  ;;  %v34_v38 = vld [vmem:[%s11011_s0] sm:$0xff]  ;;  %v35_v39 = vld [vmem:[%s11011_s0 + $0x8] sm:$0xff]  ;;  %v6708_v42 = vld [vmem:[%s11011_s0 + $0xf8] sm:$0xff] }
  0x4b   :  { %v98_v44 = vpack.c.bf16 %v35_v39, %v34_v38  ;;  %v7855_v46 = vpack.c.bf16 %v6708_v42, %v6707_v40  ;;  %v6772_v48 = vld [vmem:[%s11011_s0 + $0xf9] sm:$0xff]  ;;  %v6899_v1 = vld [vmem:[%s11011_s0 + $0x108] sm:$0xff]  ;;  %v6964_v15 = vld [vmem:[%s11011_s0 + $0x111] sm:$0xff] }
  0x4c   :  { %1134 = vrot.lane.b32.xlu1 %v7725_v57, %s7489_s18  ;;  %v492_v53 = vpack.c.bf16 %v6772_v48, %v6771_v47  ;;  %v6836_v55 = vld [vmem:[%s11011_s0 + $0xfa] sm:$0xff]  ;;  %v6776_v42 = vld [vmem:[%s11011_s0 + $0x129] sm:$0xff] }
  0x4d   :  { %1132 = vrot.lane.b32.xlu0 %v7699_v50, %s7489_s18  ;;  %v6775_v40 = vld [vmem:[%s11011_s0 + $0x121] sm:$0xff] }
  0x4e   :  { %v6839_v48 = vld [vmem:[%s11011_s0 + $0x122] sm:$0xff] }
  0x50   :  { %1230 = vrot.lane.b32.xlu1 %v488_v60, %s7490_s23 }
  0x51   :  { %1228 = vrot.lane.b32.xlu0 %v775_v51, %s7490_s23 }
  0x54   :  { %1326 = vrot.lane.b32.xlu1 %v584_v63, %s7491_s30 }
  0x55   :  { %1324 = vrot.lane.b32.xlu0 %v871_v54, %s7491_s30  ;;  %v6835_v54 = vld [vmem:[%s11011_s0 + $0xf2] sm:$0xff] }
  0x58   :  { %1422 = vrot.lane.b32.xlu1 %v7753_v2, %s7492_s19 }
  0x59   :  { %1420 = vrot.lane.b32.xlu0 %v7725_v57, %s7492_s19 }
  0x5c   :  { %1518 = vrot.lane.b32.xlu1 %v777_v5, %s7493_s22 }
  0x5d   :  { %1516 = vrot.lane.b32.xlu0 %v488_v60, %s7493_s22 }
  0x60   :  { %944 = vrot.lane.b32.xlu1 %v488_v60, %s7488_s26 }
  0x61   :  { %1612 = vrot.lane.b32.xlu0 %v584_v63, %s7494_s1 }
  0x64   :  { %946 = vrot.lane.b32.xlu1 %v777_v5, %s7488_s26 }
  0x65   :  { %1614 = vrot.lane.b32.xlu0 %v873_v8, %s7494_s1 }
  0x68   :  { %1042 = vrot.lane.b32.xlu1 %v873_v8, %s7487_s25 }
  0x69   :  { %1040 = vrot.lane.b32.xlu0 %v584_v63, %s7487_s25  ;;  %v588_v63 = vpack.c.bf16 %v6836_v55, %v6835_v54 }
  0x6c   :  { %1138 = vrot.lane.b32.xlu1 %v7785_v11, %s7489_s18 }
  0x6d   :  { %1136 = vrot.lane.b32.xlu0 %v7753_v2, %s7489_s18 }
  0x70   :  { %1234 = vrot.lane.b32.xlu1 %v490_v14, %s7490_s23 }
  0x71   :  { %1232 = vrot.lane.b32.xlu0 %v777_v5, %s7490_s23 }
  0x74   :  { %1330 = vrot.lane.b32.xlu1 %v586_v19, %s7491_s30 }
  0x75   :  { %1328 = vrot.lane.b32.xlu0 %v873_v8, %s7491_s30 }
  0x76   :  { %v1029_v25 = vpop.permute.xlu1 %1028 }
  0x77   :  { %v933_v27 = vpop.permute.xlu0 %932 }
  0x78   :  { %1426 = vrot.lane.b32.xlu1 %v7813_v22, %s7492_s19  ;;  %v1671_v51 = vsel %vm1668_vm1, %v98_v44, %v933_v27  ;;  %v7028_v27 = vld [vmem:[%s11011_s0 + $0x112] sm:$0xff] }
  0x79   :  { %1424 = vrot.lane.b32.xlu0 %v7785_v11, %s7492_s19  ;;  %v1767_v56 = vsel %vm1765_vm2, %v1671_v51, %v1029_v25  ;;  %v7027_v25 = vld [vmem:[%s11011_s0 + $0x10a] sm:$0xff] }
  0x7a   :  { %v1031_v31 = vpop.permute.xlu1 %1030  ;;  %v877_v30 = vpack.c.bf16 %v7028_v27, %v7027_v25 }
  0x7b   :  { %v935_v32 = vpop.permute.xlu0 %934 }
  0x7c   :  { %1522 = vrot.lane.b32.xlu1 %v779_v28, %s7493_s22  ;;  %v1674_v59 = vsel %vm1668_vm1, %v7597_v17, %v935_v32  ;;  %v6900_v17 = vld [vmem:[%s11011_s0 + $0x110] sm:$0xff] }
  0x7d   :  { %1520 = vrot.lane.b32.xlu0 %v490_v14, %s7493_s22  ;;  %v1769_v3 = vsel %vm1765_vm2, %v1674_v59, %v1031_v31  ;;  %v7896_v12 = vpack.c.bf16 %v6900_v17, %v6899_v1  ;;  %v6903_v59 = vld [vmem:[%s11011_s0 + $0x138] sm:$0xff] }
  0x7e   :  { %v1127_v34 = vpop.permute.xlu1 %1126 }
  0x7f   :  { %v1125_v35 = vpop.permute.xlu0 %1124  ;;  %v1834_v6 = vsel %vm1830_vm3, %v1769_v3, %v1127_v34 }
  0x80   :  { %1618 = vrot.lane.b32.xlu1 %v7833_v33, %s7494_s1  ;;  %v1832_v60 = vsel %vm1830_vm3, %v1767_v56, %v1125_v35  ;;  %v6711_v35 = vld [vmem:[%s11011_s0 + $0x120] sm:$0xff] }
  0x81   :  { %1616 = vrot.lane.b32.xlu0 %v586_v19, %s7494_s1 }
  0x82   :  { %v1223_v36 = vpop.permute.xlu1 %1222 }
  0x83   :  { %v1221_v37 = vpop.permute.xlu0 %1220  ;;  %v1899_v9 = vsel %vm1895_vm4, %v1834_v6, %v1223_v36  ;;  %v6712_v36 = vld [vmem:[%s11011_s0 + $0x128] sm:$0xff]  ;;  %v6967_v6 = vld [vmem:[%s11011_s0 + $0x139] sm:$0xff] }
  0x84   :  { %950 = vrot.lane.b32.xlu1 %v779_v28, %s7488_s26  ;;  %v1897_v62 = vsel %vm1895_vm4, %v1832_v60, %v1221_v37  ;;  %v7935_v39 = vpack.c.bf16 %v6712_v36, %v6711_v35  ;;  %v6904_v60 = vld [vmem:[%s11011_s0 + $0x140] sm:$0xff] }
  0x85   :  { %948 = vrot.lane.b32.xlu0 %v490_v14, %s7488_s26  ;;  %v6963_v14 = vld [vmem:[%s11011_s0 + $0x109] sm:$0xff]  ;;  %v6780_v35 = vld [vmem:[%s11011_s0 + $0x159] sm:$0xff] }
  0x86   :  { %v1319_v43 = vpop.permute.xlu1 %1318  ;;  %v781_v24 = vpack.c.bf16 %v6964_v15, %v6963_v14 }
  0x87   :  { %v1317_v45 = vpop.permute.xlu0 %1316  ;;  %v1964_v13 = vsel %vm1960_vm5, %v1899_v9, %v1319_v43 }
  0x88   :  { %1046 = vrot.lane.b32.xlu1 %v7833_v33, %s7487_s25  ;;  %v1962_v0 = vsel %vm1960_vm5, %v1897_v62, %v1317_v45  ;;  %v494_v45 = vpack.c.bf16 %v6776_v42, %v6775_v40  ;;  %v6843_v42 = vld [vmem:[%s11011_s0 + $0x152] sm:$0xff] }
  0x89   :  { %1044 = vrot.lane.b32.xlu0 %v586_v19, %s7487_s25 }
  0x8a   :  { %v1415_v49 = vpop.permute.xlu1 %1414 }
  0x8b   :  { %v1413_v52 = vpop.permute.xlu0 %1412  ;;  %v2029_v18 = vsel %vm2025_vm6, %v1964_v13, %v1415_v49  ;;  %v6840_v49 = vld [vmem:[%s11011_s0 + $0x12a] sm:$0xff] }
  0x8c   :  { %1142 = vrot.lane.b32.xlu1 %v7855_v46, %s7489_s18  ;;  %v2027_v4 = vsel %vm2025_vm6, %v1962_v0, %v1413_v52 }
  0x8d   :  { %1140 = vrot.lane.b32.xlu0 %v7813_v22, %s7489_s18 }
  0x8e   :  { %v1511_v58 = vpop.permute.xlu1 %1510 }
  0x8f   :  { %v1509_v61 = vpop.permute.xlu0 %1508  ;;  %v2094_v20 = vsel %vm2090_vm7, %v2029_v18, %v1511_v58  ;;  %v7031_v18 = vld [vmem:[%s11011_s0 + $0x13a] sm:$0xff] }
  0x90   :  { %1238 = vrot.lane.b32.xlu1 %v492_v53, %s7490_s23  ;;  %v2092_v7 = vsel %vm2090_vm7, %v2027_v4, %v1509_v61  ;;  %v7977_v4 = vpack.c.bf16 %v6904_v60, %v6903_v59 }
  0x91   :  { %1236 = vrot.lane.b32.xlu0 %v779_v28, %s7490_s23 }
  0x92   :  { %v937_v5 = vpop.permute.xlu1 %936 }
  0x93   :  { %v1605_v8 = vpop.permute.xlu0 %1604  ;;  %v1677_v47 = vsel %vm1668_vm1, %v7594_v16, %v937_v5  ;;  %v590_v16 = vpack.c.bf16 %v6840_v49, %v6839_v48 }
  0x94   :  { %1334 = vrot.lane.b32.xlu1 %v588_v63, %s7491_s30  ;;  %v2157_v10 = vsel %vm2155_vm8, %v2092_v7, %v1605_v8  ;;  %v6968_v7 = vld [vmem:[%s11011_s0 + $0x141] sm:$0xff] }
  0x95   :  { %1332 = vrot.lane.b32.xlu0 %v7833_v33, %s7491_s30  ;;  %7285 = vmatprep.mubr.msk.bf16.mxu0 %vm2247_vm9, %v2157_v10  ;;  %v783_v15 = vpack.c.bf16 %v6968_v7, %v6967_v6 }
  0x96   :  { %v939_v19 = vpop.permute.xlu1 %938 }
  0x97   :  { %v1607_v21 = vpop.permute.xlu0 %1606  ;;  %v1680_v56 = vsel %vm1668_vm1, %v7624_v26, %v939_v19  ;;  %v7032_v19 = vld [vmem:[%s11011_s0 + $0x142] sm:$0xff] }
  0x98   :  { %v2159_v23 = vsel %vm2155_vm8, %v2094_v20, %v1607_v21  ;;  %1430 = vrot.lane.b32.xlu1 %v7896_v12, %s7492_s19 }
  0x99   :  { %1428 = vrot.lane.b32.xlu0 %v7855_v46, %s7492_s19  ;;  %7286 = vmatmul.mubr.msk.bf16.vlgmr.msra.gmra.mrb[0].mxu0 %vm2247_vm9, %v2159_v23  ;;  %v879_v23 = vpack.c.bf16 %v7032_v19, %v7031_v18 }
  0x9a   :  { %v1035_v28 = vpop.permute.xlu1 %1034 }
  0x9b   :  { %v1033_v29 = vpop.permute.xlu0 %1032  ;;  %v1773_v61 = vsel %vm1765_vm2, %v1680_v56, %v1035_v28 }
  0x9c   :  { %1526 = vrot.lane.b32.xlu1 %v781_v24, %s7493_s22  ;;  %v1771_v51 = vsel %vm1765_vm2, %v1677_v47, %v1033_v29  ;;  %v6715_v29 = vld [vmem:[%s11011_s0 + $0x150] sm:$0xff] }
  0x9d   :  { %1524 = vrot.lane.b32.xlu0 %v492_v53, %s7493_s22 }
  0x9e   :  { %v1131_v31 = vpop.permute.xlu1 %1130 }
  0x9f   :  { %v1129_v32 = vpop.permute.xlu0 %1128  ;;  %v1838_v0 = vsel %vm1830_vm3, %v1773_v61, %v1131_v31 }
  0xa0   :  { %1622 = vrot.lane.b32.xlu1 %v877_v30, %s7494_s1 }
  0xa1   :  { %1620 = vrot.lane.b32.xlu0 %v588_v63, %s7494_s1 }
  0xa2   :  { %v1227_v33 = vpop.permute.xlu1 %1226 }
  0xa3   :  { %v1225_v34 = vpop.permute.xlu0 %1224  ;;  %v1903_v17 = vsel %vm1895_vm4, %v1838_v0, %v1227_v33  ;;  %v6971_v0 = vld [vmem:[%s11011_s0 + $0x169] sm:$0xff] }
  0xa4   :  { %954 = vrot.lane.b32.xlu1 %v781_v24, %s7488_s26 }
  0xa5   :  { %952 = vrot.lane.b32.xlu0 %v492_v53, %s7488_s26  ;;  %v1836_v53 = vsel %vm1830_vm3, %v1771_v51, %v1129_v32 }
  0xa6   :  { %v1323_v37 = vpop.permute.xlu1 %1322  ;;  %v1901_v55 = vsel %vm1895_vm4, %v1836_v53, %v1225_v34  ;;  %v6779_v34 = vld [vmem:[%s11011_s0 + $0x151] sm:$0xff]  ;;  %v6907_v53 = vld [vmem:[%s11011_s0 + $0x168] sm:$0xff] }
  0xa7   :  { %v1321_v38 = vpop.permute.xlu0 %1320  ;;  %v1968_v5 = vsel %vm1960_vm5, %v1903_v17, %v1323_v37 }
  0xa8   :  { %1050 = vrot.lane.b32.xlu1 %v877_v30, %s7487_s25  ;;  %v1966_v58 = vsel %vm1960_vm5, %v1901_v55, %v1321_v38  ;;  %v496_v38 = vpack.c.bf16 %v6780_v35, %v6779_v34 }
  0xa9   :  { %1048 = vrot.lane.b32.xlu0 %v588_v63, %s7487_s25 }
  0xaa   :  { %v1419_v43 = vpop.permute.xlu1 %1418 }
  0xab   :  { %v1417_v44 = vpop.permute.xlu0 %1416  ;;  %v2033_v8 = vsel %vm2025_vm6, %v1968_v5, %v1419_v43  ;;  %v6844_v43 = vld [vmem:[%s11011_s0 + $0x15a] sm:$0xff] }
  0xac   :  { %1146 = vrot.lane.b32.xlu1 %v7935_v39, %s7489_s18  ;;  %v2031_v62 = vsel %vm2025_vm6, %v1966_v58, %v1417_v44 }
  0xad   :  { %1144 = vrot.lane.b32.xlu0 %v7896_v12, %s7489_s18 }
  0xae   :  { %v1515_v52 = vpop.permute.xlu1 %1514 }
  0xaf   :  { %v1513_v54 = vpop.permute.xlu0 %1512  ;;  %v2098_v10 = vsel %vm2090_vm7, %v2033_v8, %v1515_v52  ;;  %v7035_v8 = vld [vmem:[%s11011_s0 + $0x16a] sm:$0xff] }
  0xb0   :  { %1242 = vrot.lane.b32.xlu1 %v494_v45, %s7490_s23  ;;  %v2096_v26 = vsel %vm2090_vm7, %v2031_v62, %v1513_v54  ;;  %v6908_v54 = vld [vmem:[%s11011_s0 + $0x170] sm:$0xff] }
  0xb1   :  { %1240 = vrot.lane.b32.xlu0 %v781_v24, %s7490_s23  ;;  %v8057_v62 = vpack.c.bf16 %v6908_v54, %v6907_v53 }
  0xb2   :  { %v941_v63 = vpop.permute.xlu1 %940 }
  0xb3   :  { %v1609_v1 = vpop.permute.xlu0 %1608  ;;  %v1683_v40 = vsel %vm1668_vm1, %v7671_v41, %v941_v63  ;;  %v592_v41 = vpack.c.bf16 %v6844_v43, %v6843_v42 }
  0xb4   :  { %v2161_v3 = vsel %vm2155_vm8, %v2096_v26, %v1609_v1  ;;  %1338 = vrot.lane.b32.xlu1 %v590_v16, %s7491_s30  ;;  %v6972_v26 = vld [vmem:[%s11011_s0 + $0x171] sm:$0xff] }
  0xb5   :  { %1336 = vrot.lane.b32.xlu0 %v877_v30, %s7491_s30  ;;  %7289 = vmatprep.mubr.msk.bf16.mxu0 %vm2247_vm9, %v2161_v3  ;;  %v6716_v30 = vld [vmem:[%s11011_s0 + $0x158] sm:$0xff]  ;;  %v785_v7 = vpack.c.bf16 %v6972_v26, %v6971_v0 }
  0xb6   :  { %v943_v9 = vpop.permute.xlu1 %942  ;;  %v8015_v33 = vpack.c.bf16 %v6716_v30, %v6715_v29  ;;  %v6784_v29 = vld [vmem:[%s11011_s0 + $0x189] sm:$0xff] }
  0xb7   :  { %v1611_v13 = vpop.permute.xlu0 %1610  ;;  %v1686_v51 = vsel %vm1668_vm1, %v7699_v50, %v943_v9  ;;  %v7036_v9 = vld [vmem:[%s11011_s0 + $0x172] sm:$0xff] }
  0xb8   :  { %v2163_v14 = vsel %vm2155_vm8, %v2098_v10, %v1611_v13  ;;  %1434 = vrot.lane.b32.xlu1 %v7977_v4, %s7492_s19 }
  0xb9   :  { %1432 = vrot.lane.b32.xlu0 %v7935_v39, %s7492_s19  ;;  %7290 = vmatmul.mubr.msk.bf16.gmra.mrb[4].mxu0 %vm2247_vm9, %v2163_v14  ;;  %v881_v14 = vpack.c.bf16 %v7036_v9, %v7035_v8  ;;  %v165_v8 = vld [vmem:[%s11011_s0 + $0x1d1] sm:$0xff] }
  0xba   :  { %v1039_v20 = vpop.permute.xlu1 %1038 }
  0xbb   :  { %v1037_v21 = vpop.permute.xlu0 %1036  ;;  %v1777_v55 = vsel %vm1765_vm2, %v1686_v51, %v1039_v20  ;;  %v6911_v51 = vld [vmem:[%s11011_s0 + $0x198] sm:$0xff] }
  0xbc   :  { %1530 = vrot.lane.b32.xlu1 %v783_v15, %s7493_s22  ;;  %v1775_v44 = vsel %vm1765_vm2, %v1683_v40, %v1037_v21  ;;  %v6719_v21 = vld [vmem:[%s11011_s0 + $0x180] sm:$0xff] }
  0xbd   :  { %1528 = vrot.lane.b32.xlu0 %v494_v45, %s7493_s22 }
  0xbe   :  { %v1135_v24 = vpop.permute.xlu1 %1134 }
  0xbf   :  { %v1133_v25 = vpop.permute.xlu0 %1132  ;;  %v1842_v58 = vsel %vm1830_vm3, %v1777_v55, %v1135_v24 }
  0xc0   :  { %1626 = vrot.lane.b32.xlu1 %v879_v23, %s7494_s1  ;;  %v1840_v47 = vsel %vm1830_vm3, %v1775_v44, %v1133_v25 }
  0xc1   :  { %1624 = vrot.lane.b32.xlu0 %v590_v16, %s7494_s1 }
  0xc2   :  { %v1231_v27 = vpop.permute.xlu1 %1230 }
  0xc3   :  { %v1229_v28 = vpop.permute.xlu0 %1228  ;;  %v1907_v60 = vsel %vm1895_vm4, %v1842_v58, %v1231_v27 }
  0xc4   :  { %958 = vrot.lane.b32.xlu1 %v783_v15, %s7488_s26  ;;  %v1905_v49 = vsel %vm1895_vm4, %v1840_v47, %v1229_v28  ;;  %v6783_v28 = vld [vmem:[%s11011_s0 + $0x181] sm:$0xff] }
  0xc5   :  { %956 = vrot.lane.b32.xlu0 %v494_v45, %s7488_s26  ;;  %v498_v34 = vpack.c.bf16 %v6784_v29, %v6783_v28  ;;  %v6723_v29 = vld [vmem:[%s11011_s0 + $0x1e0] sm:$0xff] }
  0xc6   :  { %v1327_v31 = vpop.permute.xlu1 %1326 }
  0xc7   :  { %v1325_v32 = vpop.permute.xlu0 %1324  ;;  %v1972_v63 = vsel %vm1960_vm5, %v1907_v60, %v1327_v31  ;;  %v6975_v60 = vld [vmem:[%s11011_s0 + $0x199] sm:$0xff] }
  0xc8   :  { %1054 = vrot.lane.b32.xlu1 %v879_v23, %s7487_s25  ;;  %v1970_v52 = vsel %vm1960_vm5, %v1905_v49, %v1325_v32 }
  0xc9   :  { %1052 = vrot.lane.b32.xlu0 %v590_v16, %s7487_s25 }
  0xca   :  { %v1423_v36 = vpop.permute.xlu1 %1422 }
  0xcb   :  { %v1421_v37 = vpop.permute.xlu0 %1420  ;;  %v2037_v1 = vsel %vm2025_vm6, %v1972_v63, %v1423_v36 }
  0xcc   :  { %1150 = vrot.lane.b32.xlu1 %v8015_v33, %s7489_s18  ;;  %v2035_v16 = vsel %vm2025_vm6, %v1970_v52, %v1421_v37  ;;  %v6847_v37 = vld [vmem:[%s11011_s0 + $0x182] sm:$0xff] }
  0xcd   :  { %1148 = vrot.lane.b32.xlu0 %v7977_v4, %s7489_s18  ;;  %v6912_v52 = vld [vmem:[%s11011_s0 + $0x1a0] sm:$0xff] }
  0xce   :  { %v1519_v45 = vpop.permute.xlu1 %1518 }
  0xcf   :  { %v1517_v48 = vpop.permute.xlu0 %1516  ;;  %v2102_v3 = vsel %vm2090_vm7, %v2037_v1, %v1519_v45  ;;  %v7039_v1 = vld [vmem:[%s11011_s0 + $0x19a] sm:$0xff] }
  0xd0   :  { %1246 = vrot.lane.b32.xlu1 %v496_v38, %s7490_s23  ;;  %v2100_v50 = vsel %vm2090_vm7, %v2035_v16, %v1517_v48 }
  0xd1   :  { %1244 = vrot.lane.b32.xlu0 %v783_v15, %s7490_s23 }
  0xd2   :  { %v945_v56 = vpop.permute.xlu1 %944 }
  0xd3   :  { %v1613_v59 = vpop.permute.xlu0 %1612  ;;  %v1689_v35 = vsel %vm1668_vm1, %v7725_v57, %v945_v56 }
  0xd4   :  { %v2165_v61 = vsel %vm2155_vm8, %v2100_v50, %v1613_v59  ;;  %1342 = vrot.lane.b32.xlu1 %v592_v41, %s7491_s30  ;;  %v691_v59 = vpack.c.bf16 %v6912_v52, %v6911_v51 }
  0xd5   :  { %1340 = vrot.lane.b32.xlu0 %v879_v23, %s7491_s30  ;;  %7293 = vmatprep.mubr.msk.bf16.mxu0 %vm2247_vm9, %v2165_v61  ;;  %v6720_v23 = vld [vmem:[%s11011_s0 + $0x188] sm:$0xff] }
  0xd6   :  { %v947_v17 = vpop.permute.xlu1 %946  ;;  %v402_v27 = vpack.c.bf16 %v6720_v23, %v6719_v21  ;;  %v6976_v61 = vld [vmem:[%s11011_s0 + $0x1a1] sm:$0xff]  ;;  %v258_v23 = vld [vmem:[%s11011_s0 + $0x1b2] sm:$0xff] }
  0xd7   :  { %v1615_v5 = vpop.permute.xlu0 %1614  ;;  %v1692_v32 = vsel %vm1668_vm1, %v7753_v2, %v947_v17  ;;  %v787_v26 = vpack.c.bf16 %v6976_v61, %v6975_v60  ;;  %v7040_v17 = vld [vmem:[%s11011_s0 + $0x1a2] sm:$0xff] }
  0xd8   :  { %v2167_v6 = vsel %vm2155_vm8, %v2102_v3, %v1615_v5  ;;  %1438 = vrot.lane.b32.xlu1 %v8057_v62, %s7492_s19 }
  0xd9   :  { %1436 = vrot.lane.b32.xlu0 %v8015_v33, %s7492_s19  ;;  %7294 = vmatmul.mubr.msk.bf16.gmra.mrb[8].mxu0 %vm2247_vm9, %v2167_v6  ;;  %v883_v6 = vpack.c.bf16 %v7040_v17, %v7039_v1 }
  0xda   :  { %v1043_v10 = vpop.permute.xlu1 %1042 }
  0xdb   :  { %v1041_v13 = vpop.permute.xlu0 %1040  ;;  %v1781_v36 = vsel %vm1765_vm2, %v1692_v32, %v1043_v10  ;;  %v162_v10 = vld [vmem:[%s11011_s0 + $0x1b1] sm:$0xff]  ;;  %v6721_v32 = vld [vmem:[%s11011_s0 + $0x1c8] sm:$0xff] }
  0xdc   :  { %1534 = vrot.lane.b32.xlu1 %v785_v7, %s7493_s22  ;;  %v1779_v2 = vsel %vm1765_vm2, %v1689_v35, %v1041_v13  ;;  %v163_v13 = vld [vmem:[%s11011_s0 + $0x1b9] sm:$0xff] }
  0xdd   :  { %1532 = vrot.lane.b32.xlu0 %v496_v38, %s7493_s22 }
  0xde   :  { %v1139_v15 = vpop.permute.xlu1 %1138 }
  0xdf   :  { %v1137_v18 = vpop.permute.xlu0 %1136  ;;  %v1846_v40 = vsel %vm1830_vm3, %v1781_v36, %v1139_v15 }
  0xe0   :  { %1630 = vrot.lane.b32.xlu1 %v881_v14, %s7494_s1  ;;  %v1844_v57 = vsel %vm1830_vm3, %v1779_v2, %v1137_v18  ;;  %v210_v18 = vpack.c.bf16 %v163_v13, %v162_v10  ;;  %v6788_v2 = vld [vmem:[%s11011_s0 + $0x1e9] sm:$0xff] }
  0xe1   :  { %1628 = vrot.lane.b32.xlu0 %v592_v41, %s7494_s1  ;;  %v7044_v10 = vld [vmem:[%s11011_s0 + $0x202] sm:$0xff] }
  0xe2   :  { %v1235_v19 = vpop.permute.xlu1 %1234 }
  0xe3   :  { %v1233_v20 = vpop.permute.xlu0 %1232  ;;  %v1911_v43 = vsel %vm1895_vm4, %v1846_v40, %v1235_v19  ;;  %v260_v19 = vld [vmem:[%s11011_s0 + $0x1ca] sm:$0xff] }
  0xe4   :  { %962 = vrot.lane.b32.xlu1 %v785_v7, %s7488_s26  ;;  %v1909_v45 = vsel %vm1895_vm4, %v1844_v57, %v1233_v20  ;;  %v261_v20 = vld [vmem:[%s11011_s0 + $0x1d2] sm:$0xff] }
  0xe5   :  { %960 = vrot.lane.b32.xlu0 %v496_v38, %s7488_s26  ;;  %v6848_v38 = vld [vmem:[%s11011_s0 + $0x18a] sm:$0xff] }
  0xe6   :  { %v1331_v24 = vpop.permute.xlu1 %1330  ;;  %v594_v48 = vpack.c.bf16 %v6848_v38, %v6847_v37  ;;  %v6787_v38 = vld [vmem:[%s11011_s0 + $0x1e1] sm:$0xff] }
  0xe7   :  { %v1329_v25 = vpop.permute.xlu0 %1328  ;;  %v1976_v47 = vsel %vm1960_vm5, %v1911_v43, %v1331_v24  ;;  %v259_v24 = vld [vmem:[%s11011_s0 + $0x1ba] sm:$0xff]  ;;  %v500_v43 = vpack.c.bf16 %v6788_v2, %v6787_v38 }
  0xe8   :  { %1058 = vrot.lane.b32.xlu1 %v881_v14, %s7487_s25  ;;  %v1974_v49 = vsel %vm1960_vm5, %v1909_v45, %v1329_v25  ;;  %v306_v28 = vpack.c.bf16 %v259_v24, %v258_v23  ;;  %v6727_v23 = vld [vmem:[%s11011_s0 + $0x210] sm:$0xff]  ;;  %v6728_v24 = vld [vmem:[%s11011_s0 + $0x218] sm:$0xff] }
  0xe9   :  { %1056 = vrot.lane.b32.xlu0 %v592_v41, %s7487_s25 }
  0xea   :  { %v1427_v30 = vpop.permute.xlu1 %1426 }
  0xeb   :  { %v1425_v31 = vpop.permute.xlu0 %1424  ;;  %v2041_v41 = vsel %vm2025_vm6, %v1976_v47, %v1427_v30  ;;  %v6724_v30 = vld [vmem:[%s11011_s0 + $0x1e8] sm:$0xff] }
  0xec   :  { %1154 = vrot.lane.b32.xlu1 %v402_v27, %s7489_s18  ;;  %v2039_v53 = vsel %vm2025_vm6, %v1974_v49, %v1425_v31  ;;  %v8198_v36 = vpack.c.bf16 %v6724_v30, %v6723_v29  ;;  %v6851_v47 = vld [vmem:[%s11011_s0 + $0x1e2] sm:$0xff]  ;;  %v6791_v29 = vld [vmem:[%s11011_s0 + $0x211] sm:$0xff]  ;;  %v6792_v30 = vld [vmem:[%s11011_s0 + $0x219] sm:$0xff] }
  0xed   :  { %1152 = vrot.lane.b32.xlu0 %v8057_v62, %s7489_s18 }
  0xee   :  { %v1523_v42 = vpop.permute.xlu1 %1522 }
  0xef   :  { %v1521_v44 = vpop.permute.xlu0 %1520  ;;  %v2106_v54 = vsel %vm2090_vm7, %v2041_v41, %v1523_v42 }
  0xf0   :  { %1250 = vrot.lane.b32.xlu1 %v498_v34, %s7490_s23  ;;  %v2104_v16 = vsel %vm2090_vm7, %v2039_v53, %v1521_v44 }
  0xf1   :  { %1248 = vrot.lane.b32.xlu0 %v785_v7, %s7490_s23  ;;  %v164_v7 = vld [vmem:[%s11011_s0 + $0x1c9] sm:$0xff] }
  0xf2   :  { %v1619_v55 = vpop.permute.xlu1 %1618  ;;  %v211_v15 = vpack.c.bf16 %v165_v8, %v164_v7 }
  0xf3   :  { %v2171_v56 = vsel %vm2155_vm8, %v2106_v54, %v1619_v55  ;;  %v1617_v58 = vpop.permute.xlu0 %1616 }
  0xf4   :  { %v2169_v50 = vsel %vm2155_vm8, %v2104_v16, %v1617_v58  ;;  %1346 = vrot.lane.b32.xlu1 %v594_v48, %s7491_s30  ;;  %v6915_v58 = vld [vmem:[%s11011_s0 + $0x1f8] sm:$0xff] }
  0xf5   :  { %1344 = vrot.lane.b32.xlu0 %v881_v14, %s7491_s30  ;;  %7297 = vmatprep.mubr.msk.bf16.mxu0 %vm2247_vm9, %v2169_v50  ;;  %v6916_v50 = vld [vmem:[%s11011_s0 + $0x200] sm:$0xff] }
  0xf6   :  { %7298 = vmatmul.mubr.msk.bf16.gmra.mrb[12].mxu0 %vm2247_vm9, %v2171_v56  ;;  %v951_v63 = vpop.permute.xlu1 %950  ;;  %v8246_v17 = vpack.c.bf16 %v6916_v50, %v6915_v58 }
  0xf7   :  { %v949_v0 = vpop.permute.xlu0 %948  ;;  %v1698_v57 = vsel %vm1668_vm1, %v7813_v22, %v951_v63  ;;  %v6852_v22 = vld [vmem:[%s11011_s0 + $0x1ea] sm:$0xff] }
  0xf8   :  { %1442 = vrot.lane.b32.xlu1 %v691_v59, %s7492_s19  ;;  %v1695_v44 = vsel %vm1668_vm1, %v7785_v11, %v949_v0  ;;  %v596_v55 = vpack.c.bf16 %v6852_v22, %v6851_v47 }
  0xf9   :  { %1440 = vrot.lane.b32.xlu0 %v402_v27, %s7492_s19  ;;  %v307_v27 = vpack.c.bf16 %v261_v20, %v260_v19 }
  0xfa   :  { %v1047_v3 = vpop.permute.xlu1 %1046 }
  0xfb   :  { %v1045_v5 = vpop.permute.xlu0 %1044  ;;  %v1785_v45 = vsel %vm1765_vm2, %v1698_v57, %v1047_v3  ;;  %v6979_v3 = vld [vmem:[%s11011_s0 + $0x1f9] sm:$0xff] }
  0xfc   :  { %1538 = vrot.lane.b32.xlu1 %v787_v26, %s7493_s22 }
  0xfd   :  { %1536 = vrot.lane.b32.xlu0 %v498_v34, %s7493_s22  ;;  %v6722_v34 = vld [vmem:[%s11011_s0 + $0x1d0] sm:$0xff] }
  0xfe   :  { %v1143_v9 = vpop.permute.xlu1 %1142  ;;  %v8201_v37 = vpack.c.bf16 %v6722_v34, %v6721_v32 }
  0xff   :  { %v1141_v14 = vpop.permute.xlu0 %1140  ;;  %v1850_v49 = vsel %vm1830_vm3, %v1785_v45, %v1143_v9  ;;  %v7043_v9 = vld [vmem:[%s11011_s0 + $0x1fa] sm:$0xff] }
 0x100   :  { %1634 = vrot.lane.b32.xlu1 %v883_v6, %s7494_s1 }
 0x101   :  { %1632 = vrot.lane.b32.xlu0 %v594_v48, %s7494_s1  ;;  %v1783_v48 = vsel %vm1765_vm2, %v1695_v44, %v1045_v5  ;;  %v6980_v5 = vld [vmem:[%s11011_s0 + $0x201] sm:$0xff] }
 0x102   :  { %v1239_v21 = vpop.permute.xlu1 %1238  ;;  %v1848_v11 = vsel %vm1830_vm3, %v1783_v48, %v1141_v14  ;;  %v789_v8 = vpack.c.bf16 %v6980_v5, %v6979_v3 }
 0x103   :  { %v1237_v25 = vpop.permute.xlu0 %1236  ;;  %v1915_v51 = vsel %vm1895_vm4, %v1850_v49, %v1239_v21 }
 0x104   :  { %966 = vrot.lane.b32.xlu1 %v211_v15, %s7488_s26  ;;  %v1913_v53 = vsel %vm1895_vm4, %v1848_v11, %v1237_v25  ;;  %v6919_v11 = vld [vmem:[%s11011_s0 + $0x228] sm:$0xff] }
 0x105   :  { %964 = vrot.lane.b32.xlu0 %v210_v18, %s7488_s26 }
 0x106   :  { %v1335_v31 = vpop.permute.xlu1 %1334 }
 0x107   :  { %v1333_v35 = vpop.permute.xlu0 %1332  ;;  %v1980_v54 = vsel %vm1960_vm5, %v1915_v51, %v1335_v31  ;;  %v6920_v51 = vld [vmem:[%s11011_s0 + $0x230] sm:$0xff] }
 0x108   :  { %1062 = vrot.lane.b32.xlu1 %v307_v27, %s7487_s25  ;;  %v1978_v16 = vsel %vm1960_vm5, %v1913_v53, %v1333_v35  ;;  %v502_v35 = vpack.c.bf16 %v6792_v30, %v6791_v29  ;;  %v8326_v50 = vpack.c.bf16 %v6920_v51, %v6919_v11 }
 0x109   :  { %1060 = vrot.lane.b32.xlu0 %v306_v28, %s7487_s25  ;;  %v8280_v28 = vpack.c.bf16 %v6728_v24, %v6727_v23 }
 0x10a   :  { %v1431_v40 = vpop.permute.xlu1 %1430 }
 0x10b   :  { %v1429_v42 = vpop.permute.xlu0 %1428  ;;  %v2045_v56 = vsel %vm2025_vm6, %v1980_v54, %v1431_v40  ;;  %v6855_v40 = vld [vmem:[%s11011_s0 + $0x212] sm:$0xff] }
 0x10c   :  { %1158 = vrot.lane.b32.xlu1 %v8198_v36, %s7489_s18  ;;  %v2043_v59 = vsel %vm2025_vm6, %v1978_v16, %v1429_v42 }
 0x10d   :  { %1156 = vrot.lane.b32.xlu0 %v8201_v37, %s7489_s18 }
 0x10e   :  { %v1527_v41 = vpop.permute.xlu1 %1526 }
 0x10f   :  { %v1525_v52 = vpop.permute.xlu0 %1524  ;;  %v2110_v60 = vsel %vm2090_vm7, %v2045_v56, %v1527_v41 }
 0x110   :  { %1254 = vrot.lane.b32.xlu1 %v500_v43, %s7490_s23  ;;  %v2108_v63 = vsel %vm2090_vm7, %v2043_v59, %v1525_v52  ;;  %v6983_v59 = vld [vmem:[%s11011_s0 + $0x229] sm:$0xff] }
 0x111   :  { %1252 = vrot.lane.b32.xlu0 %v211_v15, %s7490_s23  ;;  %v885_v15 = vpack.c.bf16 %v7044_v10, %v7043_v9 }
 0x112   :  { %v1623_v61 = vpop.permute.xlu1 %1622 }
 0x113   :  { %v2175_v0 = vsel %vm2155_vm8, %v2110_v60, %v1623_v61  ;;  %v1621_v26 = vpop.permute.xlu0 %1620  ;;  %v6984_v60 = vld [vmem:[%s11011_s0 + $0x231] sm:$0xff] }
 0x114   :  { %v2173_v1 = vsel %vm2155_vm8, %v2108_v63, %v1621_v26  ;;  %1350 = vrot.lane.b32.xlu1 %v596_v55, %s7491_s30  ;;  %v7047_v26 = vld [vmem:[%s11011_s0 + $0x22a] sm:$0xff] }
 0x115   :  { %1348 = vrot.lane.b32.xlu0 %v307_v27, %s7491_s30  ;;  %7301 = vmatprep.mubr.msk.bf16.mxu0 %vm2247_vm9, %v2173_v1  ;;  %v7048_v1 = vld [vmem:[%s11011_s0 + $0x232] sm:$0xff] }
 0x116   :  { %7302 = vmatmul.mubr.msk.bf16.gmra.mrb[16].mxu0 %vm2247_vm9, %v2175_v0  ;;  %v955_v6 = vpop.permute.xlu1 %954  ;;  %v791_v0 = vpack.c.bf16 %v6984_v60, %v6983_v59 }
 0x117   :  { %v953_v7 = vpop.permute.xlu0 %952  ;;  %v1704_v34 = vsel %vm1668_vm1, %v7896_v12, %v955_v6  ;;  %v6856_v12 = vld [vmem:[%s11011_s0 + $0x21a] sm:$0xff]  ;;  %v887_v6 = vpack.c.bf16 %v7048_v1, %v7047_v26 }
 0x118   :  { %1446 = vrot.lane.b32.xlu1 %v8246_v17, %s7492_s19  ;;  %v1701_v38 = vsel %vm1668_vm1, %v7855_v46, %v953_v7  ;;  %v598_v48 = vpack.c.bf16 %v6856_v12, %v6855_v40 }
 0x119   :  { %1444 = vrot.lane.b32.xlu0 %v8198_v36, %s7492_s19 }
 0x11a   :  { %v1051_v13 = vpop.permute.xlu1 %1050 }
 0x11b   :  { %v1049_v14 = vpop.permute.xlu0 %1048  ;;  %v1789_v2 = vsel %vm1765_vm2, %v1704_v34, %v1051_v13  ;;  %v6731_v13 = vld [vmem:[%s11011_s0 + $0x240] sm:$0xff] }
 0x11c   :  { %1542 = vrot.lane.b32.xlu1 %v789_v8, %s7493_s22  ;;  %v1787_v42 = vsel %vm1765_vm2, %v1701_v38, %v1049_v14  ;;  %v6732_v14 = vld [vmem:[%s11011_s0 + $0x248] sm:$0xff] }
 0x11d   :  { %1540 = vrot.lane.b32.xlu0 %v500_v43, %s7493_s22 }
 0x11e   :  { %v1147_v18 = vpop.permute.xlu1 %1146 }
 0x11f   :  { %v1145_v19 = vpop.permute.xlu0 %1144  ;;  %v1854_v57 = vsel %vm1830_vm3, %v1789_v2, %v1147_v18 }
 0x120   :  { %1638 = vrot.lane.b32.xlu1 %v885_v15, %s7494_s1  ;;  %v1852_v46 = vsel %vm1830_vm3, %v1787_v42, %v1145_v19  ;;  %v408_v19 = vpack.c.bf16 %v6732_v14, %v6731_v13  ;;  %v8452_v14 = vld [vmem:[%s11013_s2] ss:$0 sm:$0xff] }
 0x121   :  { %1636 = vrot.lane.b32.xlu0 %v596_v55, %s7494_s1 }
 0x122   :  { %v1243_v20 = vpop.permute.xlu1 %1242 }
 0x123   :  { %v1241_v21 = vpop.permute.xlu0 %1240  ;;  %v1919_v44 = vsel %vm1895_vm4, %v1854_v57, %v1243_v20  ;;  %v6795_v20 = vld [vmem:[%s11011_s0 + $0x241] sm:$0xff] }
 0x124   :  { %970 = vrot.lane.b32.xlu1 %v789_v8, %s7488_s26  ;;  %v1917_v47 = vsel %vm1895_vm4, %v1852_v46, %v1241_v21  ;;  %v6796_v21 = vld [vmem:[%s11011_s0 + $0x249] sm:$0xff]  ;;  %v6923_v46 = vld [vmem:[%s11011_s0 + $0x258] sm:$0xff] }
 0x125   :  { %968 = vrot.lane.b32.xlu0 %v500_v43, %s7488_s26 }
 0x126   :  { %v1339_v25 = vpop.permute.xlu1 %1338 }
 0x127   :  { %v1337_v27 = vpop.permute.xlu0 %1336  ;;  %v1984_v22 = vsel %vm1960_vm5, %v1919_v44, %v1339_v25  ;;  %v6924_v44 = vld [vmem:[%s11011_s0 + $0x260] sm:$0xff] }
 0x128   :  { %1066 = vrot.lane.b32.xlu1 %v885_v15, %s7487_s25  ;;  %v1982_v49 = vsel %vm1960_vm5, %v1917_v47, %v1337_v27  ;;  %v504_v27 = vpack.c.bf16 %v6796_v21, %v6795_v20  ;;  %v8403_v51 = vpack.c.bf16 %v6924_v44, %v6923_v46 }
 0x129   :  { %1064 = vrot.lane.b32.xlu0 %v596_v55, %s7487_s25 }
 0x12a   :  { %v1435_v31 = vpop.permute.xlu1 %1434 }
 0x12b   :  { %v1433_v32 = vpop.permute.xlu0 %1432  ;;  %v2049_v41 = vsel %vm2025_vm6, %v1984_v22, %v1435_v31  ;;  %v6859_v31 = vld [vmem:[%s11011_s0 + $0x242] sm:$0xff] }
 0x12c   :  { %1162 = vrot.lane.b32.xlu1 %v8280_v28, %s7489_s18  ;;  %v2047_v52 = vsel %vm2025_vm6, %v1982_v49, %v1433_v32  ;;  %v6860_v32 = vld [vmem:[%s11011_s0 + $0x24a] sm:$0xff] }
 0x12d   :  { %1160 = vrot.lane.b32.xlu0 %v8246_v17, %s7489_s18  ;;  %v600_v42 = vpack.c.bf16 %v6860_v32, %v6859_v31 }
 0x12e   :  { %v1531_v43 = vpop.permute.xlu1 %1530 }
 0x12f   :  { %v1529_v45 = vpop.permute.xlu0 %1528  ;;  %v2114_v53 = vsel %vm2090_vm7, %v2049_v41, %v1531_v43 }
 0x130   :  { %1258 = vrot.lane.b32.xlu1 %v502_v35, %s7490_s23  ;;  %v2112_v55 = vsel %vm2090_vm7, %v2047_v52, %v1529_v45  ;;  %v6987_v52 = vld [vmem:[%s11011_s0 + $0x259] sm:$0xff] }
 0x131   :  { %1256 = vrot.lane.b32.xlu0 %v789_v8, %s7490_s23 }
 0x132   :  { %v1627_v54 = vpop.permute.xlu1 %1626 }
 0x133   :  { %v2179_v16 = vsel %vm2155_vm8, %v2114_v53, %v1627_v54  ;;  %v1625_v56 = vpop.permute.xlu0 %1624  ;;  %v6988_v53 = vld [vmem:[%s11011_s0 + $0x261] sm:$0xff] }
 0x134   :  { %v2177_v58 = vsel %vm2155_vm8, %v2112_v55, %v1625_v56  ;;  %1354 = vrot.lane.b32.xlu1 %v598_v48, %s7491_s30  ;;  %v7051_v56 = vld [vmem:[%s11011_s0 + $0x25a] sm:$0xff] }
 0x135   :  { %1352 = vrot.lane.b32.xlu0 %v885_v15, %s7491_s30  ;;  %7305 = vmatprep.mubr.msk.bf16.mxu0 %vm2247_vm9, %v2177_v58  ;;  %v7052_v58 = vld [vmem:[%s11011_s0 + $0x262] sm:$0xff] }
 0x136   :  { %7306 = vmatmul.mubr.msk.bf16.gmra.mrb[20].mxu0 %vm2247_vm9, %v2179_v16  ;;  %v959_v61 = vpop.permute.xlu1 %958  ;;  %v793_v16 = vpack.c.bf16 %v6988_v53, %v6987_v52 }
 0x137   :  { %v957_v63 = vpop.permute.xlu0 %956  ;;  %v1710_v25 = vsel %vm1668_vm1, %v7977_v4, %v959_v61  ;;  %v8424_v61 = vpack.c.bf16 %v7052_v58, %v7051_v56  ;;  %v6991_v56 = vld [vmem:[%s11011_s0 + $0x289] sm:$0xff]  ;;  %v6992_v58 = vld [vmem:[%s11011_s0 + $0x291] sm:$0xff] }
 0x138   :  { %1450 = vrot.lane.b32.xlu1 %v8326_v50, %s7492_s19  ;;  %v1707_v29 = vsel %vm1668_vm1, %v7935_v39, %v957_v63 }
 0x139   :  { %1448 = vrot.lane.b32.xlu0 %v8280_v28, %s7492_s19 }
 0x13a   :  { %v1055_v3 = vpop.permute.xlu1 %1054 }
 0x13b   :  { %v1053_v5 = vpop.permute.xlu0 %1052  ;;  %v1793_v30 = vsel %vm1765_vm2, %v1710_v25, %v1055_v3  ;;  %v6735_v3 = vld [vmem:[%s11011_s0 + $0x270] sm:$0xff] }
 0x13c   :  { %1546 = vrot.lane.b32.xlu1 %v791_v0, %s7493_s22  ;;  %v1791_v4 = vsel %vm1765_vm2, %v1707_v29, %v1053_v5  ;;  %v6736_v5 = vld [vmem:[%s11011_s0 + $0x278] sm:$0xff] }
 0x13d   :  { %1544 = vrot.lane.b32.xlu0 %v502_v35, %s7493_s22 }
 0x13e   :  { %v1151_v7 = vpop.permute.xlu1 %1150 }
 0x13f   :  { %v1149_v8 = vpop.permute.xlu0 %1148  ;;  %v1858_v34 = vsel %vm1830_vm3, %v1793_v30, %v1151_v7 }
 0x140   :  { %1642 = vrot.lane.b32.xlu1 %v887_v6, %s7494_s1  ;;  %v1856_v39 = vsel %vm1830_vm3, %v1791_v4, %v1149_v8  ;;  %v8440_v8 = vpack.c.bf16 %v6736_v5, %v6735_v3 }
 0x141   :  { %1640 = vrot.lane.b32.xlu0 %v598_v48, %s7494_s1 }
 0x142   :  { %v1247_v9 = vpop.permute.xlu1 %1246 }
 0x143   :  { %v1245_v10 = vpop.permute.xlu0 %1244  ;;  %v1923_v38 = vsel %vm1895_vm4, %v1858_v34, %v1247_v9  ;;  %v6799_v9 = vld [vmem:[%s11011_s0 + $0x271] sm:$0xff] }
 0x144   :  { %974 = vrot.lane.b32.xlu1 %v791_v0, %s7488_s26  ;;  %v1921_v40 = vsel %vm1895_vm4, %v1856_v39, %v1245_v10  ;;  %v6800_v10 = vld [vmem:[%s11011_s0 + $0x279] sm:$0xff] }
 0x145   :  { %972 = vrot.lane.b32.xlu0 %v502_v35, %s7488_s26 }
 0x146   :  { %v1343_v15 = vpop.permute.xlu1 %1342 }
 0x147   :  { %v1341_v18 = vpop.permute.xlu0 %1340  ;;  %v1988_v12 = vsel %vm1960_vm5, %v1923_v38, %v1343_v15 }
 0x148   :  { %1070 = vrot.lane.b32.xlu1 %v887_v6, %s7487_s25  ;;  %v1986_v57 = vsel %vm1960_vm5, %v1921_v40, %v1341_v18  ;;  %v6863_v18 = vld [vmem:[%s11011_s0 + $0x272] sm:$0xff] }
 0x149   :  { %1068 = vrot.lane.b32.xlu0 %v598_v48, %s7487_s25 }
 0x14a   :  { %v1439_v23 = vpop.permute.xlu1 %1438 }
 0x14b   :  { %v1437_v24 = vpop.permute.xlu0 %1436  ;;  %v2053_v43 = vsel %vm2025_vm6, %v1988_v12, %v1439_v23  ;;  %v8464_v23 = vpack.c.bf16 %v6800_v10, %v6799_v9  ;;  %v6739_v9 = vld [vmem:[%s11011_s0 + $0x2a0] sm:$0xff]  ;;  %v6740_v10 = vld [vmem:[%s11011_s0 + $0x2a8] sm:$0xff] }
 0x14c   :  { %1166 = vrot.lane.b32.xlu1 %v408_v19, %s7489_s18  ;;  %v2051_v45 = vsel %vm2025_vm6, %v1986_v57, %v1437_v24 }
 0x14d   :  { %1164 = vrot.lane.b32.xlu0 %v8326_v50, %s7489_s18 }
 0x14e   :  { %v1535_v35 = vpop.permute.xlu1 %1534 }
 0x14f   :  { %v1533_v2 = vpop.permute.xlu0 %1532  ;;  %v2118_v47 = vsel %vm2090_vm7, %v2053_v43, %v1535_v35 }
 0x150   :  { %1262 = vrot.lane.b32.xlu1 %v504_v27, %s7490_s23  ;;  %v2116_v48 = vsel %vm2090_vm7, %v2051_v45, %v1533_v2 }
 0x151   :  { %1260 = vrot.lane.b32.xlu0 %v791_v0, %s7490_s23 }
 0x152   :  { %v1631_v22 = vpop.permute.xlu1 %1630 }
 0x153   :  { %v2183_v49 = vsel %vm2155_vm8, %v2118_v47, %v1631_v22  ;;  %v1629_v41 = vpop.permute.xlu0 %1628  ;;  %v6927_v47 = vld [vmem:[%s11011_s0 + $0x288] sm:$0xff]  ;;  %v6928_v22 = vld [vmem:[%s11011_s0 + $0x290] sm:$0xff] }
 0x154   :  { %v2181_v11 = vsel %vm2155_vm8, %v2116_v48, %v1629_v41  ;;  %1358 = vrot.lane.b32.xlu1 %v600_v42, %s7491_s30 }
 0x155   :  { %1356 = vrot.lane.b32.xlu0 %v887_v6, %s7491_s30  ;;  %7309 = vmatprep.mubr.msk.bf16.mxu0 %vm2247_vm9, %v2181_v11 }
 0x156   :  { %7310 = vmatmul.mubr.msk.bf16.gmra.mrb[24].mxu0 %vm2247_vm9, %v2183_v49  ;;  %v963_v54 = vpop.permute.xlu1 %962 }
 0x157   :  { %v961_v55 = vpop.permute.xlu0 %960  ;;  %v1716_v20 = vsel %vm1668_vm1, %v8057_v62, %v963_v54 }
 0x158   :  { %1454 = vrot.lane.b32.xlu1 %v8403_v51, %s7492_s19  ;;  %v1713_v24 = vsel %vm1668_vm1, %v8015_v33, %v961_v55 }
 0x159   :  { %1452 = vrot.lane.b32.xlu0 %v408_v19, %s7492_s19  ;;  %v6864_v19 = vld [vmem:[%s11011_s0 + $0x27a] sm:$0xff] }
 0x15a   :  { %v1059_v59 = vpop.permute.xlu1 %1058  ;;  %v8475_v34 = vpack.c.bf16 %v6864_v19, %v6863_v18 }
 0x15b   :  { %v1057_v60 = vpop.permute.xlu0 %1056  ;;  %v1797_v25 = vsel %vm1765_vm2, %v1716_v20, %v1059_v59  ;;  %v8553_v20 = vpack.c.bf16 %v6740_v10, %v6739_v9  ;;  %v7060_v9 = vld [vmem:[%s11011_s0 + $0x2c2] sm:$0xff] }
 0x15c   :  { %1550 = vrot.lane.b32.xlu1 %v793_v16, %s7493_s22  ;;  %v1795_v30 = vsel %vm1765_vm2, %v1713_v24, %v1057_v60  ;;  %v6804_v24 = vld [vmem:[%s11011_s0 + $0x2a9] sm:$0xff] }
 0x15d   :  { %1548 = vrot.lane.b32.xlu0 %v504_v27, %s7493_s22 }
 0x15e   :  { %v1155_v63 = vpop.permute.xlu1 %1154 }
 0x15f   :  { %v1153_v0 = vpop.permute.xlu0 %1152  ;;  %v1862_v62 = vsel %vm1830_vm3, %v1797_v25, %v1155_v63  ;;  %v795_v63 = vpack.c.bf16 %v6992_v58, %v6991_v56 }
 0x160   :  { %1646 = vrot.lane.b32.xlu1 %v8424_v61, %s7494_s1  ;;  %v1860_v33 = vsel %vm1830_vm3, %v1795_v30, %v1153_v0  ;;  %v7056_v0 = vld [vmem:[%s11011_s0 + $0x292] sm:$0xff]  ;;  %v6868_v30 = vld [vmem:[%s11011_s0 + $0x2aa] sm:$0xff] }
 0x161   :  { %1644 = vrot.lane.b32.xlu0 %v600_v42, %s7494_s1 }
 0x162   :  { %v1251_v26 = vpop.permute.xlu1 %1250 }
 0x163   :  { %v1249_v1 = vpop.permute.xlu0 %1248  ;;  %v1927_v35 = vsel %vm1895_vm4, %v1862_v62, %v1251_v26 }
 0x164   :  { %978 = vrot.lane.b32.xlu1 %v793_v16, %s7488_s26  ;;  %v1925_v12 = vsel %vm1895_vm4, %v1860_v33, %v1249_v1 }
 0x165   :  { %976 = vrot.lane.b32.xlu0 %v504_v27, %s7488_s26 }
 0x166   :  { %v1347_v6 = vpop.permute.xlu1 %1346 }
 0x167   :  { %v1345_v7 = vpop.permute.xlu0 %1344 }
 0x168   :  { %1074 = vrot.lane.b32.xlu1 %v8424_v61, %s7487_s25  ;;  %v1990_v46 = vsel %vm1960_vm5, %v1925_v12, %v1345_v7 }
 0x169   :  { %1072 = vrot.lane.b32.xlu0 %v600_v42, %s7487_s25  ;;  %v1992_v42 = vsel %vm1960_vm5, %v1927_v35, %v1347_v6 }
 0x16a   :  { %v1443_v13 = vpop.permute.xlu1 %1442 }
 0x16b   :  { %v1441_v15 = vpop.permute.xlu0 %1440  ;;  %v2057_v44 = vsel %vm2025_vm6, %v1992_v42, %v1443_v13  ;;  %v66_v13 = vld [vmem:[%s11011_s0 + $0x1b0] sm:$0xff] }
 0x16c   :  { %v7287_v21 = vpop.f32.mrb[0].mxu0  ;;  %1170 = vrot.lane.b32.xlu1 %v8440_v8, %s7489_s18  ;;  %v2055_v48 = vsel %vm2025_vm6, %v1990_v46, %v1441_v15  ;;  %v67_v15 = vld [vmem:[%s11011_s0 + $0x1b8] sm:$0xff] }
 0x16d   :  { %v2359_v27 = vadd.f32 %v7287_v21, %v8452_v14  ;;  %1168 = vrot.lane.b32.xlu0 %v8403_v51, %s7489_s18  ;;  %v2350_v29 = vpop.f32.mrb[1].mxu0  ;;  %v114_v21 = vpack.c.bf16 %v67_v15, %v66_v13 }
 0x16e   :  { %v2351_v31 = vadd.f32 %v8452_v14, %v2350_v29  ;;  %v7288_v32 = vpop.f32.mrb[2].mxu0  ;;  %v1539_v4 = vpop.permute.xlu1 %1538  ;;  %v6867_v29 = vld [vmem:[%s11011_s0 + $0x2a2] sm:$0xff] }
 0x16f   :  { %v2607_v39 = vmax.f32 %v2359_v27, 0.0  ;;  %v2362_v38 = vadd.f32 %v7288_v32, %v8452_v14  ;;  %v1537_v2 = vpop.permute.xlu0 %1536  ;;  %v2353_v40 = vpop.f32.mrb[3].mxu0  ;;  %v2122_v49 = vsel %vm2090_vm7, %v2057_v44, %v1539_v4  ;;  %v8583_v12 = vpack.c.bf16 %v6868_v30, %v6867_v29  ;;  %v6807_v30 = vld [vmem:[%s11011_s0 + $0x2d1] sm:$0xff] }
 0x170   :  { %v2605_v57 = vmax.f32 %v2351_v31, 0.0  ;;  %v2354_v43 = vadd.f32 %v8452_v14, %v2353_v40  ;;  %1266 = vrot.lane.b32.xlu1 %v8464_v23, %s7490_s23  ;;  %v2120_v52 = vsel %vm2090_vm7, %v2055_v48, %v1537_v2 }
 0x171   :  { %2671 = vst.msk [vmem:[#allocation2 + $0x28] sm:$0xff] %vm1895_vm4, %v2607_v39  ;;  %v2608_v45 = vmax.f32 %v2362_v38, 0.0  ;;  %1264 = vrot.lane.b32.xlu0 %v793_v16, %s7490_s23  ;;  %v8505_v16 = vpack.c.bf16 %v6928_v22, %v6927_v47 }
 0x172   :  { %2669 = vst.msk [vmem:[#allocation2 + $0x18] sm:$0xff] %vm1895_vm4, %v2605_v57  ;;  %v2606_v41 = vmax.f32 %v2354_v43, 0.0  ;;  %v1635_v11 = vpop.permute.xlu1 %1634 }
 0x173   :  { %2672 = vst.msk [vmem:[#allocation2 + $0x30] sm:$0xff] %vm1895_vm4, %v2608_v45  ;;  %v2187_v53 = vsel %vm2155_vm8, %v2122_v49, %v1635_v11  ;;  %v1633_v54 = vpop.permute.xlu0 %1632 }
 0x174   :  { %2670 = vst.msk [vmem:[#allocation2 + $0x20] sm:$0xff] %vm1895_vm4, %v2606_v41  ;;  %v2185_v55 = vsel %vm2155_vm8, %v2120_v52, %v1633_v54  ;;  %1362 = vrot.lane.b32.xlu1 %v8475_v34, %s7491_s30  ;;  %v6932_v54 = vld [vmem:[%s11011_s0 + $0x2c0] sm:$0xff] }
 0x175   :  { %1360 = vrot.lane.b32.xlu0 %v8424_v61, %s7491_s30  ;;  %7313 = vmatprep.mubr.msk.bf16.mxu0 %vm2247_vm9, %v2185_v55  ;;  %v7055_v61 = vld [vmem:[%s11011_s0 + $0x28a] sm:$0xff] }
 0x176   :  { %7314 = vmatmul.mubr.msk.bf16.gmra.mrb[28].mxu0 %vm2247_vm9, %v2187_v53  ;;  %v967_v59 = vpop.permute.xlu1 %966  ;;  %v8528_v3 = vpack.c.bf16 %v7056_v0, %v7055_v61  ;;  %v6931_v53 = vld [vmem:[%s11011_s0 + $0x2b8] sm:$0xff] }
 0x177   :  { %v965_v60 = vpop.permute.xlu0 %964  ;;  %v1722_v62 = vsel %vm1668_vm1, %v8201_v37, %v967_v59 }
 0x178   :  { %1458 = vrot.lane.b32.xlu1 %v8505_v16, %s7492_s19  ;;  %v1719_v4 = vsel %vm1668_vm1, %v114_v21, %v965_v60 }
 0x179   :  { %1456 = vrot.lane.b32.xlu0 %v8440_v8, %s7492_s19 }
 0x17a   :  { %v1063_v26 = vpop.permute.xlu1 %1062 }
 0x17b   :  { %v1061_v1 = vpop.permute.xlu0 %1060 }
 0x17c   :  { %1554 = vrot.lane.b32.xlu1 %v795_v63, %s7493_s22  ;;  %v1799_v39 = vsel %vm1765_vm2, %v1719_v4, %v1061_v1  ;;  %v6995_v1 = vld [vmem:[%s11011_s0 + $0x2b9] sm:$0xff] }
 0x17d   :  { %1552 = vrot.lane.b32.xlu0 %v8464_v23, %s7493_s22  ;;  %v6871_v4 = vld [vmem:[%s11011_s0 + $0x2d2] sm:$0xff] }
 0x17e   :  { %v1159_v5 = vpop.permute.xlu1 %1158 }
 0x17f   :  { %v1157_v6 = vpop.permute.xlu0 %1156 }
 0x180   :  { %1650 = vrot.lane.b32.xlu1 %v8528_v3, %s7494_s1  ;;  %v1864_v42 = vsel %vm1830_vm3, %v1799_v39, %v1157_v6 }
 0x181   :  { %1648 = vrot.lane.b32.xlu0 %v8475_v34, %s7494_s1 }
 0x182   :  { %v1255_v7 = vpop.permute.xlu1 %1254 }
 0x183   :  { %v1253_v8 = vpop.permute.xlu0 %1252 }
 0x184   :  { %982 = vrot.lane.b32.xlu1 %v795_v63, %s7488_s26  ;;  %v1929_v47 = vsel %vm1895_vm4, %v1864_v42, %v1253_v8 }
 0x185   :  { %980 = vrot.lane.b32.xlu0 %v8464_v23, %s7488_s26  ;;  %v6803_v23 = vld [vmem:[%s11011_s0 + $0x2a1] sm:$0xff] }
 0x186   :  { %v1351_v18 = vpop.permute.xlu1 %1350  ;;  %v8573_v32 = vpack.c.bf16 %v6804_v24, %v6803_v23  ;;  %v6743_v23 = vld [vmem:[%s11011_s0 + $0x2d0] sm:$0xff]  ;;  %v6744_v24 = vld [vmem:[%s11011_s0 + $0x2d8] sm:$0xff] }
 0x187   :  { %v1349_v19 = vpop.permute.xlu0 %1348  ;;  %v8655_v29 = vpack.c.bf16 %v6744_v24, %v6743_v23 }
 0x188   :  { %1078 = vrot.lane.b32.xlu1 %v8528_v3, %s7487_s25  ;;  %v1994_v41 = vsel %vm1960_vm5, %v1929_v47, %v1349_v19 }
 0x189   :  { %1076 = vrot.lane.b32.xlu0 %v8475_v34, %s7487_s25  ;;  %v1801_v34 = vsel %vm1765_vm2, %v1722_v62, %v1063_v26  ;;  %v8613_v26 = vpack.c.bf16 %v6932_v54, %v6931_v53  ;;  %v6808_v62 = vld [vmem:[%s11011_s0 + $0x2d9] sm:$0xff] }
 0x18a   :  { %v1447_v25 = vpop.permute.xlu1 %1446  ;;  %v1866_v37 = vsel %vm1830_vm3, %v1801_v34, %v1159_v5  ;;  %v6996_v5 = vld [vmem:[%s11011_s0 + $0x2c1] sm:$0xff]  ;;  %v8675_v39 = vpack.c.bf16 %v6808_v62, %v6807_v30 }
 0x18b   :  { %v1445_v27 = vpop.permute.xlu0 %1444  ;;  %v1931_v57 = vsel %vm1895_vm4, %v1866_v37, %v1255_v7  ;;  %v797_v8 = vpack.c.bf16 %v6996_v5, %v6995_v1  ;;  %v6872_v34 = vld [vmem:[%s11011_s0 + $0x2da] sm:$0xff]  ;;  %v6748_v30 = vld [vmem:[%s11011_s0 + $0x308] sm:$0xff] }
 0x18c   :  { %v7291_v31 = vpop.f32.mrb[4].mxu0  ;;  %1174 = vrot.lane.b32.xlu1 %v8553_v20, %s7489_s18  ;;  %v1996_v22 = vsel %vm1960_vm5, %v1931_v57, %v1351_v18  ;;  %v2059_v55 = vsel %vm2025_vm6, %v1994_v41, %v1445_v27 }
 0x18d   :  { %v2375_v33 = vadd.f32 %v7291_v31, %v8452_v14  ;;  %1172 = vrot.lane.b32.xlu0 %v8505_v16, %s7489_s18  ;;  %v2366_v35 = vpop.f32.mrb[5].mxu0  ;;  %v2061_v11 = vsel %vm2025_vm6, %v1996_v22, %v1447_v25 }
 0x18e   :  { %v2367_v38 = vadd.f32 %v8452_v14, %v2366_v35  ;;  %v7292_v2 = vpop.f32.mrb[6].mxu0  ;;  %v1543_v40 = vpop.permute.xlu1 %1542 }
 0x18f   :  { %v2611_v43 = vmax.f32 %v2375_v33, 0.0  ;;  %v2378_v46 = vadd.f32 %v7292_v2, %v8452_v14  ;;  %v1541_v44 = vpop.permute.xlu0 %1540  ;;  %v2369_v45 = vpop.f32.mrb[7].mxu0  ;;  %v2126_v56 = vsel %vm2090_vm7, %v2061_v11, %v1543_v40 }
 0x190   :  { %v2609_v48 = vmax.f32 %v2367_v38, 0.0  ;;  %v2370_v49 = vadd.f32 %v8452_v14, %v2369_v45  ;;  %1270 = vrot.lane.b32.xlu1 %v8573_v32, %s7490_s23  ;;  %v2124_v60 = vsel %vm2090_vm7, %v2059_v55, %v1541_v44 }
 0x191   :  { %2675 = vst.msk [vmem:[#allocation2 + $0x48] sm:$0xff] %vm1895_vm4, %v2611_v43  ;;  %v2612_v52 = vmax.f32 %v2378_v46, 0.0  ;;  %1268 = vrot.lane.b32.xlu0 %v795_v63, %s7490_s23  ;;  %v8686_v46 = vpack.c.bf16 %v6872_v34, %v6871_v4  ;;  %v6811_v34 = vld [vmem:[%s11011_s0 + $0x301] sm:$0xff] }
 0x192   :  { %2673 = vst.msk [vmem:[#allocation2 + $0x38] sm:$0xff] %vm1895_vm4, %v2609_v48  ;;  %v2610_v58 = vmax.f32 %v2370_v49, 0.0  ;;  %v1639_v59 = vpop.permute.xlu1 %1638 }
 0x193   :  { %2676 = vst.msk [vmem:[#allocation2 + $0x50] sm:$0xff] %vm1895_vm4, %v2612_v52  ;;  %v2191_v63 = vsel %vm2155_vm8, %v2126_v56, %v1639_v59  ;;  %v1637_v61 = vpop.permute.xlu0 %1636  ;;  %v6935_v56 = vld [vmem:[%s11011_s0 + $0x2e8] sm:$0xff] }
 0x194   :  { %2674 = vst.msk [vmem:[#allocation2 + $0x40] sm:$0xff] %vm1895_vm4, %v2610_v58  ;;  %v2189_v0 = vsel %vm2155_vm8, %v2124_v60, %v1637_v61  ;;  %1366 = vrot.lane.b32.xlu1 %v8583_v12, %s7491_s30  ;;  %v6936_v58 = vld [vmem:[%s11011_s0 + $0x2f0] sm:$0xff] }
 0x195   :  { %1364 = vrot.lane.b32.xlu0 %v8528_v3, %s7491_s30  ;;  %7317 = vmatprep.mubr.msk.bf16.mxu0 %vm2247_vm9, %v2189_v0  ;;  %v7059_v3 = vld [vmem:[%s11011_s0 + $0x2ba] sm:$0xff] }
 0x196   :  { %7318 = vmatmul.mubr.msk.bf16.gmra.mrb[32].mxu0 %vm2247_vm9, %v2191_v63  ;;  %v971_v6 = vpop.permute.xlu1 %970  ;;  %v8636_v15 = vpack.c.bf16 %v7060_v9, %v7059_v3  ;;  %v7000_v3 = vld [vmem:[%s11011_s0 + $0x2f1] sm:$0xff] }
 0x197   :  { %v969_v7 = vpop.permute.xlu0 %968  ;;  %v1728_v33 = vsel %vm1668_vm1, %v8246_v17, %v971_v6 }
 0x198   :  { %1462 = vrot.lane.b32.xlu1 %v8613_v26, %s7492_s19  ;;  %v1725_v37 = vsel %vm1668_vm1, %v8198_v36, %v969_v7  ;;  %v8716_v7 = vpack.c.bf16 %v6936_v58, %v6935_v56 }
 0x199   :  { %1460 = vrot.lane.b32.xlu0 %v8553_v20, %s7492_s19 }
 0x19a   :  { %v1067_v10 = vpop.permute.xlu1 %1066 }
 0x19b   :  { %v1065_v13 = vpop.permute.xlu0 %1064  ;;  %v1805_v38 = vsel %vm1765_vm2, %v1728_v33, %v1067_v10  ;;  %v6812_v33 = vld [vmem:[%s11011_s0 + $0x309] sm:$0xff] }
 0x19c   :  { %1558 = vrot.lane.b32.xlu1 %v797_v8, %s7493_s22 }
 0x19d   :  { %1556 = vrot.lane.b32.xlu0 %v8573_v32, %s7493_s22 }
 0x19e   :  { %v1163_v18 = vpop.permute.xlu1 %1162 }
 0x19f   :  { %v1161_v19 = vpop.permute.xlu0 %1160  ;;  %v1870_v17 = vsel %vm1830_vm3, %v1805_v38, %v1163_v18  ;;  %v7064_v18 = vld [vmem:[%s11011_s0 + $0x2f2] sm:$0xff] }
 0x1a0   :  { %1654 = vrot.lane.b32.xlu1 %v8636_v15, %s7494_s1 }
 0x1a1   :  { %1652 = vrot.lane.b32.xlu0 %v8583_v12, %s7494_s1 }
 0x1a2   :  { %v1259_v20 = vpop.permute.xlu1 %1258 }
 0x1a3   :  { %v1257_v21 = vpop.permute.xlu0 %1256  ;;  %v1935_v44 = vsel %vm1895_vm4, %v1870_v17, %v1259_v20 }
 0x1a4   :  { %986 = vrot.lane.b32.xlu1 %v797_v8, %s7488_s26 }
 0x1a5   :  { %984 = vrot.lane.b32.xlu0 %v8573_v32, %s7488_s26 }
 0x1a6   :  { %v1355_v25 = vpop.permute.xlu1 %1354 }
 0x1a7   :  { %v1353_v27 = vpop.permute.xlu0 %1352  ;;  %v2000_v41 = vsel %vm1960_vm5, %v1935_v44, %v1355_v25 }
 0x1a8   :  { %1082 = vrot.lane.b32.xlu1 %v8636_v15, %s7487_s25 }
 0x1a9   :  { %1080 = vrot.lane.b32.xlu0 %v8583_v12, %s7487_s25  ;;  %v1803_v12 = vsel %vm1765_vm2, %v1725_v37, %v1065_v13 }
 0x1aa   :  { %v1451_v31 = vpop.permute.xlu1 %1450  ;;  %v1868_v36 = vsel %vm1830_vm3, %v1803_v12, %v1161_v19  ;;  %v2733_v12 = vlaneseq }
 0x1ab   :  { %v1449_v32 = vpop.permute.xlu0 %1448  ;;  %v1933_v49 = vsel %vm1895_vm4, %v1868_v36, %v1257_v21  ;;  %v2065_v54 = vsel %vm2025_vm6, %v2000_v41, %v1451_v31 }
 0x1ac   :  { %v7295_v35 = vpop.f32.mrb[8].mxu0  ;;  %1178 = vrot.lane.b32.xlu1 %v8655_v29, %s7489_s18  ;;  %v1998_v53 = vsel %vm1960_vm5, %v1933_v49, %v1353_v27 }
 0x1ad   :  { %v2391_v2 = vadd.f32 %v7295_v35, %v8452_v14  ;;  %1176 = vrot.lane.b32.xlu0 %v8613_v26, %s7489_s18  ;;  %v2382_v40 = vpop.f32.mrb[9].mxu0  ;;  %v2063_v59 = vsel %vm2025_vm6, %v1998_v53, %v1449_v32 }
 0x1ae   :  { %v2383_v42 = vadd.f32 %v8452_v14, %v2382_v40  ;;  %v7296_v57 = vpop.f32.mrb[10].mxu0  ;;  %v1547_v43 = vpop.permute.xlu1 %1546 }
 0x1af   :  { %v2615_v45 = vmax.f32 %v2391_v2, 0.0  ;;  %v2394_v47 = vadd.f32 %v7296_v57, %v8452_v14  ;;  %v1545_v22 = vpop.permute.xlu0 %1544  ;;  %v2385_v48 = vpop.f32.mrb[11].mxu0  ;;  %v2130_v60 = vsel %vm2090_vm7, %v2065_v54, %v1547_v43 }
 0x1b0   :  { %v2613_v11 = vmax.f32 %v2383_v42, 0.0  ;;  %v2386_v52 = vadd.f32 %v8452_v14, %v2385_v48  ;;  %1274 = vrot.lane.b32.xlu1 %v8675_v39, %s7490_s23  ;;  %v2128_v0 = vsel %vm2090_vm7, %v2063_v59, %v1545_v22  ;;  %v6876_v22 = vld [vmem:[%s11011_s0 + $0x30a] sm:$0xff]  ;;  %v8806_v59 = vshrl.u32 %v2733_v12, 7  ;;  %v6752_v12 = vld [vmem:[%s11011_s0 + $0x338] sm:$0xff] }
 0x1b1   :  { %2679 = vst.msk [vmem:[#allocation2 + $0x68] sm:$0xff] %vm1895_vm4, %v2615_v45  ;;  %v2616_v55 = vmax.f32 %v2394_v47, 0.0  ;;  %1272 = vrot.lane.b32.xlu0 %v797_v8, %s7490_s23  ;;  %v6999_v8 = vld [vmem:[%s11011_s0 + $0x2e9] sm:$0xff] }
 0x1b2   :  { %2677 = vst.msk [vmem:[#allocation2 + $0x58] sm:$0xff] %vm1895_vm4, %v2613_v11  ;;  %v2614_v63 = vmax.f32 %v2386_v52, 0.0  ;;  %v1643_v61 = vpop.permute.xlu1 %1642  ;;  %v8730_v13 = vpack.c.bf16 %v7000_v3, %v6999_v8  ;;  %vm2736_vm11 = vcmp.ge.s32.totalorder %v8806_v59, 1 }
 0x1b3   :  { %2680 = vst.msk [vmem:[#allocation2 + $0x70] sm:$0xff] %vm1895_vm4, %v2616_v55  ;;  %v2195_v1 = vsel %vm2155_vm8, %v2130_v60, %v1643_v61  ;;  %v1641_v5 = vpop.permute.xlu0 %1640  ;;  %v6939_v61 = vld [vmem:[%s11011_s0 + $0x318] sm:$0xff] }
 0x1b4   :  { %2678 = vst.msk [vmem:[#allocation2 + $0x60] sm:$0xff] %vm1895_vm4, %v2614_v63  ;;  %v2193_v6 = vsel %vm2155_vm8, %v2128_v0, %v1641_v5  ;;  %1370 = vrot.lane.b32.xlu1 %v8686_v46, %s7491_s30  ;;  %v6940_v0 = vld [vmem:[%s11011_s0 + $0x320] sm:$0xff] }
 0x1b5   :  { %1368 = vrot.lane.b32.xlu0 %v8636_v15, %s7491_s30  ;;  %7321 = vmatprep.mubr.msk.bf16.mxu0 %vm2247_vm9, %v2193_v6  ;;  %v7063_v15 = vld [vmem:[%s11011_s0 + $0x2ea] sm:$0xff] }
 0x1b6   :  { %7322 = vmatmul.mubr.msk.bf16.gmra.mrb[36].mxu0 %vm2247_vm9, %v2195_v1  ;;  %v975_v9 = vpop.permute.xlu1 %974  ;;  %v8742_v21 = vpack.c.bf16 %v7064_v18, %v7063_v15  ;;  %v8829_v15 = vadd.s32 8, %v8806_v59  ;;  %v7003_v18 = vld [vmem:[%s11011_s0 + $0x319] sm:$0xff] }
 0x1b7   :  { %v973_v10 = vpop.permute.xlu0 %972  ;;  %v1734_v17 = vsel %vm1668_vm1, %v8326_v50, %v975_v9  ;;  %v6875_v50 = vld [vmem:[%s11011_s0 + $0x302] sm:$0xff] }
 0x1b8   :  { %1466 = vrot.lane.b32.xlu1 %v8716_v7, %s7492_s19  ;;  %v1731_v36 = vsel %vm1668_vm1, %v8280_v28, %v973_v10  ;;  %v8804_v58 = vpack.c.bf16 %v6876_v22, %v6875_v50  ;;  %vm2739_vm10 = vcmp.lt.s32.totalorder %v8829_v15, 15  ;;  %v6816_v50 = vld [vmem:[%s11011_s0 + $0x339] sm:$0xff]  ;;  %v7411_v22 = vld [vmem:[%s11014_s3 + $0x10] sm:$0xff]  }
 0x1b9   :  { %1464 = vrot.lane.b32.xlu0 %v8655_v29, %s7492_s19  ;;  %v6747_v29 = vld [vmem:[%s11011_s0 + $0x300] sm:$0xff] }
 0x1ba   :  { %v1071_v19 = vpop.permute.xlu1 %1070  ;;  %v8762_v32 = vpack.c.bf16 %v6748_v30, %v6747_v29  ;;  %v7067_v29 = vld [vmem:[%s11011_s0 + $0x31a] sm:$0xff]  ;;  %v7068_v30 = vld [vmem:[%s11011_s0 + $0x322] sm:$0xff] }
 0x1bb   :  { %v1069_v20 = vpop.permute.xlu0 %1068  ;;  %v1809_v44 = vsel %vm1765_vm2, %v1734_v17, %v1071_v19  ;;  %v7004_v19 = vld [vmem:[%s11011_s0 + $0x321] sm:$0xff] }
 0x1bc   :  { %1562 = vrot.lane.b32.xlu1 %v8730_v13, %s7493_s22  ;;  %v1807_v48 = vsel %vm1765_vm2, %v1731_v36, %v1069_v20  ;;  %v7410_v17 = vld [vmem:[%s11014_s3 + $0x8] sm:$0xff]  }
 0x1bd   :  { %1560 = vrot.lane.b32.xlu0 %v8675_v39, %s7493_s22 }
 0x1be   :  { %v1167_v23 = vpop.permute.xlu1 %1166 }
 0x1bf   :  { %v1165_v24 = vpop.permute.xlu0 %1164  ;;  %v1874_v28 = vsel %vm1830_vm3, %v1809_v44, %v1167_v23 }
 0x1c0   :  { %1658 = vrot.lane.b32.xlu1 %v8742_v21, %s7494_s1  ;;  %v1872_v11 = vsel %vm1830_vm3, %v1807_v48, %v1165_v24 }
 0x1c1   :  { %1656 = vrot.lane.b32.xlu0 %v8686_v46, %s7494_s1 }
 0x1c2   :  { %v1263_v25 = vpop.permute.xlu1 %1262 }
 0x1c3   :  { %v1261_v27 = vpop.permute.xlu0 %1260  ;;  %v1939_v52 = vsel %vm1895_vm4, %v1874_v28, %v1263_v25  ;;  %v8846_v25 = vpack.c.bf16 %v7004_v19, %v7003_v18 }
 0x1c4   :  { %990 = vrot.lane.b32.xlu1 %v8730_v13, %s7488_s26  ;;  %v1937_v55 = vsel %vm1895_vm4, %v1872_v11, %v1261_v27 }
 0x1c5   :  { %988 = vrot.lane.b32.xlu0 %v8675_v39, %s7488_s26 }
 0x1c6   :  { %v1359_v62 = vpop.permute.xlu1 %1358 }
 0x1c7   :  { %v1357_v31 = vpop.permute.xlu0 %1356  ;;  %v2004_v56 = vsel %vm1960_vm5, %v1939_v52, %v1359_v62 }
 0x1c8   :  { %1086 = vrot.lane.b32.xlu1 %v8742_v21, %s7487_s25  ;;  %v2002_v60 = vsel %vm1960_vm5, %v1937_v55, %v1357_v31 }
 0x1c9   :  { %1084 = vrot.lane.b32.xlu0 %v8686_v46, %s7487_s25  ;;  %v7299_v4 = vpop.f32.mrb[12].mxu0  ;;  %v8779_v46 = vpack.c.bf16 %v6812_v33, %v6811_v34  ;;  %v8866_v34 = vpack.c.bf16 %v7068_v30, %v7067_v29  ;;  %v6943_v30 = vld [vmem:[%s11011_s0 + $0x348] sm:$0xff] }
 0x1ca   :  { %v2407_v35 = vadd.f32 %v7299_v4, %v8452_v14  ;;  %v2398_v39 = vpop.f32.mrb[13].mxu0  ;;  %v1455_v37 = vpop.permute.xlu1 %1454 }
 0x1cb   :  { %v2399_v38 = vadd.f32 %v8452_v14, %v2398_v39  ;;  %v1453_v2 = vpop.permute.xlu0 %1452  ;;  %v7300_v40 = vpop.f32.mrb[14].mxu0  ;;  %v2069_v63 = vsel %vm2025_vm6, %v2004_v56, %v1455_v37  ;;  %v7495_v39 = vmov 0   ;;  %v7409_v37 = vld [vmem:[%s11014_s3] sm:$0xff]  }
 0x1cc   :  { %v2619_v42 = vmax.f32 %v2407_v35, 0.0  ;;  %v2410_v57 = vadd.f32 %v7300_v40, %v8452_v14  ;;  %v2401_v43 = vpop.f32.mrb[15].mxu0  ;;  %1182 = vrot.lane.b32.xlu1 %v8762_v32, %s7489_s18  ;;  %v2067_v1 = vsel %vm2025_vm6, %v2002_v60, %v1453_v2  ;;  %7369 = vmatprep.subr.bf16.mxu1 %v7495_v39  ;;  %v6751_v40 = vld [vmem:[%s11011_s0 + $0x330] sm:$0xff] }
 0x1cd   :  { %v2617_v45 = vmax.f32 %v2399_v38, 0.0  ;;  %v2402_v47 = vadd.f32 %v8452_v14, %v2401_v43  ;;  %1180 = vrot.lane.b32.xlu0 %v8716_v7, %s7489_s18  ;;  %4383 = vmatprep.subr.bf16.mxu0 %v7495_v39  ;;  %v8906_v36 = vpack.c.bf16 %v6752_v12, %v6751_v40 }
 0x1ce   :  { %2683 = vst.msk [vmem:[#allocation2 + $0x88] sm:$0xff] %vm1895_vm4, %v2619_v42  ;;  %v2620_v49 = vmax.f32 %v2410_v57, 0.0  ;;  %v1551_v41 = vpop.permute.xlu1 %1550  ;;  %7378 = vmatpush1.bf16.msra.mxu1 %v7409_v37  ;;  %4384 = vmatpush1.bf16.msra.mxu0 %v7409_v37  ;;  %v78_v42 = vld [vmem:[%s11011_s0 + $0x240] sm:$0xff]  ;;  %v79_v57 = vld [vmem:[%s11011_s0 + $0x248] sm:$0xff] }
 0x1cf   :  { %2681 = vst.msk [vmem:[#allocation2 + $0x78] sm:$0xff] %vm1895_vm4, %v2617_v45  ;;  %v2618_v53 = vmax.f32 %v2402_v47, 0.0  ;;  %v1549_v54 = vpop.permute.xlu0 %1548  ;;  %v2134_v5 = vsel %vm2090_vm7, %v2069_v63, %v1551_v41  ;;  %7370 = vmatprep.subr.bf16.mxu1 %v7495_v39  ;;  %4385 = vmatprep.subr.bf16.mxu0 %v7495_v39  ;;  %v120_v44 = vpack.c.bf16 %v79_v57, %v78_v42  ;;  %v6815_v47 = vld [vmem:[%s11011_s0 + $0x331] sm:$0xff]  ;;  %v7414_v57 = vld [vmem:[%s11014_s3 + $0x28] sm:$0xff]  }
 0x1d0   :  { %2684 = vst.msk [vmem:[#allocation2 + $0x90] sm:$0xff] %vm1895_vm4, %v2620_v49  ;;  %1278 = vrot.lane.b32.xlu1 %v8779_v46, %s7490_s23  ;;  %v2132_v8 = vsel %vm2090_vm7, %v2067_v1, %v1549_v54  ;;  %v6880_v1 = vld [vmem:[%s11011_s0 + $0x33a] sm:$0xff]  ;;  %v7008_v42 = vld [vmem:[%s11011_s0 + $0x351] sm:$0xff] }
 0x1d1   :  { %2682 = vst.msk [vmem:[#allocation2 + $0x80] sm:$0xff] %vm1895_vm4, %v2618_v53  ;;  %1276 = vrot.lane.b32.xlu0 %v8730_v13, %s7490_s23  ;;  %v8826_v13 = vpack.c.bf16 %v6940_v0, %v6939_v61 }
 0x1d2   :  { %v1647_v6 = vpop.permute.xlu1 %1646  ;;  %7379 = vmatpush1.bf16.msra.mxu1 %v7410_v17  ;;  %4386 = vmatpush1.bf16.msra.mxu0 %v7410_v17  ;;  %v7007_v17 = vld [vmem:[%s11011_s0 + $0x349] sm:$0xff] }
 0x1d3   :  { %v2199_v3 = vsel %vm2155_vm8, %v2134_v5, %v1647_v6  ;;  %v1645_v9 = vpop.permute.xlu0 %1644  ;;  %7371 = vmatprep.subr.bf16.mxu1 %v7495_v39  ;;  %4387 = vmatprep.subr.bf16.mxu0 %v7495_v39  ;;  %v7412_v5 = vld [vmem:[%s11014_s3 + $0x18] sm:$0xff]  }
 0x1d4   :  { %v2197_v10 = vsel %vm2155_vm8, %v2132_v8, %v1645_v9  ;;  %1374 = vrot.lane.b32.xlu1 %v8804_v58, %s7491_s30 }
 0x1d5   :  { %1372 = vrot.lane.b32.xlu0 %v8742_v21, %s7491_s30  ;;  %7325 = vmatprep.mubr.msk.bf16.mxu0 %vm2247_vm9, %v2197_v10 }
 0x1d6   :  { %7326 = vmatmul.mubr.msk.bf16.gmra.mrb[40].mxu0 %vm2247_vm9, %v2199_v3  ;;  %v979_v20 = vpop.permute.xlu1 %978  ;;  %7380 = vmatpush1.bf16.msra.mxu1 %v7411_v22 }
 0x1d7   :  { %v8841_v23 = vpop.permute.xlu0 %976  ;;  %4388 = vmatpush1.bf16.msra.mxu0 %v7411_v22  ;;  %v1740_v53 = vsel %vm1668_vm1, %v8403_v51, %v979_v20  ;;  %7372 = vmatprep.subr.bf16.mxu1 %v7495_v39  ;;  %v6879_v51 = vld [vmem:[%s11011_s0 + $0x332] sm:$0xff] }
 0x1d8   :  { %1470 = vrot.lane.b32.xlu1 %v8826_v13, %s7492_s19  ;;  %v2997_v21 = vld [vmem:[#allocation2 + $0x79] sm:$0xff]  ;;  %v2998_v24 = vld [vmem:[#allocation2 + $0x81] sm:$0xff]  ;;  %v1737_v60 = vsel %vm1668_vm1, %v120_v44, %v8841_v23  ;;  %4389 = vmatprep.subr.bf16.mxu0 %v7495_v39  ;;  %v7071_v44 = vld [vmem:[%s11011_s0 + $0x34a] sm:$0xff] }
 0x1d9   :  { %1468 = vrot.lane.b32.xlu0 %v8762_v32, %s7492_s19  ;;  %v3062_v27 = vsel %vm2739_vm10, %v2998_v24, 0.0  ;;  %v610_v24 = vpack.c.bf16 %v6880_v1, %v6879_v51  ;;  %v2905_v1 = vld [vmem:[#allocation2 + $0x68] sm:$0xff] }
 0x1da   :  { %v1075_v62 = vpop.permute.xlu1 %1074  ;;  %v8858_v31 = vpack.c.bf16 %v3062_v27, %v2997_v21  ;;  %7381 = vmatpush1.bf16.msra.mxu1 %v7412_v5 }
 0x1db   :  { %v8860_v4 = vpop.permute.xlu0 %1072  ;;  %v1813_v63 = vsel %vm1765_vm2, %v1740_v53, %v1075_v62  ;;  %4390 = vmatpush1.bf16.msra.mxu0 %v7412_v5  ;;  %7373 = vmatprep.subr.bf16.mxu1 %v7495_v39  ;;  %v6944_v62 = vld [vmem:[%s11011_s0 + $0x350] sm:$0xff]  ;;  %v2904_v53 = vld [vmem:[#allocation2 + $0x60] sm:$0xff] }
 0x1dc   :  { %7124 = vmatprep.mubr.msk.bf16.mxu1 %vm1895_vm4, %v8858_v31  ;;  %1566 = vrot.lane.b32.xlu1 %v8846_v25, %s7493_s22  ;;  %v1811_v6 = vsel %vm1765_vm2, %v1737_v60, %v8860_v4  ;;  %v7413_v4 = vld [vmem:[%s11014_s3 + $0x20] sm:$0xff]   ;;  %v707_v12 = vpack.c.bf16 %v6944_v62, %v6943_v30  ;;  %v2903_v60 = vld [vmem:[#allocation2 + $0x58] sm:$0xff] }
 0x1dd   :  { %1564 = vrot.lane.b32.xlu0 %v8779_v46, %s7493_s22  ;;  %4391 = vmatprep.subr.bf16.mxu0 %v7495_v39  ;;  %v2996_v5 = vld [vmem:[#allocation2 + $0x71] sm:$0xff] }
 0x1de   :  { %v1171_v33 = vpop.permute.xlu1 %1170  ;;  %7382 = vmatpush1.bf16.msra.mxu1 %v7413_v4 }
 0x1df   :  { %v8870_v35 = vpop.permute.xlu0 %1168  ;;  %v1878_v8 = vsel %vm1830_vm3, %v1813_v63, %v1171_v33  ;;  %4392 = vmatpush1.bf16.msra.mxu0 %v7413_v4  ;;  %7374 = vmatprep.subr.bf16.mxu1 %v7495_v39 }
 0x1e0   :  { %1662 = vrot.lane.b32.xlu1 %v8866_v34, %s7494_s1  ;;  %v1876_v10 = vsel %vm1830_vm3, %v1811_v6, %v8870_v35  ;;  %4393 = vmatprep.subr.bf16.mxu0 %v7495_v39  ;;  %v82_v6 = vld [vmem:[%s11011_s0 + $0x270] sm:$0xff] }
 0x1e1   :  { %1660 = vrot.lane.b32.xlu0 %v8804_v58, %s7494_s1 }
 0x1e2   :  { %v1267_v38 = vpop.permute.xlu1 %1266  ;;  %7383 = vmatpush1.bf16.msra.mxu1 %v7414_v57 }
 0x1e3   :  { %v8881_v2 = vpop.permute.xlu0 %1264  ;;  %v1943_v18 = vsel %vm1895_vm4, %v1878_v8, %v1267_v38  ;;  %4394 = vmatpush1.bf16.msra.mxu0 %v7414_v57  ;;  %7375 = vmatprep.subr.bf16.mxu1 %v7495_v39  ;;  %v83_v8 = vld [vmem:[%s11011_s0 + $0x278] sm:$0xff] }
 0x1e4   :  { %994 = vrot.lane.b32.xlu1 %v8846_v25, %s7488_s26  ;;  %v1941_v23 = vsel %vm1895_vm4, %v1876_v10, %v8881_v2  ;;  %4395 = vmatprep.subr.bf16.mxu0 %v7495_v39  ;;  %v2751_v10 = vld [vmem:[#allocation2 + $0x6f] sm:$0xff] }
 0x1e5   :  { %992 = vrot.lane.b32.xlu0 %v8779_v46, %s7488_s26 }
 0x1e6   :  { %v1363_v43 = vpop.permute.xlu1 %1362 }
 0x1e7   :  { %v1361_v46 = vpop.permute.xlu0 %1360  ;;  %v2008_v21 = vsel %vm1960_vm5, %v1943_v18, %v1363_v43 }
 0x1e8   :  { %1090 = vrot.lane.b32.xlu1 %v8866_v34, %s7487_s25  ;;  %v2006_v27 = vsel %vm1960_vm5, %v1941_v23, %v1361_v46  ;;  %v803_v46 = vpack.c.bf16 %v7008_v42, %v7007_v17 }
 0x1e9   :  { %1088 = vrot.lane.b32.xlu0 %v8804_v58, %s7487_s25  ;;  %v7303_v45 = vpop.f32.mrb[16].mxu0  ;;  %v8928_v58 = vpack.c.bf16 %v6816_v50, %v6815_v47  ;;  %v7415_v47 = vld [vmem:[%s11014_s3 + $0x30] sm:$0xff]   ;;  %s7500_s25 = smov 112  }
 0x1ea   :  { %v2423_v48 = vadd.f32 %v7303_v45, %v8452_v14  ;;  %v2414_v28 = vpop.f32.mrb[17].mxu0  ;;  %v1459_v49 = vpop.permute.xlu1 %1458  ;;  %v7072_v45 = vld [vmem:[%s11011_s0 + $0x352] sm:$0xff]  ;;  %7384 = vmatpush1.bf16.msra.mxu1 %v7415_v47  ;;  %4396 = vmatpush1.bf16.msra.mxu0 %v7415_v47 }
 0x1eb   :  { %v2415_v41 = vadd.f32 %v8452_v14, %v2414_v28  ;;  %v1457_v11 = vpop.permute.xlu0 %1456  ;;  %v7304_v52 = vpop.f32.mrb[18].mxu0  ;;  %v2073_v29 = vsel %vm2025_vm6, %v2008_v21, %v1459_v49  ;;  %7376 = vmatprep.subr.bf16.mxu1 %v7495_v39  ;;  %v7416_v28 = vld [vmem:[%s11014_s3 + $0x38] sm:$0xff]   ;;  %4397 = vmatprep.subr.bf16.mxu0 %v7495_v39  ;;  %v3060_v21 = vsel %vm2739_vm10, %v2996_v5, 0.0 }
 0x1ec   :  { %v2623_v54 = vmax.f32 %v2423_v48, 0.0  ;;  %v2426_v55 = vadd.f32 %v7304_v52, %v8452_v14  ;;  %v2417_v56 = vpop.f32.mrb[19].mxu0  ;;  %1186 = vrot.lane.b32.xlu1 %v8906_v36, %s7489_s18  ;;  %v2071_v33 = vsel %vm2025_vm6, %v2006_v27, %v1457_v11  ;;  %v2994_v48 = vld [vmem:[#allocation2 + $0x61] sm:$0xff]  ;;  %v2993_v11 = vld [vmem:[#allocation2 + $0x59] sm:$0xff] }
 0x1ed   :  { %v2621_v61 = vmax.f32 %v2415_v41, 0.0  ;;  %v2418_v0 = vadd.f32 %v8452_v14, %v2417_v56  ;;  %1184 = vrot.lane.b32.xlu0 %v8826_v13, %s7489_s18  ;;  %v3058_v52 = vsel %vm2739_vm10, %v2994_v48, 0.0 }
 0x1ee   :  { %2687 = vst.msk [vmem:[#allocation2 + $0xa8] sm:$0xff] %vm1895_vm4, %v2623_v54  ;;  %v2624_v3 = vmax.f32 %v2426_v55, 0.0  ;;  %v1555_v9 = vpop.permute.xlu1 %1554  ;;  %7385 = vmatpush1.bf16.msra.mxu1 %v7416_v28  ;;  %4398 = vmatpush1.bf16.msra.mxu0 %v7416_v28  ;;  %v2750_v54 = vld [vmem:[#allocation2 + $0x67] sm:$0xff] }
 0x1ef   :  { %2685 = vst.msk [vmem:[#allocation2 + $0x98] sm:$0xff] %vm1895_vm4, %v2621_v61  ;;  %v2622_v19 = vmax.f32 %v2418_v0, 0.0  ;;  %v1553_v20 = vpop.permute.xlu0 %1552  ;;  %v2138_v35 = vsel %vm2090_vm7, %v2073_v29, %v1555_v9  ;;  %7377 = vmatprep.subr.bf16.mxu1 %v7495_v39  ;;  %v7417_v55 = vld [vmem:[%s11014_s3 + $0x40] sm:$0xff]   ;;  %4399 = vmatprep.subr.bf16.mxu0 %v7495_v39  ;;  %v9045_v61 = vpack.c.bf16 %v2904_v53, %v2903_v60  ;;  %v2906_v0 = vld [vmem:[#allocation2 + $0x70] sm:$0xff]  ;;  %v2814_v51 = vsel %vm2736_vm11, %v2750_v54, 0.0 }
 0x1f0   :  { %2688 = vst.msk [vmem:[#allocation2 + $0xb0] sm:$0xff] %vm1895_vm4, %v2624_v3  ;;  %1282 = vrot.lane.b32.xlu1 %v8928_v58, %s7490_s23  ;;  %v2752_v39 = vld [vmem:[#allocation2 + $0x77] sm:$0xff]  ;;  %v9060_v9 = vpack.c.bf16 %v2906_v0, %v2905_v1 }
 0x1f1   :  { %2686 = vst.msk [vmem:[#allocation2 + $0xa0] sm:$0xff] %vm1895_vm4, %v2622_v19  ;;  %1280 = vrot.lane.b32.xlu0 %v8846_v25, %s7490_s23  ;;  %v2136_v25 = vsel %vm2090_vm7, %v2071_v33, %v1553_v20  ;;  %v9062_v19 = vpack.c.bf16 %v2751_v10, %v2814_v51  ;;  %v2753_v20 = vld [vmem:[#allocation2 + $0x7f] sm:$0xff]  ;;  %v2816_v23 = vsel %vm2736_vm11, %v2752_v39, 0.0  ;;  %v2995_v33 = vld [vmem:[#allocation2 + $0x69] sm:$0xff] }
 0x1f2   :  { %v1651_v37 = vpop.permute.xlu1 %1650  ;;  %7386 = vmatpush1.bf16.msra.mxu1 %v7417_v55  ;;  %4400 = vmatpush1.bf16.msra.mxu0 %v7417_v55  ;;  %v9073_v4 = vpack.c.bf16 %v2753_v20, %v2816_v23  ;;  %v2754_v39 = vld [vmem:[#allocation2 + $0x87] sm:$0xff]  ;;  %v2755_v20 = vld [vmem:[#allocation2 + $0x8f] sm:$0xff] }
 0x1f3   :  { %v2203_v38 = vsel %vm2155_vm8, %v2138_v35, %v1651_v37  ;;  %v1649_v2 = vpop.permute.xlu0 %1648 }
 0x1f4   :  { %v2201_v40 = vsel %vm2155_vm8, %v2136_v25, %v1649_v2  ;;  %1378 = vrot.lane.b32.xlu1 %v610_v24, %s7491_s30 }
 0x1f5   :  { %1376 = vrot.lane.b32.xlu0 %v8866_v34, %s7491_s30  ;;  %7329 = vmatprep.mubr.msk.bf16.mxu0 %vm2247_vm9, %v2201_v40 }
 0x1f6   :  { %7330 = vmatmul.mubr.msk.bf16.gmra.mrb[44].mxu0 %vm2247_vm9, %v2203_v38  ;;  %v8997_v43 = vpop.permute.xlu1 %982  ;;  %v9076_v38 = vpack.c.bf16 %v3060_v21, %v2995_v33 }
 0x1f7   :  { %v9000_v34 = vpop.permute.xlu0 %980  ;;  %v1746_v2 = vsel %vm1668_vm1, %v8505_v16, %v8997_v43 }
 0x1f8   :  { %1474 = vrot.lane.b32.xlu1 %v707_v12, %s7492_s19  ;;  %v9084_v12 = vld [vmem:[%s11013_s2] ss:$0 sm:$0xff] }
 0x1f9   :  { %1472 = vrot.lane.b32.xlu0 %v8906_v36, %s7492_s19  ;;  %v899_v36 = vpack.c.bf16 %v7072_v45, %v7071_v44 }
 0x1fa   :  { %v9016_v50 = vpop.permute.xlu1 %1078 }
 0x1fb   :  { %v9018_v22 = vpop.permute.xlu0 %1076  ;;  %v1817_v16 = vsel %vm1765_vm2, %v1746_v2, %v9016_v50  ;;  %v87_v2 = vld [vmem:[%s11011_s0 + $0x2a8] sm:$0xff] }
 0x1fc   :  { %1570 = vrot.lane.b32.xlu1 %v803_v46, %s7493_s22 }
 0x1fd   :  { %1568 = vrot.lane.b32.xlu0 %v8928_v58, %s7493_s22  ;;  %v9041_v58 = vpack.c.bf16 %v3058_v52, %v2993_v11 }
 0x1fe   :  { %v9028_v49 = vpop.permute.xlu1 %1174 }
 0x1ff   :  { %v9030_v41 = vpop.permute.xlu0 %1172  ;;  %v1882_v45 = vsel %vm1830_vm3, %v1817_v16, %v9028_v49  ;;  %v2912_v16 = vld [vmem:[#allocation2 + $0xa0] sm:$0xff] }
 0x200   :  { %1666 = vrot.lane.b32.xlu1 %v899_v36, %s7494_s1  ;;  %v2907_v36 = vld [vmem:[#allocation2 + $0x78] sm:$0xff] }
 0x201   :  { %1664 = vrot.lane.b32.xlu0 %v610_v24, %s7494_s1  ;;  %v122_v24 = vpack.c.bf16 %v83_v8, %v82_v6  ;;  %v2910_v6 = vld [vmem:[#allocation2 + $0x90] sm:$0xff]  ;;  %v2818_v8 = vsel %vm2736_vm11, %v2754_v39, 0.0 }
 0x202   :  { %v1271_v56 = vpop.permute.xlu1 %1270  ;;  %v9131_v21 = vpack.c.bf16 %v2755_v20, %v2818_v8 }
 0x203   :  { %v9043_v63 = vpop.permute.xlu0 %1268  ;;  %v1743_v57 = vsel %vm1668_vm1, %v122_v24, %v9000_v34  ;;  %v1947_v48 = vsel %vm1895_vm4, %v1882_v45, %v1271_v56 }
 0x204   :  { %3298 = vrot.lane.b32.xlu1 %v9041_v58, %s7494_s1  ;;  %v1815_v44 = vsel %vm1765_vm2, %v1743_v57, %v9018_v22 }
 0x205   :  { %3206 = vrot.lane.b32.xlu0 %v9045_v61, %s7490_s23  ;;  %v1880_v50 = vsel %vm1830_vm3, %v1815_v44, %v9030_v41 }
 0x206   :  { %v1367_v3 = vpop.permute.xlu1 %1366  ;;  %v1945_v22 = vsel %vm1895_vm4, %v1880_v50, %v9043_v63 }
 0x207   :  { %v1365_v18 = vpop.permute.xlu0 %1364  ;;  %v2012_v49 = vsel %vm1960_vm5, %v1947_v48, %v1367_v3  ;;  %v2909_v3 = vld [vmem:[#allocation2 + $0x88] sm:$0xff] }
 0x208   :  { %3458 = vrot.lane.b32.xlu1 %v9060_v9, %s7496_s29  ;;  %v2010_v53 = vsel %vm1960_vm5, %v1945_v22, %v1365_v18  ;;  %v2962_v18 = vpack.c.bf16 %v2910_v6, %v2909_v3  ;;  %v3001_v6 = vld [vmem:[#allocation2 + $0x99] sm:$0xff] }
 0x209   :  { %v7307_v27 = vpop.f32.mrb[20].mxu0  ;;  %3392 = vrot.lane.b32.xlu0 %v9062_v19, %s7497_s10 }
 0x20a   :  { %v2439_v29 = vadd.f32 %v7307_v27, %v8452_v14  ;;  %v2430_v30 = vpop.f32.mrb[21].mxu0  ;;  %v1463_v62 = vpop.permute.xlu1 %1462 }
 0x20b   :  { %v2431_v35 = vadd.f32 %v8452_v14, %v2430_v30  ;;  %v1461_v37 = vpop.permute.xlu0 %1460  ;;  %v7308_v25 = vpop.f32.mrb[22].mxu0  ;;  %v2908_v14 = vld [vmem:[#allocation2 + $0x80] sm:$0xff]  ;;  %v2077_v41 = vsel %vm2025_vm6, %v2012_v49, %v1463_v62  ;;  %v3000_v30 = vld [vmem:[#allocation2 + $0x91] sm:$0xff] }
 0x20c   :  { %v2627_v40 = vmax.f32 %v2439_v29, 0.0  ;;  %v2442_v17 = vadd.f32 %v9084_v12, %v7308_v25  ;;  %v2433_v42 = vpop.f32.mrb[23].mxu0  ;;  %3588 = vrot.lane.b32.xlu1 %v9073_v4, %s7498_s13  ;;  %v2961_v52 = vpack.c.bf16 %v2908_v14, %v2907_v36  ;;  %v2075_v54 = vsel %vm2025_vm6, %v2010_v53, %v1461_v37  ;;  %v2756_v29 = vld [vmem:[#allocation2 + $0x97] sm:$0xff]  ;;  %v3002_v53 = vld [vmem:[#allocation2 + $0xa1] sm:$0xff] }
 0x20d   :  { %v2625_v43 = vmax.f32 %v2431_v35, 0.0  ;;  %v2434_v46 = vadd.f32 %v9084_v12, %v2433_v42  ;;  %3524 = vrot.lane.b32.xlu0 %v9076_v38, %s7499_s14  ;;  %v2757_v35 = vld [vmem:[#allocation2 + $0x9f] sm:$0xff]  ;;  %v2820_v37 = vsel %vm2736_vm11, %v2756_v29, 0.0  ;;  %v3064_v25 = vsel %vm2739_vm10, %v3000_v30, 0.0  ;;  %v2999_v42 = vld [vmem:[#allocation2 + $0x89] sm:$0xff] }
 0x20e   :  { %2691 = vst.msk [vmem:[#allocation2 + $0xc8] sm:$0xff] %vm1895_vm4, %v2627_v40  ;;  %v2628_v47 = vmax.f32 %v2442_v17, 0.0  ;;  %v1559_v34 = vpop.permute.xlu1 %1558  ;;  %v9152_v17 = vpack.c.bf16 %v2757_v35, %v2820_v37  ;;  %v9154_v57 = vpack.c.bf16 %v3064_v25, %v2999_v42  ;;  %v3066_v8 = vsel %vm2739_vm10, %v3002_v53, 0.0  ;;  %v2914_v37 = vld [vmem:[#allocation2 + $0xb0] sm:$0xff] }
 0x20f   :  { %2689 = vst.msk [vmem:[#allocation2 + $0xb8] sm:$0xff] %vm1895_vm4, %v2625_v43  ;;  %v2626_v28 = vmax.f32 %v2434_v46, 0.0  ;;  %v1557_v11 = vpop.permute.xlu0 %1556  ;;  %v2142_v55 = vsel %vm2090_vm7, %v2077_v41, %v1559_v34  ;;  %v2911_v34 = vld [vmem:[#allocation2 + $0x98] sm:$0xff]  ;;  %v9190_v30 = vpack.c.bf16 %v3066_v8, %v3001_v6 }
 0x210   :  { %2692 = vst.msk [vmem:[#allocation2 + $0xd0] sm:$0xff] %vm1895_vm4, %v2628_v47  ;;  %3208 = vrot.lane.b32.xlu1 %v9060_v9, %s7490_s23  ;;  %v2140_v60 = vsel %vm2090_vm7, %v2075_v54, %v1557_v11 }
 0x211   :  { %2690 = vst.msk [vmem:[#allocation2 + $0xc0] sm:$0xff] %vm1895_vm4, %v2626_v28  ;;  %3650 = vrot.lane.b32.xlu0 %v2961_v52, %s7500_s25  ;;  %v2963_v28 = vpack.c.bf16 %v2912_v16, %v2911_v34 }
 0x212   :  { %v1655_v56 = vpop.permute.xlu1 %1654 }
 0x213   :  { %v2207_v63 = vsel %vm2155_vm8, %v2142_v55, %v1655_v56  ;;  %v1653_v0 = vpop.permute.xlu0 %1652 }
 0x214   :  { %v2205_v51 = vsel %vm2155_vm8, %v2140_v60, %v1653_v0  ;;  %3394 = vrot.lane.b32.xlu1 %v9073_v4, %s7497_s10 }
 0x215   :  { %7333 = vmatprep.mubr.msk.bf16.mxu0 %vm2247_vm9, %v2205_v51  ;;  %3300 = vrot.lane.b32.xlu0 %v9076_v38, %s7494_s1 }
 0x216   :  { %7334 = vmatmul.mubr.msk.bf16.gmra.mrb[48].mxu0 %vm2247_vm9, %v2207_v63  ;;  %v987_v1 = vpop.permute.xlu1 %986 }
 0x217   :  { %v985_v5 = vpop.permute.xlu0 %984  ;;  %v1752_v11 = vsel %vm1668_vm1, %v8613_v26, %v987_v1 }
 0x218   :  { %3526 = vrot.lane.b32.xlu1 %v8858_v31, %s7499_s14 }
 0x219   :  { %3460 = vrot.lane.b32.xlu0 %v2961_v52, %s7496_s29 }
 0x21a   :  { %v1083_v10 = vpop.permute.xlu1 %1082 }
 0x21b   :  { %v1081_v23 = vpop.permute.xlu0 %1080  ;;  %v1821_v54 = vsel %vm1765_vm2, %v1752_v11, %v1083_v10 }
 0x21c   :  { %3652 = vrot.lane.b32.xlu1 %v2962_v18, %s7500_s25 }
 0x21d   :  { %3590 = vrot.lane.b32.xlu0 %v9131_v21, %s7498_s13 }
 0x21e   :  { %v1179_v24 = vpop.permute.xlu1 %1178 }
 0x21f   :  { %v1177_v27 = vpop.permute.xlu0 %1176  ;;  %v1886_v26 = vsel %vm1830_vm3, %v1821_v54, %v1179_v24  ;;  %v90_v54 = vld [vmem:[%s11011_s0 + $0x2d0] sm:$0xff] }
 0x220   :  { %3302 = vrot.lane.b32.xlu1 %v8858_v31, %s7494_s1  ;;  %v86_v31 = vld [vmem:[%s11011_s0 + $0x2a0] sm:$0xff] }
 0x221   :  { %3210 = vrot.lane.b32.xlu0 %v2961_v52, %s7490_s23  ;;  %v124_v43 = vpack.c.bf16 %v87_v2, %v86_v31  ;;  %v2913_v2 = vld [vmem:[#allocation2 + $0xa8] sm:$0xff] }
 0x222   :  { %v1275_v62 = vpop.permute.xlu1 %1274  ;;  %v2964_v42 = vpack.c.bf16 %v2914_v37, %v2913_v2 }
 0x223   :  { %v1273_v33 = vpop.permute.xlu0 %1272  ;;  %v1749_v41 = vsel %vm1668_vm1, %v124_v43, %v985_v5  ;;  %v1951_v39 = vsel %vm1895_vm4, %v1886_v26, %v1275_v62 }
 0x224   :  { %3462 = vrot.lane.b32.xlu1 %v2962_v18, %s7496_s29  ;;  %v1819_v60 = vsel %vm1765_vm2, %v1749_v41, %v1081_v23  ;;  %v2758_v23 = vld [vmem:[#allocation2 + $0xa7] sm:$0xff] }
 0x225   :  { %3396 = vrot.lane.b32.xlu0 %v9131_v21, %s7497_s10  ;;  %v1884_v51 = vsel %vm1830_vm3, %v1819_v60, %v1177_v27  ;;  %v2822_v31 = vsel %vm2736_vm11, %v2758_v23, 0.0  ;;  %v2916_v41 = vld [vmem:[#allocation2 + $0xc0] sm:$0xff]  ;;  %v2915_v60 = vld [vmem:[#allocation2 + $0xb8] sm:$0xff] }
 0x226   :  { %v1371_v40 = vpop.permute.xlu1 %1370  ;;  %v1949_v3 = vsel %vm1895_vm4, %v1884_v51, %v1273_v33 }
 0x227   :  { %v1369_v14 = vpop.permute.xlu0 %1368  ;;  %v2016_v10 = vsel %vm1960_vm5, %v1951_v39, %v1371_v40 }
 0x228   :  { %3592 = vrot.lane.b32.xlu1 %v9152_v17, %s7498_s13 }
 0x229   :  { %v7311_v46 = vpop.f32.mrb[24].mxu0  ;;  %3528 = vrot.lane.b32.xlu0 %v9154_v57, %s7499_s14 }
 0x22a   :  { %v2455_v44 = vadd.f32 %v9084_v12, %v7311_v46  ;;  %v2446_v45 = vpop.f32.mrb[25].mxu0  ;;  %v1467_v47 = vpop.permute.xlu1 %1466 }
 0x22b   :  { %v2447_v36 = vadd.f32 %v9084_v12, %v2446_v45  ;;  %v1465_v50 = vpop.permute.xlu0 %1464  ;;  %v7312_v48 = vpop.f32.mrb[26].mxu0  ;;  %v2081_v20 = vsel %vm2025_vm6, %v2016_v10, %v1467_v47  ;;  %v2760_v45 = vld [vmem:[#allocation2 + $0xb7] sm:$0xff] }
 0x22c   :  { %v2631_v52 = vmax.f32 %v2455_v44, 0.0  ;;  %v2458_v22 = vadd.f32 %v9084_v12, %v7312_v48  ;;  %v2449_v49 = vpop.f32.mrb[27].mxu0  ;;  %3212 = vrot.lane.b32.xlu1 %v2962_v18, %s7490_s23  ;;  %v2014_v18 = vsel %vm1960_vm5, %v1949_v3, %v1369_v14  ;;  %v2759_v14 = vld [vmem:[#allocation2 + $0xaf] sm:$0xff]  ;;  %v2824_v48 = vsel %vm2736_vm11, %v2760_v45, 0.0 }
 0x22d   :  { %v2629_v55 = vmax.f32 %v2447_v36, 0.0  ;;  %v2450_v56 = vadd.f32 %v9084_v12, %v2449_v49  ;;  %3654 = vrot.lane.b32.xlu0 %v2963_v28, %s7500_s25  ;;  %v2079_v24 = vsel %vm2025_vm6, %v2014_v18, %v1465_v50  ;;  %v9202_v43 = vpack.c.bf16 %v2759_v14, %v2822_v31  ;;  %v3004_v47 = vld [vmem:[#allocation2 + $0xb1] sm:$0xff]  ;;  %v2761_v50 = vld [vmem:[#allocation2 + $0xbf] sm:$0xff]  ;;  %v3003_v49 = vld [vmem:[#allocation2 + $0xa9] sm:$0xff] }
 0x22e   :  { %2695 = vst.msk [vmem:[#allocation2 + $0xe8] sm:$0xff] %vm1895_vm4, %v2631_v52  ;;  %v2632_v63 = vmax.f32 %v2458_v22, 0.0  ;;  %v1563_v0 = vpop.permute.xlu1 %1562  ;;  %v3068_v11 = vsel %vm2739_vm10, %v3004_v47, 0.0  ;;  %v9217_v22 = vpack.c.bf16 %v2761_v50, %v2824_v48  ;;  %v3005_v18 = vld [vmem:[#allocation2 + $0xb9] sm:$0xff]  ;;  %v2918_v47 = vld [vmem:[#allocation2 + $0xd0] sm:$0xff] }
 0x22f   :  { %2693 = vst.msk [vmem:[#allocation2 + $0xd8] sm:$0xff] %vm1895_vm4, %v2629_v55  ;;  %v2630_v1 = vmax.f32 %v2450_v56, 0.0  ;;  %v1561_v5 = vpop.permute.xlu0 %1560  ;;  %v2146_v27 = vsel %vm2090_vm7, %v2081_v20, %v1563_v0  ;;  %v9219_v53 = vpack.c.bf16 %v3068_v11, %v3003_v49  ;;  %v91_v55 = vld [vmem:[%s11011_s0 + $0x2d8] sm:$0xff]  ;;  %v3006_v0 = vld [vmem:[#allocation2 + $0xc1] sm:$0xff] }
 0x230   :  { %2696 = vst.msk [vmem:[#allocation2 + $0xf0] sm:$0xff] %vm1895_vm4, %v2632_v63  ;;  %3398 = vrot.lane.b32.xlu1 %v9152_v17, %s7497_s10  ;;  %v2144_v62 = vsel %vm2090_vm7, %v2079_v24, %v1561_v5  ;;  %v9231_v63 = vpack.c.bf16 %v2916_v41, %v2915_v60  ;;  %v126_v51 = vpack.c.bf16 %v91_v55, %v90_v54  ;;  %v3070_v20 = vsel %vm2739_vm10, %v3006_v0, 0.0  ;;  %v2917_v11 = vld [vmem:[#allocation2 + $0xc8] sm:$0xff] }
 0x231   :  { %2694 = vst.msk [vmem:[#allocation2 + $0xe0] sm:$0xff] %vm1895_vm4, %v2630_v1  ;;  %3304 = vrot.lane.b32.xlu0 %v9154_v57, %s7494_s1  ;;  %v2966_v41 = vpack.c.bf16 %v2918_v47, %v2917_v11  ;;  %v2763_v54 = vld [vmem:[#allocation2 + $0xcf] sm:$0xff] }
 0x232   :  { %v1659_v29 = vpop.permute.xlu1 %1658 }
 0x233   :  { %v2211_v33 = vsel %vm2155_vm8, %v2146_v27, %v1659_v29  ;;  %v1657_v35 = vpop.permute.xlu0 %1656 }
 0x234   :  { %v2209_v25 = vsel %vm2155_vm8, %v2144_v62, %v1657_v35  ;;  %3530 = vrot.lane.b32.xlu1 %v9190_v30, %s7499_s14 }
 0x235   :  { %7337 = vmatprep.mubr.msk.bf16.mxu0 %vm2247_vm9, %v2209_v25  ;;  %3464 = vrot.lane.b32.xlu0 %v2963_v28, %s7496_s29  ;;  %v2762_v25 = vld [vmem:[#allocation2 + $0xc7] sm:$0xff] }
 0x236   :  { %7338 = vmatmul.mubr.msk.bf16.gmra.mrb[52].mxu0 %vm2247_vm9, %v2211_v33  ;;  %v991_v40 = vpop.permute.xlu1 %990 }
 0x237   :  { %v989_v16 = vpop.permute.xlu0 %988  ;;  %v1758_v23 = vsel %vm1668_vm1, %v8716_v7, %v991_v40 }
 0x238   :  { %3656 = vrot.lane.b32.xlu1 %v2964_v42, %s7500_s25  ;;  %v1755_v62 = vsel %vm1668_vm1, %v126_v51, %v989_v16 }
 0x239   :  { %3594 = vrot.lane.b32.xlu0 %v9202_v43, %s7498_s13 }
 0x23a   :  { %v1087_v46 = vpop.permute.xlu1 %1086 }
 0x23b   :  { %v1085_v44 = vpop.permute.xlu0 %1084  ;;  %v1825_v33 = vsel %vm1765_vm2, %v1758_v23, %v1087_v46 }
 0x23c   :  { %3306 = vrot.lane.b32.xlu1 %v9190_v30, %s7494_s1  ;;  %v1823_v7 = vsel %vm1765_vm2, %v1755_v62, %v1085_v44 }
 0x23d   :  { %3214 = vrot.lane.b32.xlu0 %v2963_v28, %s7490_s23 }
 0x23e   :  { %v1183_v34 = vpop.permute.xlu1 %1182 }
 0x23f   :  { %v1181_v36 = vpop.permute.xlu0 %1180  ;;  %v1890_v31 = vsel %vm1830_vm3, %v1825_v33, %v1183_v34  ;;  %v2826_v34 = vsel %vm2736_vm11, %v2762_v25, 0.0  ;;  %v2919_v33 = vld [vmem:[#allocation2 + $0xd8] sm:$0xff]  ;;  %v3010_v25 = vld [vmem:[#allocation2 + $0xe1] sm:$0xff] }
 0x240   :  { %3466 = vrot.lane.b32.xlu1 %v2964_v42, %s7496_s29  ;;  %v1888_v14 = vsel %vm1830_vm3, %v1823_v7, %v1181_v36 }
 0x241   :  { %3400 = vrot.lane.b32.xlu0 %v9202_v43, %s7497_s10 }
 0x242   :  { %v1279_v52 = vpop.permute.xlu1 %1278 }
 0x243   :  { %v1277_v28 = vpop.permute.xlu0 %1276  ;;  %v1955_v16 = vsel %vm1895_vm4, %v1890_v31, %v1279_v52 }
 0x244   :  { %3596 = vrot.lane.b32.xlu1 %v9217_v22, %s7498_s13  ;;  %v1953_v50 = vsel %vm1895_vm4, %v1888_v14, %v1277_v28 }
 0x245   :  { %3532 = vrot.lane.b32.xlu0 %v9219_v53, %s7499_s14 }
 0x246   :  { %v1375_v56 = vpop.permute.xlu1 %1374 }
 0x247   :  { %v1373_v26 = vpop.permute.xlu0 %1372  ;;  %v2020_v44 = vsel %vm1960_vm5, %v1955_v16, %v1375_v56  ;;  %v2766_v16 = vld [vmem:[#allocation2 + $0xe7] sm:$0xff] }
 0x248   :  { %3216 = vrot.lane.b32.xlu1 %v2964_v42, %s7490_s23  ;;  %v9253_v42 = vpack.c.bf16 %v3070_v20, %v3005_v18  ;;  %v2018_v36 = vsel %vm1960_vm5, %v1953_v50, %v1373_v26  ;;  %v9274_v26 = vpack.c.bf16 %v2763_v54, %v2826_v34 }
 0x249   :  { %v7315_v39 = vpop.f32.mrb[28].mxu0  ;;  %3658 = vrot.lane.b32.xlu0 %v9231_v63, %s7500_s25 }
 0x24a   :  { %v2471_v1 = vadd.f32 %v9084_v12, %v7315_v39  ;;  %v2462_v5 = vpop.f32.mrb[29].mxu0  ;;  %v1471_v6 = vpop.permute.xlu1 %1470 }
 0x24b   :  { %v2463_v8 = vadd.f32 %v9084_v12, %v2462_v5  ;;  %v1469_v3 = vpop.permute.xlu0 %1468  ;;  %v7316_v10 = vpop.f32.mrb[30].mxu0  ;;  %v2085_v48 = vsel %vm2025_vm6, %v2020_v44, %v1471_v6  ;;  %v3008_v5 = vld [vmem:[#allocation2 + $0xd1] sm:$0xff] }
 0x24c   :  { %v2635_v24 = vmax.f32 %v2471_v1, 0.0  ;;  %v2474_v27 = vadd.f32 %v9084_v12, %v7316_v10  ;;  %v2465_v29 = vpop.f32.mrb[31].mxu0  ;;  %3402 = vrot.lane.b32.xlu1 %v9217_v22, %s7497_s10  ;;  %v2083_v52 = vsel %vm2025_vm6, %v2018_v36, %v1469_v3  ;;  %v2764_v1 = vld [vmem:[#allocation2 + $0xd7] sm:$0xff]  ;;  %v2765_v3 = vld [vmem:[#allocation2 + $0xdf] sm:$0xff]  ;;  %v3072_v18 = vsel %vm2739_vm10, %v3008_v5, 0.0 }
 0x24d   :  { %v2633_v35 = vmax.f32 %v2463_v8, 0.0  ;;  %v2466_v37 = vadd.f32 %v9084_v12, %v2465_v29  ;;  %3308 = vrot.lane.b32.xlu0 %v9219_v53, %s7494_s1  ;;  %v2828_v10 = vsel %vm2736_vm11, %v2764_v1, 0.0  ;;  %v2920_v29 = vld [vmem:[#allocation2 + $0xe0] sm:$0xff] }
 0x24e   :  { %2699 = vst.msk [vmem:[#allocation2 + $0x108] sm:$0xff] %vm1895_vm4, %v2635_v24  ;;  %v2636_v2 = vmax.f32 %v2474_v27, 0.0  ;;  %v1567_v40 = vpop.permute.xlu1 %1566  ;;  %v9293_v23 = vpack.c.bf16 %v2765_v3, %v2828_v10  ;;  %v3007_v24 = vld [vmem:[#allocation2 + $0xc9] sm:$0xff] }
 0x24f   :  { %2697 = vst.msk [vmem:[#allocation2 + $0xf8] sm:$0xff] %vm1895_vm4, %v2633_v35  ;;  %v2634_v46 = vmax.f32 %v2466_v37, 0.0  ;;  %v1565_v45 = vpop.permute.xlu0 %1564  ;;  %v2150_v49 = vsel %vm2090_vm7, %v2085_v48, %v1567_v40  ;;  %v9295_v27 = vpack.c.bf16 %v3072_v18, %v3007_v24  ;;  %v9301_v37 = vpack.c.bf16 %v2920_v29, %v2919_v33  ;;  %v2922_v48 = vld [vmem:[#allocation2 + $0xf0] sm:$0xff] }
 0x250   :  { %2700 = vst.msk [vmem:[#allocation2 + $0x110] sm:$0xff] %vm1895_vm4, %v2636_v2  ;;  %3534 = vrot.lane.b32.xlu1 %v9253_v42, %s7499_s14  ;;  %v2148_v55 = vsel %vm2090_vm7, %v2083_v52, %v1565_v45  ;;  %v3009_v2 = vld [vmem:[#allocation2 + $0xd9] sm:$0xff]  ;;  %v3074_v40 = vsel %vm2739_vm10, %v3010_v25, 0.0 }
 0x251   :  { %2698 = vst.msk [vmem:[#allocation2 + $0x100] sm:$0xff] %vm1895_vm4, %v2634_v46  ;;  %3468 = vrot.lane.b32.xlu0 %v9231_v63, %s7496_s29  ;;  %v9313_v50 = vpack.c.bf16 %v3074_v40, %v3009_v2  ;;  %v2748_v33 = vld [vmem:[#allocation2 + $0x57] sm:$0xff] }
 0x252   :  { %v1663_v28 = vpop.permute.xlu1 %1662 }
 0x253   :  { %v2215_v56 = vsel %vm2155_vm8, %v2150_v49, %v1663_v28  ;;  %v1661_v60 = vpop.permute.xlu0 %1660 }
 0x254   :  { %v2213_v0 = vsel %vm2155_vm8, %v2148_v55, %v1661_v60  ;;  %3660 = vrot.lane.b32.xlu1 %v2966_v41, %s7500_s25 }
 0x255   :  { %7341 = vmatprep.mubr.msk.bf16.mxu0 %vm2247_vm9, %v2213_v0  ;;  %3598 = vrot.lane.b32.xlu0 %v9274_v26, %s7498_s13 }
 0x256   :  { %7342 = vmatmul.mubr.msk.bf16.gmra.mrb[56].mxu0 %vm2247_vm9, %v2215_v56  ;;  %v995_v51 = vpop.permute.xlu1 %994 }
 0x257   :  { %v993_v39 = vpop.permute.xlu0 %992  ;;  %v1764_v11 = vsel %vm1668_vm1, %v8826_v13, %v995_v51  ;;  %v2921_v13 = vld [vmem:[#allocation2 + $0xe8] sm:$0xff] }
 0x258   :  { %3310 = vrot.lane.b32.xlu1 %v9253_v42, %s7494_s1  ;;  %v1761_v54 = vsel %vm1668_vm1, %v8762_v32, %v993_v39  ;;  %v9332_v3 = vpack.c.bf16 %v2922_v48, %v2921_v13  ;;  %v2767_v32 = vld [vmem:[#allocation2 + $0xef] sm:$0xff]  ;;  %vm4736_vm1 = vcmask 257024  }
 0x259   :  { %3218 = vrot.lane.b32.xlu0 %v9231_v63, %s7490_s23 }
 0x25a   :  { %v1091_v6 = vpop.permute.xlu1 %1090 }
 0x25b   :  { %v1089_v8 = vpop.permute.xlu0 %1088  ;;  %v1829_v55 = vsel %vm1765_vm2, %v1764_v11, %v1091_v6 }
 0x25c   :  { %3470 = vrot.lane.b32.xlu1 %v2966_v41, %s7496_s29  ;;  %v1827_v0 = vsel %vm1765_vm2, %v1761_v54, %v1089_v8  ;;  %v2988_v8 = vld [vmem:[#allocation2 + $0x31] sm:$0xff]  ;;  %vm5857_vm2 = vcmask 1041409  }
 0x25d   :  { %3404 = vrot.lane.b32.xlu0 %v9274_v26, %s7497_s10  ;;  %v3052_v2 = vsel %vm2739_vm10, %v2988_v8, 0.0  ;;  %v3014_v8 = vld [vmem:[#allocation2 + $0x101] sm:$0xff] }
 0x25e   :  { %v1187_v20 = vpop.permute.xlu1 %1186 }
 0x25f   :  { %v1185_v63 = vpop.permute.xlu0 %1184  ;;  %v1894_v51 = vsel %vm1830_vm3, %v1829_v55, %v1187_v20 }
 0x260   :  { %3600 = vrot.lane.b32.xlu1 %v9293_v23, %s7498_s13  ;;  %v1892_v39 = vsel %vm1830_vm3, %v1827_v0, %v1185_v63  ;;  %vm5859_vm3 = vcmask 1042434  }
 0x261   :  { %3536 = vrot.lane.b32.xlu0 %v9295_v27, %s7499_s14 }
 0x262   :  { %v1283_v62 = vpop.permute.xlu1 %1282 }
 0x263   :  { %v1281_v35 = vpop.permute.xlu0 %1280  ;;  %v1959_v6 = vsel %vm1895_vm4, %v1894_v51, %v1283_v62 }
 0x264   :  { %3220 = vrot.lane.b32.xlu1 %v2966_v41, %s7490_s23  ;;  %v2830_v41 = vsel %vm2736_vm11, %v2766_v16, 0.0  ;;  %v1957_v20 = vsel %vm1895_vm4, %v1892_v39, %v1281_v35  ;;  %v2749_v16 = vld [vmem:[#allocation2 + $0x5f] sm:$0xff] }
 0x265   :  { %3662 = vrot.lane.b32.xlu0 %v9301_v37, %s7500_s25  ;;  %v9337_v24 = vpack.c.bf16 %v2767_v32, %v2830_v41  ;;  %v2923_v32 = vld [vmem:[#allocation2 + $0xf8] sm:$0xff] }
 0x266   :  { %v1379_v7 = vpop.permute.xlu1 %1378 }
 0x267   :  { %v1377_v31 = vpop.permute.xlu0 %1376  ;;  %v2024_v29 = vsel %vm1960_vm5, %v1959_v6, %v1379_v7 }
 0x268   :  { %3406 = vrot.lane.b32.xlu1 %v9293_v23, %s7497_s10  ;;  %v2022_v63 = vsel %vm1960_vm5, %v1957_v20, %v1377_v31  ;;  %vm5861_vm5 = vcmask 1043459  }
 0x269   :  { %v7319_v14 = vpop.f32.mrb[32].mxu0  ;;  %3312 = vrot.lane.b32.xlu0 %v9295_v27, %s7494_s1 }
 0x26a   :  { %v2487_v46 = vadd.f32 %v9084_v12, %v7319_v14  ;;  %v2478_v45 = vpop.f32.mrb[33].mxu0  ;;  %v1475_v47 = vpop.permute.xlu1 %1474 }
 0x26b   :  { %v2479_v44 = vadd.f32 %v9084_v12, %v2478_v45  ;;  %v1473_v34 = vpop.permute.xlu0 %1472  ;;  %v7320_v36 = vpop.f32.mrb[34].mxu0  ;;  %v2089_v62 = vsel %vm2025_vm6, %v2024_v29, %v1475_v47  ;;  %v2987_v47 = vld [vmem:[#allocation2 + $0x29] sm:$0xff] }
 0x26c   :  { %v2639_v52 = vmax.f32 %v2487_v46, 0.0  ;;  %v2490_v49 = vadd.f32 %v9084_v12, %v7320_v36  ;;  %v2481_v28 = vpop.f32.mrb[35].mxu0  ;;  %3538 = vrot.lane.b32.xlu1 %v9313_v50, %s7499_s14  ;;  %v2087_v25 = vsel %vm2025_vm6, %v2022_v63, %v1473_v34  ;;  %v2812_v46 = vsel %vm2736_vm11, %v2748_v33, 0.0  ;;  %v3012_v36 = vld [vmem:[#allocation2 + $0xf1] sm:$0xff]  ;;  %v3013_v63 = vld [vmem:[#allocation2 + $0xf9] sm:$0xff] }
 0x26d   :  { %v2637_v56 = vmax.f32 %v2479_v44, 0.0  ;;  %v2482_v60 = vadd.f32 %v9084_v12, %v2481_v28  ;;  %3472 = vrot.lane.b32.xlu0 %v9301_v37, %s7496_s29  ;;  %v2768_v44 = vld [vmem:[#allocation2 + $0xf7] sm:$0xff]  ;;  %v9363_v34 = vpack.c.bf16 %v3052_v2, %v2987_v47  ;;  %v9366_v11 = vpack.c.bf16 %v2749_v16, %v2812_v46 }
 0x26e   :  { %2703 = vst.msk [vmem:[#allocation2 + $0x128] sm:$0xff] %vm1895_vm4, %v2639_v52  ;;  %v2640_v1 = vmax.f32 %v2490_v49, 0.0  ;;  %v1571_v5 = vpop.permute.xlu1 %1570  ;;  %v2769_v49 = vld [vmem:[#allocation2 + $0xff] sm:$0xff]  ;;  %v2832_v28 = vsel %vm2736_vm11, %v2768_v44, 0.0  ;;  %vm5863_vm6 = vcmask 1044484  }
 0x26f   :  { %2701 = vst.msk [vmem:[#allocation2 + $0x118] sm:$0xff] %vm1895_vm4, %v2637_v56  ;;  %v2638_v10 = vmax.f32 %v2482_v60, 0.0  ;;  %v1569_v18 = vpop.permute.xlu0 %1568  ;;  %v2154_v35 = vsel %vm2090_vm7, %v2089_v62, %v1571_v5  ;;  %v9380_v55 = vpack.c.bf16 %v2769_v49, %v2832_v28  ;;  %v3011_v56 = vld [vmem:[#allocation2 + $0xe9] sm:$0xff]  ;;  %v3078_v62 = vsel %vm2739_vm10, %v3014_v8, 0.0 }
 0x270   :  { %2704 = vst.msk [vmem:[#allocation2 + $0x130] sm:$0xff] %vm1895_vm4, %v2640_v1  ;;  %3664 = vrot.lane.b32.xlu1 %v9332_v3, %s7500_s25  ;;  %v2152_v40 = vsel %vm2090_vm7, %v2087_v25, %v1569_v18  ;;  %v2924_v1 = vld [vmem:[#allocation2 + $0x100] sm:$0xff]  ;;  %vm5865_vm7 = vcmask 1045509  }
 0x271   :  { %2702 = vst.msk [vmem:[#allocation2 + $0x120] sm:$0xff] %vm1895_vm4, %v2638_v10  ;;  %3602 = vrot.lane.b32.xlu0 %v9337_v24, %s7498_s13  ;;  %v2969_v10 = vpack.c.bf16 %v2924_v1, %v2923_v32 }
 0x272   :  { %v1667_v7 = vpop.permute.xlu1 %1666 }
 0x273   :  { %v2219_v14 = vsel %vm2155_vm8, %v2154_v35, %v1667_v7  ;;  %v1665_v31 = vpop.permute.xlu0 %1664  ;;  %v9405_v7 = vpack.c.bf16 %v3078_v62, %v3013_v63 }
 0x274   :  { %v2217_v45 = vsel %vm2155_vm8, %v2152_v40, %v1665_v31  ;;  %3314 = vrot.lane.b32.xlu1 %v9313_v50, %s7494_s1 }
 0x275   :  { %7345 = vmatprep.mubr.msk.bf16.mxu0 %vm2247_vm9, %v2217_v45  ;;  %3222 = vrot.lane.b32.xlu0 %v9301_v37, %s7490_s23  ;;  %v3076_v37 = vsel %vm2739_vm10, %v3012_v36, 0.0 }
 0x276   :  { %7346 = vmatmul.mubr.msk.bf16.gmra.mrb[60].mxu0 %vm2247_vm9, %v2219_v14  ;;  %v3299_v48 = vpop.permute.xlu1 %3298  ;;  %v9383_v0 = vpack.c.bf16 %v3076_v37, %v3011_v56  ;;  %v3150_v14 = vld [vmem:[#allocation2 + $0x110] sm:$0xff]  ;;  %vm5867_vm9 = vcmask 1046534  }
 0x277   :  { %v3207_v52 = vpop.permute.xlu0 %3206  ;;  %7119 = vmatprep.mubr.msk.bf16.mxu0 %vm1895_vm4, %v9363_v34 }
 0x278   :  { %v3719_v41 = vsel %vm1895_vm4, %v9366_v11, %v3207_v52  ;;  %3474 = vrot.lane.b32.xlu1 %v9332_v3, %s7496_s29 }
 0x279   :  { %3408 = vrot.lane.b32.xlu0 %v9337_v24, %s7497_s10  ;;  %v3806_v13 = vsel %vm2155_vm8, %v3719_v41, %v3299_v48  ;;  %v3140_v48 = vld [vmem:[#allocation2 + $0x10f] sm:$0xff] }
 0x27a   :  { %v3459_v54 = vpop.permute.xlu1 %3458 }
 0x27b   :  { %v3393_v60 = vpop.permute.xlu0 %3392 }
 0x27c   :  { %v3869_v51 = vsel %vm3857_vm12, %v3806_v13, %v3393_v60  ;;  %3604 = vrot.lane.b32.xlu1 %v9380_v55, %s7498_s13 }
 0x27d   :  { %3540 = vrot.lane.b32.xlu0 %v9383_v0, %s7499_s14  ;;  %v3934_v6 = vsel %vm3922_vm13, %v3869_v51, %v3459_v54 }
 0x27e   :  { %v3589_v5 = vpop.permute.xlu1 %3588 }
 0x27f   :  { %v3525_v39 = vpop.permute.xlu0 %3524 }
 0x280   :  { %v3999_v18 = vsel %vm3987_vm14, %v3934_v6, %v3525_v39  ;;  %3224 = vrot.lane.b32.xlu1 %v9332_v3, %s7490_s23  ;;  %v3139_v3 = vld [vmem:[#allocation2 + $0x107] sm:$0xff] }
 0x281   :  { %3666 = vrot.lane.b32.xlu0 %v2969_v10, %s7500_s25  ;;  %v4064_v33 = vsel %vm4052_vm15, %v3999_v18, %v3589_v5  ;;  %v3143_v16 = vsel %vm2736_vm11, %v3139_v3, 0.0  ;;  %v3155_v3 = vld [vmem:[#allocation2 + $0x109] sm:$0xff] }
 0x282   :  { %v3209_v20 = vpop.permute.xlu1 %3208  ;;  %v3147_v37 = vpack.c.bf16 %v3140_v48, %v3143_v16 }
 0x283   :  { %v3651_v29 = vpop.permute.xlu0 %3650  ;;  %v3722_v2 = vsel %vm1895_vm4, %v9062_v19, %v3209_v20 }
 0x284   :  { %3410 = vrot.lane.b32.xlu1 %v9380_v55, %s7497_s10  ;;  %v4133_v25 = vsel %vm4116_vm0, %v4064_v33, %v3651_v29  ;;  %v3156_v29 = vld [vmem:[#allocation2 + $0x111] sm:$0xff] }
 0x285   :  { %3316 = vrot.lane.b32.xlu0 %v9383_v0, %s7494_s1  ;;  %4456 = vmatmul.mubr.bf16.vlgmr.msra.gmra.mrb[0].mxu1 %v4133_v25  ;;  %v3160_v25 = vsel %vm2739_vm10, %v3156_v29, 0.0  ;;  %v2773_v29 = vld [vmem:[#allocation2 + $0x12f] sm:$0xff] }
 0x286   :  { %7125 = vmatprep.mubr.msk.bf16.mxu1 %vm1895_vm4, %v9154_v57  ;;  %v3395_v35 = vpop.permute.xlu1 %3394  ;;  %v3149_v57 = vld [vmem:[#allocation2 + $0x108] sm:$0xff] }
 0x287   :  { %v3301_v40 = vpop.permute.xlu0 %3300  ;;  %v3153_v36 = vpack.c.bf16 %v3150_v14, %v3149_v57  ;;  %v2771_v57 = vld [vmem:[#allocation2 + $0x11f] sm:$0xff] }
 0x288   :  { %v3808_v31 = vsel %vm2155_vm8, %v3722_v2, %v3301_v40  ;;  %3542 = vrot.lane.b32.xlu1 %v9405_v7, %s7499_s14  ;;  %v9442_v40 = vpack.c.bf16 %v3160_v25, %v3155_v3 }
 0x289   :  { %v7323_v46 = vpop.f32.mrb[36].mxu0  ;;  %3476 = vrot.lane.b32.xlu0 %v2969_v10, %s7496_s29  ;;  %v3871_v28 = vsel %vm3857_vm12, %v3808_v31, %v3395_v35 }
 0x28a   :  { %v2503_v45 = vadd.f32 %v9084_v12, %v7323_v46  ;;  %v2494_v47 = vpop.f32.mrb[37].mxu0  ;;  %v3527_v44 = vpop.permute.xlu1 %3526 }
 0x28b   :  { %v2495_v52 = vadd.f32 %v9084_v12, %v2494_v47  ;;  %v7324_v49 = vpop.f32.mrb[38].mxu0  ;;  %v3461_v41 = vpop.permute.xlu0 %3460 }
 0x28c   :  { %v2643_v54 = vmax.f32 %v2503_v45, 0.0  ;;  %v2506_v56 = vadd.f32 %v9084_v12, %v7324_v49  ;;  %v3936_v60 = vsel %vm3922_vm13, %v3871_v28, %v3461_v41  ;;  %v2497_v13 = vpop.f32.mrb[39].mxu0  ;;  %3668 = vrot.lane.b32.xlu1 %v3153_v36, %s7500_s25  ;;  %v3015_v28 = vld [vmem:[#allocation2 + $0x119] sm:$0xff] }
 0x28d   :  { %v2641_v51 = vmax.f32 %v2495_v52, 0.0  ;;  %v2498_v1 = vadd.f32 %v9084_v12, %v2497_v13  ;;  %3606 = vrot.lane.b32.xlu0 %v3147_v37, %s7498_s13  ;;  %v4001_v6 = vsel %vm3987_vm14, %v3936_v60, %v3527_v44  ;;  %v3016_v44 = vld [vmem:[#allocation2 + $0x121] sm:$0xff] }
 0x28e   :  { %2707 = vst.msk [vmem:[#allocation2 + $0x148] sm:$0xff] %vm1895_vm4, %v2643_v54  ;;  %v2644_v5 = vmax.f32 %v2506_v56, 0.0  ;;  %v3653_v32 = vpop.permute.xlu1 %3652  ;;  %v3080_v41 = vsel %vm2739_vm10, %v3016_v44, 0.0  ;;  %v2926_v54 = vld [vmem:[#allocation2 + $0x120] sm:$0xff] }
 0x28f   :  { %2705 = vst.msk [vmem:[#allocation2 + $0x138] sm:$0xff] %vm1895_vm4, %v2641_v51  ;;  %v2642_v39 = vmax.f32 %v2498_v1, 0.0  ;;  %v3591_v18 = vpop.permute.xlu0 %3590  ;;  %v2772_v56 = vld [vmem:[#allocation2 + $0x127] sm:$0xff]  ;;  %v3124_v13 = vpack.c.bf16 %v3080_v41, %v3015_v28  ;;  %v2925_v51 = vld [vmem:[#allocation2 + $0x118] sm:$0xff] }
 0x290   :  { %2708 = vst.msk [vmem:[#allocation2 + $0x150] sm:$0xff] %vm1895_vm4, %v2644_v5  ;;  %v4066_v8 = vsel %vm4052_vm15, %v4001_v6, %v3591_v18  ;;  %3318 = vrot.lane.b32.xlu1 %v9405_v7, %s7494_s1  ;;  %v2836_v18 = vsel %vm2736_vm11, %v2772_v56, 0.0 }
 0x291   :  { %2706 = vst.msk [vmem:[#allocation2 + $0x140] sm:$0xff] %vm1895_vm4, %v2642_v39  ;;  %3226 = vrot.lane.b32.xlu0 %v2969_v10, %s7490_s23  ;;  %v4136_v20 = vsel %vm4116_vm0, %v4066_v8, %v3653_v32  ;;  %v2970_v32 = vpack.c.bf16 %v2926_v54, %v2925_v51  ;;  %v2928_v39 = vld [vmem:[#allocation2 + $0x130] sm:$0xff]  ;;  %v2927_v8 = vld [vmem:[#allocation2 + $0x128] sm:$0xff] }
 0x292   :  { %4464 = vmatmul.mubr.bf16.gmra.mrb[4].mxu1 %v4136_v20  ;;  %v3303_v33 = vpop.permute.xlu1 %3302  ;;  %v2971_v20 = vpack.c.bf16 %v2928_v39, %v2927_v8 }
 0x293   :  { %v3211_v63 = vpop.permute.xlu0 %3210  ;;  %7126 = vmatprep.mubr.msk.bf16.mxu1 %vm1895_vm4, %v9190_v30  ;;  %v11021_v30 = vmov 0.0|0.0  }
 0x294   :  { %v3725_v62 = vsel %vm1895_vm4, %v9073_v4, %v3211_v63  ;;  %3478 = vrot.lane.b32.xlu1 %v3153_v36, %s7496_s29  ;;  %v2770_v4 = vld [vmem:[#allocation2 + $0x117] sm:$0xff] }
 0x295   :  { %3412 = vrot.lane.b32.xlu0 %v3147_v37, %s7497_s10  ;;  %v3810_v35 = vsel %vm2155_vm8, %v3725_v62, %v3303_v33  ;;  %v2834_v45 = vsel %vm2736_vm11, %v2770_v4, 0.0 }
 0x296   :  { %v3463_v10 = vpop.permute.xlu1 %3462  ;;  %v9457_v48 = vpack.c.bf16 %v2771_v57, %v2834_v45  ;;  %v2929_v8 = vld [vmem:[#allocation2 + $0x138] sm:$0xff] }
 0x297   :  { %v3397_v2 = vpop.permute.xlu0 %3396 }
 0x298   :  { %v3873_v14 = vsel %vm3857_vm12, %v3810_v35, %v3397_v2  ;;  %3608 = vrot.lane.b32.xlu1 %v11021_v30, %s7498_s13  ;;  %v2775_v56 = vld [vmem:[#allocation2 + $0x13f] sm:$0xff] }
 0x299   :  { %3544 = vrot.lane.b32.xlu0 %v9442_v40, %s7499_s14  ;;  %v3938_v16 = vsel %vm3922_vm13, %v3873_v14, %v3463_v10 }
 0x29a   :  { %v3593_v31 = vpop.permute.xlu1 %3592 }
 0x29b   :  { %v3529_v46 = vpop.permute.xlu0 %3528 }
 0x29c   :  { %v4003_v47 = vsel %vm3987_vm14, %v3938_v16, %v3529_v46  ;;  %3196 = vrot.lane.b32.xlu1 %v11021_v30, %s7490_s23 }
 0x29d   :  { %3670 = vrot.lane.b32.xlu0 %v11021_v30, %s7500_s25  ;;  %v4068_v49 = vsel %vm4052_vm15, %v4003_v47, %v3593_v31  ;;  %v2774_v47 = vld [vmem:[#allocation2 + $0x137] sm:$0xff] }
 0x29e   :  { %v3213_v36 = vpop.permute.xlu1 %3212 }
 0x29f   :  { %v3655_v52 = vpop.permute.xlu0 %3654  ;;  %v3728_v1 = vsel %vm1895_vm4, %v9131_v21, %v3213_v36  ;;  %v9477_v21 = vpack.c.bf16 %v2773_v29, %v2836_v18 }
 0x2a0   :  { %3414 = vrot.lane.b32.xlu1 %v9457_v48, %s7497_s10  ;;  %v4139_v37 = vsel %vm4116_vm0, %v4068_v49, %v3655_v52  ;;  %v3018_v49 = vld [vmem:[#allocation2 + $0x131] sm:$0xff] }
 0x2a1   :  { %3288 = vrot.lane.b32.xlu0 %v11021_v30, %s7494_s1  ;;  %4472 = vmatmul.mubr.bf16.gmra.mrb[8].mxu1 %v4139_v37 }
 0x2a2   :  { %7127 = vmatprep.mubr.msk.bf16.mxu1 %vm1895_vm4, %v9219_v53  ;;  %v3399_v60 = vpop.permute.xlu1 %3398 }
 0x2a3   :  { %v3305_v5 = vpop.permute.xlu0 %3304 }
 0x2a4   :  { %v3812_v6 = vsel %vm2155_vm8, %v3728_v1, %v3305_v5  ;;  %3546 = vrot.lane.b32.xlu1 %v3124_v13, %s7499_s14  ;;  %v3017_v1 = vld [vmem:[#allocation2 + $0x129] sm:$0xff] }
 0x2a5   :  { %3480 = vrot.lane.b32.xlu0 %v2970_v32, %s7496_s29  ;;  %v3875_v33 = vsel %vm3857_vm12, %v3812_v6, %v3399_v60  ;;  %v2930_v6 = vld [vmem:[#allocation2 + $0x140] sm:$0xff] }
 0x2a6   :  { %v3531_v53 = vpop.permute.xlu1 %3530 }
 0x2a7   :  { %v3465_v63 = vpop.permute.xlu0 %3464 }
 0x2a8   :  { %v3940_v62 = vsel %vm3922_vm13, %v3875_v33, %v3465_v63  ;;  %3672 = vrot.lane.b32.xlu1 %v2971_v20, %s7500_s25  ;;  %v2972_v33 = vpack.c.bf16 %v2930_v6, %v2929_v8 }
 0x2a9   :  { %v7327_v25 = vpop.f32.mrb[40].mxu0  ;;  %3610 = vrot.lane.b32.xlu0 %v9477_v21, %s7498_s13  ;;  %v4005_v4 = vsel %vm3987_vm14, %v3940_v62, %v3531_v53  ;;  %v3020_v62 = vld [vmem:[#allocation2 + $0x141] sm:$0xff] }
 0x2aa   :  { %v2519_v10 = vadd.f32 %v9084_v12, %v7327_v25  ;;  %v2510_v3 = vpop.f32.mrb[41].mxu0  ;;  %v3657_v35 = vpop.permute.xlu1 %3656 }
 0x2ab   :  { %v2511_v2 = vadd.f32 %v9084_v12, %v2510_v3  ;;  %v7328_v14 = vpop.f32.mrb[42].mxu0  ;;  %v3595_v31 = vpop.permute.xlu0 %3594 }
 0x2ac   :  { %v2647_v16 = vmax.f32 %v2519_v10, 0.0  ;;  %v2522_v46 = vadd.f32 %v9084_v12, %v7328_v14  ;;  %v4070_v57 = vsel %vm4052_vm15, %v4005_v4, %v3595_v31  ;;  %v2513_v45 = vpop.f32.mrb[43].mxu0  ;;  %3320 = vrot.lane.b32.xlu1 %v3124_v13, %s7494_s1  ;;  %v3082_v13 = vsel %vm2739_vm10, %v3018_v49, 0.0 }
 0x2ad   :  { %v2645_v44 = vmax.f32 %v2511_v2, 0.0  ;;  %v2514_v36 = vadd.f32 %v9084_v12, %v2513_v45  ;;  %3228 = vrot.lane.b32.xlu0 %v2970_v32, %s7490_s23  ;;  %v4142_v52 = vsel %vm4116_vm0, %v4070_v57, %v3657_v35  ;;  %v2838_v12 = vsel %vm2736_vm11, %v2774_v47, 0.0  ;;  %v3019_v35 = vld [vmem:[#allocation2 + $0x139] sm:$0xff]  ;;  %v2932_v57 = vld [vmem:[#allocation2 + $0x150] sm:$0xff] }
 0x2ae   :  { %2711 = vst.msk [vmem:[#allocation2 + $0x168] sm:$0xff] %vm1895_vm4, %v2647_v16  ;;  %v2648_v28 = vmax.f32 %v2522_v46, 0.0  ;;  %4480 = vmatmul.mubr.bf16.gmra.mrb[12].mxu1 %v4142_v52  ;;  %v3307_v41 = vpop.permute.xlu1 %3306  ;;  %v9507_v51 = vpack.c.bf16 %v2775_v56, %v2838_v12  ;;  %v9510_v39 = vpack.c.bf16 %v3082_v13, %v3017_v1  ;;  %v3084_v2 = vsel %vm2739_vm10, %v3020_v62, 0.0  ;;  %v2777_v52 = vld [vmem:[#allocation2 + $0x14f] sm:$0xff] }
 0x2af   :  { %2709 = vst.msk [vmem:[#allocation2 + $0x158] sm:$0xff] %vm1895_vm4, %v2645_v44  ;;  %v2646_v37 = vmax.f32 %v2514_v36, 0.0  ;;  %v3215_v54 = vpop.permute.xlu0 %3214  ;;  %7128 = vmatprep.mubr.msk.bf16.mxu1 %vm1895_vm4, %v9253_v42  ;;  %v9531_v31 = vpack.c.bf16 %v3084_v2, %v3019_v35  ;;  %v2931_v44 = vld [vmem:[#allocation2 + $0x148] sm:$0xff] }
 0x2b0   :  { %2712 = vst.msk [vmem:[#allocation2 + $0x170] sm:$0xff] %vm1895_vm4, %v2648_v28  ;;  %v3731_v60 = vsel %vm1895_vm4, %v9152_v17, %v3215_v54  ;;  %3482 = vrot.lane.b32.xlu1 %v2971_v20, %s7496_s29  ;;  %v2973_v36 = vpack.c.bf16 %v2932_v57, %v2931_v44 }
 0x2b1   :  { %2710 = vst.msk [vmem:[#allocation2 + $0x160] sm:$0xff] %vm1895_vm4, %v2646_v37  ;;  %3416 = vrot.lane.b32.xlu0 %v9477_v21, %s7497_s10  ;;  %v3814_v5 = vsel %vm2155_vm8, %v3731_v60, %v3307_v41 }
 0x2b2   :  { %v3467_v42 = vpop.permute.xlu1 %3466 }
 0x2b3   :  { %v3401_v32 = vpop.permute.xlu0 %3400 }
 0x2b4   :  { %v3877_v17 = vsel %vm3857_vm12, %v3814_v5, %v3401_v32  ;;  %3612 = vrot.lane.b32.xlu1 %v9507_v51, %s7498_s13  ;;  %v9557_v5 = vld [vmem:[%s11013_s2] ss:$0 sm:$0xff] }
 0x2b5   :  { %3548 = vrot.lane.b32.xlu0 %v9510_v39, %s7499_s14  ;;  %v3942_v53 = vsel %vm3922_vm13, %v3877_v17, %v3467_v42 }
 0x2b6   :  { %v3597_v18 = vpop.permute.xlu1 %3596  ;;  %v2778_v60 = vld [vmem:[#allocation2 + $0x157] sm:$0xff] }
 0x2b7   :  { %v3533_v29 = vpop.permute.xlu0 %3532  ;;  %v3022_v1 = vld [vmem:[#allocation2 + $0x151] sm:$0xff] }
 0x2b8   :  { %v4007_v63 = vsel %vm3987_vm14, %v3942_v53, %v3533_v29  ;;  %3230 = vrot.lane.b32.xlu1 %v2971_v20, %s7490_s23  ;;  %v2776_v20 = vld [vmem:[#allocation2 + $0x147] sm:$0xff]  ;;  %v2779_v29 = vld [vmem:[#allocation2 + $0x15f] sm:$0xff] }
 0x2b9   :  { %3674 = vrot.lane.b32.xlu0 %v2972_v33, %s7500_s25  ;;  %v4072_v3 = vsel %vm4052_vm15, %v4007_v63, %v3597_v18  ;;  %v2840_v47 = vsel %vm2736_vm11, %v2776_v20, 0.0 }
 0x2ba   :  { %v3217_v25 = vpop.permute.xlu1 %3216 }
 0x2bb   :  { %v3659_v10 = vpop.permute.xlu0 %3658  ;;  %v3734_v16 = vsel %vm1895_vm4, %v9202_v43, %v3217_v25  ;;  %v9542_v43 = vpack.c.bf16 %v2777_v52, %v2840_v47  ;;  %v2934_v47 = vld [vmem:[#allocation2 + $0x160] sm:$0xff] }
 0x2bc   :  { %3418 = vrot.lane.b32.xlu1 %v9507_v51, %s7497_s10  ;;  %v4145_v14 = vsel %vm4116_vm0, %v4072_v3, %v3659_v10  ;;  %v3086_v3 = vsel %vm2739_vm10, %v3022_v1, 0.0 }
 0x2bd   :  { %3322 = vrot.lane.b32.xlu0 %v9510_v39, %s7494_s1  ;;  %4488 = vmatmul.mubr.bf16.gmra.mrb[16].mxu1 %v4145_v14 }
 0x2be   :  { %7129 = vmatprep.mubr.msk.bf16.mxu1 %vm1895_vm4, %v9295_v27  ;;  %v3403_v4 = vpop.permute.xlu1 %3402 }
 0x2bf   :  { %v3309_v46 = vpop.permute.xlu0 %3308 }
 0x2c0   :  { %v3816_v45 = vsel %vm2155_vm8, %v3734_v16, %v3309_v46  ;;  %3550 = vrot.lane.b32.xlu1 %v9531_v31, %s7499_s14 }
 0x2c1   :  { %3484 = vrot.lane.b32.xlu0 %v2972_v33, %s7496_s29  ;;  %v3879_v49 = vsel %vm3857_vm12, %v3816_v45, %v3403_v4  ;;  %v3021_v4 = vld [vmem:[#allocation2 + $0x149] sm:$0xff] }
 0x2c2   :  { %v3535_v27 = vpop.permute.xlu1 %3534  ;;  %v9579_v57 = vpack.c.bf16 %v3086_v3, %v3021_v4 }
 0x2c3   :  { %v3469_v28 = vpop.permute.xlu0 %3468 }
 0x2c4   :  { %v3944_v41 = vsel %vm3922_vm13, %v3879_v49, %v3469_v28  ;;  %3676 = vrot.lane.b32.xlu1 %v2973_v36, %s7500_s25 }
 0x2c5   :  { %3614 = vrot.lane.b32.xlu0 %v9542_v43, %s7498_s13  ;;  %v4009_v54 = vsel %vm3987_vm14, %v3944_v41, %v3535_v27  ;;  %v2933_v27 = vld [vmem:[#allocation2 + $0x158] sm:$0xff] }
 0x2c6   :  { %v3661_v37 = vpop.permute.xlu1 %3660  ;;  %v2974_v28 = vpack.c.bf16 %v2934_v47, %v2933_v27 }
 0x2c7   :  { %v3599_v56 = vpop.permute.xlu0 %3598 }
 0x2c8   :  { %v4074_v12 = vsel %vm4052_vm15, %v4009_v54, %v3599_v56  ;;  %3324 = vrot.lane.b32.xlu1 %v9531_v31, %s7494_s1 }
 0x2c9   :  { %v7331_v13 = vpop.f32.mrb[44].mxu0  ;;  %3232 = vrot.lane.b32.xlu0 %v2972_v33, %s7490_s23  ;;  %v4148_v42 = vsel %vm4116_vm0, %v4074_v12, %v3661_v37  ;;  %v2842_v33 = vsel %vm2736_vm11, %v2778_v60, 0.0  ;;  %v3024_v37 = vld [vmem:[#allocation2 + $0x161] sm:$0xff]  ;;  %v3023_v60 = vld [vmem:[#allocation2 + $0x159] sm:$0xff] }
 0x2ca   :  { %v2535_v32 = vadd.f32 %v9557_v5, %v7331_v13  ;;  %v2526_v17 = vpop.f32.mrb[45].mxu0  ;;  %4496 = vmatmul.mubr.bf16.gmra.mrb[20].mxu1 %v4148_v42  ;;  %v3311_v6 = vpop.permute.xlu1 %3310  ;;  %v9575_v20 = vpack.c.bf16 %v2779_v29, %v2842_v33  ;;  %v3088_v13 = vsel %vm2739_vm10, %v3024_v37, 0.0  ;;  %v2935_v29 = vld [vmem:[#allocation2 + $0x168] sm:$0xff] }
 0x2cb   :  { %v2527_v18 = vadd.f32 %v9557_v5, %v2526_v17  ;;  %v7332_v8 = vpop.f32.mrb[46].mxu0  ;;  %v3219_v53 = vpop.permute.xlu0 %3218  ;;  %7130 = vmatprep.mubr.msk.bf16.mxu1 %vm1895_vm4, %v9313_v50  ;;  %v3025_v37 = vld [vmem:[#allocation2 + $0x169] sm:$0xff] }
 0x2cc   :  { %v2651_v63 = vmax.f32 %v2535_v32, 0.0  ;;  %v2538_v62 = vadd.f32 %v9557_v5, %v7332_v8  ;;  %v3737_v25 = vsel %vm1895_vm4, %v9217_v22, %v3219_v53  ;;  %v2529_v10 = vpop.f32.mrb[47].mxu0  ;;  %3486 = vrot.lane.b32.xlu1 %v2973_v36, %s7496_s29  ;;  %v9602_v32 = vpack.c.bf16 %v3088_v13, %v3023_v60 }
 0x2cd   :  { %v2649_v35 = vmax.f32 %v2527_v18, 0.0  ;;  %v2530_v2 = vadd.f32 %v9557_v5, %v2529_v10  ;;  %3420 = vrot.lane.b32.xlu0 %v9542_v43, %s7497_s10  ;;  %v3818_v16 = vsel %vm2155_vm8, %v3737_v25, %v3311_v6  ;;  %v2936_v18 = vld [vmem:[#allocation2 + $0x170] sm:$0xff] }
 0x2ce   :  { %2715 = vst.msk [vmem:[#allocation2 + $0x188] sm:$0xff] %vm1895_vm4, %v2651_v63  ;;  %v2652_v50 = vmax.f32 %v2538_v62, 0.0  ;;  %v3471_v14 = vpop.permute.xlu1 %3470  ;;  %v2975_v33 = vpack.c.bf16 %v2936_v18, %v2935_v29  ;;  %v2781_v63 = vld [vmem:[#allocation2 + $0x16f] sm:$0xff] }
 0x2cf   :  { %2713 = vst.msk [vmem:[#allocation2 + $0x178] sm:$0xff] %vm1895_vm4, %v2649_v35  ;;  %v2650_v22 = vmax.f32 %v2530_v2, 0.0  ;;  %v3405_v46 = vpop.permute.xlu0 %3404 }
 0x2d0   :  { %2716 = vst.msk [vmem:[#allocation2 + $0x190] sm:$0xff] %vm1895_vm4, %v2652_v50  ;;  %v3881_v45 = vsel %vm3857_vm12, %v3818_v16, %v3405_v46  ;;  %3616 = vrot.lane.b32.xlu1 %v9575_v20, %s7498_s13 }
 0x2d1   :  { %2714 = vst.msk [vmem:[#allocation2 + $0x180] sm:$0xff] %vm1895_vm4, %v2650_v22  ;;  %3552 = vrot.lane.b32.xlu0 %v9579_v57, %s7499_s14  ;;  %v3946_v52 = vsel %vm3922_vm13, %v3881_v45, %v3471_v14 }
 0x2d2   :  { %v3601_v44 = vpop.permute.xlu1 %3600 }
 0x2d3   :  { %v3537_v49 = vpop.permute.xlu0 %3536 }
 0x2d4   :  { %v4011_v41 = vsel %vm3987_vm14, %v3946_v52, %v3537_v49  ;;  %3234 = vrot.lane.b32.xlu1 %v2973_v36, %s7490_s23  ;;  %v2780_v36 = vld [vmem:[#allocation2 + $0x167] sm:$0xff] }
 0x2d5   :  { %3678 = vrot.lane.b32.xlu0 %v2974_v28, %s7500_s25  ;;  %v4076_v12 = vsel %vm4052_vm15, %v4011_v41, %v3601_v44  ;;  %v2844_v53 = vsel %vm2736_vm11, %v2780_v36, 0.0 }
 0x2d6   :  { %v3221_v54 = vpop.permute.xlu1 %3220  ;;  %v2782_v14 = vld [vmem:[#allocation2 + $0x177] sm:$0xff] }
 0x2d7   :  { %v3663_v56 = vpop.permute.xlu0 %3662  ;;  %v3740_v17 = vsel %vm1895_vm4, %v9274_v26, %v3221_v54  ;;  %v9613_v26 = vpack.c.bf16 %v2781_v63, %v2844_v53  ;;  %v3026_v22 = vld [vmem:[#allocation2 + $0x171] sm:$0xff]  ;;  %v2846_v47 = vsel %vm2736_vm11, %v2782_v14, 0.0 }
 0x2d8   :  { %3422 = vrot.lane.b32.xlu1 %v9575_v20, %s7497_s10  ;;  %v4151_v42 = vsel %vm4116_vm0, %v4076_v12, %v3663_v56  ;;  %v2783_v45 = vld [vmem:[#allocation2 + $0x17f] sm:$0xff]  ;;  %v3090_v27 = vsel %vm2739_vm10, %v3026_v22, 0.0 }
 0x2d9   :  { %3326 = vrot.lane.b32.xlu0 %v9579_v57, %s7494_s1  ;;  %4504 = vmatmul.mubr.bf16.gmra.mrb[24].mxu1 %v4151_v42  ;;  %v9637_v41 = vpack.c.bf16 %v2783_v45, %v2846_v47  ;;  %v9641_v60 = vpack.c.bf16 %v3090_v27, %v3025_v37  ;;  %v2937_v29 = vld [vmem:[#allocation2 + $0x178] sm:$0xff]  ;;  %v2785_v37 = vld [vmem:[#allocation2 + $0x18f] sm:$0xff] }
 0x2da   :  { %7131 = vmatprep.mubr.msk.bf16.mxu1 %vm1895_vm4, %v9383_v0  ;;  %v3407_v1 = vpop.permute.xlu1 %3406  ;;  %v3027_v14 = vld [vmem:[#allocation2 + $0x179] sm:$0xff] }
 0x2db   :  { %v3313_v6 = vpop.permute.xlu0 %3312 }
 0x2dc   :  { %v3820_v8 = vsel %vm2155_vm8, %v3740_v17, %v3313_v6  ;;  %3554 = vrot.lane.b32.xlu1 %v9602_v32, %s7499_s14  ;;  %v2938_v17 = vld [vmem:[#allocation2 + $0x180] sm:$0xff] }
 0x2dd   :  { %3488 = vrot.lane.b32.xlu0 %v2974_v28, %s7496_s29  ;;  %v3883_v62 = vsel %vm3857_vm12, %v3820_v8, %v3407_v1 }
 0x2de   :  { %v3539_v0 = vpop.permute.xlu1 %3538 }
 0x2df   :  { %v3473_v25 = vpop.permute.xlu0 %3472 }
 0x2e0   :  { %v3948_v10 = vsel %vm3922_vm13, %v3883_v62, %v3473_v25  ;;  %3680 = vrot.lane.b32.xlu1 %v2975_v33, %s7500_s25  ;;  %v2976_v25 = vpack.c.bf16 %v2938_v17, %v2937_v29  ;;  %v2895_v29 = vld [vmem:[#allocation2 + $0x18] sm:$0xff] }
 0x2e1   :  { %3618 = vrot.lane.b32.xlu0 %v9613_v26, %s7498_s13  ;;  %v4013_v35 = vsel %vm3987_vm14, %v3948_v10, %v3539_v0 }
 0x2e2   :  { %v3665_v3 = vpop.permute.xlu1 %3664 }
 0x2e3   :  { %v3603_v2 = vpop.permute.xlu0 %3602 }
 0x2e4   :  { %v4078_v50 = vsel %vm4052_vm15, %v4013_v35, %v3603_v2  ;;  %3328 = vrot.lane.b32.xlu1 %v9602_v32, %s7494_s1 }
 0x2e5   :  { %3236 = vrot.lane.b32.xlu0 %v2974_v28, %s7490_s23  ;;  %v4154_v4 = vsel %vm4116_vm0, %v4078_v50, %v3665_v3  ;;  %v3028_v3 = vld [vmem:[#allocation2 + $0x181] sm:$0xff] }
 0x2e6   :  { %4512 = vmatmul.mubr.bf16.gmra.mrb[28].mxu1 %v4154_v4  ;;  %v3315_v16 = vpop.permute.xlu1 %3314  ;;  %v3092_v4 = vsel %vm2739_vm10, %v3028_v3, 0.0 }
 0x2e7   :  { %v3223_v46 = vpop.permute.xlu0 %3222  ;;  %7132 = vmatprep.mubr.msk.bf16.mxu1 %vm1895_vm4, %v9405_v7 }
 0x2e8   :  { %v3743_v44 = vsel %vm1895_vm4, %v9293_v23, %v3223_v46  ;;  %3490 = vrot.lane.b32.xlu1 %v2975_v33, %s7496_s29  ;;  %v9668_v46 = vpack.c.bf16 %v3092_v4, %v3027_v14 }
 0x2e9   :  { %v7335_v52 = vpop.f32.mrb[48].mxu0  ;;  %3424 = vrot.lane.b32.xlu0 %v9613_v26, %s7497_s10  ;;  %v3822_v23 = vsel %vm2155_vm8, %v3743_v44, %v3315_v16  ;;  %v2940_v44 = vld [vmem:[#allocation2 + $0x190] sm:$0xff] }
 0x2ea   :  { %v2551_v49 = vadd.f32 %v9557_v5, %v7335_v52  ;;  %v2542_v28 = vpop.f32.mrb[49].mxu0  ;;  %v3475_v7 = vpop.permute.xlu1 %3474 }
 0x2eb   :  { %v2543_v54 = vadd.f32 %v9557_v5, %v2542_v28  ;;  %v7336_v56 = vpop.f32.mrb[50].mxu0  ;;  %v3409_v12 = vpop.permute.xlu0 %3408 }
 0x2ec   :  { %v2655_v13 = vmax.f32 %v2551_v49, 0.0  ;;  %v2554_v42 = vadd.f32 %v9557_v5, %v7336_v56  ;;  %v3885_v36 = vsel %vm3857_vm12, %v3822_v23, %v3409_v12  ;;  %v2545_v1 = vpop.f32.mrb[51].mxu0  ;;  %3620 = vrot.lane.b32.xlu1 %v9637_v41, %s7498_s13  ;;  %v2740_v49 = vld [vmem:[#allocation2 + $0x17] sm:$0xff]  ;;  %v2741_v23 = vld [vmem:[#allocation2 + $0x1f] sm:$0xff] }
 0x2ed   :  { %v2653_v6 = vmax.f32 %v2543_v54, 0.0  ;;  %v2546_v18 = vadd.f32 %v9557_v5, %v2545_v1  ;;  %3556 = vrot.lane.b32.xlu0 %v9641_v60, %s7499_s14  ;;  %v3950_v63 = vsel %vm3922_vm13, %v3885_v36, %v3475_v7  ;;  %v2804_v12 = vsel %vm2736_vm11, %v2740_v49, 0.0 }
 0x2ee   :  { %2719 = vst.msk [vmem:[#allocation2 + $0x1a8] sm:$0xff] %vm1895_vm4, %v2655_v13  ;;  %v2656_v8 = vmax.f32 %v2554_v42, 0.0  ;;  %v3605_v53 = vpop.permute.xlu1 %3604  ;;  %v9690_v36 = vpack.c.bf16 %v2741_v23, %v2804_v12 }
 0x2ef   :  { %2717 = vst.msk [vmem:[#allocation2 + $0x198] sm:$0xff] %vm1895_vm4, %v2653_v6  ;;  %v2654_v0 = vmax.f32 %v2546_v18, 0.0  ;;  %v3541_v62 = vpop.permute.xlu0 %3540  ;;  %v2896_v6 = vld [vmem:[#allocation2 + $0x20] sm:$0xff] }
 0x2f0   :  { %2720 = vst.msk [vmem:[#allocation2 + $0x1b0] sm:$0xff] %vm1895_vm4, %v2656_v8  ;;  %v4015_v10 = vsel %vm3987_vm14, %v3950_v63, %v3541_v62  ;;  %3238 = vrot.lane.b32.xlu1 %v2975_v33, %s7490_s23  ;;  %v2784_v33 = vld [vmem:[#allocation2 + $0x187] sm:$0xff]  ;;  %v9698_v63 = vpack.c.bf16 %v2896_v6, %v2895_v29 }
 0x2f1   :  { %2718 = vst.msk [vmem:[#allocation2 + $0x1a0] sm:$0xff] %vm1895_vm4, %v2654_v0  ;;  %3682 = vrot.lane.b32.xlu0 %v2976_v25, %s7500_s25  ;;  %v4080_v50 = vsel %vm4052_vm15, %v4015_v10, %v3605_v53  ;;  %v2848_v52 = vsel %vm2736_vm11, %v2784_v33, 0.0  ;;  %v2986_v8 = vld [vmem:[#allocation2 + $0x21] sm:$0xff]  ;;  %v2985_v10 = vld [vmem:[#allocation2 + $0x19] sm:$0xff]  ;;  %v3029_v29 = vld [vmem:[#allocation2 + $0x189] sm:$0xff] }
 0x2f2   :  { %v3225_v35 = vpop.permute.xlu1 %3224  ;;  %v9681_v56 = vpack.c.bf16 %v2785_v37, %v2848_v52  ;;  %v3050_v3 = vsel %vm2739_vm10, %v2986_v8, 0.0  ;;  %v2897_v6 = vld [vmem:[#allocation2 + $0x28] sm:$0xff] }
 0x2f3   :  { %v3667_v2 = vpop.permute.xlu0 %3666  ;;  %v3746_v45 = vsel %vm1895_vm4, %v9337_v24, %v3225_v35 }
 0x2f4   :  { %3426 = vrot.lane.b32.xlu1 %v9637_v41, %s7497_s10  ;;  %v4157_v22 = vsel %vm4116_vm0, %v4080_v50, %v3667_v2  ;;  %v9709_v50 = vpack.c.bf16 %v3050_v3, %v2985_v10 }
 0x2f5   :  { %3330 = vrot.lane.b32.xlu0 %v9641_v60, %s7494_s1  ;;  %4520 = vmatmul.mubr.bf16.gmra.mrb[32].mxu1 %v4157_v22 }
 0x2f6   :  { %7133 = vmatprep.mubr.msk.bf16.mxu1 %vm1895_vm4, %v9442_v40  ;;  %v3411_v16 = vpop.permute.xlu1 %3410  ;;  %v2939_v40 = vld [vmem:[#allocation2 + $0x188] sm:$0xff] }
 0x2f7   :  { %v3317_v47 = vpop.permute.xlu0 %3316  ;;  %v9678_v7 = vpack.c.bf16 %v2940_v44, %v2939_v40 }
 0x2f8   :  { %v3824_v27 = vsel %vm2155_vm8, %v3746_v45, %v3317_v47  ;;  %3558 = vrot.lane.b32.xlu1 %v9668_v46, %s7499_s14  ;;  %v3030_v45 = vld [vmem:[#allocation2 + $0x191] sm:$0xff] }
 0x2f9   :  { %3492 = vrot.lane.b32.xlu0 %v2976_v25, %s7496_s29  ;;  %v3887_v24 = vsel %vm3857_vm12, %v3824_v27, %v3411_v16  ;;  %v2743_v16 = vld [vmem:[#allocation2 + $0x2f] sm:$0xff] }
 0x2fa   :  { %v3543_v28 = vpop.permute.xlu1 %3542 }
 0x2fb   :  { %v3477_v54 = vpop.permute.xlu0 %3476 }
 0x2fc   :  { %v3952_v13 = vsel %vm3922_vm13, %v3887_v24, %v3477_v54  ;;  %3684 = vrot.lane.b32.xlu1 %v9678_v7, %s7500_s25  ;;  %v2898_v24 = vld [vmem:[#allocation2 + $0x30] sm:$0xff] }
 0x2fd   :  { %3622 = vrot.lane.b32.xlu0 %v9681_v56, %s7498_s13  ;;  %v4017_v1 = vsel %vm3987_vm14, %v3952_v13, %v3543_v28 }
 0x2fe   :  { %v3669_v42 = vpop.permute.xlu1 %3668 }
 0x2ff   :  { %v3607_v17 = vpop.permute.xlu0 %3606 }
 0x300   :  { %v4082_v18 = vsel %vm4052_vm15, %v4017_v1, %v3607_v17  ;;  %3382 = vrot.lane.b32.xlu1 %v9690_v36, %s7497_s10 }
 0x301   :  { %3240 = vrot.lane.b32.xlu0 %v2976_v25, %s7490_s23  ;;  %v4160_v53 = vsel %vm4116_vm0, %v4082_v18, %v3669_v42  ;;  %v2742_v25 = vld [vmem:[#allocation2 + $0x27] sm:$0xff]  ;;  %v3094_v42 = vsel %vm2739_vm10, %v3030_v45, 0.0  ;;  %v2786_v18 = vld [vmem:[#allocation2 + $0x197] sm:$0xff] }
 0x302   :  { %4528 = vmatmul.mubr.bf16.gmra.mrb[36].mxu1 %v4160_v53  ;;  %v3319_v0 = vpop.permute.xlu1 %3318  ;;  %v2806_v22 = vsel %vm2736_vm11, %v2742_v25, 0.0  ;;  %v9741_v3 = vpack.c.bf16 %v3094_v42, %v3029_v29  ;;  %v2942_v45 = vld [vmem:[#allocation2 + $0x1a0] sm:$0xff]  ;;  %v2744_v42 = vld [vmem:[#allocation2 + $0x37] sm:$0xff] }
 0x303   :  { %v3227_v62 = vpop.permute.xlu0 %3226  ;;  %4535 = vmatprep.mubr.bf16.mxu1 %v11021_v30  ;;  %v9722_v52 = vpack.c.bf16 %v2743_v16, %v2806_v22 }
 0x304   :  { %v3749_v35 = vsel %vm1895_vm4, %v9380_v55, %v3227_v62  ;;  %3448 = vrot.lane.b32.xlu1 %v9698_v63, %s7496_s29 }
 0x305   :  { %3332 = vrot.lane.b32.xlu0 %v9668_v46, %s7494_s1  ;;  %v3826_v14 = vsel %vm2155_vm8, %v3749_v35, %v3319_v0  ;;  %v9736_v0 = vpack.c.bf16 %v2898_v24, %v2897_v6  ;;  %v2745_v6 = vld [vmem:[#allocation2 + $0x3f] sm:$0xff] }
 0x306   :  { %v3479_v2 = vpop.permute.xlu1 %3478 }
 0x307   :  { %v3413_v4 = vpop.permute.xlu0 %3412 }
 0x308   :  { %v3889_v33 = vsel %vm3857_vm12, %v3826_v14, %v3413_v4  ;;  %3514 = vrot.lane.b32.xlu1 %v9709_v50, %s7499_s14  ;;  %v2850_v14 = vsel %vm2736_vm11, %v2786_v18, 0.0  ;;  %v2808_v18 = vsel %vm2736_vm11, %v2744_v42, 0.0 }
 0x309   :  { %v7339_v55 = vpop.f32.mrb[52].mxu0  ;;  %3428 = vrot.lane.b32.xlu0 %v9681_v56, %s7497_s10  ;;  %v3954_v28 = vsel %vm3922_vm13, %v3889_v33, %v3479_v2  ;;  %v2787_v2 = vld [vmem:[#allocation2 + $0x19f] sm:$0xff] }
 0x30a   :  { %v2567_v47 = vadd.f32 %v9557_v5, %v7339_v55  ;;  %v2558_v44 = vpop.f32.mrb[53].mxu0  ;;  %v9720_v27 = vpop.permute.xlu1 %3608  ;;  %v9758_v55 = vpack.c.bf16 %v2787_v2, %v2850_v14  ;;  %v3031_v2 = vld [vmem:[#allocation2 + $0x199] sm:$0xff] }
 0x30b   :  { %v2559_v49 = vadd.f32 %v9557_v5, %v2558_v44  ;;  %v7340_v40 = vpop.f32.mrb[54].mxu0  ;;  %v3545_v37 = vpop.permute.xlu0 %3544  ;;  %v2941_v44 = vld [vmem:[#allocation2 + $0x198] sm:$0xff] }
 0x30c   :  { %v2659_v54 = vmax.f32 %v2567_v47, 0.0  ;;  %v2570_v23 = vadd.f32 %v9557_v5, %v7340_v40  ;;  %v4019_v12 = vsel %vm3987_vm14, %v3954_v28, %v3545_v37  ;;  %v2561_v13 = vpop.f32.mrb[55].mxu0  ;;  %3578 = vrot.lane.b32.xlu1 %v9722_v52, %s7498_s13  ;;  %v9769_v40 = vpack.c.bf16 %v2942_v45, %v2941_v44 }
 0x30d   :  { %v2657_v1 = vmax.f32 %v2559_v49, 0.0  ;;  %v2562_v17 = vadd.f32 %v9557_v5, %v2561_v13  ;;  %3494 = vrot.lane.b32.xlu0 %v9678_v7, %s7496_s29  ;;  %v4084_v35 = vsel %vm4052_vm15, %v4019_v12, %v9720_v27 }
 0x30e   :  { %2723 = vst.msk [vmem:[#allocation2 + $0x1c8] sm:$0xff] %vm1895_vm4, %v2659_v54  ;;  %v2660_v8 = vmax.f32 %v2570_v23, 0.0  ;;  %v3197_v53 = vpop.permute.xlu1 %3196 }
 0x30f   :  { %2721 = vst.msk [vmem:[#allocation2 + $0x1b8] sm:$0xff] %vm1895_vm4, %v2657_v1  ;;  %v2658_v62 = vmax.f32 %v2562_v17, 0.0  ;;  %v9739_v10 = vpop.permute.xlu0 %3670  ;;  %v3704_v22 = vsel %vm1895_vm4, 0.0|0.0, %v3197_v53  ;;  %v9799_v53 = vpack.c.bf16 %v2745_v6, %v2808_v18  ;;  %v2789_v6 = vld [vmem:[#allocation2 + $0x1af] sm:$0xff] }
 0x310   :  { %2724 = vst.msk [vmem:[#allocation2 + $0x1d0] sm:$0xff] %vm1895_vm4, %v2660_v8  ;;  %v4163_v25 = vsel %vm4116_vm0, %v4084_v35, %v9739_v10  ;;  %3640 = vrot.lane.b32.xlu1 %v9736_v0, %s7500_s25  ;;  %v2900_v35 = vld [vmem:[#allocation2 + $0x40] sm:$0xff] }
 0x311   :  { %2722 = vst.msk [vmem:[#allocation2 + $0x1c0] sm:$0xff] %vm1895_vm4, %v2658_v62  ;;  %3560 = vrot.lane.b32.xlu0 %v9741_v3, %s7499_s14  ;;  %4536 = vmatmul.mubr.bf16.gmra.mrb[40].mxu1 %v4163_v25 }
 0x312   :  { %7134 = vmatprep.mubr.msk.bf16.mxu1 %vm1895_vm4, %v9510_v39  ;;  %v3415_v4 = vpop.permute.xlu1 %3414 }
 0x313   :  { %v3289_v33 = vpop.permute.xlu0 %3288 }
 0x314   :  { %v9761_v16 = vsel %vm2155_vm8, %v3704_v22, %v3289_v33  ;;  %3198 = vrot.lane.b32.xlu1 %v9698_v63, %s7490_s23  ;;  %v2899_v22 = vld [vmem:[#allocation2 + $0x38] sm:$0xff]  ;;  %v2788_v33 = vld [vmem:[#allocation2 + $0x1a7] sm:$0xff] }
 0x315   :  { %3624 = vrot.lane.b32.xlu0 %v9758_v55, %s7498_s13  ;;  %v3891_v39 = vsel %vm3857_vm12, %v9761_v16, %v3415_v4 }
 0x316   :  { %v3547_v47 = vpop.permute.xlu1 %3546 }
 0x317   :  { %v3481_v49 = vpop.permute.xlu0 %3480 }
 0x318   :  { %v3956_v28 = vsel %vm3922_vm13, %v3891_v39, %v3481_v49  ;;  %3290 = vrot.lane.b32.xlu1 %v9709_v50, %s7494_s1  ;;  %v9810_v39 = vpack.c.bf16 %v2900_v35, %v2899_v22  ;;  %v2943_v35 = vld [vmem:[#allocation2 + $0x1a8] sm:$0xff] }
 0x319   :  { %3686 = vrot.lane.b32.xlu0 %v9769_v40, %s7500_s25  ;;  %v4021_v37 = vsel %vm3987_vm14, %v3956_v28, %v3547_v47 }
 0x31a   :  { %v3673_v63 = vpop.permute.xlu1 %3672 }
 0x31b   :  { %v3611_v24 = vpop.permute.xlu0 %3610 }
 0x31c   :  { %v4086_v54 = vsel %vm4052_vm15, %v4021_v37, %v3611_v24  ;;  %3384 = vrot.lane.b32.xlu1 %v9722_v52, %s7497_s10 }
 0x31d   :  { %3242 = vrot.lane.b32.xlu0 %v9678_v7, %s7490_s23  ;;  %v4166_v23 = vsel %vm4116_vm0, %v4086_v54, %v3673_v63 }
 0x31e   :  { %4544 = vmatmul.mubr.bf16.gmra.mrb[44].mxu1 %v4166_v23  ;;  %v3321_v12 = vpop.permute.xlu1 %3320 }
 0x31f   :  { %v3229_v50 = vpop.permute.xlu0 %3228  ;;  %7135 = vmatprep.mubr.msk.bf16.mxu1 %vm1895_vm4, %v9531_v31 }
 0x320   :  { %v3752_v13 = vsel %vm1895_vm4, %v9457_v48, %v3229_v50  ;;  %3450 = vrot.lane.b32.xlu1 %v9736_v0, %s7496_s29  ;;  %v3032_v48 = vld [vmem:[#allocation2 + $0x1a1] sm:$0xff] }
 0x321   :  { %3334 = vrot.lane.b32.xlu0 %v9741_v3, %s7494_s1  ;;  %v3828_v7 = vsel %vm2155_vm8, %v3752_v13, %v3321_v12  ;;  %v3096_v14 = vsel %vm2739_vm10, %v3032_v48, 0.0  ;;  %v2852_v13 = vsel %vm2736_vm11, %v2788_v33, 0.0 }
 0x322   :  { %v3483_v1 = vpop.permute.xlu1 %3482  ;;  %v9813_v37 = vpack.c.bf16 %v3096_v14, %v3031_v2 }
 0x323   :  { %v3417_v17 = vpop.permute.xlu0 %3416 }
 0x324   :  { %v3893_v31 = vsel %vm3857_vm12, %v3828_v7, %v3417_v17  ;;  %3516 = vrot.lane.b32.xlu1 %v9363_v34, %s7499_s14 }
 0x325   :  { %3430 = vrot.lane.b32.xlu0 %v9758_v55, %s7497_s10  ;;  %v3958_v29 = vsel %vm3922_vm13, %v3893_v31, %v3483_v1 }
 0x326   :  { %v3613_v8 = vpop.permute.xlu1 %3612 }
 0x327   :  { %v3549_v62 = vpop.permute.xlu0 %3548 }
 0x328   :  { %v4023_v25 = vsel %vm3987_vm14, %v3958_v29, %v3549_v62  ;;  %3580 = vrot.lane.b32.xlu1 %v9799_v53, %s7498_s13  ;;  %v2944_v62 = vld [vmem:[#allocation2 + $0x1b0] sm:$0xff] }
 0x329   :  { %v7343_v4 = vpop.f32.mrb[56].mxu0  ;;  %3496 = vrot.lane.b32.xlu0 %v9769_v40, %s7496_s29  ;;  %v4088_v24 = vsel %vm4052_vm15, %v4023_v25, %v3613_v8  ;;  %v9831_v8 = vpack.c.bf16 %v2789_v6, %v2852_v13  ;;  %v9841_v2 = vpack.c.bf16 %v2944_v62, %v2943_v35  ;;  %v3034_v13 = vld [vmem:[#allocation2 + $0x1b1] sm:$0xff] }
 0x32a   :  { %v2583_v45 = vadd.f32 %v9557_v5, %v7343_v4  ;;  %v2574_v47 = vpop.f32.mrb[57].mxu0  ;;  %v3231_v44 = vpop.permute.xlu1 %3230  ;;  %v2902_v6 = vld [vmem:[#allocation2 + $0x50] sm:$0xff] }
 0x32b   :  { %v2575_v49 = vadd.f32 %v9557_v5, %v2574_v47  ;;  %v7344_v28 = vpop.f32.mrb[58].mxu0  ;;  %v3675_v63 = vpop.permute.xlu0 %3674  ;;  %v3755_v18 = vsel %vm1895_vm4, %v9477_v21, %v3231_v44 }
 0x32c   :  { %v2663_v54 = vmax.f32 %v2583_v45, 0.0  ;;  %v2586_v23 = vadd.f32 %v9557_v5, %v7344_v28  ;;  %v2577_v12 = vpop.f32.mrb[59].mxu0  ;;  %v4169_v50 = vsel %vm4116_vm0, %v4088_v24, %v3675_v63  ;;  %3642 = vrot.lane.b32.xlu1 %v9810_v39, %s7500_s25  ;;  %v2990_v45 = vld [vmem:[#allocation2 + $0x41] sm:$0xff] }
 0x32d   :  { %v2661_v42 = vmax.f32 %v2575_v49, 0.0  ;;  %v2578_v1 = vadd.f32 %v9557_v5, %v2577_v12  ;;  %3562 = vrot.lane.b32.xlu0 %v9813_v37, %s7499_s14  ;;  %4552 = vmatmul.mubr.bf16.gmra.mrb[48].mxu1 %v4169_v50  ;;  %v2989_v49 = vld [vmem:[#allocation2 + $0x39] sm:$0xff]  ;;  %v3054_v28 = vsel %vm2739_vm10, %v2990_v45, 0.0  ;;  %v2746_v24 = vld [vmem:[#allocation2 + $0x47] sm:$0xff] }
 0x32e   :  { %2727 = vst.msk [vmem:[#allocation2 + $0x1e8] sm:$0xff] %vm1895_vm4, %v2663_v54  ;;  %v2664_v7 = vmax.f32 %v2586_v23, 0.0  ;;  %7136 = vmatprep.mubr.msk.bf16.mxu1 %vm1895_vm4, %v9579_v57  ;;  %v3419_v17 = vpop.permute.xlu1 %3418  ;;  %v9865_v54 = vpack.c.bf16 %v3054_v28, %v2989_v49  ;;  %v2810_v12 = vsel %vm2736_vm11, %v2746_v24, 0.0 }
 0x32f   :  { %2725 = vst.msk [vmem:[#allocation2 + $0x1d8] sm:$0xff] %vm1895_vm4, %v2661_v42  ;;  %v2662_v31 = vmax.f32 %v2578_v1, 0.0  ;;  %v3323_v48 = vpop.permute.xlu0 %3322 }
 0x330   :  { %2728 = vst.msk [vmem:[#allocation2 + $0x1f0] sm:$0xff] %vm1895_vm4, %v2664_v7  ;;  %v3830_v29 = vsel %vm2155_vm8, %v3755_v18, %v3323_v48  ;;  %3200 = vrot.lane.b32.xlu1 %v9736_v0, %s7490_s23  ;;  %v2901_v48 = vld [vmem:[#allocation2 + $0x48] sm:$0xff] }
 0x331   :  { %2726 = vst.msk [vmem:[#allocation2 + $0x1e0] sm:$0xff] %vm1895_vm4, %v2662_v31  ;;  %3626 = vrot.lane.b32.xlu0 %v9831_v8, %s7498_s13  ;;  %v3895_v21 = vsel %vm3857_vm12, %v3830_v29, %v3419_v17  ;;  %v3098_v31 = vsel %vm2739_vm10, %v3034_v13, 0.0  ;;  %v2790_v29 = vld [vmem:[#allocation2 + $0x1b7] sm:$0xff]  ;;  %v9885_v35 = vpack.c.bf16 %v2902_v6, %v2901_v48 }
 0x332   :  { %v3551_v57 = vpop.permute.xlu1 %3550 }
 0x333   :  { %v3485_v25 = vpop.permute.xlu0 %3484 }
 0x334   :  { %v3960_v14 = vsel %vm3922_vm13, %v3895_v21, %v3485_v25  ;;  %3292 = vrot.lane.b32.xlu1 %v9363_v34, %s7494_s1 }
 0x335   :  { %3688 = vrot.lane.b32.xlu0 %v9841_v2, %s7500_s25  ;;  %v4025_v4 = vsel %vm3987_vm14, %v3960_v14, %v3551_v57  ;;  %v3033_v57 = vld [vmem:[#allocation2 + $0x1a9] sm:$0xff] }
 0x336   :  { %v3677_v0 = vpop.permute.xlu1 %3676  ;;  %v9887_v25 = vpack.c.bf16 %v3098_v31, %v3033_v57 }
 0x337   :  { %v3615_v22 = vpop.permute.xlu0 %3614 }
 0x338   :  { %v4090_v33 = vsel %vm4052_vm15, %v4025_v4, %v3615_v22  ;;  %3386 = vrot.lane.b32.xlu1 %v9799_v53, %s7497_s10  ;;  %v2791_v4 = vld [vmem:[#allocation2 + $0x1bf] sm:$0xff]  ;;  %v2854_v22 = vsel %vm2736_vm11, %v2790_v29, 0.0 }
 0x339   :  { %3244 = vrot.lane.b32.xlu0 %v9769_v40, %s7490_s23  ;;  %v4172_v47 = vsel %vm4116_vm0, %v4090_v33, %v3677_v0  ;;  %v9903_v24 = vpack.c.bf16 %v2791_v4, %v2854_v22 }
 0x33a   :  { %4560 = vmatmul.mubr.bf16.gmra.mrb[52].mxu1 %v4172_v47  ;;  %v3325_v34 = vpop.permute.xlu1 %3324 }
 0x33b   :  { %v3233_v44 = vpop.permute.xlu0 %3232  ;;  %7137 = vmatprep.mubr.msk.bf16.mxu1 %vm1895_vm4, %v9602_v32 }
 0x33c   :  { %v3758_v63 = vsel %vm1895_vm4, %v9507_v51, %v3233_v44  ;;  %3452 = vrot.lane.b32.xlu1 %v9810_v39, %s7496_s29  ;;  %v2747_v51 = vld [vmem:[#allocation2 + $0x4f] sm:$0xff] }
 0x33d   :  { %3336 = vrot.lane.b32.xlu0 %v9813_v37, %s7494_s1  ;;  %v3832_v23 = vsel %vm2155_vm8, %v3758_v63, %v3325_v34  ;;  %v9875_v1 = vpack.c.bf16 %v2747_v51, %v2810_v12 }
 0x33e   :  { %v3487_v40 = vpop.permute.xlu1 %3486 }
 0x33f   :  { %v3421_v32 = vpop.permute.xlu0 %3420 }
 0x340   :  { %v3897_v50 = vsel %vm3857_vm12, %v3832_v23, %v3421_v32  ;;  %3518 = vrot.lane.b32.xlu1 %v9865_v54, %s7499_s14 }
 0x341   :  { %3432 = vrot.lane.b32.xlu0 %v9831_v8, %s7497_s10  ;;  %v3962_v7 = vsel %vm3922_vm13, %v3897_v50, %v3487_v40 }
 0x342   :  { %v3617_v42 = vpop.permute.xlu1 %3616 }
 0x343   :  { %v3553_v17 = vpop.permute.xlu0 %3552 }
 0x344   :  { %v4027_v18 = vsel %vm3987_vm14, %v3962_v7, %v3553_v17  ;;  %3582 = vrot.lane.b32.xlu1 %v9875_v1, %s7498_s13 }
 0x345   :  { %3498 = vrot.lane.b32.xlu0 %v9841_v2, %s7496_s29  ;;  %v4092_v14 = vsel %vm4052_vm15, %v4027_v18, %v3617_v42  ;;  %v2945_v42 = vld [vmem:[#allocation2 + $0x1b8] sm:$0xff] }
 0x346   :  { %v3235_v62 = vpop.permute.xlu1 %3234 }
 0x347   :  { %v3679_v21 = vpop.permute.xlu0 %3678  ;;  %v3761_v44 = vsel %vm1895_vm4, %v9542_v43, %v3235_v62  ;;  %v2992_v62 = vld [vmem:[#allocation2 + $0x51] sm:$0xff] }
 0x348   :  { %v4175_v0 = vsel %vm4116_vm0, %v4092_v14, %v3679_v21  ;;  %3644 = vrot.lane.b32.xlu1 %v9885_v35, %s7500_s25 }
 0x349   :  { %v7347_v33 = vpop.f32.mrb[60].mxu0  ;;  %3564 = vrot.lane.b32.xlu0 %v9887_v25, %s7499_s14  ;;  %4568 = vmatmul.mubr.bf16.gmra.mrb[56].mxu1 %v4175_v0  ;;  %v3056_v0 = vsel %vm2739_vm10, %v2992_v62, 0.0 }
 0x34a   :  { %v2599_v45 = vadd.f32 %v9557_v5, %v7347_v33  ;;  %v2590_v47 = vpop.f32.mrb[61].mxu0  ;;  %7138 = vmatprep.mubr.msk.bf16.mxu1 %vm1895_vm4, %v9641_v60  ;;  %v3423_v34 = vpop.permute.xlu1 %3422  ;;  %v2946_v60 = vld [vmem:[#allocation2 + $0x1c0] sm:$0xff]  ;;  %v2991_v33 = vld [vmem:[#allocation2 + $0x49] sm:$0xff] }
 0x34b   :  { %v2591_v49 = vadd.f32 %v9557_v5, %v2590_v47  ;;  %v7348_v28 = vpop.f32.mrb[62].mxu0  ;;  %v3327_v63 = vpop.permute.xlu0 %3326  ;;  %v9915_v18 = vpack.c.bf16 %v2946_v60, %v2945_v42 }
 0x34c   :  { %v2667_v40 = vmax.f32 %v2599_v45, 0.0  ;;  %v2602_v23 = vadd.f32 %v9557_v5, %v7348_v28  ;;  %v3834_v32 = vsel %vm2155_vm8, %v3761_v44, %v3327_v63  ;;  %v2593_v12 = vpop.f32.mrb[63].mxu0  ;;  %3202 = vrot.lane.b32.xlu1 %v9810_v39, %s7490_s23 }
 0x34d   :  { %v2665_v50 = vmax.f32 %v2591_v49, 0.0  ;;  %v2594_v51 = vadd.f32 %v9557_v5, %v2593_v12  ;;  %3628 = vrot.lane.b32.xlu0 %v9903_v24, %s7498_s13  ;;  %v3899_v17 = vsel %vm3857_vm12, %v3834_v32, %v3423_v34  ;;  %v3035_v32 = vld [vmem:[#allocation2 + $0x1b9] sm:$0xff] }
 0x34e   :  { %2731 = vst.msk [vmem:[#allocation2 + $0x208] sm:$0xff] %vm1895_vm4, %v2667_v40  ;;  %v2668_v43 = vmax.f32 %v2602_v23, 0.0  ;;  %v3555_v13 = vpop.permute.xlu1 %3554 }
 0x34f   :  { %2729 = vst.msk [vmem:[#allocation2 + $0x1f8] sm:$0xff] %vm1895_vm4, %v2665_v50  ;;  %v2666_v7 = vmax.f32 %v2594_v51, 0.0  ;;  %v3489_v6 = vpop.permute.xlu0 %3488  ;;  %v2792_v50 = vld [vmem:[#allocation2 + $0x1c7] sm:$0xff] }
 0x350   :  { %2732 = vst.msk [vmem:[#allocation2 + $0x210] sm:$0xff] %vm1895_vm4, %v2668_v43  ;;  %v3964_v5 = vsel %vm3922_vm13, %v3899_v17, %v3489_v6  ;;  %3294 = vrot.lane.b32.xlu1 %v9865_v54, %s7494_s1 }
 0x351   :  { %2730 = vst.msk [vmem:[#allocation2 + $0x200] sm:$0xff] %vm1895_vm4, %v2666_v7  ;;  %3690 = vrot.lane.b32.xlu0 %v9915_v18, %s7500_s25  ;;  %v4029_v31 = vsel %vm3987_vm14, %v3964_v5, %v3555_v13  ;;  %v2856_v7 = vsel %vm2736_vm11, %v2792_v50, 0.0 }
 0x352   :  { %v3681_v39 = vpop.permute.xlu1 %3680 }
 0x353   :  { %v3619_v48 = vpop.permute.xlu0 %3618 }
 0x354   :  { %v4094_v29 = vsel %vm4052_vm15, %v4029_v31, %v3619_v48  ;;  %3388 = vrot.lane.b32.xlu1 %v9875_v1, %s7497_s10  ;;  %v2793_v31 = vld [vmem:[#allocation2 + $0x1cf] sm:$0xff] }
 0x355   :  { %3246 = vrot.lane.b32.xlu0 %v9841_v2, %s7490_s23  ;;  %v4178_v57 = vsel %vm4116_vm0, %v4094_v29, %v3681_v39  ;;  %v9977_v62 = vpack.c.bf16 %v2793_v31, %v2856_v7 }
 0x356   :  { %4576 = vmatmul.mubr.bf16.gmra.mrb[60].mxu1 %v4178_v57  ;;  %v3329_v21 = vpop.permute.xlu1 %3328 }
 0x357   :  { %v3237_v14 = vpop.permute.xlu0 %3236  ;;  %7139 = vmatprep.mubr.msk.bf16.mxu1 %vm1895_vm4, %v9668_v46  ;;  %v9945_v46 = vpack.c.bf16 %v3056_v0, %v2991_v33 }
 0x358   :  { %v9935_v4 = vpop.f32.mrb[0].mxu1  ;;  %3454 = vrot.lane.b32.xlu1 %v9885_v35, %s7496_s29  ;;  %v3764_v22 = vsel %vm1895_vm4, %v9575_v20, %v3237_v14  ;;  %v3036_v20 = vld [vmem:[#allocation2 + $0x1c1] sm:$0xff]  ;;  %v2948_v14 = vld [vmem:[#allocation2 + $0x1d0] sm:$0xff] }
 0x359   :  { %3338 = vrot.lane.b32.xlu0 %v9887_v25, %s7494_s1  ;;  %v4459_v2 = vpop.f32.mrb[1].mxu1  ;;  %v3836_v49 = vsel %vm2155_vm8, %v3764_v22, %v3329_v21  ;;  %v3100_v12 = vsel %vm2739_vm10, %v3036_v20, 0.0 }
 0x35a   :  { %v9943_v45 = vpop.f32.mrb[2].mxu1  ;;  %v3491_v47 = vpop.permute.xlu1 %3490  ;;  %v9961_v13 = vpack.c.bf16 %v3100_v12, %v3035_v32 }
 0x35b   :  { %v3425_v34 = vpop.permute.xlu0 %3424  ;;  %v4462_v44 = vpop.f32.mrb[3].mxu1 }
 0x35c   :  { %3520 = vrot.lane.b32.xlu1 %v9945_v46, %s7499_s14  ;;  %v3901_v28 = vsel %vm3857_vm12, %v3836_v49, %v3425_v34 }
 0x35d   :  { %3434 = vrot.lane.b32.xlu0 %v9903_v24, %s7497_s10  ;;  %v3966_v23 = vsel %vm3922_vm13, %v3901_v28, %v3491_v47 }
 0x35e   :  { %v3621_v63 = vpop.permute.xlu1 %3620 }
 0x35f   :  { %v3557_v40 = vpop.permute.xlu0 %3556 }
 0x360   :  { %3584 = vrot.lane.b32.xlu1 %v9366_v11, %s7498_s13  ;;  %v4031_v60 = vsel %vm3987_vm14, %v3966_v23, %v3557_v40 }
 0x361   :  { %3500 = vrot.lane.b32.xlu0 %v9915_v18, %s7496_s29  ;;  %v4096_v42 = vsel %vm4052_vm15, %v4031_v60, %v3621_v63  ;;  %v3038_v60 = vld [vmem:[#allocation2 + $0x1d1] sm:$0xff] }
 0x362   :  { %v3239_v51 = vpop.permute.xlu1 %3238 }
 0x363   :  { %v3683_v43 = vpop.permute.xlu0 %3682  ;;  %v3767_v57 = vsel %vm1895_vm4, %v9613_v26, %v3239_v51  ;;  %v2794_v51 = vld [vmem:[#allocation2 + $0x1d7] sm:$0xff] }
 0x364   :  { %3646 = vrot.lane.b32.xlu1 %v9045_v61, %s7500_s25  ;;  %v4181_v6 = vsel %vm4116_vm0, %v4096_v42, %v3683_v43  ;;  %v3037_v42 = vld [vmem:[#allocation2 + $0x1c9] sm:$0xff] }
 0x365   :  { %3566 = vrot.lane.b32.xlu0 %v9961_v13, %s7499_s14  ;;  %v9970_v17 = vpop.f32.mrb[4].mxu1  ;;  %4584 = vmatmul.mubr.bf16.gmra.mrb[64].mxu1 %v4181_v6 }
 0x366   :  { %v4467_v5 = vpop.f32.mrb[5].mxu1  ;;  %v3427_v39 = vpop.permute.xlu1 %3426  ;;  %7140 = vmatprep.mubr.msk.bf16.mxu1 %vm1895_vm4, %v9741_v3  ;;  %v2947_v3 = vld [vmem:[#allocation2 + $0x1c8] sm:$0xff] }
 0x367   :  { %v3331_v48 = vpop.permute.xlu0 %3330  ;;  %v9975_v29 = vpop.f32.mrb[6].mxu1  ;;  %v9986_v33 = vpack.c.bf16 %v2948_v14, %v2947_v3  ;;  %v10036_v14 = vld [vmem:[%s11015_s4] ss:$0 sm:$0xff] }
 0x368   :  { %v4470_v21 = vpop.f32.mrb[7].mxu1  ;;  %3204 = vrot.lane.b32.xlu1 %v9885_v35, %s7490_s23  ;;  %v3838_v0 = vsel %vm2155_vm8, %v3767_v57, %v3331_v48  ;;  %v2858_v48 = vsel %vm2736_vm11, %v2794_v51, 0.0 }
 0x369   :  { %3630 = vrot.lane.b32.xlu0 %v9977_v62, %s7498_s13  ;;  %v3903_v47 = vsel %vm3857_vm12, %v3838_v0, %v3427_v39  ;;  %v2950_v39 = vld [vmem:[#allocation2 + $0x1e0] sm:$0xff] }
 0x36a   :  { %v3559_v22 = vpop.permute.xlu1 %3558 }
 0x36b   :  { %v3493_v2 = vpop.permute.xlu0 %3492 }
 0x36c   :  { %3296 = vrot.lane.b32.xlu1 %v9945_v46, %s7494_s1  ;;  %v3968_v26 = vsel %vm3922_vm13, %v3903_v47, %v3493_v2 }
 0x36d   :  { %3692 = vrot.lane.b32.xlu0 %v9986_v33, %s7500_s25  ;;  %v4033_v44 = vsel %vm3987_vm14, %v3968_v26, %v3559_v22 }
 0x36e   :  { %v3685_v35 = vpop.permute.xlu1 %3684 }
 0x36f   :  { %v3623_v34 = vpop.permute.xlu0 %3622 }
 0x370   :  { %3390 = vrot.lane.b32.xlu1 %v9366_v11, %s7497_s10  ;;  %v4098_v49 = vsel %vm4052_vm15, %v4033_v44, %v3623_v34 }
 0x371   :  { %3248 = vrot.lane.b32.xlu0 %v9915_v18, %s7490_s23  ;;  %v4184_v20 = vsel %vm4116_vm0, %v4098_v49, %v3685_v35 }
 0x372   :  { %v3383_v28 = vpop.permute.xlu1 %3382  ;;  %4592 = vmatmul.mubr.bf16.gmra.mrb[68].mxu1 %v4184_v20 }
 0x373   :  { %v3241_v63 = vpop.permute.xlu0 %3240  ;;  %7141 = vmatprep.mubr.msk.bf16.mxu1 %vm1895_vm4, %v9813_v37  ;;  %v3102_v37 = vsel %vm2739_vm10, %v3038_v60, 0.0  ;;  %v3859_v7 = vsel %vm3857_vm12, %v9761_v16, %v3383_v28  ;;  %v2949_v16 = vld [vmem:[#allocation2 + $0x1d8] sm:$0xff] }
 0x374   :  { %v10001_v40 = vpop.f32.mrb[8].mxu1  ;;  %3456 = vrot.lane.b32.xlu1 %v9045_v61, %s7496_s29  ;;  %v10023_v5 = vpack.c.bf16 %v3102_v37, %v3037_v42  ;;  %v10039_v3 = vpack.c.bf16 %v2950_v39, %v2949_v16 }
 0x375   :  { %3340 = vrot.lane.b32.xlu0 %v9961_v13, %s7494_s1  ;;  %v4475_v11 = vpop.f32.mrb[9].mxu1 }
 0x376   :  { %v10009_v23 = vpop.f32.mrb[10].mxu1  ;;  %v3449_v18 = vpop.permute.xlu1 %3448  ;;  %v3770_v11 = vsel %vm1895_vm4, %v9637_v41, %v3241_v63  ;;  %v3040_v41 = vld [vmem:[#allocation2 + $0x1e1] sm:$0xff] }
 0x377   :  { %11022 = vst [vmem:[#allocation6_spill] sm:$0xff] %v10009_v23  ;;  %v3333_v32 = vpop.permute.xlu0 %3332  ;;  %v4478_v12 = vpop.f32.mrb[11].mxu1  ;;  %v3924_v31 = vsel %vm3922_vm13, %v3859_v7, %v3449_v18 }
 0x378   :  { %3522 = vrot.lane.b32.xlu1 %v9041_v58, %s7499_s14  ;;  %v3840_v37 = vsel %vm2155_vm8, %v3770_v11, %v3333_v32 }
 0x379   :  { %3436 = vrot.lane.b32.xlu0 %v9977_v62, %s7497_s10 }
 0x37a   :  { %v3515_v61 = vpop.permute.xlu1 %3514 }
 0x37b   :  { %v3429_v50 = vpop.permute.xlu0 %3428  ;;  %v3989_v57 = vsel %vm3987_vm14, %v3924_v31, %v3515_v61 }
 0x37c   :  { %3586 = vrot.lane.b32.xlu1 %v9062_v19, %s7498_s13  ;;  %v2795_v19 = vld [vmem:[#allocation2 + $0x1df] sm:$0xff]  ;;  %v3905_v42 = vsel %vm3857_vm12, %v3840_v37, %v3429_v50 }
 0x37d   :  { %3502 = vrot.lane.b32.xlu0 %v9986_v33, %s7496_s29  ;;  %v10043_v34 = vpack.c.bf16 %v2795_v19, %v2858_v48 }
 0x37e   :  { %v3579_v43 = vpop.permute.xlu1 %3578 }
 0x37f   :  { %v3495_v6 = vpop.permute.xlu0 %3494  ;;  %v4054_v0 = vsel %vm4052_vm15, %v3989_v57, %v3579_v43  ;;  %v2796_v43 = vld [vmem:[#allocation2 + $0x1e7] sm:$0xff] }
 0x380   :  { %3648 = vrot.lane.b32.xlu1 %v9060_v9, %s7500_s25  ;;  %v3970_v63 = vsel %vm3922_vm13, %v3905_v42, %v3495_v6  ;;  %v2860_v50 = vsel %vm2736_vm11, %v2796_v43, 0.0  ;;  %v3104_v6 = vsel %vm2739_vm10, %v3040_v41, 0.0 }
 0x381   :  { %3568 = vrot.lane.b32.xlu0 %v10023_v5, %s7499_s14  ;;  %v4481_v21 = vpop.f32.mrb[12].mxu1 }
 0x382   :  { %v4483_v22 = vpop.f32.mrb[13].mxu1  ;;  %v3641_v9 = vpop.permute.xlu1 %3640  ;;  %v4482_v2 = vadd.f32 %v10036_v14, %v4481_v21 }
 0x383   :  { %v3561_v47 = vpop.permute.xlu0 %3560  ;;  %v4484_v26 = vpop.f32.mrb[14].mxu1  ;;  %v4118_v35 = vsel %vm4116_vm0, %v4054_v0, %v3641_v9 }
 0x384   :  { %v4486_v44 = vpop.f32.mrb[15].mxu1  ;;  %3694 = vrot.lane.b32.xlu1 %v10039_v3, %s7500_s25  ;;  %4416 = vmatmul.mubr.bf16.vlgmr.msra.gmra.mrb[64].mxu0 %v4118_v35  ;;  %v4688_v49 = vmax.f32 %v4482_v2, 0.0  ;;  %v4485_v28 = vadd.f32 %v10036_v14, %v4484_v26  ;;  %v4035_v19 = vsel %vm3987_vm14, %v3970_v63, %v3561_v47  ;;  %v2797_v47 = vld [vmem:[#allocation2 + $0x1ef] sm:$0xff] }
 0x385   :  { %3632 = vrot.lane.b32.xlu0 %v10043_v34, %s7498_s13  ;;  %7120 = vmatprep.mubr.msk.bf16.mxu0 %vm1895_vm4, %v9865_v54  ;;  %v10076_v35 = vpack.c.bf16 %v2797_v47, %v2860_v50  ;;  %v3042_v44 = vld [vmem:[#allocation2 + $0x1f1] sm:$0xff] }
 0x386   :  { %v3199_v20 = vpop.permute.xlu1 %3198  ;;  %v4793_v18 = vsel %vm4736_vm1, %v4688_v49, 0.0  ;;  %v5001_v12 = vrot.slane %v4688_v49, 4  ;;  %v4689_v60 = vmax.f32 %v4485_v28, 0.0 }
 0x387   :  { %v3625_v61 = vpop.permute.xlu0 %3624  ;;  %v4794_v51 = vrot.slane %v4793_v18, 4 }
 0x388   :  { %3342 = vrot.lane.b32.xlu1 %v10023_v5, %s7494_s1  ;;  %v5113_v54 = vsel %vm4736_vm1, %v5001_v12, 0.0  ;;  %v5337_v7 = vsel %vm4736_vm1, %v4689_v60, 0.0  ;;  %v5545_v39 = vrot.slane %v4689_v60, 4  ;;  %v4100_v22 = vsel %vm4052_vm15, %v4035_v19, %v3625_v61  ;;  %v2798_v12 = vld [vmem:[#allocation2 + $0x1f7] sm:$0xff] }
 0x389   :  { %3250 = vrot.lane.b32.xlu0 %v9986_v33, %s7490_s23  ;;  %v5114_v31 = vrot.slane %v5113_v54, 4  ;;  %v5338_v48 = vrot.slane %v5337_v7, 4  ;;  %v4795_v16 = vadd.f32 %v4794_v51, %v4793_v18  ;;  %v3039_v33 = vld [vmem:[#allocation2 + $0x1d9] sm:$0xff]  ;;  %v2952_v18 = vld [vmem:[#allocation2 + $0x1f0] sm:$0xff]  ;;  %v2862_v63 = vsel %vm2736_vm11, %v2798_v12, 0.0 }
 0x38a   :  { %v3291_v32 = vpop.permute.xlu1 %3290  ;;  %v5657_v57 = vsel %vm4736_vm1, %v5545_v39, 0.0  ;;  %v10082_v11 = vpack.c.bf16 %v3104_v6, %v3039_v33  ;;  %v3707_v19 = vsel %vm1895_vm4, %v9690_v36, %v3199_v20  ;;  %v2799_v33 = vld [vmem:[#allocation2 + $0x1ff] sm:$0xff] }
 0x38b   :  { %v3687_v21 = vpop.permute.xlu0 %3686  ;;  %v5115_v0 = vadd.f32 %v5114_v31, %v5113_v54  ;;  %v5658_v9 = vrot.slane %v5657_v57, 4  ;;  %v5339_v49 = vadd.f32 %v5338_v48, %v5337_v7  ;;  %v4796_v60 = vrot.slane %v4795_v16, 2  ;;  %v2954_v6 = vld [vmem:[#allocation2 + $0x200] sm:$0xff] }
 0x38c   :  { %3504 = vrot.lane.b32.xlu1 %v10039_v3, %s7496_s29  ;;  %v4187_v2 = vsel %vm4116_vm0, %v4100_v22, %v3687_v21  ;;  %v3106_v54 = vsel %vm2739_vm10, %v3042_v44, 0.0  ;;  %v3041_v22 = vld [vmem:[#allocation2 + $0x1e9] sm:$0xff]  ;;  %v3798_v47 = vsel %vm2155_vm8, %v3707_v19, %v3291_v32 }
 0x38d   :  { %3438 = vrot.lane.b32.xlu0 %v10043_v34, %s7497_s10  ;;  %4600 = vmatmul.mubr.bf16.gmra.mrb[72].mxu1 %v4187_v2  ;;  %v5116_v61 = vrot.slane %v5115_v0, 2  ;;  %v5659_v51 = vadd.f32 %v5658_v9, %v5657_v57  ;;  %v5340_v31 = vrot.slane %v5339_v49, 2  ;;  %v4797_v9 = vadd.f32 %v4796_v60, %v4795_v16 }
 0x38e   :  { %v3385_v26 = vpop.permute.xlu1 %3384  ;;  %7142 = vmatprep.mubr.msk.bf16.mxu1 %vm1895_vm4, %v9887_v25  ;;  %v2951_v25 = vld [vmem:[#allocation2 + $0x1e8] sm:$0xff]  ;;  %v10103_v44 = vpack.c.bf16 %v3106_v54, %v3041_v22  ;;  %v10109_v60 = vpack.c.bf16 %v2799_v33, %v2862_v63 }
 0x38f   :  { %v10080_v28 = vpop.permute.xlu0 %3242  ;;  %v10091_v41 = vpack.c.bf16 %v2952_v18, %v2951_v25  ;;  %v5117_v2 = vadd.f32 %v5116_v61, %v5115_v0  ;;  %v5660_v18 = vrot.slane %v5659_v51, 2 }
 0x390   :  { %v4489_v37 = vpop.f32.mrb[16].mxu1  ;;  %3634 = vrot.lane.b32.xlu1 %v10076_v35, %s7498_s13 }
 0x391   :  { %v4490_v43 = vadd.f32 %v10036_v14, %v4489_v37  ;;  %3570 = vrot.lane.b32.xlu0 %v10082_v11, %s7499_s14  ;;  %v4491_v42 = vpop.f32.mrb[17].mxu1  ;;  %v2953_v37 = vld [vmem:[#allocation2 + $0x1f8] sm:$0xff]  ;;  %v5118_v63 = vrot.slane %v5117_v2, 1 }
 0x392   :  { %v4492_v7 = vpop.f32.mrb[18].mxu1  ;;  %v3451_v39 = vpop.permute.xlu1 %3450  ;;  %v10111_v32 = vpack.c.bf16 %v2954_v6, %v2953_v37 }
 0x393   :  { %v4690_v48 = vmax.f32 %v4490_v43, 0.0  ;;  %v4493_v57 = vadd.f32 %v10036_v14, %v4492_v7  ;;  %v10098_v21 = vpop.permute.xlu0 %3334  ;;  %v4494_v50 = vpop.f32.mrb[19].mxu1  ;;  %v3861_v43 = vsel %vm3857_vm12, %v3798_v47, %v3385_v26  ;;  %v4798_v7 = vrot.slane %v4797_v9, 1  ;;  %v3141_v26 = vld [vmem:[#allocation2 + $0x207] sm:$0xff] }
 0x394   :  { %3252 = vrot.lane.b32.xlu1 %v10039_v3, %s7490_s23  ;;  %v5341_v3 = vadd.f32 %v5340_v31, %v5339_v49  ;;  %v5661_v50 = vadd.f32 %v5660_v18, %v5659_v51  ;;  %v3926_v49 = vsel %vm3922_vm13, %v3861_v43, %v3451_v39  ;;  %v10127_v18 = vsel %vm2736_vm11, %v3141_v26, 0.0 }
 0x395   :  { %v4800_v36 = vsel %vm4736_vm1, %v4690_v48, 0.0  ;;  %v5002_v20 = vrot.slane %v4690_v48, 4  ;;  %v4691_v12 = vmax.f32 %v4493_v57, 0.0  ;;  %3696 = vrot.lane.b32.xlu0 %v10091_v41, %s7500_s25  ;;  %vm6673_vm11 = vcmask 33792  }
 0x396   :  { %v4801_v16 = vrot.slane %v4800_v36, 4  ;;  %v3517_v0 = vpop.permute.xlu1 %3516 }
 0x397   :  { %v5120_v61 = vsel %vm4736_vm1, %v5002_v20, 0.0  ;;  %v5344_v42 = vsel %vm4736_vm1, %v4691_v12, 0.0  ;;  %v5546_v25 = vrot.slane %v4691_v12, 4  ;;  %v3431_v54 = vpop.permute.xlu0 %3430  ;;  %v5342_v20 = vrot.slane %v5341_v3, 1 }
 0x398   :  { %v4802_v19 = vadd.f32 %v4801_v16, %v4800_v36  ;;  %v5121_v48 = vrot.slane %v5120_v61, 4  ;;  %v5345_v57 = vrot.slane %v5344_v42, 4  ;;  %3440 = vrot.lane.b32.xlu1 %v10076_v35, %s7497_s10  ;;  %v3773_v12 = vsel %vm1895_vm4, %v9681_v56, %v10080_v28 }
 0x399   :  { %v5664_v22 = vsel %vm4736_vm1, %v5546_v25, 0.0  ;;  %3344 = vrot.lane.b32.xlu0 %v10082_v11, %s7494_s1  ;;  %v3991_v37 = vsel %vm3987_vm14, %v3926_v49, %v3517_v0 }
 0x39a   :  { %v4803_v31 = vrot.slane %v4802_v19, 2  ;;  %v5122_v33 = vadd.f32 %v5121_v48, %v5120_v61  ;;  %v5346_v6 = vadd.f32 %v5345_v57, %v5344_v42  ;;  %v5665_v47 = vrot.slane %v5664_v22, 4  ;;  %v3581_v36 = vpop.permute.xlu1 %3580 }
 0x39b   :  { %v3497_v51 = vpop.permute.xlu0 %3496  ;;  %v4799_v61 = vadd.f32 %v4798_v7, %v4797_v9  ;;  %v5119_v42 = vadd.f32 %v5118_v63, %v5117_v2  ;;  %v5662_v48 = vrot.slane %v5661_v50, 1  ;;  %v4056_v57 = vsel %vm4052_vm15, %v3991_v37, %v3581_v36 }
 0x39c   :  { %v4804_v39 = vadd.f32 %v4803_v31, %v4802_v19  ;;  %v5123_v43 = vrot.slane %v5122_v33, 2  ;;  %v5347_v16 = vrot.slane %v5346_v6, 2  ;;  %v5666_v25 = vadd.f32 %v5665_v47, %v5664_v22  ;;  %3572 = vrot.lane.b32.xlu1 %v10103_v44, %s7499_s14 }
 0x39d   :  { %3506 = vrot.lane.b32.xlu0 %v10091_v41, %s7496_s29  ;;  %v4497_v56 = vpop.f32.mrb[20].mxu1  ;;  %v5343_v31 = vadd.f32 %v5342_v20, %v5341_v3  ;;  %v3842_v22 = vsel %vm2155_vm8, %v3773_v12, %v10098_v21 }
 0x39e   :  { %v4805_v28 = vrot.slane %v4804_v39, 1  ;;  %v5124_v59 = vadd.f32 %v5123_v43, %v5122_v33  ;;  %v5348_v0 = vadd.f32 %v5347_v16, %v5346_v6  ;;  %v5667_v26 = vrot.slane %v5666_v25, 2  ;;  %v4499_v19 = vpop.f32.mrb[21].mxu1  ;;  %v3643_v49 = vpop.permute.xlu1 %3642 }
 0x39f   :  { %v4498_v9 = vadd.f32 %v10036_v14, %v4497_v56  ;;  %v3563_v2 = vpop.permute.xlu0 %3562  ;;  %v4500_v7 = vpop.f32.mrb[22].mxu1  ;;  %v4121_v63 = vsel %vm4116_vm0, %v4056_v57, %v3643_v49  ;;  %v5663_v33 = vadd.f32 %v5662_v48, %v5661_v50  ;;  %v3907_v3 = vsel %vm3857_vm12, %v3842_v22, %v3431_v54 }
 0x3a0   :  { %v4806_v47 = vadd.f32 %v4805_v28, %v4804_v39  ;;  %v5125_v36 = vrot.slane %v5124_v59, 1  ;;  %v5349_v37 = vrot.slane %v5348_v0, 1  ;;  %v5668_v30 = vadd.f32 %v5667_v26, %v5666_v25  ;;  %v4502_v23 = vpop.f32.mrb[23].mxu1  ;;  %3698 = vrot.lane.b32.xlu1 %v10111_v32, %s7500_s25  ;;  %4424 = vmatmul.mubr.bf16.gmra.mrb[68].mxu0 %v4121_v63  ;;  %v3044_v28 = vld [vmem:[#allocation2 + $0x201] sm:$0xff] }
 0x3a1   :  { %v4692_v6 = vmax.f32 %v4498_v9, 0.0  ;;  %v4501_v21 = vadd.f32 %v10036_v14, %v4500_v7  ;;  %3636 = vrot.lane.b32.xlu0 %v10109_v60, %s7498_s13  ;;  %7121 = vmatprep.mubr.msk.bf16.mxu0 %vm1895_vm4, %v9945_v46  ;;  %v3972_v50 = vsel %vm3922_vm13, %v3907_v3, %v3497_v51 }
 0x3a2   :  { %v5126_v20 = vadd.f32 %v5125_v36, %v5124_v59  ;;  %v10147_v12 = vsel %vm5857_vm2, %v4806_v47, %v4799_v61  ;;  %v5350_v23 = vadd.f32 %v5349_v37, %v5348_v0  ;;  %v5669_v39 = vrot.slane %v5668_v30, 1  ;;  %v10149_v43 = vpop.permute.xlu1 %3200 }
 0x3a3   :  { %v4807_v54 = vsel %vm4736_vm1, %v4692_v6, 0.0  ;;  %v5003_v16 = vrot.slane %v4692_v6, 4  ;;  %v4693_v25 = vmax.f32 %v4501_v21, 0.0  ;;  %v3627_v48 = vpop.permute.xlu0 %3626  ;;  %v4037_v51 = vsel %vm3987_vm14, %v3972_v50, %v3563_v2 }
 0x3a4   :  { %v10154_v57 = vsel %vm5857_vm2, %v5126_v20, %v5119_v42  ;;  %v5670_v56 = vadd.f32 %v5669_v39, %v5668_v30  ;;  %v10157_v46 = vsel %vm5857_vm2, %v5350_v23, %v5343_v31  ;;  %v4808_v61 = vrot.slane %v4807_v54, 4  ;;  %3346 = vrot.lane.b32.xlu1 %v10103_v44, %s7494_s1 }
 0x3a5   :  { %v5127_v59 = vsel %vm4736_vm1, %v5003_v16, 0.0  ;;  %v5351_v0 = vsel %vm4736_vm1, %v4693_v25, 0.0  ;;  %v5547_v26 = vrot.slane %v4693_v25, 4  ;;  %3254 = vrot.lane.b32.xlu0 %v10091_v41, %s7490_s23  ;;  %v4102_v9 = vsel %vm4052_vm15, %v4037_v51, %v3627_v48  ;;  %v3043_v41 = vld [vmem:[#allocation2 + $0x1f9] sm:$0xff]  ;;  %v3158_v51 = vld [vmem:[#allocation2 + $0x211] sm:$0xff] }
 0x3a6   :  { %v10167_v30 = vsel %vm5857_vm2, %v5670_v56, %v5663_v33  ;;  %v4809_v42 = vadd.f32 %v4808_v61, %v4807_v54  ;;  %v5128_v19 = vrot.slane %v5127_v59, 4  ;;  %v5352_v49 = vrot.slane %v5351_v0, 4  ;;  %v3293_v31 = vpop.permute.xlu1 %3292  ;;  %v3142_v33 = vld [vmem:[#allocation2 + $0x20f] sm:$0xff] }
 0x3a7   :  { %v5671_v22 = vsel %vm4736_vm1, %v5547_v26, 0.0  ;;  %v3689_v7 = vpop.permute.xlu0 %3688  ;;  %v3108_v2 = vsel %vm2739_vm10, %v3044_v28, 0.0  ;;  %v3148_v6 = vpack.c.bf16 %v3142_v33, %v10127_v18  ;;  %v3152_v54 = vld [vmem:[#allocation2 + $0x210] sm:$0xff]  ;;  %v3151_v18 = vld [vmem:[#allocation2 + $0x208] sm:$0xff] }
 0x3a8   :  { %v4810_v63 = vrot.slane %v4809_v42, 2  ;;  %v5129_v47 = vadd.f32 %v5128_v19, %v5127_v59  ;;  %v5353_v36 = vadd.f32 %v5352_v49, %v5351_v0  ;;  %v5672_v37 = vrot.slane %v5671_v22, 4  ;;  %3508 = vrot.lane.b32.xlu1 %v10111_v32, %s7496_s29 }
 0x3a9   :  { %3442 = vrot.lane.b32.xlu0 %v10109_v60, %s7497_s10  ;;  %v4190_v3 = vsel %vm4116_vm0, %v4102_v9, %v3689_v7  ;;  %v10183_v25 = vpack.c.bf16 %v3108_v2, %v3043_v41  ;;  %v3154_v26 = vpack.c.bf16 %v3152_v54, %v3151_v18  ;;  %v3710_v2 = vsel %vm1895_vm4, %v9722_v52, %v10149_v43 }
 0x3aa   :  { %v4811_v21 = vadd.f32 %v4810_v63, %v4809_v42  ;;  %v5130_v20 = vrot.slane %v5129_v47, 2  ;;  %v5354_v23 = vrot.slane %v5353_v36, 2  ;;  %v5673_v39 = vadd.f32 %v5672_v37, %v5671_v22  ;;  %4608 = vmatmul.mubr.bf16.gmra.mrb[76].mxu1 %v4190_v3  ;;  %v3387_v50 = vpop.permute.xlu1 %3386 }
 0x3ab   :  { %7143 = vmatprep.mubr.msk.bf16.mxu1 %vm1895_vm4, %v9961_v13  ;;  %v10181_v16 = vpop.permute.xlu0 %3244  ;;  %v3162_v41 = vsel %vm2739_vm10, %v3158_v51, 0.0  ;;  %v3800_v52 = vsel %vm2155_vm8, %v3710_v2, %v3293_v31  ;;  %vm5869_vm10 = vcmask 1047559  }
 0x3ac   :  { %v4812_v48 = vrot.slane %v4811_v21, 1  ;;  %v5131_v56 = vadd.f32 %v5130_v20, %v5129_v47  ;;  %v5355_v61 = vadd.f32 %v5354_v23, %v5353_v36  ;;  %v5674_v28 = vrot.slane %v5673_v39, 2  ;;  %v4505_v59 = vpop.f32.mrb[24].mxu1  ;;  %3638 = vrot.lane.b32.xlu1 %v3148_v6, %s7498_s13 }
 0x3ad   :  { %v4506_v0 = vadd.f32 %v10036_v14, %v4505_v59  ;;  %3574 = vrot.lane.b32.xlu0 %v10183_v25, %s7499_s14  ;;  %v4507_v13 = vpop.f32.mrb[25].mxu1  ;;  %v3863_v31 = vsel %vm3857_vm12, %v3800_v52, %v3387_v50 }
 0x3ae   :  { %v4813_v42 = vadd.f32 %v4812_v48, %v4811_v21  ;;  %v5132_v19 = vrot.slane %v5131_v56, 1  ;;  %v5356_v49 = vrot.slane %v5355_v61, 1  ;;  %v5675_v22 = vadd.f32 %v5674_v28, %v5673_v39  ;;  %v4508_v9 = vpop.f32.mrb[26].mxu1  ;;  %v3453_v7 = vpop.permute.xlu1 %3452 }
 0x3af   :  { %v4694_v63 = vmax.f32 %v4506_v0, 0.0  ;;  %v4509_v47 = vadd.f32 %v10036_v14, %v4508_v9  ;;  %v3337_v36 = vpop.permute.xlu0 %3336  ;;  %v4510_v37 = vpop.f32.mrb[27].mxu1 }
 0x3b0   :  { %v5133_v33 = vadd.f32 %v5132_v19, %v5131_v56  ;;  %v10197_v3 = vsel %vm5859_vm3, %v4813_v42, %v10147_v12  ;;  %v5357_v21 = vadd.f32 %v5356_v49, %v5355_v61  ;;  %v5676_v20 = vrot.slane %v5675_v22, 1  ;;  %3256 = vrot.lane.b32.xlu1 %v10111_v32, %s7490_s23  ;;  %v3157_v32 = vld [vmem:[#allocation2 + $0x209] sm:$0xff] }
 0x3b1   :  { %v4814_v43 = vsel %vm4736_vm1, %v4694_v63, 0.0  ;;  %v5004_v23 = vrot.slane %v4694_v63, 4  ;;  %v4695_v39 = vmax.f32 %v4509_v47, 0.0  ;;  %3700 = vrot.lane.b32.xlu0 %v3154_v26, %s7500_s25  ;;  %v3928_v42 = vsel %vm3922_vm13, %v3863_v31, %v3453_v7 }
 0x3b2   :  { %v10206_v15 = vsel %vm5859_vm3, %v5133_v33, %v10154_v57  ;;  %v5677_v54 = vadd.f32 %v5676_v20, %v5675_v22  ;;  %v10210_v12 = vsel %vm5859_vm3, %v5357_v21, %v10157_v46  ;;  %v4815_v48 = vrot.slane %v4814_v43, 4  ;;  %v3519_v56 = vpop.permute.xlu1 %3518 }
 0x3b3   :  { %v5134_v61 = vsel %vm4736_vm1, %v5004_v23, 0.0  ;;  %v5358_v28 = vsel %vm4736_vm1, %v4695_v39, 0.0  ;;  %v5548_v59 = vrot.slane %v4695_v39, 4  ;;  %v3433_v18 = vpop.permute.xlu0 %3432  ;;  %v10224_v50 = vpack.c.bf16 %v3162_v41, %v3157_v32 }
 0x3b4   :  { %v10217_v57 = vsel %vm5859_vm3, %v5677_v54, %v10167_v30  ;;  %v4816_v51 = vadd.f32 %v4815_v48, %v4814_v43  ;;  %v5135_v0 = vrot.slane %v5134_v61, 4  ;;  %v5359_v13 = vrot.slane %v5358_v28, 4  ;;  %3444 = vrot.lane.b32.xlu1 %v3148_v6, %s7497_s10 }
 0x3b5   :  { %v5678_v46 = vsel %vm4736_vm1, %v5548_v59, 0.0  ;;  %3348 = vrot.lane.b32.xlu0 %v10183_v25, %s7494_s1  ;;  %v3993_v2 = vsel %vm3987_vm14, %v3928_v42, %v3519_v56  ;;  %v3776_v7 = vsel %vm1895_vm4, %v9758_v55, %v10181_v16 }
 0x3b6   :  { %v4817_v19 = vrot.slane %v4816_v51, 2  ;;  %v5136_v49 = vadd.f32 %v5135_v0, %v5134_v61  ;;  %v5360_v22 = vadd.f32 %v5359_v13, %v5358_v28  ;;  %v5679_v9 = vrot.slane %v5678_v46, 4  ;;  %v3583_v30 = vpop.permute.xlu1 %3582 }
 0x3b7   :  { %v3499_v63 = vpop.permute.xlu0 %3498  ;;  %v4058_v41 = vsel %vm4052_vm15, %v3993_v2, %v3583_v30  ;;  %v3844_v48 = vsel %vm2155_vm8, %v3776_v7, %v3337_v36 }
 0x3b8   :  { %v4818_v47 = vadd.f32 %v4817_v19, %v4816_v51  ;;  %v5137_v37 = vrot.slane %v5136_v49, 2  ;;  %v5361_v6 = vrot.slane %v5360_v22, 2  ;;  %v5680_v33 = vadd.f32 %v5679_v9, %v5678_v46  ;;  %3576 = vrot.lane.b32.xlu1 %v10224_v50, %s7499_s14 }
 0x3b9   :  { %3510 = vrot.lane.b32.xlu0 %v3154_v26, %s7496_s29  ;;  %v4513_v21 = vpop.f32.mrb[28].mxu1  ;;  %v3909_v51 = vsel %vm3857_vm12, %v3844_v48, %v3433_v18 }
 0x3ba   :  { %v4819_v20 = vrot.slane %v4818_v47, 1  ;;  %v5138_v52 = vadd.f32 %v5137_v37, %v5136_v49  ;;  %v5362_v43 = vadd.f32 %v5361_v6, %v5360_v22  ;;  %v5681_v23 = vrot.slane %v5680_v33, 2  ;;  %v4515_v39 = vpop.f32.mrb[29].mxu1  ;;  %v3645_v54 = vpop.permute.xlu1 %3644 }
 0x3bb   :  { %v4514_v56 = vadd.f32 %v10036_v14, %v4513_v21  ;;  %v3565_v32 = vpop.permute.xlu0 %3564  ;;  %v4516_v31 = vpop.f32.mrb[30].mxu1  ;;  %v4124_v55 = vsel %vm4116_vm0, %v4058_v41, %v3645_v54  ;;  %v3974_v22 = vsel %vm3922_vm13, %v3909_v51, %v3499_v63 }
 0x3bc   :  { %v4820_v16 = vadd.f32 %v4819_v20, %v4818_v47  ;;  %v5139_v61 = vrot.slane %v5138_v52, 1  ;;  %v5363_v28 = vrot.slane %v5362_v43, 1  ;;  %v5682_v26 = vadd.f32 %v5681_v23, %v5680_v33  ;;  %v4518_v59 = vpop.f32.mrb[31].mxu1  ;;  %4432 = vmatmul.mubr.bf16.gmra.mrb[72].mxu0 %v4124_v55 }
 0x3bd   :  { %v4696_v0 = vmax.f32 %v4514_v56, 0.0  ;;  %v4517_v13 = vadd.f32 %v10036_v14, %v4516_v31  ;;  %7122 = vmatprep.mubr.msk.bf16.mxu0 %vm1895_vm4, %v9041_v58  ;;  %v4039_v6 = vsel %vm3987_vm14, %v3974_v22, %v3565_v32 }
 0x3be   :  { %v5140_v36 = vadd.f32 %v5139_v61, %v5138_v52  ;;  %v10243_v46 = vsel %vm5861_vm5, %v4820_v16, %v10197_v3  ;;  %v5364_v42 = vadd.f32 %v5363_v28, %v5362_v43  ;;  %v5683_v19 = vrot.slane %v5682_v26, 1  ;;  %v3203_v49 = vpop.permute.xlu1 %3202 }
 0x3bf   :  { %v4821_v9 = vsel %vm4736_vm1, %v4696_v0, 0.0  ;;  %v5005_v30 = vrot.slane %v4696_v0, 4  ;;  %v4697_v18 = vmax.f32 %v4517_v13, 0.0  ;;  %v3629_v2 = vpop.permute.xlu0 %3628 }
 0x3c0   :  { %v5684_v47 = vadd.f32 %v5683_v19, %v5682_v26  ;;  %v4822_v37 = vrot.slane %v4821_v9, 4  ;;  %v5937_v58 = vsel %vm5861_vm5, %v5140_v36, %v10206_v15  ;;  %v6009_v63 = vsel %vm5861_vm5, %v5364_v42, %v10210_v12 }
 0x3c1   :  { %v5141_v3 = vsel %vm4736_vm1, %v5005_v30, 0.0  ;;  %v5365_v33 = vsel %vm4736_vm1, %v4697_v18, 0.0  ;;  %v5549_v7 = vrot.slane %v4697_v18, 4  ;;  %v4104_v39 = vsel %vm4052_vm15, %v4039_v6, %v3629_v2 }
 0x3c2   :  { %v4823_v41 = vadd.f32 %v4822_v37, %v4821_v9  ;;  %v5142_v21 = vrot.slane %v5141_v3, 4  ;;  %v5366_v20 = vrot.slane %v5365_v33, 4  ;;  %v3295_v52 = vpop.permute.xlu1 %3294  ;;  %v6081_v43 = vsel %vm5861_vm5, %v5684_v47, %v10217_v57 }
 0x3c3   :  { %v5685_v23 = vsel %vm4736_vm1, %v5549_v7, 0.0  ;;  %v3691_v15 = vpop.permute.xlu0 %3690 }
 0x3c4   :  { %v4824_v54 = vrot.slane %v4823_v41, 2  ;;  %v5143_v48 = vadd.f32 %v5142_v21, %v5141_v3  ;;  %v5367_v56 = vadd.f32 %v5366_v20, %v5365_v33  ;;  %v5686_v32 = vrot.slane %v5685_v23, 4 }
 0x3c5   :  { %v4193_v31 = vsel %vm4116_vm0, %v4104_v39, %v3691_v15 }
 0x3c6   :  { %v4825_v55 = vadd.f32 %v4824_v54, %v4823_v41  ;;  %v5144_v12 = vrot.slane %v5143_v48, 2  ;;  %v5368_v16 = vrot.slane %v5367_v56, 2  ;;  %v5687_v61 = vadd.f32 %v5686_v32, %v5685_v23  ;;  %4616 = vmatmul.mubr.bf16.gmra.mrb[80].mxu1 %v4193_v31  ;;  %v3389_v28 = vpop.permute.xlu1 %3388 }
 0x3c7   :  { %7144 = vmatprep.mubr.msk.bf16.mxu1 %vm1895_vm4, %v10023_v5  ;;  %v3247_v57 = vpop.permute.xlu0 %3246  ;;  %v3713_v41 = vsel %vm1895_vm4, %v9799_v53, %v3203_v49 }
 0x3c8   :  { %v4826_v26 = vrot.slane %v4825_v55, 1  ;;  %v5145_v59 = vadd.f32 %v5144_v12, %v5143_v48  ;;  %v5369_v51 = vadd.f32 %v5368_v16, %v5367_v56  ;;  %v5688_v0 = vrot.slane %v5687_v61, 2  ;;  %v4521_v13 = vpop.f32.mrb[32].mxu1 }
 0x3c9   :  { %v4522_v36 = vadd.f32 %v10036_v14, %v4521_v13  ;;  %v4523_v42 = vpop.f32.mrb[33].mxu1  ;;  %v3802_v31 = vsel %vm2155_vm8, %v3713_v41, %v3295_v52 }
 0x3ca   :  { %v4827_v19 = vadd.f32 %v4826_v26, %v4825_v55  ;;  %v5146_v22 = vrot.slane %v5145_v59, 1  ;;  %v5370_v9 = vrot.slane %v5369_v51, 1  ;;  %v5689_v30 = vadd.f32 %v5688_v0, %v5687_v61  ;;  %v4524_v18 = vpop.f32.mrb[34].mxu1  ;;  %v3455_v2 = vpop.permute.xlu1 %3454 }
 0x3cb   :  { %v4698_v47 = vmax.f32 %v4522_v36, 0.0  ;;  %v4525_v37 = vadd.f32 %v10036_v14, %v4524_v18  ;;  %v3339_v5 = vpop.permute.xlu0 %3338  ;;  %v4526_v6 = vpop.f32.mrb[35].mxu1  ;;  %v3865_v16 = vsel %vm3857_vm12, %v3802_v31, %v3389_v28  ;;  %v3779_v18 = vsel %vm1895_vm4, %v9831_v8, %v3247_v57 }
 0x3cc   :  { %v5147_v3 = vadd.f32 %v5146_v22, %v5145_v59  ;;  %v5371_v33 = vadd.f32 %v5370_v9, %v5369_v51  ;;  %v5690_v7 = vrot.slane %v5689_v30, 1  ;;  %v5874_v39 = vsel %vm5863_vm6, %v4827_v19, %v10243_v46 }
 0x3cd   :  { %v4828_v21 = vsel %vm4736_vm1, %v4698_v47, 0.0  ;;  %v5006_v20 = vrot.slane %v4698_v47, 4  ;;  %v4699_v23 = vmax.f32 %v4525_v37, 0.0  ;;  %v3846_v41 = vsel %vm2155_vm8, %v3779_v18, %v3339_v5 }
 0x3ce   :  { %v5691_v15 = vadd.f32 %v5690_v7, %v5689_v30  ;;  %v4829_v54 = vrot.slane %v4828_v21, 4  ;;  %v3521_v48 = vpop.permute.xlu1 %3520  ;;  %v10269_v56 = vsel %vm5863_vm6, %v5147_v3, %v5937_v58  ;;  %v10272_v32 = vsel %vm5863_vm6, %v5371_v33, %v6009_v63 }
 0x3cf   :  { %v5148_v53 = vsel %vm4736_vm1, %v5006_v20, 0.0  ;;  %v5372_v49 = vsel %vm4736_vm1, %v4699_v23, 0.0  ;;  %v5550_v55 = vrot.slane %v4699_v23, 4  ;;  %v3435_v12 = vpop.permute.xlu0 %3434  ;;  %v3930_v58 = vsel %vm3922_vm13, %v3865_v16, %v3455_v2 }
 0x3d0   :  { %v4830_v46 = vadd.f32 %v4829_v54, %v4828_v21  ;;  %v5149_v61 = vrot.slane %v5148_v53, 4  ;;  %v5373_v26 = vrot.slane %v5372_v49, 4  ;;  %v6082_v63 = vsel %vm5863_vm6, %v5691_v15, %v6081_v43 }
 0x3d1   :  { %v5692_v59 = vsel %vm4736_vm1, %v5550_v55, 0.0  ;;  %v3995_v42 = vsel %vm3987_vm14, %v3930_v58, %v3521_v48 }
 0x3d2   :  { %v4831_v51 = vrot.slane %v4830_v46, 2  ;;  %v5150_v0 = vadd.f32 %v5149_v61, %v5148_v53  ;;  %v5374_v52 = vadd.f32 %v5373_v26, %v5372_v49  ;;  %v5693_v13 = vrot.slane %v5692_v59, 4  ;;  %v3585_v36 = vpop.permute.xlu1 %3584 }
 0x3d3   :  { %v3501_v19 = vpop.permute.xlu0 %3500  ;;  %v4060_v47 = vsel %vm4052_vm15, %v3995_v42, %v3585_v36  ;;  %v3911_v53 = vsel %vm3857_vm12, %v3846_v41, %v3435_v12 }
 0x3d4   :  { %v4832_v22 = vadd.f32 %v4831_v51, %v4830_v46  ;;  %v5151_v9 = vrot.slane %v5150_v0, 2  ;;  %v5375_v28 = vrot.slane %v5374_v52, 2  ;;  %v5694_v30 = vadd.f32 %v5693_v13, %v5692_v59 }
 0x3d5   :  { %v4529_v2 = vpop.f32.mrb[36].mxu1  ;;  %v3976_v59 = vsel %vm3922_vm13, %v3911_v53, %v3501_v19 }
 0x3d6   :  { %v4833_v37 = vrot.slane %v4832_v22, 1  ;;  %v5152_v43 = vadd.f32 %v5151_v9, %v5150_v0  ;;  %v5376_v6 = vadd.f32 %v5375_v28, %v5374_v52  ;;  %v5695_v3 = vrot.slane %v5694_v30, 2  ;;  %v4531_v33 = vpop.f32.mrb[37].mxu1  ;;  %v3647_v7 = vpop.permute.xlu1 %3646 }
 0x3d7   :  { %v4530_v21 = vadd.f32 %v10036_v14, %v4529_v2  ;;  %v3567_v20 = vpop.permute.xlu0 %3566  ;;  %v4532_v23 = vpop.f32.mrb[38].mxu1  ;;  %v4127_v15 = vsel %vm4116_vm0, %v4060_v47, %v3647_v7 }
 0x3d8   :  { %v4834_v54 = vadd.f32 %v4833_v37, %v4832_v22  ;;  %v5153_v8 = vrot.slane %v5152_v43, 1  ;;  %v5377_v57 = vrot.slane %v5376_v6, 1  ;;  %v5696_v48 = vadd.f32 %v5695_v3, %v5694_v30  ;;  %v4534_v31 = vpop.f32.mrb[39].mxu1  ;;  %4440 = vmatmul.mubr.bf16.gmra.mrb[76].mxu0 %v4127_v15 }
 0x3d9   :  { %v4700_v49 = vmax.f32 %v4530_v21, 0.0  ;;  %v4533_v55 = vadd.f32 %v10036_v14, %v4532_v23  ;;  %7123 = vmatprep.mubr.msk.bf16.mxu0 %vm1895_vm4, %v9076_v38  ;;  %v4041_v36 = vsel %vm3987_vm14, %v3976_v59, %v3567_v20 }
 0x3da   :  { %v5154_v5 = vadd.f32 %v5153_v8, %v5152_v43  ;;  %v5378_v16 = vadd.f32 %v5377_v57, %v5376_v6  ;;  %v5697_v46 = vrot.slane %v5696_v48, 1  ;;  %v3205_v61 = vpop.permute.xlu1 %3204  ;;  %v5875_v26 = vsel %vm5865_vm7, %v4834_v54, %v5874_v39 }
 0x3db   :  { %v4835_v58 = vsel %vm4736_vm1, %v4700_v49, 0.0  ;;  %v5007_v51 = vrot.slane %v4700_v49, 4  ;;  %v4701_v0 = vmax.f32 %v4533_v55, 0.0  ;;  %v3631_v52 = vpop.permute.xlu0 %3630 }
 0x3dc   :  { %v5698_v12 = vadd.f32 %v5697_v46, %v5696_v48  ;;  %v4836_v13 = vrot.slane %v4835_v58, 4  ;;  %v5939_v38 = vsel %vm5865_vm7, %v5154_v5, %v10269_v56  ;;  %v6011_v39 = vsel %vm5865_vm7, %v5378_v16, %v10272_v32 }
 0x3dd   :  { %v5155_v42 = vsel %vm4736_vm1, %v5007_v51, 0.0  ;;  %v5379_v22 = vsel %vm4736_vm1, %v4701_v0, 0.0  ;;  %v5551_v9 = vrot.slane %v4701_v0, 4  ;;  %v4106_v37 = vsel %vm4052_vm15, %v4041_v36, %v3631_v52 }
 0x3de   :  { %v4837_v19 = vadd.f32 %v4836_v13, %v4835_v58  ;;  %v5156_v28 = vrot.slane %v5155_v42, 4  ;;  %v5380_v30 = vrot.slane %v5379_v22, 4  ;;  %v3297_v18 = vpop.permute.xlu1 %3296  ;;  %v6083_v47 = vsel %vm5865_vm7, %v5698_v12, %v6082_v63 }
 0x3df   :  { %v5699_v2 = vsel %vm4736_vm1, %v5551_v9, 0.0  ;;  %v3693_v43 = vpop.permute.xlu0 %3692  ;;  %v3716_v36 = vsel %vm1895_vm4, %v9875_v1, %v3205_v61 }
 0x3e0   :  { %v4838_v56 = vrot.slane %v4837_v19, 2  ;;  %v5157_v6 = vadd.f32 %v5156_v28, %v5155_v42  ;;  %v5381_v3 = vadd.f32 %v5380_v30, %v5379_v22  ;;  %v5700_v33 = vrot.slane %v5699_v2, 4 }
 0x3e1   :  { %v4196_v7 = vsel %vm4116_vm0, %v4106_v37, %v3693_v43  ;;  %v3804_v43 = vsel %vm2155_vm8, %v3716_v36, %v3297_v18 }
 0x3e2   :  { %v4839_v41 = vadd.f32 %v4838_v56, %v4837_v19  ;;  %v5158_v21 = vrot.slane %v5157_v6, 2  ;;  %v5382_v32 = vrot.slane %v5381_v3, 2  ;;  %v5701_v20 = vadd.f32 %v5700_v33, %v5699_v2  ;;  %4624 = vmatmul.mubr.bf16.gmra.mrb[84].mxu1 %v4196_v7  ;;  %v3391_v23 = vpop.permute.xlu1 %3390 }
 0x3e3   :  { %7145 = vmatprep.mubr.msk.bf16.mxu1 %vm1895_vm4, %v10082_v11  ;;  %v3249_v63 = vpop.permute.xlu0 %3248 }
 0x3e4   :  { %v4840_v15 = vrot.slane %v4839_v41, 1  ;;  %v5159_v54 = vadd.f32 %v5158_v21, %v5157_v6  ;;  %v5383_v8 = vadd.f32 %v5382_v32, %v5381_v3  ;;  %v5702_v57 = vrot.slane %v5701_v20, 2  ;;  %v4537_v48 = vpop.f32.mrb[40].mxu1 }
 0x3e5   :  { %v4538_v31 = vadd.f32 %v10036_v14, %v4537_v48  ;;  %v4539_v53 = vpop.f32.mrb[41].mxu1  ;;  %v3867_v3 = vsel %vm3857_vm12, %v3804_v43, %v3391_v23 }
 0x3e6   :  { %v4841_v49 = vadd.f32 %v4840_v15, %v4839_v41  ;;  %v5160_v55 = vrot.slane %v5159_v54, 1  ;;  %v5384_v5 = vrot.slane %v5383_v8, 1  ;;  %v5703_v16 = vadd.f32 %v5702_v57, %v5701_v20  ;;  %v4540_v46 = vpop.f32.mrb[42].mxu1  ;;  %v3457_v59 = vpop.permute.xlu1 %3456 }
 0x3e7   :  { %v4702_v58 = vmax.f32 %v4538_v31, 0.0  ;;  %v4541_v51 = vadd.f32 %v10036_v14, %v4540_v46  ;;  %v3341_v11 = vpop.permute.xlu0 %3340  ;;  %v4542_v0 = vpop.f32.mrb[43].mxu1  ;;  %v3782_v53 = vsel %vm1895_vm4, %v9903_v24, %v3249_v63 }
 0x3e8   :  { %v5161_v52 = vadd.f32 %v5160_v55, %v5159_v54  ;;  %v5385_v12 = vadd.f32 %v5384_v5, %v5383_v8  ;;  %v5704_v13 = vrot.slane %v5703_v16, 1  ;;  %v5876_v19 = vsel %vm5867_vm9, %v4841_v49, %v5875_v26  ;;  %v10337_v0 = vld [vmem:[%s11015_s4] ss:$0 sm:$0xff] }
 0x3e9   :  { %v4842_v42 = vsel %vm4736_vm1, %v4702_v58, 0.0  ;;  %v5008_v22 = vrot.slane %v4702_v58, 4  ;;  %v4703_v9 = vmax.f32 %v4541_v51, 0.0  ;;  %v3848_v51 = vsel %vm2155_vm8, %v3782_v53, %v3341_v11 }
 0x3ea   :  { %v5705_v28 = vadd.f32 %v5704_v13, %v5703_v16  ;;  %v4843_v30 = vrot.slane %v4842_v42, 4  ;;  %v3523_v2 = vpop.permute.xlu1 %3522  ;;  %v10315_v37 = vsel %vm5867_vm9, %v5161_v52, %v5939_v38  ;;  %v10318_v14 = vsel %vm5867_vm9, %v5385_v12, %v6011_v39 }
 0x3eb   :  { %v5162_v56 = vsel %vm4736_vm1, %v5008_v22, 0.0  ;;  %v5386_v1 = vsel %vm4736_vm1, %v4703_v9, 0.0  ;;  %v5552_v61 = vrot.slane %v4703_v9, 4  ;;  %v3437_v6 = vpop.permute.xlu0 %3436  ;;  %v3932_v38 = vsel %vm3922_vm13, %v3867_v3, %v3457_v59 }
 0x3ec   :  { %v4844_v26 = vadd.f32 %v4843_v30, %v4842_v42  ;;  %v5163_v33 = vrot.slane %v5162_v56, 4  ;;  %v5387_v7 = vrot.slane %v5386_v1, 4  ;;  %v10327_v39 = vsel %vm5867_vm9, %v5705_v28, %v6083_v47 }
 0x3ed   :  { %v5706_v41 = vsel %vm4736_vm1, %v5552_v61, 0.0  ;;  %v3997_v54 = vsel %vm3987_vm14, %v3932_v38, %v3523_v2  ;;  %v3913_v22 = vsel %vm3857_vm12, %v3848_v51, %v3437_v6 }
 0x3ee   :  { %v4845_v21 = vrot.slane %v4844_v26, 2  ;;  %v5164_v18 = vadd.f32 %v5163_v33, %v5162_v56  ;;  %v5388_v32 = vadd.f32 %v5387_v7, %v5386_v1  ;;  %v5707_v20 = vrot.slane %v5706_v41, 4  ;;  %v3587_v15 = vpop.permute.xlu1 %3586 }
 0x3ef   :  { %v3503_v8 = vpop.permute.xlu0 %3502  ;;  %v4062_v49 = vsel %vm4052_vm15, %v3997_v54, %v3587_v15 }
 0x3f0   :  { %v4846_v57 = vadd.f32 %v4845_v21, %v4844_v26  ;;  %v5165_v23 = vrot.slane %v5164_v18, 2  ;;  %v5389_v48 = vrot.slane %v5388_v32, 2  ;;  %v5708_v31 = vadd.f32 %v5707_v20, %v5706_v41 }
 0x3f1   :  { %v4545_v55 = vpop.f32.mrb[44].mxu1  ;;  %v3978_v11 = vsel %vm3922_vm13, %v3913_v22, %v3503_v8 }
 0x3f2   :  { %v4847_v47 = vrot.slane %v4846_v57, 1  ;;  %v5166_v5 = vadd.f32 %v5165_v23, %v5164_v18  ;;  %v5390_v16 = vadd.f32 %v5389_v48, %v5388_v32  ;;  %v5709_v46 = vrot.slane %v5708_v31, 2  ;;  %v4547_v59 = vpop.f32.mrb[45].mxu1  ;;  %v3649_v58 = vpop.permute.xlu1 %3648 }
 0x3f3   :  { %v4546_v52 = vadd.f32 %v10337_v0, %v4545_v55  ;;  %v3569_v12 = vpop.permute.xlu0 %3568  ;;  %v4548_v24 = vpop.f32.mrb[46].mxu1  ;;  %v4130_v63 = vsel %vm4116_vm0, %v4062_v49, %v3649_v58 }
 0x3f4   :  { %v4848_v13 = vadd.f32 %v4847_v47, %v4846_v57  ;;  %v5391_v36 = vrot.slane %v5390_v16, 1  ;;  %v5710_v42 = vadd.f32 %v5709_v46, %v5708_v31  ;;  %v4550_v9 = vpop.f32.mrb[47].mxu1  ;;  %4448 = vmatmul.mubr.bf16.gmra.mrb[80].mxu0 %v4130_v63  ;;  %v4549_v30 = vadd.f32 %v10337_v0, %v4548_v24 }
 0x3f5   :  { %v4704_v28 = vmax.f32 %v4546_v52, 0.0  ;;  %v5167_v2 = vrot.slane %v5166_v5, 1  ;;  %v4043_v43 = vsel %vm3987_vm14, %v3978_v11, %v3569_v12 }
 0x3f6   :  { %v3695_v56 = vpop.permute.xlu1 %3694  ;;  %v5392_v1 = vadd.f32 %v5391_v36, %v5390_v16  ;;  %v5711_v61 = vrot.slane %v5710_v42, 1  ;;  %v10346_v3 = vsel %vm5869_vm10, %v4848_v13, %v5876_v19  ;;  %v4705_v6 = vmax.f32 %v4549_v30, 0.0 }
 0x3f7   :  { %v4849_v26 = vsel %vm4736_vm1, %v4704_v28, 0.0  ;;  %v5009_v33 = vrot.slane %v4704_v28, 4  ;;  %v3633_v7 = vpop.permute.xlu0 %3632  ;;  %v5168_v41 = vadd.f32 %v5167_v2, %v5166_v5 }
 0x3f8   :  { %v4850_v38 = vrot.slane %v4849_v26, 4  ;;  %v4108_v21 = vsel %vm4052_vm15, %v4043_v43, %v3633_v7  ;;  %v10352_v18 = vsel %vm5869_vm10, %v5392_v1, %v10318_v14  ;;  %v5712_v32 = vadd.f32 %v5711_v61, %v5710_v42 }
 0x3f9   :  { %v5169_v20 = vsel %vm4736_vm1, %v5009_v33, 0.0  ;;  %v5393_v15 = vsel %vm4736_vm1, %v4705_v6, 0.0  ;;  %v5553_v19 = vrot.slane %v4705_v6, 4  ;;  %v4199_v54 = vsel %vm4116_vm0, %v4108_v21, %v3695_v56 }
 0x3fa   :  { %v5170_v8 = vrot.slane %v5169_v20, 4  ;;  %v5394_v57 = vrot.slane %v5393_v15, 4  ;;  %4632 = vmatmul.mubr.bf16.gmra.mrb[88].mxu1 %v4199_v54  ;;  %v3343_v23 = vpop.permute.xlu1 %3342  ;;  %v10359_v48 = vsel %vm5869_vm10, %v5168_v41, %v10315_v37  ;;  %v10366_v53 = vsel %vm5869_vm10, %v5712_v32, %v10327_v39 }
 0x3fb   :  { %v5713_v31 = vsel %vm4736_vm1, %v5553_v19, 0.0  ;;  %v3251_v14 = vpop.permute.xlu0 %3250  ;;  %7146 = vmatprep.mubr.msk.bf16.mxu1 %vm1895_vm4, %v10103_v44  ;;  %v4851_v49 = vadd.f32 %v4850_v38, %v4849_v26 }
 0x3fc   :  { %v5714_v55 = vrot.slane %v5713_v31, 4  ;;  %v3785_v47 = vsel %vm1895_vm4, %v9977_v62, %v3251_v14  ;;  %v5171_v5 = vadd.f32 %v5170_v8, %v5169_v20  ;;  %v5395_v16 = vadd.f32 %v5394_v57, %v5393_v15 }
 0x3fd   :  { %v4852_v59 = vrot.slane %v4851_v49, 2  ;;  %v3850_v58 = vsel %vm2155_vm8, %v3785_v47, %v3343_v23 }
 0x3fe   :  { %v3505_v46 = vpop.permute.xlu1 %3504  ;;  %v5715_v52 = vadd.f32 %v5714_v55, %v5713_v31  ;;  %v5172_v24 = vrot.slane %v5171_v5, 2  ;;  %v5396_v63 = vrot.slane %v5395_v16, 2 }
 0x3ff   :  { %v3439_v37 = vpop.permute.xlu0 %3438  ;;  %v4853_v28 = vadd.f32 %v4852_v59, %v4851_v49 }
 0x400   :  { %v4553_v51 = vpop.f32.mrb[48].mxu1  ;;  %v3915_v44 = vsel %vm3857_vm12, %v3850_v58, %v3439_v37  ;;  %v5716_v2 = vrot.slane %v5715_v52, 2  ;;  %v5173_v61 = vadd.f32 %v5172_v24, %v5171_v5  ;;  %v5397_v26 = vadd.f32 %v5396_v63, %v5395_v16 }
 0x401   :  { %v4554_v12 = vadd.f32 %v10337_v0, %v4553_v51  ;;  %v4555_v39 = vpop.f32.mrb[49].mxu1  ;;  %v3980_v62 = vsel %vm3922_vm13, %v3915_v44, %v3505_v46  ;;  %v4854_v8 = vrot.slane %v4853_v28, 1 }
 0x402   :  { %v4556_v13 = vpop.f32.mrb[50].mxu1  ;;  %v3635_v36 = vpop.permute.xlu1 %3634  ;;  %v5717_v57 = vadd.f32 %v5716_v2, %v5715_v52  ;;  %v5174_v5 = vrot.slane %v5173_v61, 1  ;;  %v5398_v16 = vrot.slane %v5397_v26, 1 }
 0x403   :  { %v4706_v42 = vmax.f32 %v4554_v12, 0.0  ;;  %v4557_v22 = vadd.f32 %v10337_v0, %v4556_v13  ;;  %v3571_v9 = vpop.permute.xlu0 %3570  ;;  %v4558_v11 = vpop.f32.mrb[51].mxu1  ;;  %v4855_v44 = vadd.f32 %v4854_v8, %v4853_v28 }
 0x404   :  { %v4045_v30 = vsel %vm3987_vm14, %v3980_v62, %v3571_v9  ;;  %v5718_v12 = vrot.slane %v5717_v57, 1  ;;  %v5399_v9 = vadd.f32 %v5398_v16, %v5397_v26 }
 0x405   :  { %v4856_v43 = vsel %vm4736_vm1, %v4706_v42, 0.0  ;;  %v5010_v56 = vrot.slane %v4706_v42, 4  ;;  %v4707_v1 = vmax.f32 %v4557_v22, 0.0  ;;  %v4110_v21 = vsel %vm4052_vm15, %v4045_v30, %v3635_v36 }
 0x406   :  { %v4857_v33 = vrot.slane %v4856_v43, 4  ;;  %v3253_v6 = vpop.permute.xlu1 %3252  ;;  %v5175_v22 = vadd.f32 %v5174_v5, %v5173_v61 }
 0x407   :  { %v5176_v7 = vsel %vm4736_vm1, %v5010_v56, 0.0  ;;  %v5400_v41 = vsel %vm4736_vm1, %v4707_v1, 0.0  ;;  %v5554_v38 = vrot.slane %v4707_v1, 4  ;;  %v3697_v32 = vpop.permute.xlu0 %3696  ;;  %v3788_v46 = vsel %vm1895_vm4, %v10043_v34, %v3253_v6 }
 0x408   :  { %v4858_v20 = vadd.f32 %v4857_v33, %v4856_v43  ;;  %v5177_v15 = vrot.slane %v5176_v7, 4  ;;  %v5401_v19 = vrot.slane %v5400_v41, 4  ;;  %v4202_v54 = vsel %vm4116_vm0, %v4110_v21, %v3697_v32 }
 0x409   :  { %v5720_v23 = vsel %vm4736_vm1, %v5554_v38, 0.0  ;;  %4640 = vmatmul.mubr.bf16.gmra.mrb[92].mxu1 %v4202_v54  ;;  %v5719_v6 = vadd.f32 %v5718_v12, %v5717_v57 }
 0x40a   :  { %v4859_v31 = vrot.slane %v4858_v20, 2  ;;  %v5178_v14 = vadd.f32 %v5177_v15, %v5176_v7  ;;  %v5402_v49 = vadd.f32 %v5401_v19, %v5400_v41  ;;  %v5721_v55 = vrot.slane %v5720_v23, 4  ;;  %7147 = vmatprep.mubr.msk.bf16.mxu1 %vm1895_vm4, %v10183_v25  ;;  %v3441_v47 = vpop.permute.xlu1 %3440 }
 0x40b   :  { %v3345_v37 = vpop.permute.xlu0 %3344 }
 0x40c   :  { %v4860_v59 = vadd.f32 %v4859_v31, %v4858_v20  ;;  %v5179_v58 = vrot.slane %v5178_v14, 2  ;;  %v5403_v51 = vrot.slane %v5402_v49, 2  ;;  %v5722_v52 = vadd.f32 %v5721_v55, %v5720_v23 }
 0x40d   :  { %v3852_v39 = vsel %vm2155_vm8, %v3788_v46, %v3345_v37  ;;  %v4561_v24 = vpop.f32.mrb[52].mxu1 }
 0x40e   :  { %v4861_v63 = vrot.slane %v4860_v59, 1  ;;  %v5180_v13 = vadd.f32 %v5179_v58, %v5178_v14  ;;  %v5404_v36 = vadd.f32 %v5403_v51, %v5402_v49  ;;  %v5723_v25 = vrot.slane %v5722_v52, 2  ;;  %v4563_v62 = vpop.f32.mrb[53].mxu1  ;;  %v3573_v42 = vpop.permute.xlu1 %3572 }
 0x40f   :  { %v3917_v34 = vsel %vm3857_vm12, %v3852_v39, %v3441_v47  ;;  %v4562_v11 = vadd.f32 %v10337_v0, %v4561_v24  ;;  %v3507_v30 = vpop.permute.xlu0 %3506  ;;  %v4564_v2 = vpop.f32.mrb[54].mxu1 }
 0x410   :  { %v4862_v43 = vadd.f32 %v4861_v63, %v4860_v59  ;;  %v5181_v28 = vrot.slane %v5180_v13, 1  ;;  %v5405_v56 = vrot.slane %v5404_v36, 1  ;;  %v5724_v1 = vadd.f32 %v5723_v25, %v5722_v52  ;;  %v4566_v33 = vpop.f32.mrb[55].mxu1 }
 0x411   :  { %v4708_v7 = vmax.f32 %v4562_v11, 0.0  ;;  %v3982_v41 = vsel %vm3922_vm13, %v3917_v34, %v3507_v30  ;;  %v4565_v38 = vadd.f32 %v10337_v0, %v4564_v2 }
 0x412   :  { %v5182_v21 = vadd.f32 %v5181_v28, %v5180_v13  ;;  %v5878_v61 = vsel %vm5857_vm2, %v4862_v43, %v4855_v44  ;;  %v5406_v26 = vadd.f32 %v5405_v56, %v5404_v36  ;;  %v5725_v32 = vrot.slane %v5724_v1, 1  ;;  %v3699_v20 = vpop.permute.xlu1 %3698 }
 0x413   :  { %v4863_v15 = vsel %vm4736_vm1, %v4708_v7, 0.0  ;;  %v5011_v19 = vrot.slane %v4708_v7, 4  ;;  %v4709_v54 = vmax.f32 %v4565_v38, 0.0  ;;  %v4047_v8 = vsel %vm3987_vm14, %v3982_v41, %v3573_v42  ;;  %v3637_v23 = vpop.permute.xlu0 %3636 }
 0x414   :  { %v5942_v57 = vsel %vm5857_vm2, %v5182_v21, %v5175_v22  ;;  %v5726_v31 = vadd.f32 %v5725_v32, %v5724_v1  ;;  %v6014_v14 = vsel %vm5857_vm2, %v5406_v26, %v5399_v9  ;;  %v4864_v49 = vrot.slane %v4863_v15, 4 }
 0x415   :  { %v5183_v55 = vsel %vm4736_vm1, %v5011_v19, 0.0  ;;  %v5407_v47 = vsel %vm4736_vm1, %v4709_v54, 0.0  ;;  %v5555_v5 = vrot.slane %v4709_v54, 4  ;;  %v4112_v16 = vsel %vm4052_vm15, %v4047_v8, %v3637_v23 }
 0x416   :  { %v6086_v46 = vsel %vm5857_vm2, %v5726_v31, %v5719_v6  ;;  %v4865_v37 = vadd.f32 %v4864_v49, %v4863_v15  ;;  %v5184_v59 = vrot.slane %v5183_v55, 4  ;;  %v5408_v58 = vrot.slane %v5407_v47, 4  ;;  %v3347_v51 = vpop.permute.xlu1 %3346 }
 0x417   :  { %v5727_v52 = vsel %vm4736_vm1, %v5555_v5, 0.0  ;;  %v4205_v44 = vsel %vm4116_vm0, %v4112_v16, %v3699_v20  ;;  %v3255_v12 = vpop.permute.xlu0 %3254 }
 0x418   :  { %v4866_v39 = vrot.slane %v4865_v37, 2  ;;  %v5185_v24 = vadd.f32 %v5184_v59, %v5183_v55  ;;  %v5409_v63 = vadd.f32 %v5408_v58, %v5407_v47  ;;  %v5728_v13 = vrot.slane %v5727_v52, 4  ;;  %4648 = vmatmul.mubr.bf16.gmra.mrb[96].mxu1 %v4205_v44 }
 0x419   :  { %v3791_v36 = vsel %vm1895_vm4, %v10076_v35, %v3255_v12  ;;  %7148 = vmatprep.mubr.msk.bf16.mxu1 %vm1895_vm4, %v10224_v50 }
 0x41a   :  { %v4867_v25 = vadd.f32 %v4866_v39, %v4865_v37  ;;  %v5186_v62 = vrot.slane %v5185_v24, 2  ;;  %v5410_v42 = vrot.slane %v5409_v63, 2  ;;  %v5729_v22 = vadd.f32 %v5728_v13, %v5727_v52  ;;  %v3509_v9 = vpop.permute.xlu1 %3508 }
 0x41b   :  { %v3854_v34 = vsel %vm2155_vm8, %v3791_v36, %v3347_v51  ;;  %v3443_v11 = vpop.permute.xlu0 %3442 }
 0x41c   :  { %v4868_v30 = vrot.slane %v4867_v25, 1  ;;  %v5187_v2 = vadd.f32 %v5186_v62, %v5185_v24  ;;  %v5411_v43 = vadd.f32 %v5410_v42, %v5409_v63  ;;  %v5730_v28 = vrot.slane %v5729_v22, 2  ;;  %v4569_v56 = vpop.f32.mrb[56].mxu1 }
 0x41d   :  { %v3919_v1 = vsel %vm3857_vm12, %v3854_v34, %v3443_v11  ;;  %v4570_v35 = vadd.f32 %v10337_v0, %v4569_v56  ;;  %v4571_v33 = vpop.f32.mrb[57].mxu1 }
 0x41e   :  { %v4869_v6 = vadd.f32 %v4868_v30, %v4867_v25  ;;  %v5188_v50 = vrot.slane %v5187_v2, 1  ;;  %v5412_v7 = vrot.slane %v5411_v43, 1  ;;  %v5731_v41 = vadd.f32 %v5730_v28, %v5729_v22  ;;  %v4572_v38 = vpop.f32.mrb[58].mxu1  ;;  %v3639_v21 = vpop.permute.xlu1 %3638 }
 0x41f   :  { %v3984_v26 = vsel %vm3922_vm13, %v3919_v1, %v3509_v9  ;;  %v4710_v32 = vmax.f32 %v4570_v35, 0.0  ;;  %v4573_v20 = vadd.f32 %v10337_v0, %v4572_v38  ;;  %v3575_v15 = vpop.permute.xlu0 %3574  ;;  %v4574_v19 = vpop.f32.mrb[59].mxu1  ;;  %v11023_v30 = vmov 0.0|0.0  }
 0x420   :  { %v5189_v54 = vadd.f32 %v5188_v50, %v5187_v2  ;;  %v5879_v8 = vsel %vm5859_vm3, %v4869_v6, %v5878_v61  ;;  %v5413_v23 = vadd.f32 %v5412_v7, %v5411_v43  ;;  %v5732_v31 = vrot.slane %v5731_v41, 1 }
 0x421   :  { %v4870_v49 = vsel %vm4736_vm1, %v4710_v32, 0.0  ;;  %v5012_v55 = vrot.slane %v4710_v32, 4  ;;  %v4711_v47 = vmax.f32 %v4573_v20, 0.0  ;;  %v4049_v5 = vsel %vm3987_vm14, %v3984_v26, %v3575_v15 }
 0x422   :  { %v5943_v16 = vsel %vm5859_vm3, %v5189_v54, %v5942_v57  ;;  %v5733_v37 = vadd.f32 %v5732_v31, %v5731_v41  ;;  %v10416_v59 = vsel %vm5859_vm3, %v5413_v23, %v6014_v14  ;;  %v4871_v58 = vrot.slane %v4870_v49, 4  ;;  %v3257_v51 = vpop.permute.xlu1 %3256 }
 0x423   :  { %v5190_v52 = vsel %vm4736_vm1, %v5012_v55, 0.0  ;;  %v5414_v61 = vsel %vm4736_vm1, %v4711_v47, 0.0  ;;  %v5556_v44 = vrot.slane %v4711_v47, 4  ;;  %v4114_v12 = vsel %vm4052_vm15, %v4049_v5, %v3639_v21  ;;  %v3701_v39 = vpop.permute.xlu0 %3700 }
 0x424   :  { %v6087_v24 = vsel %vm5859_vm3, %v5733_v37, %v6086_v46  ;;  %v4872_v63 = vadd.f32 %v4871_v58, %v4870_v49  ;;  %v5191_v13 = vrot.slane %v5190_v52, 4  ;;  %v5415_v36 = vrot.slane %v5414_v61, 4 }
 0x425   :  { %v5734_v57 = vsel %vm4736_vm1, %v5556_v44, 0.0  ;;  %v4208_v14 = vsel %vm4116_vm0, %v4114_v12, %v3701_v39  ;;  %v3794_v34 = vsel %vm1895_vm4, %v10109_v60, %v3257_v51  ;;  %vm6124_vm4 = vcmask 1043456  }
 0x426   :  { %v4873_v25 = vrot.slane %v4872_v63, 2  ;;  %v5192_v62 = vadd.f32 %v5191_v13, %v5190_v52  ;;  %v5416_v42 = vadd.f32 %v5415_v36, %v5414_v61  ;;  %v5735_v22 = vrot.slane %v5734_v57, 4  ;;  %4656 = vmatmul.mubr.bf16.gmra.mrb[100].mxu1 %v4208_v14  ;;  %v3445_v9 = vpop.permute.xlu1 %3444 }
 0x427   :  { %v3349_v11 = vpop.permute.xlu0 %3348  ;;  %4663 = vmatprep.mubr.bf16.mxu1 %v11023_v30 }
 0x428   :  { %v4874_v46 = vadd.f32 %v4873_v25, %v4872_v63  ;;  %v5193_v2 = vrot.slane %v5192_v62, 2  ;;  %v5417_v43 = vrot.slane %v5416_v42, 2  ;;  %v5736_v28 = vadd.f32 %v5735_v22, %v5734_v57 }
 0x429   :  { %v3856_v56 = vsel %vm2155_vm8, %v3794_v34, %v3349_v11  ;;  %v4577_v1 = vpop.f32.mrb[60].mxu1 }
 0x42a   :  { %v4875_v35 = vrot.slane %v4874_v46, 1  ;;  %v5194_v33 = vadd.f32 %v5193_v2, %v5192_v62  ;;  %v5418_v6 = vadd.f32 %v5417_v43, %v5416_v42  ;;  %v5737_v50 = vrot.slane %v5736_v28, 2  ;;  %v4579_v7 = vpop.f32.mrb[61].mxu1  ;;  %v3577_v19 = vpop.permute.xlu1 %3576 }
 0x42b   :  { %v3921_v41 = vsel %vm3857_vm12, %v3856_v56, %v3445_v9  ;;  %v4578_v38 = vadd.f32 %v10337_v0, %v4577_v1  ;;  %v3511_v60 = vpop.permute.xlu0 %3510  ;;  %v4580_v21 = vpop.f32.mrb[62].mxu1 }
 0x42c   :  { %v4876_v26 = vadd.f32 %v4875_v35, %v4874_v46  ;;  %v5195_v32 = vrot.slane %v5194_v33, 1  ;;  %v5419_v20 = vrot.slane %v5418_v6, 1  ;;  %v5738_v15 = vadd.f32 %v5737_v50, %v5736_v28  ;;  %v4582_v54 = vpop.f32.mrb[63].mxu1 }
 0x42d   :  { %v4712_v23 = vmax.f32 %v4578_v38, 0.0  ;;  %v3986_v31 = vsel %vm3922_vm13, %v3921_v41, %v3511_v60  ;;  %v4581_v49 = vadd.f32 %v10337_v0, %v4580_v21 }
 0x42e   :  { %v5196_v55 = vadd.f32 %v5195_v32, %v5194_v33  ;;  %v5880_v47 = vsel %vm5861_vm5, %v4876_v26, %v5879_v8  ;;  %v5420_v5 = vadd.f32 %v5419_v20, %v5418_v6  ;;  %v5739_v37 = vrot.slane %v5738_v15, 1 }
 0x42f   :  { %v4877_v58 = vsel %vm4736_vm1, %v4712_v23, 0.0  ;;  %v5013_v51 = vrot.slane %v4712_v23, 4  ;;  %v4713_v52 = vmax.f32 %v4581_v49, 0.0  ;;  %v4051_v61 = vsel %vm3987_vm14, %v3986_v31, %v3577_v19 }
 0x430   :  { %v5740_v44 = vadd.f32 %v5739_v37, %v5738_v15  ;;  %v4878_v12 = vrot.slane %v4877_v58, 4  ;;  %v4115_v39 = vsel %vm4052_vm15, %v4051_v61, %v9720_v27  ;;  %v5944_v63 = vsel %vm5861_vm5, %v5196_v55, %v5943_v16 }
 0x431   :  { %v5197_v13 = vsel %vm4736_vm1, %v5013_v51, 0.0  ;;  %v5421_v36 = vsel %vm4736_vm1, %v4713_v52, 0.0  ;;  %v5557_v8 = vrot.slane %v4713_v52, 4  ;;  %v4210_v57 = vsel %vm4116_vm0, %v4115_v39, %v9739_v10 }
 0x432   :  { %v4879_v14 = vadd.f32 %v4878_v12, %v4877_v58  ;;  %v5198_v25 = vrot.slane %v5197_v13, 4  ;;  %v5422_v62 = vrot.slane %v5421_v36, 4  ;;  %4664 = vmatmul.mubr.bf16.gmra.mrb[104].mxu1 %v4210_v57  ;;  %v6016_v42 = vsel %vm5861_vm5, %v5420_v5, %v10416_v59 }
 0x433   :  { %v5741_v22 = vsel %vm4736_vm1, %v5557_v8, 0.0  ;;  %v6088_v27 = vsel %vm5861_vm5, %v5740_v44, %v6087_v24 }
 0x434   :  { %v4880_v16 = vrot.slane %v4879_v14, 2  ;;  %v5199_v9 = vadd.f32 %v5198_v25, %v5197_v13  ;;  %v5423_v34 = vadd.f32 %v5422_v62, %v5421_v36  ;;  %v5742_v11 = vrot.slane %v5741_v22, 4 }
 0x436   :  { %v4881_v30 = vadd.f32 %v4880_v16, %v4879_v14  ;;  %v5200_v46 = vrot.slane %v5199_v9, 2  ;;  %v5424_v2 = vrot.slane %v5423_v34, 2  ;;  %v5743_v43 = vadd.f32 %v5742_v11, %v5741_v22 }
 0x438   :  { %v4882_v10 = vrot.slane %v4881_v30, 1  ;;  %v5201_v28 = vadd.f32 %v5200_v46, %v5199_v9  ;;  %v5425_v56 = vadd.f32 %v5424_v2, %v5423_v34  ;;  %v5744_v1 = vrot.slane %v5743_v43, 2  ;;  %v4585_v35 = vpop.f32.mrb[64].mxu1 }
 0x439   :  { %v4587_v7 = vpop.f32.mrb[65].mxu1  ;;  %v4586_v24 = vadd.f32 %v10337_v0, %v4585_v35 }
 0x43a   :  { %v4883_v33 = vadd.f32 %v4882_v10, %v4881_v30  ;;  %v5202_v6 = vrot.slane %v5201_v28, 1  ;;  %v5426_v59 = vrot.slane %v5425_v56, 1  ;;  %v5745_v50 = vadd.f32 %v5744_v1, %v5743_v43  ;;  %v4588_v41 = vpop.f32.mrb[66].mxu1 }
 0x43b   :  { %v4589_v26 = vadd.f32 %v10337_v0, %v4588_v41  ;;  %v4590_v32 = vpop.f32.mrb[67].mxu1  ;;  %v4714_v20 = vmax.f32 %v4586_v24, 0.0 }
 0x43c   :  { %v5203_v38 = vadd.f32 %v5202_v6, %v5201_v28  ;;  %v5427_v60 = vadd.f32 %v5426_v59, %v5425_v56  ;;  %v5746_v21 = vrot.slane %v5745_v50, 1  ;;  %v5881_v15 = vsel %vm5863_vm6, %v4883_v33, %v5880_v47 }
 0x43d   :  { %v4715_v54 = vmax.f32 %v4589_v26, 0.0  ;;  %v4884_v49 = vsel %vm4736_vm1, %v4714_v20, 0.0  ;;  %v5014_v55 = vrot.slane %v4714_v20, 4 }
 0x43e   :  { %v5747_v19 = vadd.f32 %v5746_v21, %v5745_v50  ;;  %v5945_v23 = vsel %vm5863_vm6, %v5203_v38, %v5944_v63  ;;  %v6017_v31 = vsel %vm5863_vm6, %v5427_v60, %v6016_v42  ;;  %v4885_v5 = vrot.slane %v4884_v49, 4 }
 0x43f   :  { %v5428_v37 = vsel %vm4736_vm1, %v4715_v54, 0.0  ;;  %v5558_v58 = vrot.slane %v4715_v54, 4  ;;  %v5204_v52 = vsel %vm4736_vm1, %v5014_v55, 0.0 }
 0x440   :  { %v6089_v51 = vsel %vm5863_vm6, %v5747_v19, %v6088_v27  ;;  %v5429_v61 = vrot.slane %v5428_v37, 4  ;;  %v4886_v44 = vadd.f32 %v4885_v5, %v4884_v49  ;;  %v5205_v47 = vrot.slane %v5204_v52, 4 }
 0x441   :  { %v5748_v12 = vsel %vm4736_vm1, %v5558_v58, 0.0 }
 0x442   :  { %v5430_v39 = vadd.f32 %v5429_v61, %v5428_v37  ;;  %v5749_v63 = vrot.slane %v5748_v12, 4  ;;  %v4887_v13 = vrot.slane %v4886_v44, 2  ;;  %v5206_v36 = vadd.f32 %v5205_v47, %v5204_v52 }
 0x444   :  { %v5431_v8 = vrot.slane %v5430_v39, 2  ;;  %v5750_v57 = vadd.f32 %v5749_v63, %v5748_v12  ;;  %v4888_v14 = vadd.f32 %v4887_v13, %v4886_v44  ;;  %v5207_v25 = vrot.slane %v5206_v36, 2 }
 0x445   :  { %v4593_v22 = vpop.f32.mrb[68].mxu1 }
 0x446   :  { %v5432_v62 = vadd.f32 %v5431_v8, %v5430_v39  ;;  %v5751_v42 = vrot.slane %v5750_v57, 2  ;;  %v4889_v16 = vrot.slane %v4888_v14, 1  ;;  %v5208_v27 = vadd.f32 %v5207_v25, %v5206_v36  ;;  %v4595_v34 = vpop.f32.mrb[69].mxu1 }
 0x447   :  { %v4594_v9 = vadd.f32 %v10337_v0, %v4593_v22  ;;  %v4596_v46 = vpop.f32.mrb[70].mxu1 }
 0x448   :  { %v5433_v11 = vrot.slane %v5432_v62, 1  ;;  %v5752_v30 = vadd.f32 %v5751_v42, %v5750_v57  ;;  %v4890_v2 = vadd.f32 %v4889_v16, %v4888_v14  ;;  %v5209_v43 = vrot.slane %v5208_v27, 1  ;;  %v4598_v56 = vpop.f32.mrb[71].mxu1 }
 0x449   :  { %v4716_v10 = vmax.f32 %v4594_v9, 0.0  ;;  %v4597_v28 = vadd.f32 %v10337_v0, %v4596_v46 }
 0x44a   :  { %v5434_v1 = vadd.f32 %v5433_v11, %v5432_v62  ;;  %v5753_v35 = vrot.slane %v5752_v30, 1  ;;  %v5210_v33 = vadd.f32 %v5209_v43, %v5208_v27  ;;  %v5882_v38 = vsel %vm5865_vm7, %v4890_v2, %v5881_v15 }
 0x44b   :  { %v4891_v6 = vsel %vm4736_vm1, %v4716_v10, 0.0  ;;  %v5015_v59 = vrot.slane %v4716_v10, 4  ;;  %v4717_v50 = vmax.f32 %v4597_v28, 0.0 }
 0x44c   :  { %v5754_v7 = vadd.f32 %v5753_v35, %v5752_v30  ;;  %v4892_v24 = vrot.slane %v4891_v6, 4  ;;  %v6018_v41 = vsel %vm5865_vm7, %v5434_v1, %v6017_v31  ;;  %v5946_v32 = vsel %vm5865_vm7, %v5210_v33, %v5945_v23 }
 0x44d   :  { %v5211_v60 = vsel %vm4736_vm1, %v5015_v59, 0.0  ;;  %v5435_v21 = vsel %vm4736_vm1, %v4717_v50, 0.0  ;;  %v5559_v26 = vrot.slane %v4717_v50, 4 }
 0x44e   :  { %v4893_v20 = vadd.f32 %v4892_v24, %v4891_v6  ;;  %v5212_v19 = vrot.slane %v5211_v60, 4  ;;  %v5436_v54 = vrot.slane %v5435_v21, 4  ;;  %v6090_v49 = vsel %vm5865_vm7, %v5754_v7, %v6089_v51 }
 0x44f   :  { %v5755_v55 = vsel %vm4736_vm1, %v5559_v26, 0.0  ;;  %v4458_v7 = vadd.f32 %v10337_v0, %v9935_v4 }
 0x450   :  { %v4894_v5 = vrot.slane %v4893_v20, 2  ;;  %v5213_v37 = vadd.f32 %v5212_v19, %v5211_v60  ;;  %v5437_v58 = vadd.f32 %v5436_v54, %v5435_v21  ;;  %v5756_v31 = vrot.slane %v5755_v55, 4 }
 0x452   :  { %v4895_v52 = vadd.f32 %v4894_v5, %v4893_v20  ;;  %v5214_v15 = vrot.slane %v5213_v37, 2  ;;  %v5438_v61 = vrot.slane %v5437_v58, 2  ;;  %v5757_v44 = vadd.f32 %v5756_v31, %v5755_v55 }
 0x454   :  { %v4896_v47 = vrot.slane %v4895_v52, 1  ;;  %v5215_v12 = vadd.f32 %v5214_v15, %v5213_v37  ;;  %v5439_v39 = vadd.f32 %v5438_v61, %v5437_v58  ;;  %v5758_v63 = vrot.slane %v5757_v44, 2 }
 0x455   :  { %v4682_v58 = vmax.f32 %v4458_v7, 0.0 }
 0x456   :  { %v4897_v23 = vadd.f32 %v4896_v47, %v4895_v52  ;;  %v5216_v13 = vrot.slane %v5215_v12, 1  ;;  %v5440_v36 = vrot.slane %v5439_v39, 1  ;;  %v5759_v8 = vadd.f32 %v5758_v63, %v5757_v44 }
 0x457   :  { %v4417_v57 = vpop.f32.mrb[64].mxu0 }
 0x458   :  { %v4419_v51 = vpop.f32.mrb[65].mxu0  ;;  %v5217_v14 = vadd.f32 %v5216_v13, %v5215_v12  ;;  %v5441_v25 = vadd.f32 %v5440_v36, %v5439_v39  ;;  %v5760_v62 = vrot.slane %v5759_v8, 1  ;;  %v10467_v22 = vsel %vm5867_vm9, %v4897_v23, %v5882_v38 }
 0x459   :  { %v4420_v42 = vpop.f32.mrb[66].mxu0  ;;  %v4418_v30 = vadd.f32 %v10337_v0, %v4417_v57  ;;  %v4461_v12 = vadd.f32 %v10337_v0, %v9943_v45  ;;  %v4772_v57 = vsel %vm4736_vm1, %v4682_v58, 0.0 }
 0x45a   :  { %v4422_v16 = vpop.f32.mrb[67].mxu0  ;;  %v5761_v27 = vadd.f32 %v5760_v62, %v5759_v8  ;;  %v10470_v9 = vsel %vm5867_vm9, %v5217_v14, %v5946_v32  ;;  %v10473_v34 = vsel %vm5867_vm9, %v5441_v25, %v6018_v41  ;;  %v4421_v28 = vadd.f32 %v10337_v0, %v4420_v42 }
 0x45b   :  { %v4672_v10 = vmax.f32 %v4418_v30, 0.0  ;;  %v4998_v62 = vrot.slane %v4682_v58, 4  ;;  %v4683_v30 = vmax.f32 %v4461_v12, 0.0 }
 0x45c   :  { %v10476_v11 = vsel %vm5867_vm9, %v5761_v27, %v6090_v49  ;;  %v4673_v41 = vmax.f32 %v4421_v28, 0.0 }
 0x45d   :  { %v4993_v24 = vrot.slane %v4672_v10, 4  ;;  %v4737_v20 = vsel %vm4736_vm1, %v4672_v10, 0.0  ;;  %v5092_v7 = vsel %vm4736_vm1, %v4998_v62, 0.0 }
 0x45e   :  { %v5537_v55 = vrot.slane %v4673_v41, 4  ;;  %v4738_v15 = vrot.slane %v4737_v20, 4  ;;  %v5281_v61 = vsel %vm4736_vm1, %v4673_v41, 0.0 }
 0x45f   :  { %v5057_v4 = vsel %vm4736_vm1, %v4993_v24, 0.0  ;;  %v5282_v51 = vrot.slane %v5281_v61, 4 }
 0x460   :  { %v4601_v46 = vpop.f32.mrb[72].mxu1  ;;  %v5058_v23 = vrot.slane %v5057_v4, 4  ;;  %v5601_v13 = vsel %vm4736_vm1, %v5537_v55, 0.0  ;;  %v4739_v42 = vadd.f32 %v4738_v15, %v4737_v20 }
 0x461   :  { %v4602_v2 = vadd.f32 %v10337_v0, %v4601_v46  ;;  %v4603_v43 = vpop.f32.mrb[73].mxu1  ;;  %v5602_v46 = vrot.slane %v5601_v13, 4 }
 0x462   :  { %v4604_v56 = vpop.f32.mrb[74].mxu1  ;;  %v4773_v43 = vrot.slane %v4772_v57, 4  ;;  %v5059_v10 = vadd.f32 %v5058_v23, %v5057_v4  ;;  %v4740_v24 = vrot.slane %v4739_v42, 2 }
 0x463   :  { %v4718_v1 = vmax.f32 %v4602_v2, 0.0  ;;  %v4605_v35 = vadd.f32 %v10337_v0, %v4604_v56  ;;  %v4606_v33 = vpop.f32.mrb[75].mxu1 }
 0x464   :  { %v10511_v4 = vadd.f32 %v4773_v43, %v4772_v57 }
 0x465   :  { %v4898_v6 = vsel %vm4736_vm1, %v4718_v1, 0.0  ;;  %v5016_v59 = vrot.slane %v4718_v1, 4  ;;  %v4719_v50 = vmax.f32 %v4605_v35, 0.0  ;;  %v5283_v35 = vadd.f32 %v5282_v51, %v5281_v61 }
 0x466   :  { %v4899_v38 = vrot.slane %v4898_v6, 4 }
 0x467   :  { %v5218_v60 = vsel %vm4736_vm1, %v5016_v59, 0.0  ;;  %v5442_v21 = vsel %vm4736_vm1, %v4719_v50, 0.0  ;;  %v5560_v26 = vrot.slane %v4719_v50, 4 }
 0x468   :  { %v5219_v32 = vrot.slane %v5218_v60, 4  ;;  %v4900_v19 = vadd.f32 %v4899_v38, %v4898_v6  ;;  %v5443_v54 = vrot.slane %v5442_v21, 4 }
 0x469   :  { %v5762_v49 = vsel %vm4736_vm1, %v5560_v26, 0.0 }
 0x46a   :  { %v5220_v5 = vadd.f32 %v5219_v32, %v5218_v60  ;;  %v5763_v37 = vrot.slane %v5762_v49, 4  ;;  %v4901_v31 = vrot.slane %v4900_v19, 2  ;;  %v5444_v52 = vadd.f32 %v5443_v54, %v5442_v21 }
 0x46b   :  { %v5603_v21 = vadd.f32 %v5602_v46, %v5601_v13  ;;  %v5542_v54 = vrot.slane %v4683_v30, 4 }
 0x46c   :  { %v5221_v44 = vrot.slane %v5220_v5, 2  ;;  %v5764_v47 = vadd.f32 %v5763_v37, %v5762_v49  ;;  %v4902_v39 = vadd.f32 %v4901_v31, %v4900_v19  ;;  %v5445_v63 = vrot.slane %v5444_v52, 2 }
 0x46d   :  { %v5060_v49 = vrot.slane %v5059_v10, 2  ;;  %v5093_v31 = vrot.slane %v5092_v7, 4  ;;  %v5604_v61 = vrot.slane %v5603_v21, 2  ;;  %v5636_v23 = vsel %vm4736_vm1, %v5542_v54, 0.0 }
 0x46e   :  { %v5222_v36 = vadd.f32 %v5221_v44, %v5220_v5  ;;  %v5765_v8 = vrot.slane %v5764_v47, 2  ;;  %v4903_v14 = vrot.slane %v4902_v39, 1  ;;  %v5446_v25 = vadd.f32 %v5445_v63, %v5444_v52 }
 0x46f   :  { %v4741_v52 = vadd.f32 %v4740_v24, %v4739_v42  ;;  %v5061_v13 = vadd.f32 %v5060_v49, %v5059_v10  ;;  %v4775_v42 = vrot.slane %v10511_v4, 2 }
 0x470   :  { %v5766_v16 = vadd.f32 %v5765_v8, %v5764_v47  ;;  %v5223_v27 = vrot.slane %v5222_v36, 1  ;;  %v4904_v2 = vadd.f32 %v4903_v14, %v4902_v39  ;;  %v5447_v45 = vrot.slane %v5446_v25, 1 }
 0x472   :  { %v5224_v56 = vadd.f32 %v5223_v27, %v5222_v36  ;;  %v5767_v1 = vrot.slane %v5766_v16, 1  ;;  %v5448_v59 = vadd.f32 %v5447_v45, %v5446_v25  ;;  %v10498_v50 = vsel %vm5869_vm10, %v4904_v2, %v10467_v22 }
 0x473   :  { %v4425_v28 = vpop.f32.mrb[68].mxu0  ;;  %v5316_v22 = vsel %vm4736_vm1, %v4683_v30, 0.0  ;;  %v4742_v27 = vrot.slane %v4741_v52, 1  ;;  %v5605_v30 = vadd.f32 %v5604_v61, %v5603_v21 }
 0x474   :  { %v4426_v33 = vadd.f32 %v10337_v0, %v4425_v28  ;;  %v4427_v6 = vpop.f32.mrb[69].mxu0  ;;  %v5948_v41 = vsel %vm5869_vm10, %v5224_v56, %v10470_v9  ;;  %v5768_v60 = vadd.f32 %v5767_v1, %v5766_v16  ;;  %v6020_v19 = vsel %vm5869_vm10, %v5448_v59, %v10473_v34 }
 0x475   :  { %v4428_v38 = vpop.f32.mrb[70].mxu0  ;;  %5960 = vrot.lane.b32.xlu1 %v5948_v41, %s7494_s1  ;;  %v5284_v9 = vrot.slane %v5283_v35, 2  ;;  %v5317_v12 = vrot.slane %v5316_v22, 4  ;;  %v5094_v16 = vadd.f32 %v5093_v31, %v5092_v7  ;;  %v5062_v1 = vrot.slane %v5061_v13, 1 }
 0x476   :  { %v4674_v26 = vmax.f32 %v4426_v33, 0.0  ;;  %v4429_v32 = vadd.f32 %v10337_v0, %v4428_v38  ;;  %v4430_v20 = vpop.f32.mrb[71].mxu0  ;;  %v6092_v55 = vsel %vm5869_vm10, %v5768_v60, %v10476_v11  ;;  %v5637_v60 = vrot.slane %v5636_v23, 4 }
 0x477   :  { %v5285_v36 = vadd.f32 %v5284_v9, %v5283_v35  ;;  %v5318_v56 = vadd.f32 %v5317_v12, %v5316_v22  ;;  %v5095_v38 = vrot.slane %v5094_v16, 2  ;;  %v4743_v21 = vadd.f32 %v4742_v27, %v4741_v52 }
 0x478   :  { %v4744_v5 = vsel %vm4736_vm1, %v4674_v26, 0.0  ;;  %v4994_v37 = vrot.slane %v4674_v26, 4  ;;  %v4675_v58 = vmax.f32 %v4429_v32, 0.0  ;;  %v5606_v26 = vrot.slane %v5605_v30, 1 }
 0x479   :  { %v4745_v15 = vrot.slane %v4744_v5, 4  ;;  %6032 = vrot.lane.b32.xlu1 %v6020_v19, %s7496_s29  ;;  %v5286_v35 = vrot.slane %v5285_v36, 1  ;;  %v5063_v49 = vadd.f32 %v5062_v1, %v5061_v13  ;;  %v5319_v52 = vrot.slane %v5318_v56, 2 }
 0x47a   :  { %v5064_v34 = vsel %vm4736_vm1, %v4994_v37, 0.0  ;;  %v5288_v44 = vsel %vm4736_vm1, %v4675_v58, 0.0  ;;  %v5538_v47 = vrot.slane %v4675_v58, 4 }
 0x47b   :  { %v4746_v11 = vadd.f32 %v4745_v15, %v4744_v5  ;;  %v5065_v39 = vrot.slane %v5064_v34, 4  ;;  %v5289_v63 = vrot.slane %v5288_v44, 4  ;;  %v5638_v15 = vadd.f32 %v5637_v60, %v5636_v23 }
 0x47c   :  { %v5608_v8 = vsel %vm4736_vm1, %v5538_v47, 0.0  ;;  %v5320_v23 = vadd.f32 %v5319_v52, %v5318_v56 }
 0x47d   :  { %v4747_v57 = vrot.slane %v4746_v11, 2  ;;  %v5066_v51 = vadd.f32 %v5065_v39, %v5064_v34  ;;  %v5290_v14 = vadd.f32 %v5289_v63, %v5288_v44  ;;  %v5609_v25 = vrot.slane %v5608_v8, 4  ;;  %v4609_v62 = vpop.f32.mrb[76].mxu1  ;;  %6104 = vrot.lane.b32.xlu1 %v6092_v55, %s7498_s13 }
 0x47e   :  { %v4611_v46 = vpop.f32.mrb[77].mxu1  ;;  %v4610_v33 = vadd.f32 %v10337_v0, %v4609_v62  ;;  %v5287_v55 = vadd.f32 %v5286_v35, %v5285_v36  ;;  %v10524_v0 = vld [vmem:[%s11015_s4] ss:$0 sm:$0xff]  ;;  %v5607_v34 = vadd.f32 %v5606_v26, %v5605_v30  ;;  %v5096_v63 = vadd.f32 %v5095_v38, %v5094_v16 }
 0x47f   :  { %v4748_v2 = vadd.f32 %v4747_v57, %v4746_v11  ;;  %v5067_v45 = vrot.slane %v5066_v51, 2  ;;  %v5291_v43 = vrot.slane %v5290_v14, 2  ;;  %v5610_v10 = vadd.f32 %v5609_v25, %v5608_v8  ;;  %v4612_v28 = vpop.f32.mrb[78].mxu1 }
 0x480   :  { %v4614_v6 = vpop.f32.mrb[79].mxu1  ;;  %v4720_v22 = vmax.f32 %v4610_v33, 0.0  ;;  %v4613_v9 = vadd.f32 %v10524_v0, %v4612_v28  ;;  %v4466_v61 = vadd.f32 %v10524_v0, %v9970_v17  ;;  %v4776_v11 = vadd.f32 %v4775_v42, %v10511_v4 }
 0x481   :  { %v4749_v59 = vrot.slane %v4748_v2, 1  ;;  %v5068_v24 = vadd.f32 %v5067_v45, %v5066_v51  ;;  %v5292_v41 = vadd.f32 %v5291_v43, %v5290_v14  ;;  %v5611_v7 = vrot.slane %v5610_v10, 2 }
 0x482   :  { %v4721_v39 = vmax.f32 %v4613_v9, 0.0  ;;  %v5017_v36 = vrot.slane %v4720_v22, 4  ;;  %v4905_v8 = vsel %vm4736_vm1, %v4720_v22, 0.0  ;;  %v5639_v17 = vrot.slane %v5638_v15, 2 }
 0x483   :  { %v4750_v32 = vadd.f32 %v4749_v59, %v4748_v2  ;;  %v5069_v20 = vrot.slane %v5068_v24, 1  ;;  %v5293_v19 = vrot.slane %v5292_v41, 1  ;;  %v5612_v54 = vadd.f32 %v5611_v7, %v5610_v10 }
 0x484   :  { %v4684_v57 = vmax.f32 %v4466_v61, 0.0  ;;  %v4777_v51 = vrot.slane %v4776_v11, 1  ;;  %v5561_v14 = vrot.slane %v4721_v39, 4  ;;  %v5097_v25 = vrot.slane %v5096_v63, 1 }
 0x485   :  { %v5070_v5 = vadd.f32 %v5069_v20, %v5068_v24  ;;  %v10528_v37 = vsel %vm5857_vm2, %v4750_v32, %v4743_v21  ;;  %v5294_v58 = vadd.f32 %v5293_v19, %v5292_v41  ;;  %v5613_v31 = vrot.slane %v5612_v54, 1 }
 0x486   :  { %v4469_v62 = vadd.f32 %v10524_v0, %v9975_v29  ;;  %v4906_v27 = vrot.slane %v4905_v8, 4  ;;  %v5225_v4 = vsel %vm4736_vm1, %v5017_v36, 0.0  ;;  %v5321_v42 = vrot.slane %v5320_v23, 1 }
 0x487   :  { %v10533_v44 = vsel %vm5857_vm2, %v5070_v5, %v5063_v49  ;;  %v5614_v47 = vadd.f32 %v5613_v31, %v5612_v54  ;;  %v10536_v12 = vsel %vm5857_vm2, %v5294_v58, %v5287_v55  ;;  %v10546_v16 = vadd.f32 %v5639_v17, %v5638_v15 }
 0x488   :  { %v4999_v30 = vrot.slane %v4684_v57, 4  ;;  %v5449_v46 = vsel %vm4736_vm1, %v4721_v39, 0.0  ;;  %v4779_v45 = vsel %vm4736_vm1, %v4684_v57, 0.0  ;;  %v5226_v43 = vrot.slane %v5225_v4, 4 }
 0x489   :  { %v10540_v13 = vsel %vm5857_vm2, %v5614_v47, %v5607_v34  ;;  %v5769_v10 = vsel %vm4736_vm1, %v5561_v14, 0.0  ;;  %v10552_v1 = vadd.f32 %v4777_v51, %v4776_v11  ;;  %v10554_v29 = vadd.f32 %v5097_v25, %v5096_v63 }
 0x48a   :  { %v4685_v35 = vmax.f32 %v4469_v62, 0.0  ;;  %v4907_v33 = vadd.f32 %v4906_v27, %v4905_v8  ;;  %v10556_v59 = vadd.f32 %v5321_v42, %v5320_v23  ;;  %v5450_v24 = vrot.slane %v5449_v46, 4 }
 0x48b   :  { %v5641_v60 = vrot.slane %v10546_v16, 1  ;;  %v4780_v21 = vrot.slane %v4779_v45, 4  ;;  %v10561_v26 = vsel %vm4736_vm1, %v4999_v30, 0.0  ;;  %v5770_v32 = vrot.slane %v5769_v10, 4 }
 0x48c   :  { %v5227_v20 = vadd.f32 %v5226_v43, %v5225_v4  ;;  %v10565_v55 = vsel %vm4736_vm1, %v4685_v35, 0.0  ;;  %v10567_v22 = vrot.slane %v4685_v35, 4  ;;  %v4908_v9 = vrot.slane %v4907_v33, 2 }
 0x48d   :  { %v5451_v58 = vadd.f32 %v5450_v24, %v5449_v46  ;;  %v10571_v61 = vadd.f32 %v4780_v21, %v4779_v45  ;;  %v5100_v39 = vrot.slane %v10561_v26, 4  ;;  %v5771_v36 = vadd.f32 %v5770_v32, %v5769_v10 }
 0x48e   :  { %v5228_v63 = vrot.slane %v5227_v20, 2  ;;  %v5324_v25 = vrot.slane %v10565_v55, 4  ;;  %v10576_v62 = vadd.f32 %v4908_v9, %v4907_v33 }
 0x48f   :  { %v4433_v2 = vpop.f32.mrb[72].mxu0  ;;  %v5452_v27 = vrot.slane %v5451_v58, 2 }
 0x490   :  { %v4434_v28 = vadd.f32 %v10524_v0, %v4433_v2  ;;  %v4435_v56 = vpop.f32.mrb[73].mxu0  ;;  %v10579_v10 = vadd.f32 %v5228_v63, %v5227_v20 }
 0x491   :  { %v4436_v6 = vpop.f32.mrb[74].mxu0 }
 0x492   :  { %v4676_v41 = vmax.f32 %v4434_v28, 0.0  ;;  %v4437_v7 = vadd.f32 %v10524_v0, %v4436_v6  ;;  %v4438_v38 = vpop.f32.mrb[75].mxu0  ;;  %v5772_v28 = vrot.slane %v5771_v36, 2 }
 0x493   :  { %v5453_v38 = vadd.f32 %v5452_v27, %v5451_v58 }
 0x494   :  { %v4751_v19 = vsel %vm4736_vm1, %v4676_v41, 0.0  ;;  %v4995_v54 = vrot.slane %v4676_v41, 4  ;;  %v4677_v49 = vmax.f32 %v4437_v7, 0.0 }
 0x495   :  { %v4752_v5 = vrot.slane %v4751_v19, 4 }
 0x496   :  { %v5071_v31 = vsel %vm4736_vm1, %v4995_v54, 0.0  ;;  %v5295_v52 = vsel %vm4736_vm1, %v4677_v49, 0.0  ;;  %v5539_v15 = vrot.slane %v4677_v49, 4 }
 0x497   :  { %v4753_v34 = vadd.f32 %v4752_v5, %v4751_v19  ;;  %v5072_v47 = vrot.slane %v5071_v31, 4  ;;  %v5296_v11 = vrot.slane %v5295_v52, 4 }
 0x498   :  { %v5615_v23 = vsel %vm4736_vm1, %v5539_v15, 0.0 }
 0x499   :  { %v4754_v8 = vrot.slane %v4753_v34, 2  ;;  %v5073_v17 = vadd.f32 %v5072_v47, %v5071_v31  ;;  %v5297_v57 = vadd.f32 %v5296_v11, %v5295_v52  ;;  %v5616_v51 = vrot.slane %v5615_v23, 4  ;;  %v4617_v14 = vpop.f32.mrb[80].mxu1 }
 0x49a   :  { %v4618_v4 = vadd.f32 %v10524_v0, %v4617_v14  ;;  %v4619_v42 = vpop.f32.mrb[81].mxu1 }
 0x49b   :  { %v4755_v30 = vadd.f32 %v4754_v8, %v4753_v34  ;;  %v5074_v46 = vrot.slane %v5073_v17, 2  ;;  %v5298_v2 = vrot.slane %v5297_v57, 2  ;;  %v5617_v45 = vadd.f32 %v5616_v51, %v5615_v23  ;;  %v4620_v43 = vpop.f32.mrb[82].mxu1  ;;  %v7419_v51 = vld [vmem:[%s11016_s5] sm:$0xff]  }
 0x49c   :  { %v4722_v56 = vmax.f32 %v4618_v4, 0.0  ;;  %v4621_v35 = vadd.f32 %v10524_v0, %v4620_v43  ;;  %v4622_v6 = vpop.f32.mrb[83].mxu1  ;;  %v10606_v42 = vsel %vm4736_vm1, %v10567_v22, 0.0  ;;  %v5773_v43 = vadd.f32 %v5772_v28, %v5771_v36 }
 0x49d   :  { %v4756_v24 = vrot.slane %v4755_v30, 1  ;;  %v5075_v41 = vadd.f32 %v5074_v46, %v5073_v17  ;;  %v5299_v33 = vadd.f32 %v5298_v2, %v5297_v57  ;;  %v5618_v7 = vrot.slane %v5617_v45, 2  ;;  %v7418_v57 = vld [vmem:[%s11016_s5 + $0x40] sm:$0xff]  }
 0x49e   :  { %v4912_v21 = vsel %vm4736_vm1, %v4722_v56, 0.0  ;;  %v5018_v32 = vrot.slane %v4722_v56, 4  ;;  %v4723_v19 = vmax.f32 %v4621_v35, 0.0  ;;  %7226 = vmatprep.subr.bf16.mxu0 %v7418_v57 }
 0x49f   :  { %v4757_v54 = vadd.f32 %v4756_v24, %v4755_v30  ;;  %v5076_v49 = vrot.slane %v5075_v41, 1  ;;  %v5300_v9 = vrot.slane %v5299_v33, 1  ;;  %v5619_v5 = vadd.f32 %v5618_v7, %v5617_v45  ;;  %7227 = vmatpush3.bf16.msra.mxu0 %v7419_v51 }
 0x4a0   :  { %v4913_v20 = vrot.slane %v4912_v21, 4  ;;  %v5232_v31 = vsel %vm4736_vm1, %v5018_v32, 0.0  ;;  %v5456_v52 = vsel %vm4736_vm1, %v4723_v19, 0.0  ;;  %v5562_v15 = vrot.slane %v4723_v19, 4  ;;  %v11024_v32 = vld [vmem:[#allocation6_spill] sm:$0xff] }
 0x4a1   :  { %v5077_v34 = vadd.f32 %v5076_v49, %v5075_v41  ;;  %v10587_v47 = vsel %vm5859_vm3, %v4757_v54, %v10528_v37  ;;  %v5301_v58 = vadd.f32 %v5300_v9, %v5299_v33  ;;  %v5620_v11 = vrot.slane %v5619_v5, 1 }
 0x4a2   :  { %v4914_v63 = vadd.f32 %v4913_v20, %v4912_v21  ;;  %v5233_v23 = vrot.slane %v5232_v31, 4  ;;  %v5457_v8 = vrot.slane %v5456_v52, 4  ;;  %v5776_v17 = vsel %vm4736_vm1, %v5562_v15, 0.0 }
 0x4a3   :  { %v10598_v14 = vsel %vm5859_vm3, %v5077_v34, %v10533_v44  ;;  %v5621_v37 = vadd.f32 %v5620_v11, %v5619_v5  ;;  %v10602_v27 = vsel %vm5859_vm3, %v5301_v58, %v10536_v12  ;;  %v5777_v4 = vrot.slane %v5776_v17, 4 }
 0x4a4   :  { %v4915_v30 = vrot.slane %v4914_v63, 2  ;;  %v5234_v46 = vadd.f32 %v5233_v23, %v5232_v31  ;;  %v5458_v2 = vadd.f32 %v5457_v8, %v5456_v52  ;;  %v4474_v45 = vadd.f32 %v10524_v0, %v10001_v40 }
 0x4a5   :  { %v10612_v44 = vsel %vm5859_vm3, %v5621_v37, %v10540_v13  ;;  %v5778_v56 = vadd.f32 %v5777_v4, %v5776_v17  ;;  %v4910_v12 = vrot.slane %v10576_v62, 1  ;;  %v4782_v24 = vrot.slane %v10571_v61, 2 }
 0x4a6   :  { %v4916_v35 = vadd.f32 %v4915_v30, %v4914_v63  ;;  %v5235_v6 = vrot.slane %v5234_v46, 2  ;;  %v5459_v22 = vrot.slane %v5458_v2, 2  ;;  %v5230_v41 = vrot.slane %v10579_v10, 1 }
 0x4a7   :  { %v5454_v33 = vrot.slane %v5453_v38, 1  ;;  %v5779_v7 = vrot.slane %v5778_v56, 2  ;;  %v10620_v40 = vadd.f32 %v5100_v39, %v10561_v26  ;;  %v4686_v21 = vmax.f32 %v4474_v45, 0.0 }
 0x4a8   :  { %v4917_v13 = vrot.slane %v4916_v35, 1  ;;  %v5236_v36 = vadd.f32 %v5235_v6, %v5234_v46  ;;  %v5460_v28 = vadd.f32 %v5459_v22, %v5458_v2  ;;  %v4477_v19 = vadd.f32 %v10524_v0, %v11024_v32 }
 0x4a9   :  { %v5774_v54 = vrot.slane %v5773_v43, 1  ;;  %v5780_v49 = vadd.f32 %v5779_v7, %v5778_v56  ;;  %v4911_v9 = vadd.f32 %v4910_v12, %v10576_v62  ;;  %v10628_v52 = vadd.f32 %v5324_v25, %v10565_v55 }
 0x4aa   :  { %v4918_v5 = vadd.f32 %v4917_v13, %v4916_v35  ;;  %v5237_v20 = vrot.slane %v5236_v36, 1  ;;  %v5461_v31 = vrot.slane %v5460_v28, 1  ;;  %v5231_v26 = vadd.f32 %v5230_v41, %v10579_v10 }
 0x4ab   :  { %v5455_v39 = vadd.f32 %v5454_v33, %v5453_v38  ;;  %v5781_v15 = vrot.slane %v5780_v49, 1  ;;  %v4441_v34 = vpop.f32.mrb[76].mxu0  ;;  %v5000_v8 = vrot.slane %v4686_v21, 4  ;;  %v4687_v17 = vmax.f32 %v4477_v19, 0.0 }
 0x4ac   :  { %v5238_v58 = vadd.f32 %v5237_v20, %v5236_v36  ;;  %v10632_v11 = vsel %vm5857_vm2, %v4918_v5, %v4911_v9  ;;  %v5462_v63 = vadd.f32 %v5461_v31, %v5460_v28  ;;  %v4442_v62 = vadd.f32 %v10524_v0, %v4441_v34  ;;  %v4443_v23 = vpop.f32.mrb[77].mxu0 }
 0x4ad   :  { %v5775_v57 = vadd.f32 %v5774_v54, %v5773_v43  ;;  %v5782_v51 = vadd.f32 %v5781_v15, %v5780_v49  ;;  %v4444_v37 = vpop.f32.mrb[78].mxu0  ;;  %v10645_v30 = vadd.f32 %v5641_v60, %v10546_v16  ;;  %v10648_v46 = vadd.f32 %v4782_v24, %v10571_v61 }
 0x4ae   :  { %v10636_v55 = vsel %vm5857_vm2, %v5238_v58, %v5231_v26  ;;  %v10639_v25 = vsel %vm5857_vm2, %v5462_v63, %v5455_v39  ;;  %v4678_v10 = vmax.f32 %v4442_v62, 0.0  ;;  %v4445_v38 = vadd.f32 %v10524_v0, %v4444_v37  ;;  %v4446_v4 = vpop.f32.mrb[79].mxu0 }
 0x4af   :  { %v5644_v2 = vrot.slane %v10606_v42, 4  ;;  %v10652_v45 = vsel %vm5857_vm2, %v5782_v51, %v5775_v57  ;;  %v5102_v43 = vrot.slane %v10620_v40, 2  ;;  %v5326_v6 = vrot.slane %v10628_v52, 2 }
 0x4b0   :  { %v4758_v56 = vsel %vm4736_vm1, %v4678_v10, 0.0  ;;  %v4996_v12 = vrot.slane %v4678_v10, 4  ;;  %v4679_v35 = vmax.f32 %v4445_v38, 0.0  ;;  %v5106_v22 = vsel %vm4736_vm1, %v5000_v8, 0.0 }
 0x4b1   :  { %v5330_v16 = vsel %vm4736_vm1, %v4687_v17, 0.0  ;;  %v4759_v60 = vrot.slane %v4758_v56, 4  ;;  %v5544_v61 = vrot.slane %v4687_v17, 4  ;;  %v4786_v7 = vsel %vm4736_vm1, %v4686_v21, 0.0 }
 0x4b2   :  { %v5078_v24 = vsel %vm4736_vm1, %v4996_v12, 0.0  ;;  %v5302_v41 = vsel %vm4736_vm1, %v4679_v35, 0.0  ;;  %v5540_v33 = vrot.slane %v4679_v35, 4  ;;  %v10663_v32 = vadd.f32 %v5644_v2, %v10606_v42 }
 0x4b3   :  { %v4760_v13 = vadd.f32 %v4759_v60, %v4758_v56  ;;  %v5079_v36 = vrot.slane %v5078_v24, 4  ;;  %v5303_v28 = vrot.slane %v5302_v41, 4  ;;  %v5107_v19 = vrot.slane %v5106_v22, 4 }
 0x4b4   :  { %v5331_v54 = vrot.slane %v5330_v16, 4  ;;  %v5622_v49 = vsel %vm4736_vm1, %v5540_v33, 0.0  ;;  %v4784_v39 = vrot.slane %v10648_v46, 1  ;;  %v4787_v15 = vrot.slane %v4786_v7, 4 }
 0x4b5   :  { %v4761_v9 = vrot.slane %v4760_v13, 2  ;;  %v5080_v5 = vadd.f32 %v5079_v36, %v5078_v24  ;;  %v5304_v20 = vadd.f32 %v5303_v28, %v5302_v41  ;;  %v5623_v31 = vrot.slane %v5622_v49, 4  ;;  %v4625_v26 = vpop.f32.mrb[84].mxu1 }
 0x4b6   :  { %v5650_v21 = vsel %vm4736_vm1, %v5544_v61, 0.0  ;;  %v4626_v34 = vadd.f32 %v10524_v0, %v4625_v26  ;;  %v4627_v58 = vpop.f32.mrb[85].mxu1  ;;  %v5108_v17 = vadd.f32 %v5107_v19, %v5106_v22  ;;  %v5332_v57 = vadd.f32 %v5331_v54, %v5330_v16 }
 0x4b7   :  { %v4762_v63 = vadd.f32 %v4761_v9, %v4760_v13  ;;  %v5081_v42 = vrot.slane %v5080_v5, 2  ;;  %v5305_v62 = vrot.slane %v5304_v20, 2  ;;  %v5624_v23 = vadd.f32 %v5623_v31, %v5622_v49  ;;  %v4628_v8 = vpop.f32.mrb[86].mxu1 }
 0x4b8   :  { %v4724_v51 = vmax.f32 %v4626_v34, 0.0  ;;  %v4629_v37 = vadd.f32 %v10524_v0, %v4628_v8  ;;  %v4630_v10 = vpop.f32.mrb[87].mxu1  ;;  %v5651_v12 = vrot.slane %v5650_v21, 4 }
 0x4b9   :  { %v4763_v38 = vrot.slane %v4762_v63, 1  ;;  %v5082_v4 = vadd.f32 %v5081_v42, %v5080_v5  ;;  %v5306_v2 = vadd.f32 %v5305_v62, %v5304_v20  ;;  %v5625_v56 = vrot.slane %v5624_v23, 2 }
 0x4ba   :  { %v4919_v35 = vsel %vm4736_vm1, %v4724_v51, 0.0  ;;  %v5019_v60 = vrot.slane %v4724_v51, 4  ;;  %v4725_v61 = vmax.f32 %v4629_v37, 0.0  ;;  %v4788_v51 = vadd.f32 %v4787_v15, %v4786_v7 }
 0x4bb   :  { %v4764_v24 = vadd.f32 %v4763_v38, %v4762_v63  ;;  %v5083_v41 = vrot.slane %v5082_v4, 1  ;;  %v5307_v33 = vrot.slane %v5306_v2, 1  ;;  %v5626_v13 = vadd.f32 %v5625_v56, %v5624_v23 }
 0x4bc   :  { %v4920_v36 = vrot.slane %v4919_v35, 4  ;;  %v5239_v22 = vsel %vm4736_vm1, %v5019_v60, 0.0  ;;  %v5463_v16 = vsel %vm4736_vm1, %v4725_v61, 0.0  ;;  %v5563_v28 = vrot.slane %v4725_v61, 4 }
 0x4bd   :  { %v5084_v19 = vadd.f32 %v5083_v41, %v5082_v4  ;;  %v10675_v54 = vsel %vm5861_vm5, %v4764_v24, %v10587_v47  ;;  %v5308_v49 = vadd.f32 %v5307_v33, %v5306_v2  ;;  %v5627_v9 = vrot.slane %v5626_v13, 1 }
 0x4be   :  { %v4921_v5 = vadd.f32 %v4920_v36, %v4919_v35  ;;  %v5240_v20 = vrot.slane %v5239_v22, 4  ;;  %v5464_v31 = vrot.slane %v5463_v16, 4  ;;  %v5783_v26 = vsel %vm4736_vm1, %v5563_v28, 0.0 }
 0x4bf   :  { %v5628_v34 = vadd.f32 %v5627_v9, %v5626_v13  ;;  %v5784_v58 = vrot.slane %v5783_v26, 4  ;;  %v10680_v63 = vsel %vm5861_vm5, %v5084_v19, %v10598_v14  ;;  %v10684_v42 = vsel %vm5861_vm5, %v5308_v49, %v10602_v27 }
 0x4c0   :  { %v5646_v47 = vrot.slane %v10663_v32, 2  ;;  %v4922_v62 = vrot.slane %v4921_v5, 2  ;;  %v5241_v23 = vadd.f32 %v5240_v20, %v5239_v22  ;;  %v5465_v8 = vadd.f32 %v5464_v31, %v5463_v16 }
 0x4c1   :  { %v5652_v37 = vadd.f32 %v5651_v12, %v5650_v21  ;;  %v5785_v10 = vadd.f32 %v5784_v58, %v5783_v26  ;;  %v10689_v38 = vsel %vm5861_vm5, %v5628_v34, %v10612_v44  ;;  %v5103_v14 = vadd.f32 %v5102_v43, %v10620_v40 }
 0x4c2   :  { %v4923_v4 = vadd.f32 %v4922_v62, %v4921_v5  ;;  %v5242_v2 = vrot.slane %v5241_v23, 2  ;;  %v5466_v27 = vrot.slane %v5465_v8, 2  ;;  %v5327_v56 = vadd.f32 %v5326_v6, %v10628_v52 }
 0x4c3   :  { %v5109_v35 = vrot.slane %v5108_v17, 2  ;;  %v5333_v60 = vrot.slane %v5332_v57, 2  ;;  %v5786_v7 = vrot.slane %v5785_v10, 2  ;;  %v10698_v15 = vadd.f32 %v4784_v39, %v10648_v46 }
 0x4c4   :  { %v4924_v21 = vrot.slane %v4923_v4, 1  ;;  %v5243_v44 = vadd.f32 %v5242_v2, %v5241_v23  ;;  %v5467_v12 = vadd.f32 %v5466_v27, %v5465_v8  ;;  %v5647_v61 = vadd.f32 %v5646_v47, %v10663_v32 }
 0x4c5   :  { %v4789_v24 = vrot.slane %v4788_v51, 2  ;;  %v5653_v40 = vrot.slane %v5652_v37, 2  ;;  %v5787_v43 = vadd.f32 %v5786_v7, %v5785_v10  ;;  %v5104_v41 = vrot.slane %v5103_v14, 1 }
 0x4c6   :  { %v4925_v33 = vadd.f32 %v4924_v21, %v4923_v4  ;;  %v5244_v13 = vrot.slane %v5243_v44, 1  ;;  %v5468_v36 = vrot.slane %v5467_v12, 1  ;;  %v5328_v22 = vrot.slane %v5327_v56, 1 }
 0x4c7   :  { %v5110_v52 = vadd.f32 %v5109_v35, %v5108_v17  ;;  %v5334_v6 = vadd.f32 %v5333_v60, %v5332_v57  ;;  %v5788_v16 = vrot.slane %v5787_v43, 1  ;;  %v4449_v28 = vpop.f32.mrb[80].mxu0  ;;  %v5648_v9 = vrot.slane %v5647_v61, 1 }
 0x4c8   :  { %v5245_v19 = vadd.f32 %v5244_v13, %v5243_v44  ;;  %v10703_v46 = vsel %vm5859_vm3, %v4925_v33, %v10632_v11  ;;  %v5469_v39 = vadd.f32 %v5468_v36, %v5467_v12  ;;  %v4450_v32 = vadd.f32 %v10524_v0, %v4449_v28  ;;  %v4451_v49 = vpop.f32.mrb[81].mxu0 }
 0x4c9   :  { %v10706_v5 = vadd.f32 %v4789_v24, %v4788_v51  ;;  %v5654_v20 = vadd.f32 %v5653_v40, %v5652_v37  ;;  %v5789_v31 = vadd.f32 %v5788_v16, %v5787_v43  ;;  %v4452_v26 = vpop.f32.mrb[82].mxu0  ;;  %v10717_v47 = vadd.f32 %v5104_v41, %v5103_v14 }
 0x4ca   :  { %v10710_v17 = vsel %vm5859_vm3, %v5245_v19, %v10636_v55  ;;  %v10714_v57 = vsel %vm5859_vm3, %v5469_v39, %v10639_v25  ;;  %v4680_v11 = vmax.f32 %v4450_v32, 0.0  ;;  %v4453_v34 = vadd.f32 %v10524_v0, %v4452_v26  ;;  %v4454_v58 = vpop.f32.mrb[83].mxu0 }
 0x4cb   :  { %v10719_v62 = vadd.f32 %v5328_v22, %v5327_v56  ;;  %v5335_v23 = vrot.slane %v5334_v6, 1  ;;  %v10723_v8 = vsel %vm5859_vm3, %v5789_v31, %v10652_v45  ;;  %v5111_v10 = vrot.slane %v5110_v52, 1 }
 0x4cc   :  { %v4765_v55 = vsel %vm4736_vm1, %v4680_v11, 0.0  ;;  %v4997_v51 = vrot.slane %v4680_v11, 4  ;;  %v4681_v37 = vmax.f32 %v4453_v34, 0.0  ;;  %v10726_v25 = vadd.f32 %v5648_v9, %v5647_v61 }
 0x4cd   :  { %v4791_v4 = vrot.slane %v10706_v5, 1  ;;  %v4766_v2 = vrot.slane %v4765_v55, 4  ;;  %v4633_v27 = vpop.f32.mrb[88].mxu1  ;;  %v5655_v14 = vrot.slane %v5654_v20, 1  ;;  %v10732_v40 = vadd.f32 %v5335_v23, %v5334_v6 }
 0x4ce   :  { %v5085_v56 = vsel %vm4736_vm1, %v4997_v51, 0.0  ;;  %v5309_v35 = vsel %vm4736_vm1, %v4681_v37, 0.0  ;;  %v5541_v60 = vrot.slane %v4681_v37, 4  ;;  %v4634_v45 = vadd.f32 %v10524_v0, %v4633_v27  ;;  %v4635_v7 = vpop.f32.mrb[89].mxu1 }
 0x4cf   :  { %v4767_v21 = vadd.f32 %v4766_v2, %v4765_v55  ;;  %v5086_v44 = vrot.slane %v5085_v56, 4  ;;  %v5310_v12 = vrot.slane %v5309_v35, 4  ;;  %v4636_v24 = vpop.f32.mrb[90].mxu1  ;;  %v10736_v13 = vadd.f32 %v5111_v10, %v5110_v52  ;;  %v7420_v10 = vld [vmem:[%s11016_s5 + $0x48] sm:$0xff]  }
 0x4d0   :  { %v5629_v61 = vsel %vm4736_vm1, %v5541_v60, 0.0  ;;  %v4726_v43 = vmax.f32 %v4634_v45, 0.0  ;;  %v4637_v41 = vadd.f32 %v10524_v0, %v4636_v24  ;;  %v4638_v33 = vpop.f32.mrb[91].mxu1  ;;  %v10739_v49 = vadd.f32 %v5655_v14, %v5654_v20  ;;  %v7421_v20 = vld [vmem:[%s11016_s5 + $0x8] sm:$0xff]   ;;  %7228 = vmatprep.subr.bf16.mxu0 %v7420_v10 }
 0x4d1   :  { %v4768_v36 = vrot.slane %v4767_v21, 2  ;;  %v5087_v22 = vadd.f32 %v5086_v44, %v5085_v56  ;;  %v5311_v16 = vadd.f32 %v5310_v12, %v5309_v35  ;;  %v5630_v28 = vrot.slane %v5629_v61, 4  ;;  %7229 = vmatpush3.bf16.msra.mxu0 %v7421_v20 }
 0x4d2   :  { %v4926_v19 = vsel %vm4736_vm1, %v4726_v43, 0.0  ;;  %v5020_v39 = vrot.slane %v4726_v43, 4  ;;  %v4727_v32 = vmax.f32 %v4637_v41, 0.0 }
 0x4d3   :  { %v4769_v6 = vadd.f32 %v4768_v36, %v4767_v21  ;;  %v5088_v9 = vrot.slane %v5087_v22, 2  ;;  %v5312_v31 = vrot.slane %v5311_v16, 2  ;;  %v5631_v26 = vadd.f32 %v5630_v28, %v5629_v61  ;;  %v7422_v36 = vld [vmem:[%s11016_s5 + $0x50] sm:$0xff]  }
 0x4d4   :  { %v4927_v11 = vrot.slane %v4926_v19, 4  ;;  %v5246_v34 = vsel %vm4736_vm1, %v5020_v39, 0.0  ;;  %v5470_v52 = vsel %vm4736_vm1, %v4727_v32, 0.0  ;;  %v5564_v58 = vrot.slane %v4727_v32, 4  ;;  %7230 = vmatprep.subr.bf16.mxu0 %v7422_v36 }
 0x4d5   :  { %v4770_v23 = vrot.slane %v4769_v6, 1  ;;  %v5089_v55 = vadd.f32 %v5088_v9, %v5087_v22  ;;  %v5313_v51 = vadd.f32 %v5312_v31, %v5311_v16  ;;  %v5632_v37 = vrot.slane %v5631_v26, 2  ;;  %v7423_v22 = vld [vmem:[%s11016_s5 + $0x10] sm:$0xff]  }
 0x4d6   :  { %v4928_v2 = vadd.f32 %v4927_v11, %v4926_v19  ;;  %v5247_v27 = vrot.slane %v5246_v34, 4  ;;  %v5471_v14 = vrot.slane %v5470_v52, 4  ;;  %v5790_v56 = vsel %vm4736_vm1, %v5564_v58, 0.0  ;;  %7231 = vmatpush3.bf16.msra.mxu0 %v7423_v22 }
 0x4d7   :  { %v4771_v35 = vadd.f32 %v4770_v23, %v4769_v6  ;;  %v5090_v60 = vrot.slane %v5089_v55, 1  ;;  %v5314_v45 = vrot.slane %v5313_v51, 1  ;;  %v5633_v7 = vadd.f32 %v5632_v37, %v5631_v26 }
 0x4d8   :  { %v4929_v21 = vrot.slane %v4928_v2, 2  ;;  %v5248_v44 = vadd.f32 %v5247_v27, %v5246_v34  ;;  %v5472_v12 = vadd.f32 %v5471_v14, %v5470_v52  ;;  %v5791_v24 = vrot.slane %v5790_v56, 4 }
 0x4d9   :  { %v5091_v61 = vadd.f32 %v5090_v60, %v5089_v55  ;;  %v5315_v43 = vadd.f32 %v5314_v45, %v5313_v51  ;;  %v5634_v41 = vrot.slane %v5633_v7, 1  ;;  %v5864_v33 = vsel %vm5863_vm6, %v4771_v35, %v10675_v54 }
 0x4da   :  { %v4930_v16 = vadd.f32 %v4929_v21, %v4928_v2  ;;  %v5249_v28 = vrot.slane %v5248_v44, 2  ;;  %v5473_v19 = vrot.slane %v5472_v12, 2  ;;  %v5792_v39 = vadd.f32 %v5791_v24, %v5790_v56 }
 0x4db   :  { %v5635_v32 = vadd.f32 %v5634_v41, %v5633_v7  ;;  %v5931_v6 = vsel %vm5863_vm6, %v5091_v61, %v10680_v63  ;;  %v6003_v9 = vsel %vm5863_vm6, %v5315_v43, %v10684_v42  ;;  %v5866_v54 = vsel %vm5865_vm7, %v10552_v1, %v5864_v33 }
 0x4dc   :  { %v4931_v31 = vrot.slane %v4930_v16, 1  ;;  %v5250_v26 = vadd.f32 %v5249_v28, %v5248_v44  ;;  %v5474_v11 = vadd.f32 %v5473_v19, %v5472_v12  ;;  %v5793_v34 = vrot.slane %v5792_v39, 2  ;;  %v4641_v52 = vpop.f32.mrb[92].mxu1 }
 0x4dd   :  { %v4642_v58 = vadd.f32 %v10524_v0, %v4641_v52  ;;  %v4643_v23 = vpop.f32.mrb[93].mxu1  ;;  %v5932_v55 = vsel %vm5865_vm7, %v10554_v29, %v5931_v6  ;;  %v6004_v63 = vsel %vm5865_vm7, %v10556_v59, %v6003_v9  ;;  %v6075_v42 = vsel %vm5863_vm6, %v5635_v32, %v10689_v38  ;;  %v7426_v52 = vld [vmem:[%s11016_s5 + $0x60] sm:$0xff]  }
 0x4de   :  { %v4932_v1 = vadd.f32 %v4931_v31, %v4930_v16  ;;  %v5251_v51 = vrot.slane %v5250_v26, 1  ;;  %v5475_v37 = vrot.slane %v5474_v11, 1  ;;  %v5794_v10 = vadd.f32 %v5793_v34, %v5792_v39  ;;  %v4644_v20 = vpop.f32.mrb[94].mxu1  ;;  %v7428_v23 = vld [vmem:[%s11016_s5 + $0x68] sm:$0xff]  }
 0x4df   :  { %v4728_v2 = vmax.f32 %v4642_v58, 0.0  ;;  %v4645_v27 = vadd.f32 %v10524_v0, %v4644_v20  ;;  %v4646_v14 = vpop.f32.mrb[95].mxu1  ;;  %v5933_v56 = vsel %vm5867_vm9, %v10717_v47, %v5932_v55  ;;  %v6005_v29 = vsel %vm5867_vm9, %v10719_v62, %v6004_v63  ;;  %v7427_v58 = vld [vmem:[%s11016_s5 + $0x20] sm:$0xff]  }
 0x4e0   :  { %v5252_v35 = vadd.f32 %v5251_v51, %v5250_v26  ;;  %v10778_v59 = vsel %vm5861_vm5, %v4932_v1, %v10703_v46  ;;  %v5476_v38 = vadd.f32 %v5475_v37, %v5474_v11  ;;  %v5795_v60 = vrot.slane %v5794_v10, 1  ;;  %v7425_v26 = vld [vmem:[%s11016_s5 + $0x18] sm:$0xff]  }
 0x4e1   :  { %v4933_v45 = vsel %vm4736_vm1, %v4728_v2, 0.0  ;;  %v5021_v7 = vrot.slane %v4728_v2, 4  ;;  %v4729_v21 = vmax.f32 %v4645_v27, 0.0  ;;  %v5934_v44 = vsel %vm5869_vm10, %v10736_v13, %v5933_v56 }
 0x4e2   :  { %v5796_v12 = vadd.f32 %v5795_v60, %v5794_v10  ;;  %v4934_v24 = vrot.slane %v4933_v45, 4  ;;  %5956 = vrot.lane.b32.xlu0 %v5934_v44, %s7494_s1  ;;  %v6006_v47 = vsel %vm5869_vm10, %v10732_v40, %v6005_v29  ;;  %v6076_v46 = vsel %vm5865_vm7, %v10645_v30, %v6075_v42  ;;  %v7429_v29 = vld [vmem:[%s11016_s5 + $0x28] sm:$0xff]  }
 0x4e3   :  { %v5253_v62 = vsel %vm4736_vm1, %v5021_v7, 0.0  ;;  %v5477_v61 = vsel %vm4736_vm1, %v4729_v21, 0.0  ;;  %v5565_v43 = vrot.slane %v4729_v21, 4  ;;  %v6077_v41 = vsel %vm5867_vm9, %v10726_v25, %v6076_v46 }
 0x4e4   :  { %v4935_v33 = vadd.f32 %v4934_v24, %v4933_v45  ;;  %v5254_v13 = vrot.slane %v5253_v62, 4  ;;  %v5478_v36 = vrot.slane %v5477_v61, 4  ;;  %v6078_v22 = vsel %vm5869_vm10, %v10739_v49, %v6077_v41 }
 0x4e5   :  { %v5797_v16 = vsel %vm4736_vm1, %v5565_v43, 0.0  ;;  %v5951_v40 = vsel %vm5861_vm5, %v5252_v35, %v10710_v17  ;;  %v6023_v30 = vsel %vm5861_vm5, %v5476_v38, %v10714_v57  ;;  %v10801_v28 = vsel %vm5861_vm5, %v5796_v12, %v10723_v8  ;;  %v7424_v57 = vld [vmem:[%s11016_s5 + $0x58] sm:$0xff]  }
 0x4e6   :  { %v4936_v19 = vrot.slane %v4935_v33, 2  ;;  %v5255_v25 = vadd.f32 %v5254_v13, %v5253_v62  ;;  %v5479_v39 = vadd.f32 %v5478_v36, %v5477_v61  ;;  %v5798_v32 = vrot.slane %v5797_v16, 4  ;;  %6028 = vrot.lane.b32.xlu0 %v6006_v47, %s7496_s29  ;;  %7232 = vmatprep.subr.bf16.mxu0 %v7424_v57  ;;  %v7430_v62 = vld [vmem:[%s11016_s5 + $0x70] sm:$0xff]  }
 0x4e7   :  { %v4792_v49 = vadd.f32 %v4791_v4, %v10706_v5  ;;  %v5868_v17 = vsel %vm5867_vm9, %v10698_v15, %v5866_v54  ;;  %7233 = vmatpush3.bf16.msra.mxu0 %v7425_v26  ;;  %v7431_v13 = vld [vmem:[%s11016_s5 + $0x30] sm:$0xff]  }
 0x4e8   :  { %v4937_v6 = vadd.f32 %v4936_v19, %v4935_v33  ;;  %v5256_v8 = vrot.slane %v5255_v25, 2  ;;  %v5480_v9 = vrot.slane %v5479_v39, 2  ;;  %v5799_v31 = vadd.f32 %v5798_v32, %v5797_v16  ;;  %7234 = vmatprep.subr.bf16.mxu0 %v7426_v52 }
 0x4e9   :  { %v10816_v11 = vsel %vm5869_vm10, %v4792_v49, %v5868_v17 }
 0x4ea   :  { %v4938_v5 = vrot.slane %v4937_v6, 1  ;;  %v5257_v4 = vadd.f32 %v5256_v8, %v5255_v25  ;;  %v5481_v34 = vadd.f32 %v5480_v9, %v5479_v39  ;;  %v5800_v15 = vrot.slane %v5799_v31, 2  ;;  %6100 = vrot.lane.b32.xlu0 %v6078_v22, %s7498_s13  ;;  %v7432_v22 = vld [vmem:[%s11016_s5 + $0x78] sm:$0xff]   ;;  %v7434_v25 = vld [vmem:[%s11016_s5 + $0xc0] sm:$0xff]  }
 0x4eb   :  { %v4649_v54 = vpop.f32.mrb[96].mxu1  ;;  %7235 = vmatpush3.bf16.msra.mxu0 %v7427_v58 }
 0x4ec   :  { %v4939_v55 = vadd.f32 %v4938_v5, %v4937_v6  ;;  %v5258_v63 = vrot.slane %v5257_v4, 1  ;;  %v5482_v42 = vrot.slane %v5481_v34, 1  ;;  %v5801_v1 = vadd.f32 %v5800_v15, %v5799_v31  ;;  %v4651_v51 = vpop.f32.mrb[97].mxu1  ;;  %7236 = vmatprep.subr.bf16.mxu0 %v7428_v23  ;;  %v7462_v23 = vld [vmem:[%s11015_s4] ss:$0 sm:$0xff] }
 0x4ed   :  { %v4650_v37 = vadd.f32 %v10524_v0, %v4649_v54  ;;  %v4652_v10 = vpop.f32.mrb[98].mxu1 }
 0x4ee   :  { %v5259_v20 = vadd.f32 %v5258_v63, %v5257_v4  ;;  %v5483_v2 = vadd.f32 %v5482_v42, %v5481_v34  ;;  %v5802_v27 = vrot.slane %v5801_v1, 1  ;;  %v4653_v14 = vadd.f32 %v10524_v0, %v4652_v10  ;;  %5958 = vrot.lane.b32.xlu0 %v10359_v48, %s7494_s1  ;;  %v4654_v56 = vpop.f32.mrb[99].mxu1 }
 0x4ef   :  { %v4730_v35 = vmax.f32 %v4650_v37, 0.0  ;;  %v10837_v38 = vsel %vm5863_vm6, %v4939_v55, %v10778_v59  ;;  %7237 = vmatpush3.bf16.msra.mxu0 %v7429_v29 }
 0x4f0   :  { %v5803_v60 = vadd.f32 %v5802_v27, %v5801_v1  ;;  %v4731_v45 = vmax.f32 %v4653_v14, 0.0  ;;  %v5952_v7 = vsel %vm5863_vm6, %v5259_v20, %v5951_v40  ;;  %v6024_v21 = vsel %vm5863_vm6, %v5483_v2, %v6023_v30  ;;  %7238 = vmatprep.subr.bf16.mxu0 %v7430_v62  ;;  %v7433_v30 = vld [vmem:[%s11016_s5 + $0x38] sm:$0xff]  }
 0x4f1   :  { %v4940_v48 = vsel %vm4736_vm1, %v4730_v35, 0.0  ;;  %v5022_v44 = vrot.slane %v4730_v35, 4 }
 0x4f2   :  { %v4941_v12 = vrot.slane %v4940_v48, 4  ;;  %v5484_v24 = vsel %vm4736_vm1, %v4731_v45, 0.0  ;;  %v5566_v47 = vrot.slane %v4731_v45, 4  ;;  %6030 = vrot.lane.b32.xlu0 %v10352_v18, %s7496_s29  ;;  %v6096_v33 = vsel %vm5863_vm6, %v5803_v60, %v10801_v28 }
 0x4f3   :  { %v5260_v59 = vsel %vm4736_vm1, %v5022_v44, 0.0  ;;  %v5485_v46 = vrot.slane %v5484_v24, 4  ;;  %7239 = vmatpush3.bf16.msra.mxu0 %v7431_v13 }
 0x4f4   :  { %v4942_v61 = vadd.f32 %v4941_v12, %v4940_v48  ;;  %v5261_v43 = vrot.slane %v5260_v59, 4  ;;  %v5804_v41 = vsel %vm4736_vm1, %v5566_v47, 0.0  ;;  %7240 = vmatprep.subr.bf16.mxu0 %v7432_v22 }
 0x4f5   :  { %v5486_v18 = vadd.f32 %v5485_v46, %v5484_v24  ;;  %v5805_v36 = vrot.slane %v5804_v41, 4 }
 0x4f6   :  { %v4943_v16 = vrot.slane %v4942_v61, 2  ;;  %v5262_v40 = vadd.f32 %v5261_v43, %v5260_v59  ;;  %6102 = vrot.lane.b32.xlu0 %v10366_v53, %s7498_s13 }
 0x4f7   :  { %v5487_v28 = vrot.slane %v5486_v18, 2  ;;  %v5806_v19 = vadd.f32 %v5805_v36, %v5804_v41  ;;  %7241 = vmatpush3.bf16.msra.mxu0 %v7433_v30 }
 0x4f8   :  { %v4944_v39 = vadd.f32 %v4943_v16, %v4942_v61  ;;  %v5263_v32 = vrot.slane %v5262_v40, 2  ;;  %7248 = vmatprep.subr.bf16.mxu0 %v7434_v25 }
 0x4f9   :  { %v5488_v49 = vadd.f32 %v5487_v28, %v5486_v18  ;;  %v5807_v17 = vrot.slane %v5806_v19, 2  ;;  %v4657_v57 = vpop.f32.mrb[100].mxu1 }
 0x4fa   :  { %v4945_v6 = vrot.slane %v4944_v39, 1  ;;  %v5264_v8 = vadd.f32 %v5263_v32, %v5262_v40  ;;  %v4658_v53 = vadd.f32 %v10524_v0, %v4657_v57  ;;  %v4659_v9 = vpop.f32.mrb[101].mxu1 }
 0x4fb   :  { %v5489_v31 = vrot.slane %v5488_v49, 1  ;;  %v5808_v26 = vadd.f32 %v5807_v17, %v5806_v19  ;;  %v4660_v5 = vpop.f32.mrb[102].mxu1 }
 0x4fc   :  { %v4946_v4 = vadd.f32 %v4945_v6, %v4944_v39  ;;  %v5265_v34 = vrot.slane %v5264_v8, 1  ;;  %v4732_v15 = vmax.f32 %v4658_v53, 0.0  ;;  %v4662_v54 = vpop.f32.mrb[103].mxu1  ;;  %v4661_v55 = vadd.f32 %v7462_v23, %v4660_v5 }
 0x4fd   :  { %v5490_v52 = vadd.f32 %v5489_v31, %v5488_v49  ;;  %v5809_v58 = vrot.slane %v5808_v26, 1 }
 0x4fe   :  { %v5266_v63 = vadd.f32 %v5265_v34, %v5264_v8  ;;  %v4947_v0 = vsel %vm4736_vm1, %v4732_v15, 0.0  ;;  %v5023_v42 = vrot.slane %v4732_v15, 4  ;;  %v4733_v37 = vmax.f32 %v4661_v55, 0.0 }
 0x4ff   :  { %v5810_v1 = vadd.f32 %v5809_v58, %v5808_v26  ;;  %v4948_v51 = vrot.slane %v4947_v0, 4  ;;  %v6025_v10 = vsel %vm5865_vm7, %v5490_v52, %v6024_v21  ;;  %v5889_v27 = vsel %vm5865_vm7, %v4946_v4, %v10837_v38 }
 0x500   :  { %v5267_v20 = vsel %vm4736_vm1, %v5023_v42, 0.0  ;;  %v5953_v2 = vsel %vm5865_vm7, %v5266_v63, %v5952_v7  ;;  %v5491_v29 = vsel %vm4736_vm1, %v4733_v37, 0.0  ;;  %v5567_v35 = vrot.slane %v4733_v37, 4 }
 0x501   :  { %v4949_v14 = vadd.f32 %v4948_v51, %v4947_v0  ;;  %v5268_v56 = vrot.slane %v5267_v20, 4  ;;  %v5492_v60 = vrot.slane %v5491_v29, 4  ;;  %v6097_v45 = vsel %vm5865_vm7, %v5810_v1, %v6096_v33 }
 0x502   :  { %v5811_v12 = vsel %vm4736_vm1, %v5567_v35, 0.0 }
 0x503   :  { %v4950_v48 = vrot.slane %v4949_v14, 2  ;;  %v5269_v44 = vadd.f32 %v5268_v56, %v5267_v20  ;;  %v5493_v21 = vadd.f32 %v5492_v60, %v5491_v29  ;;  %v5812_v24 = vrot.slane %v5811_v12, 4 }
 0x505   :  { %v4951_v47 = vadd.f32 %v4950_v48, %v4949_v14  ;;  %v5270_v59 = vrot.slane %v5269_v44, 2  ;;  %v4665_v7 = vpop.f32.mrb[104].mxu1  ;;  %v5494_v46 = vrot.slane %v5493_v21, 2  ;;  %v5813_v62 = vadd.f32 %v5812_v24, %v5811_v12 }
 0x506   :  { %v4666_v38 = vadd.f32 %v7462_v23, %v4665_v7  ;;  %v4667_v61 = vpop.f32.mrb[105].mxu1 }
 0x507   :  { %v4952_v43 = vrot.slane %v4951_v47, 1  ;;  %v5271_v41 = vadd.f32 %v5270_v59, %v5269_v44  ;;  %v4668_v13 = vpop.f32.mrb[106].mxu1  ;;  %v5495_v18 = vadd.f32 %v5494_v46, %v5493_v21  ;;  %v5814_v36 = vrot.slane %v5813_v62, 2  ;;  %v5961_v59 = vpop.permute.xlu1 %5960 }
 0x508   :  { %v4734_v22 = vmax.f32 %v4666_v38, 0.0  ;;  %v4669_v33 = vadd.f32 %v7462_v23, %v4668_v13  ;;  %v4670_v16 = vpop.f32.mrb[107].mxu1 }
 0x509   :  { %v4953_v40 = vadd.f32 %v4952_v43, %v4951_v47  ;;  %v5272_v30 = vrot.slane %v5271_v41, 1  ;;  %v5496_v28 = vrot.slane %v5495_v18, 1  ;;  %v5815_v19 = vadd.f32 %v5814_v36, %v5813_v62 }
 0x50a   :  { %v4954_v25 = vsel %vm4736_vm1, %v4734_v22, 0.0  ;;  %v5024_v39 = vrot.slane %v4734_v22, 4  ;;  %v4735_v17 = vmax.f32 %v4669_v33, 0.0  ;;  %v6114_v62 = vsel %vm2155_vm8, %v10498_v50, %v5961_v59 }
 0x50b   :  { %v5273_v32 = vadd.f32 %v5272_v30, %v5271_v41  ;;  %v4955_v49 = vrot.slane %v4954_v25, 4  ;;  %v5890_v57 = vsel %vm5867_vm9, %v4953_v40, %v5889_v27  ;;  %v5497_v6 = vadd.f32 %v5496_v28, %v5495_v18  ;;  %v6033_v7 = vpop.permute.xlu1 %6032 }
 0x50c   :  { %v5816_v8 = vrot.slane %v5815_v19, 1  ;;  %v5274_v53 = vsel %vm4736_vm1, %v5024_v39, 0.0  ;;  %v5498_v26 = vsel %vm4736_vm1, %v4735_v17, 0.0  ;;  %v5568_v5 = vrot.slane %v4735_v17, 4 }
 0x50d   :  { %v4956_v9 = vadd.f32 %v4955_v49, %v4954_v25  ;;  %v5275_v31 = vrot.slane %v5274_v53, 4  ;;  %v5499_v34 = vrot.slane %v5498_v26, 4  ;;  %v5954_v15 = vsel %vm5867_vm9, %v5273_v32, %v5953_v2 }
 0x50e   :  { %v5817_v4 = vadd.f32 %v5816_v8, %v5815_v19  ;;  %v6026_v54 = vsel %vm5867_vm9, %v5497_v6, %v6025_v10  ;;  %v5818_v23 = vsel %vm4736_vm1, %v5568_v5, 0.0  ;;  %v6118_v38 = vsel %vm3922_vm13, %v6114_v62, %v6033_v7  ;;  %v7445_v7 = vld [vmem:[%s11016_s5 + $0xa8] sm:$0xff]   ;;  %v7446_v62 = vld [vmem:[%s11016_s5 + $0xf0] sm:$0xff]  }
 0x50f   :  { %v4957_v52 = vrot.slane %v4956_v9, 2  ;;  %v5276_v58 = vadd.f32 %v5275_v31, %v5274_v53  ;;  %v5500_v55 = vadd.f32 %v5499_v34, %v5498_v26  ;;  %v5819_v63 = vrot.slane %v5818_v23, 4  ;;  %v6105_v46 = vpop.permute.xlu1 %6104 }
 0x510   :  { %v6098_v0 = vsel %vm5867_vm9, %v5817_v4, %v6097_v45  ;;  %v6122_v61 = vsel %vm4052_vm15, %v6118_v38, %v6105_v46 }
 0x511   :  { %v4958_v42 = vadd.f32 %v4957_v52, %v4956_v9  ;;  %v5277_v1 = vrot.slane %v5276_v58, 2  ;;  %v5501_v51 = vrot.slane %v5500_v55, 2  ;;  %v5820_v37 = vadd.f32 %v5819_v63, %v5818_v23 }
 0x512   :  { %v6142_v43 = vrot.slane %v6122_v61, 4  ;;  %v6132_v41 = vsel %vm6124_vm4, %v6122_v61, 0.0  ;;  %v7448_v61 = vld [vmem:[%s11016_s5 + $0xf8] sm:$0xff]  }
 0x513   :  { %v4959_v20 = vrot.slane %v4958_v42, 1  ;;  %v5278_v27 = vadd.f32 %v5277_v1, %v5276_v58  ;;  %v5502_v14 = vadd.f32 %v5501_v51, %v5500_v55  ;;  %v5821_v56 = vrot.slane %v5820_v37, 2 }
 0x514   :  { %v6152_v13 = vsel %vm6124_vm4, %v6142_v43, 0.0  ;;  %v6133_v36 = vrot.slane %v6132_v41, 4 }
 0x515   :  { %v4960_v29 = vadd.f32 %v4959_v20, %v4958_v42  ;;  %v5279_v2 = vrot.slane %v5278_v27, 1  ;;  %v5503_v35 = vrot.slane %v5502_v14, 1  ;;  %v5822_v10 = vadd.f32 %v5821_v56, %v5820_v37  ;;  %v7435_v20 = vld [vmem:[%s11016_s5 + $0x80] sm:$0xff]   ;;  %v7437_v56 = vld [vmem:[%s11016_s5 + $0x88] sm:$0xff]  }
 0x516   :  { %v6153_v22 = vrot.slane %v6152_v13, 4  ;;  %v6134_v16 = vadd.f32 %v6133_v36, %v6132_v41 }
 0x517   :  { %v5280_v60 = vadd.f32 %v5279_v2, %v5278_v27  ;;  %v10888_v48 = vsel %vm5869_vm10, %v4960_v29, %v5890_v57  ;;  %v5504_v44 = vadd.f32 %v5503_v35, %v5502_v14  ;;  %v5823_v12 = vrot.slane %v5822_v10, 1  ;;  %v7436_v14 = vld [vmem:[%s11016_s5 + $0xc8] sm:$0xff]   ;;  %v7438_v29 = vld [vmem:[%s11016_s5 + $0xd0] sm:$0xff]  }
 0x518   :  { %v6154_v40 = vadd.f32 %v6153_v22, %v6152_v13  ;;  %v6135_v19 = vrot.slane %v6134_v16, 2  ;;  %v7439_v35 = vld [vmem:[%s11016_s5 + $0x90] sm:$0xff]  }
 0x519   :  { %v5955_v45 = vsel %vm5869_vm10, %v5280_v60, %v5954_v15  ;;  %v6027_v21 = vsel %vm5869_vm10, %v5504_v44, %v6026_v54  ;;  %v5824_v24 = vadd.f32 %v5823_v12, %v5822_v10  ;;  %v7440_v10 = vld [vmem:[%s11016_s5 + $0xd8] sm:$0xff]   ;;  %v7442_v12 = vld [vmem:[%s11016_s5 + $0xe0] sm:$0xff]  }
 0x51a   :  { %5962 = vrot.lane.b32.xlu1 %v5955_v45, %s7494_s1  ;;  %v6155_v49 = vrot.slane %v6154_v40, 2  ;;  %v6136_v6 = vadd.f32 %v6135_v19, %v6134_v16  ;;  %v7441_v44 = vld [vmem:[%s11016_s5 + $0x98] sm:$0xff]   ;;  %v7443_v45 = vld [vmem:[%s11016_s5 + $0xa0] sm:$0xff]  }
 0x51b   :  { %v6099_v47 = vsel %vm5869_vm10, %v5824_v24, %v6098_v0 }
 0x51c   :  { %v6156_v9 = vadd.f32 %v6155_v49, %v6154_v40 }
 0x51e   :  { %6034 = vrot.lane.b32.xlu1 %v6027_v21, %s7496_s29  ;;  %v6157_v34 = vrot.slane %v6156_v9, 1  ;;  %v7444_v21 = vld [vmem:[%s11016_s5 + $0xe8] sm:$0xff]  }
 0x520   :  { %v6158_v0 = vadd.f32 %v6157_v34, %v6156_v9 }
 0x522   :  { %6106 = vrot.lane.b32.xlu1 %v6099_v47, %s7498_s13 }
 0x554   :  { %v5957_v18 = vpop.permute.xlu0 %5956 }
 0x555   :  { %v6112_v30 = vsel %vm2155_vm8, %v10816_v11, %v5957_v18  ;;  %v6137_v11 = vrot.slane %v6136_v6, 1  ;;  %v7449_v18 = vld [vmem:[%s11016_s5 + $0xb8] sm:$0xff]  }
 0x557   :  { %v6138_v52 = vadd.f32 %v6137_v11, %v6136_v6 }
 0x558   :  { %v6029_v33 = vpop.permute.xlu0 %6028 }
 0x559   :  { %v6116_v50 = vsel %vm3922_vm13, %v6112_v30, %v6029_v33 }
 0x55c   :  { %v6101_v28 = vpop.permute.xlu0 %6100 }
 0x55d   :  { %v6120_v25 = vsel %vm4052_vm15, %v6116_v50, %v6101_v28 }
 0x55e   :  { %v6125_v39 = vsel %vm6124_vm4, %v6120_v25, 0.0  ;;  %v6141_v32 = vrot.slane %v6120_v25, 4 }
 0x55f   :  { %v6126_v17 = vrot.slane %v6125_v39, 4 }
 0x560   :  { %v6145_v57 = vsel %vm6124_vm4, %v6141_v32, 0.0  ;;  %v5959_v2 = vpop.permute.xlu0 %5958 }
 0x561   :  { %v6127_v8 = vadd.f32 %v6126_v17, %v6125_v39  ;;  %v6146_v53 = vrot.slane %v6145_v57, 4  ;;  %v6113_v47 = vsel %vm2155_vm8, %v10346_v3, %v5959_v2  ;;  %v7447_v3 = vld [vmem:[%s11016_s5 + $0xb0] sm:$0xff]   ;;  %v7454_v2 = vld [vmem:[%s11018_s7 + $0x20] sm:$0xff]  }
 0x563   :  { %v6128_v31 = vrot.slane %v6127_v8, 2  ;;  %v6147_v26 = vadd.f32 %v6146_v53, %v6145_v57 }
 0x564   :  { %v6031_v60 = vpop.permute.xlu0 %6030 }
 0x565   :  { %v6129_v5 = vadd.f32 %v6128_v31, %v6127_v8  ;;  %v6148_v4 = vrot.slane %v6147_v26, 2  ;;  %v6117_v59 = vsel %vm3922_vm13, %v6113_v47, %v6031_v60  ;;  %v7457_v60 = vld [vmem:[%s11018_s7 + $0x38] sm:$0xff]   ;;  %v7149_v47 = vld [vmem:[%s11017_s6] ss:$0 sm:$0xff]  ;;  %s7463_s6 = scalar_lea.vmem %s6682_s21, 32 }
 0x566   :  { %p7464_p0 = scmp.ne.s32.totalorder %s6682_s21, %s7463_s6  ;;  %p7469_p2 = scmp.lt.s32.totalorder %s7463_s6, %s7463_s6 }
 0x567   :  { %v6130_v15 = vrot.slane %v6129_v5, 1  ;;  %v6149_v54 = vadd.f32 %v6148_v4, %v6147_v26 }
 0x568   :  { %v6103_v24 = vpop.permute.xlu0 %6102  ;;  %p7470_p3 = por %p7469_p2, %p7468_p1 }
 0x569   :  { %v6131_v58 = vadd.f32 %v6130_v15, %v6129_v5  ;;  %v6150_v23 = vrot.slane %v6149_v54, 1  ;;  %v6121_v46 = vsel %vm4052_vm15, %v6117_v59, %v6103_v24 }
 0x56a   :  { %v6175_v38 = vrot.slane %v6121_v46, 4  ;;  %v6159_v43 = vsel %vm6124_vm4, %v6121_v46, 0.0  ;;  %p7471_p4 = pnand %p7470_p3, %p7464_p0 }
 0x56b   :  { %v6195_v55 = vsel %vm5857_vm2, %v6138_v52, %v6131_v58  ;;  %v6151_v63 = vadd.f32 %v6150_v23, %v6149_v54  ;;  %v6160_v36 = vrot.slane %v6159_v43, 4 }
 0x56c   :  { %v6209_v1 = vmul.f32 0.0625, %v6195_v55  ;;  %v6179_v41 = vsel %vm6124_vm4, %v6175_v38, 0.0 }
 0x56d   :  { %v6199_v42 = vsel %vm5857_vm2, %v6158_v0, %v6151_v63  ;;  %v6180_v22 = vrot.slane %v6179_v41, 4  ;;  %v6161_v16 = vadd.f32 %v6160_v36, %v6159_v43 }
 0x56e   :  { %v6210_v51 = vmul.f32 0.0625, %v6199_v42  ;;  %v6213_v27 = vpack.c.bf16 %v6209_v1, %v6209_v1 }
 0x56f   :  { %v6181_v40 = vadd.f32 %v6180_v22, %v6179_v41  ;;  %v6162_v19 = vrot.slane %v6161_v16, 2 }
 0x570   :  { %v6214_v37 = vpack.c.bf16 %v6210_v51, %v6210_v51 }
 0x571   :  { %v6182_v49 = vrot.slane %v6181_v40, 2  ;;  %v6163_v6 = vadd.f32 %v6162_v19, %v6161_v16 }
 0x572   :  { %6512 = vmatprep.mubr.bf16.mxu0 %v6214_v37 }
 0x573   :  { %6513 = vmatmul.mubr.bf16.vlgmr.msra.gmra.mrb[84].mxu0 %v6213_v27  ;;  %v6183_v9 = vadd.f32 %v6182_v49, %v6181_v40  ;;  %v7502_v27 = vmov 0.0  }
 0x574   :  { %7249 = vmatpush3.bf16.msra.mxu0 %v7435_v20  ;;  %v7450_v20 = vld [vmem:[%s11018_s7] sm:$0xff]  }
 0x575   :  { %7250 = vmatprep.subr.bf16.mxu0 %v7436_v14  ;;  %v6184_v4 = vrot.slane %v6183_v9, 1  ;;  %v7451_v14 = vld [vmem:[%s11018_s7 + $0x8] sm:$0xff]  }
 0x577   :  { %v6185_v23 = vadd.f32 %v6184_v4, %v6183_v9 }
 0x578   :  { %7251 = vmatpush3.bf16.msra.mxu0 %v7437_v56  ;;  %v7452_v56 = vld [vmem:[%s11018_s7 + $0x10] sm:$0xff]  }
 0x579   :  { %7252 = vmatprep.subr.bf16.mxu0 %v7438_v29  ;;  %v7453_v29 = vld [vmem:[%s11018_s7 + $0x18] sm:$0xff]  }
 0x57c   :  { %7253 = vmatpush3.bf16.msra.mxu0 %v7439_v35  ;;  %v7455_v35 = vld [vmem:[%s11018_s7 + $0x28] sm:$0xff]  }
 0x57d   :  { %7254 = vmatprep.subr.bf16.mxu0 %v7440_v10  ;;  %v7456_v10 = vld [vmem:[%s11018_s7 + $0x30] sm:$0xff]  }
 0x580   :  { %7255 = vmatpush3.bf16.msra.mxu0 %v7441_v44 }
 0x581   :  { %7256 = vmatprep.subr.bf16.mxu0 %v7442_v12 }
 0x584   :  { %7257 = vmatpush3.bf16.msra.mxu0 %v7443_v45 }
 0x585   :  { %7258 = vmatprep.subr.bf16.mxu0 %v7444_v21 }
 0x588   :  { %7259 = vmatpush3.bf16.msra.mxu0 %v7445_v7 }
 0x589   :  { %7260 = vmatprep.subr.bf16.mxu0 %v7446_v62 }
 0x58c   :  { %v5963_v13 = vpop.permute.xlu1 %5962  ;;  %7261 = vmatpush3.bf16.msra.mxu0 %v7447_v3 }
 0x58d   :  { %7262 = vmatprep.subr.bf16.mxu0 %v7448_v61  ;;  %v6115_v30 = vsel %vm2155_vm8, %v10888_v48, %v5963_v13  ;;  %v6164_v48 = vrot.slane %v6163_v6, 1  ;;  %vm7503_vm8 = vmmov 0   ;;  %v7182_v13 = vld [vmem:[%s11019_s8] ss:$0 sm:$0xff] }
 0x58f   :  { %v6165_v54 = vadd.f32 %v6164_v48, %v6163_v6 }
 0x590   :  { %v6035_v33 = vpop.permute.xlu1 %6034  ;;  %7263 = vmatpush3.bf16.msra.mxu0 %v7449_v18 }
 0x591   :  { %v6119_v50 = vsel %vm3922_vm13, %v6115_v30, %v6035_v33  ;;  %7349 = vmatprep.subr.bf16.mxu0 %v7502_v27 }
 0x594   :  { %v6107_v28 = vpop.permute.xlu1 %6106 }
 0x595   :  { %v6123_v25 = vsel %vm4052_vm15, %v6119_v50, %v6107_v28 }
 0x596   :  { %v6166_v39 = vsel %vm6124_vm4, %v6123_v25, 0.0  ;;  %v6176_v32 = vrot.slane %v6123_v25, 4 }
 0x597   :  { %v6167_v17 = vrot.slane %v6166_v39, 4 }
 0x598   :  { %v6186_v57 = vsel %vm6124_vm4, %v6176_v32, 0.0 }
 0x599   :  { %v6168_v8 = vadd.f32 %v6167_v17, %v6166_v39  ;;  %v6187_v53 = vrot.slane %v6186_v57, 4 }
 0x59b   :  { %v6169_v31 = vrot.slane %v6168_v8, 2  ;;  %v6188_v26 = vadd.f32 %v6187_v53, %v6186_v57 }
 0x59d   :  { %v6170_v11 = vadd.f32 %v6169_v31, %v6168_v8  ;;  %v6189_v5 = vrot.slane %v6188_v26, 2 }
 0x59f   :  { %v6171_v34 = vrot.slane %v6170_v11, 1  ;;  %v6190_v15 = vadd.f32 %v6189_v5, %v6188_v26 }
 0x5a1   :  { %v6172_v52 = vadd.f32 %v6171_v34, %v6170_v11  ;;  %v6191_v58 = vrot.slane %v6190_v15, 1 }
 0x5a3   :  { %v6192_v55 = vadd.f32 %v6191_v58, %v6190_v15  ;;  %v6203_v63 = vsel %vm5857_vm2, %v6172_v52, %v6165_v54 }
 0x5a4   :  { %v6211_v42 = vmul.f32 0.0625, %v6203_v63 }
 0x5a5   :  { %v6207_v0 = vsel %vm5857_vm2, %v6192_v55, %v6185_v23 }
 0x5a6   :  { %v6212_v1 = vmul.f32 0.0625, %v6207_v0  ;;  %v6215_v37 = vpack.c.bf16 %v6211_v42, %v6211_v42 }
 0x5a8   :  { %v6216_v51 = vpack.c.bf16 %v6212_v1, %v6212_v1 }
 0x5aa   :  { %6552 = vmatprep.mubr.bf16.mxu0 %v6216_v51 }
 0x5ab   :  { %6553 = vmatmul.mubr.bf16.vlgmr.msra.gmra.mrb[88].mxu0 %v6215_v37 }
 0x5ac   :  { %7350 = vmatpush3.bf16.msra.mxu0 %v7450_v20  ;;  %7365 = vmatprep.mubr.msk.bf16.mxu0 %vm7503_vm8, %v7502_v27 }
 0x5ad   :  { %7351 = vmatprep.subr.bf16.mxu0 %v7502_v27 }
 0x5b0   :  { %7352 = vmatpush3.bf16.msra.mxu0 %v7451_v14 }
 0x5b1   :  { %7353 = vmatprep.subr.bf16.mxu0 %v7502_v27 }
 0x5b4   :  { %7354 = vmatpush3.bf16.msra.mxu0 %v7452_v56 }
 0x5b5   :  { %7355 = vmatprep.subr.bf16.mxu0 %v7502_v27 }
 0x5b8   :  { %7356 = vmatpush3.bf16.msra.mxu0 %v7453_v29 }
 0x5b9   :  { %7357 = vmatprep.subr.bf16.mxu0 %v7502_v27 }
 0x5bc   :  { %7358 = vmatpush3.bf16.msra.mxu0 %v7454_v2 }
 0x5bd   :  { %7359 = vmatprep.subr.bf16.mxu0 %v7502_v27 }
 0x5c0   :  { %7360 = vmatpush3.bf16.msra.mxu0 %v7455_v35 }
 0x5c1   :  { %7361 = vmatprep.subr.bf16.mxu0 %v7502_v27 }
 0x5c4   :  { %7362 = vmatpush3.bf16.msra.mxu0 %v7456_v10 }
 0x5c5   :  { %7363 = vmatprep.subr.bf16.mxu0 %v7502_v27 }
 0x5c8   :  { %7364 = vmatpush3.bf16.msra.mxu0 %v7457_v60 }
 0x646   :  { %v7242_v44 = vpop.f32.mrb[84].mxu0 }
 0x647   :  { %v7243_v12 = vpop.f32.mrb[85].mxu0 }
 0x648   :  { %v7244_v45 = vadd.f32 %v7243_v12, %v7242_v44  ;;  %v7245_v21 = vpop.f32.mrb[86].mxu0 }
 0x649   :  { %v7246_v24 = vpop.f32.mrb[87].mxu0 }
 0x64a   :  { %v6515_v46 = vadd.f32 %v7244_v45, %v7149_v47 }
 0x67e   :  { %v7264_v59 = vpop.f32.mrb[88].mxu0 }
 0x67f   :  { %v7265_v7 = vpop.f32.mrb[89].mxu0 }
 0x680   :  { %v7266_v62 = vadd.f32 %v7265_v7, %v7264_v59  ;;  %v7267_v38 = vpop.f32.mrb[90].mxu0 }
 0x681   :  { %v7268_v3 = vpop.f32.mrb[91].mxu0 }
 0x682   :  { %v6555_v61 = vadd.f32 %v7266_v62, %v6515_v46 }
 0x684   :  { %v6560_v43 = vmax.f32 %v6555_v61, 0.0 }
 0x686   :  { %v6561_v41 = vpack.c.bf16 %v6560_v43, %v6560_v43 }
 0x688   :  { %7366 = vmatmul.mubr.bf16.vlgmr.msra.gmra.mrb[92].mxu0 %v6561_v41 }
 0x75b   :  { %v6667_v18 = vpop.f32.mrb[92].mxu0 }
 0x75c   :  { %v6668_v36 = vadd.f32 %v7182_v13, %v6667_v18  ;;  %v7367_v22 = vpop.f32.mrb[93].mxu0 }
 0x75d   :  { %v6670_v33 = vpop.f32.mrb[94].mxu0 }
 0x75e   :  { %v7368_v16 = vpop.f32.mrb[95].mxu0  ;;  %6674 = vst.msk [vmem:[#allocation3] sm:$0x3] %vm6673_vm11, %v6668_v36 }
 0x75f   :  { %7474 = shalt.err (!%p7471_p4)
}
 0x760   :  { %s7475_s8 = scalar_lea.hbm %s11020_s9, 32 }
 0x761   :  { %p7476_p5 = scmp.ne.s32.totalorder %s11020_s9, %s7475_s8  ;;  %p7479_p6 = scmp.lt.u32.totalorder %s7475_s8, %s11020_s9 }
 0x763   :  { %p7481_p7 = pnand %p7479_p6, %p7476_p5 }
 0x765   :  { %7484 = shalt.err (!%p7481_p7)
}
 0x766   :  { %6684 = dma.vmem_to_hbm [thread:$0]  %s6682_s21, 32, %s11020_s9, [#allocation4]  }
 0x767   :  { %7485 = dma.done.wait [#allocation4], 32  }
 0x768   :  { %7486 = vsyncadd [#allocation4], 4294967264 }
 0x769   :  { %6688 = vsyncpa [#allocation4], 1 }

</bundles_post_ra>
